<compile_context>
chip_gen: v7x
topology: tpu7x:2x2x1
jax: 0.10.0
libtpu: 0.0.40
codegen_flags: <defaults>
</compile_context>

<pallas_src>
import functools

import jax
import jax.numpy as jnp
from jax import lax
from jax.experimental import pallas as pl
from jax.experimental.pallas import tpu as pltpu

NUM_KERNELS = 6
KMAX = 2 * (NUM_KERNELS - 1) + 1   # 11 (largest branch kernel)
PAD = NUM_KERNELS - 1              # 5
NTAPS = KMAX * KMAX                # 121


def _round_up(x, m):
    return (x + m - 1) // m * m


def _inception_kernel(x_ref, m_ref, b_ref, o_ref, acc_ref, *, cin, cout, wp, lpad):
    """One grid step = one batch element; all 6 branches fused onto the MXU.

    x_ref  : (Cin, Lin)          zero-padded image flattened row-major (row stride = wp)
    m_ref  : (121, Cout, Cin)    per-tap effective pointwise matrices (depthwise + 1/6 folded in)
    b_ref  : (Cout, 1)           mean bias
    o_ref  : (Cout, Lpad)        lane-dense output slab (wrapper extracts the HxW window)
    acc_ref: (Cout, Lpad) f32    VMEM accumulator scratch
    """
    # Initialize the accumulator with the mean bias once (single lane-broadcast).
    acc_ref[...] = jnp.broadcast_to(b_ref[...], (cout, lpad)).astype(jnp.float32)

    # All tap work on the MXU: acc += M_t @ x_shifted_t.  Taps are grouped per dy-row so the
    # SSA partial has bounded liveness (KMAX dots) and the VMEM accumulator is only
    # read-modify-written KMAX times instead of KMAX*KMAX times.
    for dy in range(KMAX):
        base = dy * wp
        part = None
        for dx in range(KMAX):
            t = dy * KMAX + dx
            patch = x_ref[:, base + dx: base + dx + lpad]            # (Cin, Lpad)
            contrib = jnp.dot(m_ref[t], patch,
                              preferred_element_type=jnp.float32)    # (Cout, Lpad), MXU
            part = contrib if part is None else part + contrib
        acc_ref[...] += part

    o_ref[...] = acc_ref[...].astype(o_ref.dtype)


def _vmem_limit_bytes(cin, cout, lin, lpad):
    """Estimate the real VMEM need from block shapes; cap below v7x's 64 MiB physical VMEM."""
    f32 = 4
    sub = lambda c: _round_up(c, 8)     # sublane padding
    lane = lambda c: _round_up(c, 128)  # lane padding
    inp = sub(cin) * lane(lin) * f32 * 2            # input block, double-buffered
    outp = sub(cout) * lane(lpad) * f32 * 2         # output block, double-buffered
    wts = NTAPS * sub(cout) * lane(cin) * f32 * 2   # resident per-tap matrices
    bias = sub(cout) * 128 * f32 * 2
    acc = sub(cout) * lane(lpad) * f32              # accumulator scratch
    need = inp + outp + wts + bias + acc
    return int(min(_round_up(need + (8 << 20), 1 << 20), 48 << 20))


def inception_block_v4(x_nchw, m_taps, b_mean):
    """x_nchw: (N, Cin, H, W). Returns (N, Cout, H, W) == mean of the 6 DWConv branches."""
    N, Cin, H, W = x_nchw.shape
    Cout = m_taps.shape[1]
    Hp, Wp = H + 2 * PAD, W + 2 * PAD

    lpad = _round_up(H * Wp, 128)            # lane-dense output width (multiple of 128)
    smax = 2 * PAD * Wp + 2 * PAD            # largest tap shift
    lin = _round_up(smax + lpad, 128)        # flat padded input length

    # Host-side pad + flatten (tiny at these shapes; in-kernel halo fill only matters once
    # the kernel is HBM-bound on large inputs).
    xp = jnp.pad(x_nchw.astype(jnp.float32),
                 ((0, 0), (0, 0), (PAD, PAD), (PAD, PAD)))
    xf = xp.reshape(N, Cin, Hp * Wp)
    xf = jnp.pad(xf, ((0, 0), (0, 0), (0, lin - Hp * Wp)))

    kernel = functools.partial(_inception_kernel, cin=Cin, cout=Cout, wp=Wp, lpad=lpad)

    out_flat = pl.pallas_call(
        kernel,
        out_shape=jax.ShapeDtypeStruct((N, Cout, lpad), jnp.float32),
        grid=(N,),
        in_specs=[
            pl.BlockSpec((None, Cin, lin), lambda n: (n, 0, 0)),
            # Weights / bias: constant block index -> resident across grid steps (no re-DMA).
            pl.BlockSpec((NTAPS, Cout, Cin), lambda n: (0, 0, 0)),
            pl.BlockSpec((Cout, 1), lambda n: (0, 0)),
        ],
        out_specs=pl.BlockSpec((None, Cout, lpad), lambda n: (n, 0, 0)),
        scratch_shapes=[pltpu.VMEM((Cout, lpad), jnp.float32)],
        compiler_params=pltpu.CompilerParams(
            dimension_semantics=("parallel",),
            vmem_limit_bytes=_vmem_limit_bytes(Cin, Cout, lin, lpad)),
    )(xf, m_taps, b_mean)

    # Extract the valid H x W window (row stride in the flat axis is Wp).
    out = out_flat[:, :, :H * Wp].reshape(N, Cout, H, Wp)[:, :, :, :W]
    return out


def init_params(key, cin, cout):
    """Per-branch params matching the torch module's layout (kaiming-like init, random bias
    to exercise the bias path): dw_i (Cin,k,k), pw_i (Cout,Cin), b_i (Cout,)."""
    dw_list, pw_list, b_list = [], [], []
    for i in range(NUM_KERNELS):
        k = 2 * i + 1
        key, k1, k2, k3 = jax.random.split(key, 4)
        std_dw = (2.0 / (k * k)) ** 0.5
        dw_list.append(std_dw * jax.random.normal(k1, (cin, k, k), jnp.float32))
        std_pw = (2.0 / cout) ** 0.5
        pw_list.append(std_pw * jax.random.normal(k2, (cout, cin), jnp.float32))
        b_list.append(0.1 * jax.random.normal(k3, (cout,), jnp.float32))
    return dw_list, pw_list, b_list


def pack_params(dw_list, pw_list, b_list):
    """Fold depthwise taps, pointwise weights and the 1/NUM_KERNELS mean into per-tap
    effective (Cout, Cin) matrices:
        M[t, o, c] = (1/NK) * sum_i pw_i[o, c] * emb_i[c, t]
    where emb_i centers branch i's (2i+1)x(2i+1) depthwise kernel in the common 11x11 grid."""
    cin = dw_list[0].shape[0]
    cout = pw_list[0].shape[0]
    emb = []
    for i in range(NUM_KERNELS):
        k = 2 * i + 1
        off = PAD - i
        e = jnp.zeros((cin, KMAX, KMAX), jnp.float32)
        e = e.at[:, off:off + k, off:off + k].set(dw_list[i])
        emb.append(e.reshape(cin, NTAPS))
    emb_all = jnp.stack(emb, 0)                                        # (NK, Cin, 121)
    pw_all = jnp.stack(pw_list, 0)                                     # (NK, Cout, Cin)
    m_taps = jnp.einsum("ioc,ict->toc", pw_all, emb_all) / NUM_KERNELS # (121, Cout, Cin)
    b_mean = jnp.stack(b_list, 0).mean(0).reshape(cout, 1)             # (Cout, 1)
    return m_taps, b_mean


def reference(x, dw_list, pw_list, b_list):
    """Pure-JAX reference (lax convs) matching the torch forward semantics exactly."""
    cin = x.shape[1]
    outs = []
    for i in range(NUM_KERNELS):
        k = 2 * i + 1
        w_dw = dw_list[i].reshape(cin, 1, k, k)
        d = lax.conv_general_dilated(
            x, w_dw, window_strides=(1, 1), padding=[(i, i), (i, i)],
            dimension_numbers=("NCHW", "OIHW", "NCHW"), feature_group_count=cin)
        p = jnp.einsum("nchw,oc->nohw", d, pw_list[i]) + b_list[i][None, :, None, None]
        outs.append(p)
    return jnp.mean(jnp.stack(outs, axis=-1), axis=-1)


if __name__ == "__main__":
    key = jax.random.PRNGKey(0)
    N, Cin, Cout, H, W = 2, 4, 4, 16, 16
    kx, kp = jax.random.split(key)
    x = jax.random.normal(kx, (N, Cin, H, W), jnp.float32)

    dw_list, pw_list, b_list = init_params(kp, Cin, Cout)
    m_taps, b_mean = pack_params(dw_list, pw_list, b_list)

    out = jax.block_until_ready(inception_block_v4(x, m_taps, b_mean))
    ref = reference(x, dw_list, pw_list, b_list)

    assert out.shape == (N, Cout, H, W), out.shape
    err = float(jnp.max(jnp.abs(out - ref)))
    assert jnp.allclose(out, ref, atol=2e-4, rtol=2e-4), err
    print("KERNEL_OK")
</pallas_src>

<mosaic_0001>
module attributes {stable_mosaic.version = 11 : i64} {
  func.func @_inception_kernel(%arg0: i32, %arg1: memref<1x4x896xf32, #tpu.memory_space<vmem>>, %arg2: memref<121x4x4xf32, #tpu.memory_space<vmem>>, %arg3: memref<4x1xf32, #tpu.memory_space<vmem>>, %arg4: memref<1x4x512xf32, #tpu.memory_space<vmem>>, %arg5: memref<4x512xf32, #tpu.memory_space<vmem>>) attributes {dimension_semantics = [#tpu.dimension_semantics<parallel>], iteration_bounds = array<i64: 2>, scalar_prefetch = 0 : i64, scratch_operands = 1 : i64, tpu.core_type = #tpu.core_type<tc>, window_params = [{transform_indices = @transform_0, window_bounds = array<i64: 1, 4, 896>}, {pipeline_mode = #tpu.pipeline_mode<synchronous>, transform_indices = @transform_1, window_bounds = array<i64: 121, 4, 4>}, {pipeline_mode = #tpu.pipeline_mode<synchronous>, transform_indices = @transform_2, window_bounds = array<i64: 4, 1>}, {transform_indices = @transform_3, window_bounds = array<i64: 1, 4, 512>}]} {
    %c0 = arith.constant 0 : index
    %c0_0 = arith.constant 0 : index
    %0 = vector.load %arg3[%c0, %c0_0] : memref<4x1xf32, #tpu.memory_space<vmem>>, vector<4x1xf32>
    %1 = vector.shape_cast %0 : vector<4x1xf32> to vector<4x1xf32>
    %2 = vector.broadcast %1 : vector<4x1xf32> to vector<4x512xf32>
    %c0_1 = arith.constant 0 : index
    %c0_2 = arith.constant 0 : index
    %3 = vector.load %arg5[%c0_1, %c0_2] : memref<4x512xf32, #tpu.memory_space<vmem>>, vector<4x512xf32>
    tpu.vector_store %arg5[%c0_1, %c0_2], %2 {strides = array<i32>} : memref<4x512xf32, #tpu.memory_space<vmem>>, vector<4x512xf32>,
    %c0_3 = arith.constant 0 : index
    %c0_4 = arith.constant 0 : index
    %c0_5 = arith.constant 0 : index
    %4 = vector.load %arg1[%c0_3, %c0_4, %c0_5] : memref<1x4x896xf32, #tpu.memory_space<vmem>>, vector<1x4x512xf32>
    %5 = vector.shape_cast %4 : vector<1x4x512xf32> to vector<4x512xf32>
    %c0_6 = arith.constant 0 : index
    %c0_7 = arith.constant 0 : index
    %c0_8 = arith.constant 0 : index
    %6 = vector.load %arg2[%c0_6, %c0_7, %c0_8] : memref<121x4x4xf32, #tpu.memory_space<vmem>>, vector<1x4x4xf32>
    %7 = vector.shape_cast %6 : vector<1x4x4xf32> to vector<4x4xf32>
    %cst = arith.constant dense<0.000000e+00> : vector<4x512xf32>
    %8 = tpu.matmul %7, %5, %cst {dimension_numbers = #tpu.dot_dimension_numbers<[1], [0], [0], [1], [0, 0, 1, 1], [], []>} : vector<4x4xf32>, vector<4x512xf32>, vector<4x512xf32> -> vector<4x512xf32>
    %c0_9 = arith.constant 0 : index
    %c0_10 = arith.constant 0 : index
    %c1 = arith.constant 1 : index
    %9 = vector.load %arg1[%c0_9, %c0_10, %c1] : memref<1x4x896xf32, #tpu.memory_space<vmem>>, vector<1x4x512xf32>
    %10 = vector.shape_cast %9 : vector<1x4x512xf32> to vector<4x512xf32>
    %c1_11 = arith.constant 1 : index
    %c0_12 = arith.constant 0 : index
    %c0_13 = arith.constant 0 : index
    %11 = vector.load %arg2[%c1_11, %c0_12, %c0_13] : memref<121x4x4xf32, #tpu.memory_space<vmem>>, vector<1x4x4xf32>
    %12 = vector.shape_cast %11 : vector<1x4x4xf32> to vector<4x4xf32>
    %cst_14 = arith.constant dense<0.000000e+00> : vector<4x512xf32>
    %13 = tpu.matmul %12, %10, %cst_14 {dimension_numbers = #tpu.dot_dimension_numbers<[1], [0], [0], [1], [0, 0, 1, 1], [], []>} : vector<4x4xf32>, vector<4x512xf32>, vector<4x512xf32> -> vector<4x512xf32>
    %14 = arith.addf %8, %13 : vector<4x512xf32>
    %c0_15 = arith.constant 0 : index
    %c0_16 = arith.constant 0 : index
    %c2 = arith.constant 2 : index
    %15 = vector.load %arg1[%c0_15, %c0_16, %c2] : memref<1x4x896xf32, #tpu.memory_space<vmem>>, vector<1x4x512xf32>
    %16 = vector.shape_cast %15 : vector<1x4x512xf32> to vector<4x512xf32>
    %c2_17 = arith.constant 2 : index
    %c0_18 = arith.constant 0 : index
    %c0_19 = arith.constant 0 : index
    %17 = vector.load %arg2[%c2_17, %c0_18, %c0_19] : memref<121x4x4xf32, #tpu.memory_space<vmem>>, vector<1x4x4xf32>
    %18 = vector.shape_cast %17 : vector<1x4x4xf32> to vector<4x4xf32>
    %cst_20 = arith.constant dense<0.000000e+00> : vector<4x512xf32>
    %19 = tpu.matmul %18, %16, %cst_20 {dimension_numbers = #tpu.dot_dimension_numbers<[1], [0], [0], [1], [0, 0, 1, 1], [], []>} : vector<4x4xf32>, vector<4x512xf32>, vector<4x512xf32> -> vector<4x512xf32>
    %20 = arith.addf %14, %19 : vector<4x512xf32>
    %c0_21 = arith.constant 0 : index
    %c0_22 = arith.constant 0 : index
    %c3 = arith.constant 3 : index
    %21 = vector.load %arg1[%c0_21, %c0_22, %c3] : memref<1x4x896xf32, #tpu.memory_space<vmem>>, vector<1x4x512xf32>
    %22 = vector.shape_cast %21 : vector<1x4x512xf32> to vector<4x512xf32>
    %c3_23 = arith.constant 3 : index
    %c0_24 = arith.constant 0 : index
    %c0_25 = arith.constant 0 : index
    %23 = vector.load %arg2[%c3_23, %c0_24, %c0_25] : memref<121x4x4xf32, #tpu.memory_space<vmem>>, vector<1x4x4xf32>
    %24 = vector.shape_cast %23 : vector<1x4x4xf32> to vector<4x4xf32>
    %cst_26 = arith.constant dense<0.000000e+00> : vector<4x512xf32>
    %25 = tpu.matmul %24, %22, %cst_26 {dimension_numbers = #tpu.dot_dimension_numbers<[1], [0], [0], [1], [0, 0, 1, 1], [], []>} : vector<4x4xf32>, vector<4x512xf32>, vector<4x512xf32> -> vector<4x512xf32>
    %26 = arith.addf %20, %25 : vector<4x512xf32>
    %c0_27 = arith.constant 0 : index
    %c0_28 = arith.constant 0 : index
    %c4 = arith.constant 4 : index
    %27 = vector.load %arg1[%c0_27, %c0_28, %c4] : memref<1x4x896xf32, #tpu.memory_space<vmem>>, vector<1x4x512xf32>
    %28 = vector.shape_cast %27 : vector<1x4x512xf32> to vector<4x512xf32>
    %c4_29 = arith.constant 4 : index
    %c0_30 = arith.constant 0 : index
    %c0_31 = arith.constant 0 : index
    %29 = vector.load %arg2[%c4_29, %c0_30, %c0_31] : memref<121x4x4xf32, #tpu.memory_space<vmem>>, vector<1x4x4xf32>
    %30 = vector.shape_cast %29 : vector<1x4x4xf32> to vector<4x4xf32>
    %cst_32 = arith.constant dense<0.000000e+00> : vector<4x512xf32>
    %31 = tpu.matmul %30, %28, %cst_32 {dimension_numbers = #tpu.dot_dimension_numbers<[1], [0], [0], [1], [0, 0, 1, 1], [], []>} : vector<4x4xf32>, vector<4x512xf32>, vector<4x512xf32> -> vector<4x512xf32>
    %32 = arith.addf %26, %31 : vector<4x512xf32>
    %c0_33 = arith.constant 0 : index
    %c0_34 = arith.constant 0 : index
    %c5 = arith.constant 5 : index
    %33 = vector.load %arg1[%c0_33, %c0_34, %c5] : memref<1x4x896xf32, #tpu.memory_space<vmem>>, vector<1x4x512xf32>
    %34 = vector.shape_cast %33 : vector<1x4x512xf32> to vector<4x512xf32>
    %c5_35 = arith.constant 5 : index
    %c0_36 = arith.constant 0 : index
    %c0_37 = arith.constant 0 : index
    %35 = vector.load %arg2[%c5_35, %c0_36, %c0_37] : memref<121x4x4xf32, #tpu.memory_space<vmem>>, vector<1x4x4xf32>
    %36 = vector.shape_cast %35 : vector<1x4x4xf32> to vector<4x4xf32>
    %cst_38 = arith.constant dense<0.000000e+00> : vector<4x512xf32>
    %37 = tpu.matmul %36, %34, %cst_38 {dimension_numbers = #tpu.dot_dimension_numbers<[1], [0], [0], [1], [0, 0, 1, 1], [], []>} : vector<4x4xf32>, vector<4x512xf32>, vector<4x512xf32> -> vector<4x512xf32>
    %38 = arith.addf %32, %37 : vector<4x512xf32>
    %c0_39 = arith.constant 0 : index
    %c0_40 = arith.constant 0 : index
    %c6 = arith.constant 6 : index
    %39 = vector.load %arg1[%c0_39, %c0_40, %c6] : memref<1x4x896xf32, #tpu.memory_space<vmem>>, vector<1x4x512xf32>
    %40 = vector.shape_cast %39 : vector<1x4x512xf32> to vector<4x512xf32>
    %c6_41 = arith.constant 6 : index
    %c0_42 = arith.constant 0 : index
    %c0_43 = arith.constant 0 : index
    %41 = vector.load %arg2[%c6_41, %c0_42, %c0_43] : memref<121x4x4xf32, #tpu.memory_space<vmem>>, vector<1x4x4xf32>
    %42 = vector.shape_cast %41 : vector<1x4x4xf32> to vector<4x4xf32>
    %cst_44 = arith.constant dense<0.000000e+00> : vector<4x512xf32>
    %43 = tpu.matmul %42, %40, %cst_44 {dimension_numbers = #tpu.dot_dimension_numbers<[1], [0], [0], [1], [0, 0, 1, 1], [], []>} : vector<4x4xf32>, vector<4x512xf32>, vector<4x512xf32> -> vector<4x512xf32>
    %44 = arith.addf %38, %43 : vector<4x512xf32>
    %c0_45 = arith.constant 0 : index
    %c0_46 = arith.constant 0 : index
    %c7 = arith.constant 7 : index
    %45 = vector.load %arg1[%c0_45, %c0_46, %c7] : memref<1x4x896xf32, #tpu.memory_space<vmem>>, vector<1x4x512xf32>
    %46 = vector.shape_cast %45 : vector<1x4x512xf32> to vector<4x512xf32>
    %c7_47 = arith.constant 7 : index
    %c0_48 = arith.constant 0 : index
    %c0_49 = arith.constant 0 : index
    %47 = vector.load %arg2[%c7_47, %c0_48, %c0_49] : memref<121x4x4xf32, #tpu.memory_space<vmem>>, vector<1x4x4xf32>
    %48 = vector.shape_cast %47 : vector<1x4x4xf32> to vector<4x4xf32>
    %cst_50 = arith.constant dense<0.000000e+00> : vector<4x512xf32>
    %49 = tpu.matmul %48, %46, %cst_50 {dimension_numbers = #tpu.dot_dimension_numbers<[1], [0], [0], [1], [0, 0, 1, 1], [], []>} : vector<4x4xf32>, vector<4x512xf32>, vector<4x512xf32> -> vector<4x512xf32>
    %50 = arith.addf %44, %49 : vector<4x512xf32>
    %c0_51 = arith.constant 0 : index
    %c0_52 = arith.constant 0 : index
    %c8 = arith.constant 8 : index
    %51 = vector.load %arg1[%c0_51, %c0_52, %c8] : memref<1x4x896xf32, #tpu.memory_space<vmem>>, vector<1x4x512xf32>
    %52 = vector.shape_cast %51 : vector<1x4x512xf32> to vector<4x512xf32>
    %c8_53 = arith.constant 8 : index
    %c0_54 = arith.constant 0 : index
    %c0_55 = arith.constant 0 : index
    %53 = vector.load %arg2[%c8_53, %c0_54, %c0_55] : memref<121x4x4xf32, #tpu.memory_space<vmem>>, vector<1x4x4xf32>
    %54 = vector.shape_cast %53 : vector<1x4x4xf32> to vector<4x4xf32>
    %cst_56 = arith.constant dense<0.000000e+00> : vector<4x512xf32>
    %55 = tpu.matmul %54, %52, %cst_56 {dimension_numbers = #tpu.dot_dimension_numbers<[1], [0], [0], [1], [0, 0, 1, 1], [], []>} : vector<4x4xf32>, vector<4x512xf32>, vector<4x512xf32> -> vector<4x512xf32>
    %56 = arith.addf %50, %55 : vector<4x512xf32>
    %c0_57 = arith.constant 0 : index
    %c0_58 = arith.constant 0 : index
    %c9 = arith.constant 9 : index
    %57 = vector.load %arg1[%c0_57, %c0_58, %c9] : memref<1x4x896xf32, #tpu.memory_space<vmem>>, vector<1x4x512xf32>
    %58 = vector.shape_cast %57 : vector<1x4x512xf32> to vector<4x512xf32>
    %c9_59 = arith.constant 9 : index
    %c0_60 = arith.constant 0 : index
    %c0_61 = arith.constant 0 : index
    %59 = vector.load %arg2[%c9_59, %c0_60, %c0_61] : memref<121x4x4xf32, #tpu.memory_space<vmem>>, vector<1x4x4xf32>
    %60 = vector.shape_cast %59 : vector<1x4x4xf32> to vector<4x4xf32>
    %cst_62 = arith.constant dense<0.000000e+00> : vector<4x512xf32>
    %61 = tpu.matmul %60, %58, %cst_62 {dimension_numbers = #tpu.dot_dimension_numbers<[1], [0], [0], [1], [0, 0, 1, 1], [], []>} : vector<4x4xf32>, vector<4x512xf32>, vector<4x512xf32> -> vector<4x512xf32>
    %62 = arith.addf %56, %61 : vector<4x512xf32>
    %c0_63 = arith.constant 0 : index
    %c0_64 = arith.constant 0 : index
    %c10 = arith.constant 10 : index
    %63 = vector.load %arg1[%c0_63, %c0_64, %c10] : memref<1x4x896xf32, #tpu.memory_space<vmem>>, vector<1x4x512xf32>
    %64 = vector.shape_cast %63 : vector<1x4x512xf32> to vector<4x512xf32>
    %c10_65 = arith.constant 10 : index
    %c0_66 = arith.constant 0 : index
    %c0_67 = arith.constant 0 : index
    %65 = vector.load %arg2[%c10_65, %c0_66, %c0_67] : memref<121x4x4xf32, #tpu.memory_space<vmem>>, vector<1x4x4xf32>
    %66 = vector.shape_cast %65 : vector<1x4x4xf32> to vector<4x4xf32>
    %cst_68 = arith.constant dense<0.000000e+00> : vector<4x512xf32>
    %67 = tpu.matmul %66, %64, %cst_68 {dimension_numbers = #tpu.dot_dimension_numbers<[1], [0], [0], [1], [0, 0, 1, 1], [], []>} : vector<4x4xf32>, vector<4x512xf32>, vector<4x512xf32> -> vector<4x512xf32>
    %68 = arith.addf %62, %67 : vector<4x512xf32>
    %c0_69 = arith.constant 0 : index
    %c0_70 = arith.constant 0 : index
    %69 = vector.load %arg5[%c0_69, %c0_70] : memref<4x512xf32, #tpu.memory_space<vmem>>, vector<4x512xf32>
    %70 = arith.addf %69, %68 : vector<4x512xf32>
    %c0_71 = arith.constant 0 : index
    %c0_72 = arith.constant 0 : index
    %71 = vector.load %arg5[%c0_71, %c0_72] : memref<4x512xf32, #tpu.memory_space<vmem>>, vector<4x512xf32>
    tpu.vector_store %arg5[%c0_71, %c0_72], %70 {strides = array<i32>} : memref<4x512xf32, #tpu.memory_space<vmem>>, vector<4x512xf32>,
    %c0_73 = arith.constant 0 : index
    %c0_74 = arith.constant 0 : index
    %c26 = arith.constant 26 : index
    %72 = vector.load %arg1[%c0_73, %c0_74, %c26] : memref<1x4x896xf32, #tpu.memory_space<vmem>>, vector<1x4x512xf32>
    %73 = vector.shape_cast %72 : vector<1x4x512xf32> to vector<4x512xf32>
    %c11 = arith.constant 11 : index
    %c0_75 = arith.constant 0 : index
    %c0_76 = arith.constant 0 : index
    %74 = vector.load %arg2[%c11, %c0_75, %c0_76] : memref<121x4x4xf32, #tpu.memory_space<vmem>>, vector<1x4x4xf32>
    %75 = vector.shape_cast %74 : vector<1x4x4xf32> to vector<4x4xf32>
    %cst_77 = arith.constant dense<0.000000e+00> : vector<4x512xf32>
    %76 = tpu.matmul %75, %73, %cst_77 {dimension_numbers = #tpu.dot_dimension_numbers<[1], [0], [0], [1], [0, 0, 1, 1], [], []>} : vector<4x4xf32>, vector<4x512xf32>, vector<4x512xf32> -> vector<4x512xf32>
    %c0_78 = arith.constant 0 : index
    %c0_79 = arith.constant 0 : index
    %c27 = arith.constant 27 : index
    %77 = vector.load %arg1[%c0_78, %c0_79, %c27] : memref<1x4x896xf32, #tpu.memory_space<vmem>>, vector<1x4x512xf32>
    %78 = vector.shape_cast %77 : vector<1x4x512xf32> to vector<4x512xf32>
    %c12 = arith.constant 12 : index
    %c0_80 = arith.constant 0 : index
    %c0_81 = arith.constant 0 : index
    %79 = vector.load %arg2[%c12, %c0_80, %c0_81] : memref<121x4x4xf32, #tpu.memory_space<vmem>>, vector<1x4x4xf32>
    %80 = vector.shape_cast %79 : vector<1x4x4xf32> to vector<4x4xf32>
    %cst_82 = arith.constant dense<0.000000e+00> : vector<4x512xf32>
    %81 = tpu.matmul %80, %78, %cst_82 {dimension_numbers = #tpu.dot_dimension_numbers<[1], [0], [0], [1], [0, 0, 1, 1], [], []>} : vector<4x4xf32>, vector<4x512xf32>, vector<4x512xf32> -> vector<4x512xf32>
    %82 = arith.addf %76, %81 : vector<4x512xf32>
    %c0_83 = arith.constant 0 : index
    %c0_84 = arith.constant 0 : index
    %c28 = arith.constant 28 : index
    %83 = vector.load %arg1[%c0_83, %c0_84, %c28] : memref<1x4x896xf32, #tpu.memory_space<vmem>>, vector<1x4x512xf32>
    %84 = vector.shape_cast %83 : vector<1x4x512xf32> to vector<4x512xf32>
    %c13 = arith.constant 13 : index
    %c0_85 = arith.constant 0 : index
    %c0_86 = arith.constant 0 : index
    %85 = vector.load %arg2[%c13, %c0_85, %c0_86] : memref<121x4x4xf32, #tpu.memory_space<vmem>>, vector<1x4x4xf32>
    %86 = vector.shape_cast %85 : vector<1x4x4xf32> to vector<4x4xf32>
    %cst_87 = arith.constant dense<0.000000e+00> : vector<4x512xf32>
    %87 = tpu.matmul %86, %84, %cst_87 {dimension_numbers = #tpu.dot_dimension_numbers<[1], [0], [0], [1], [0, 0, 1, 1], [], []>} : vector<4x4xf32>, vector<4x512xf32>, vector<4x512xf32> -> vector<4x512xf32>
    %88 = arith.addf %82, %87 : vector<4x512xf32>
    %c0_88 = arith.constant 0 : index
    %c0_89 = arith.constant 0 : index
    %c29 = arith.constant 29 : index
    %89 = vector.load %arg1[%c0_88, %c0_89, %c29] : memref<1x4x896xf32, #tpu.memory_space<vmem>>, vector<1x4x512xf32>
    %90 = vector.shape_cast %89 : vector<1x4x512xf32> to vector<4x512xf32>
    %c14 = arith.constant 14 : index
    %c0_90 = arith.constant 0 : index
    %c0_91 = arith.constant 0 : index
    %91 = vector.load %arg2[%c14, %c0_90, %c0_91] : memref<121x4x4xf32, #tpu.memory_space<vmem>>, vector<1x4x4xf32>
    %92 = vector.shape_cast %91 : vector<1x4x4xf32> to vector<4x4xf32>
    %cst_92 = arith.constant dense<0.000000e+00> : vector<4x512xf32>
    %93 = tpu.matmul %92, %90, %cst_92 {dimension_numbers = #tpu.dot_dimension_numbers<[1], [0], [0], [1], [0, 0, 1, 1], [], []>} : vector<4x4xf32>, vector<4x512xf32>, vector<4x512xf32> -> vector<4x512xf32>
    %94 = arith.addf %88, %93 : vector<4x512xf32>
    %c0_93 = arith.constant 0 : index
    %c0_94 = arith.constant 0 : index
    %c30 = arith.constant 30 : index
    %95 = vector.load %arg1[%c0_93, %c0_94, %c30] : memref<1x4x896xf32, #tpu.memory_space<vmem>>, vector<1x4x512xf32>
    %96 = vector.shape_cast %95 : vector<1x4x512xf32> to vector<4x512xf32>
    %c15 = arith.constant 15 : index
    %c0_95 = arith.constant 0 : index
    %c0_96 = arith.constant 0 : index
    %97 = vector.load %arg2[%c15, %c0_95, %c0_96] : memref<121x4x4xf32, #tpu.memory_space<vmem>>, vector<1x4x4xf32>
    %98 = vector.shape_cast %97 : vector<1x4x4xf32> to vector<4x4xf32>
    %cst_97 = arith.constant dense<0.000000e+00> : vector<4x512xf32>
    %99 = tpu.matmul %98, %96, %cst_97 {dimension_numbers = #tpu.dot_dimension_numbers<[1], [0], [0], [1], [0, 0, 1, 1], [], []>} : vector<4x4xf32>, vector<4x512xf32>, vector<4x512xf32> -> vector<4x512xf32>
    %100 = arith.addf %94, %99 : vector<4x512xf32>
    %c0_98 = arith.constant 0 : index
    %c0_99 = arith.constant 0 : index
    %c31 = arith.constant 31 : index
    %101 = vector.load %arg1[%c0_98, %c0_99, %c31] : memref<1x4x896xf32, #tpu.memory_space<vmem>>, vector<1x4x512xf32>
    %102 = vector.shape_cast %101 : vector<1x4x512xf32> to vector<4x512xf32>
    %c16 = arith.constant 16 : index
    %c0_100 = arith.constant 0 : index
    %c0_101 = arith.constant 0 : index
    %103 = vector.load %arg2[%c16, %c0_100, %c0_101] : memref<121x4x4xf32, #tpu.memory_space<vmem>>, vector<1x4x4xf32>
    %104 = vector.shape_cast %103 : vector<1x4x4xf32> to vector<4x4xf32>
    %cst_102 = arith.constant dense<0.000000e+00> : vector<4x512xf32>
    %105 = tpu.matmul %104, %102, %cst_102 {dimension_numbers = #tpu.dot_dimension_numbers<[1], [0], [0], [1], [0, 0, 1, 1], [], []>} : vector<4x4xf32>, vector<4x512xf32>, vector<4x512xf32> -> vector<4x512xf32>
    %106 = arith.addf %100, %105 : vector<4x512xf32>
    %c0_103 = arith.constant 0 : index
    %c0_104 = arith.constant 0 : index
    %c32 = arith.constant 32 : index
    %107 = vector.load %arg1[%c0_103, %c0_104, %c32] : memref<1x4x896xf32, #tpu.memory_space<vmem>>, vector<1x4x512xf32>
    %108 = vector.shape_cast %107 : vector<1x4x512xf32> to vector<4x512xf32>
    %c17 = arith.constant 17 : index
    %c0_105 = arith.constant 0 : index
    %c0_106 = arith.constant 0 : index
    %109 = vector.load %arg2[%c17, %c0_105, %c0_106] : memref<121x4x4xf32, #tpu.memory_space<vmem>>, vector<1x4x4xf32>
    %110 = vector.shape_cast %109 : vector<1x4x4xf32> to vector<4x4xf32>
    %cst_107 = arith.constant dense<0.000000e+00> : vector<4x512xf32>
    %111 = tpu.matmul %110, %108, %cst_107 {dimension_numbers = #tpu.dot_dimension_numbers<[1], [0], [0], [1], [0, 0, 1, 1], [], []>} : vector<4x4xf32>, vector<4x512xf32>, vector<4x512xf32> -> vector<4x512xf32>
    %112 = arith.addf %106, %111 : vector<4x512xf32>
    %c0_108 = arith.constant 0 : index
    %c0_109 = arith.constant 0 : index
    %c33 = arith.constant 33 : index
    %113 = vector.load %arg1[%c0_108, %c0_109, %c33] : memref<1x4x896xf32, #tpu.memory_space<vmem>>, vector<1x4x512xf32>
    %114 = vector.shape_cast %113 : vector<1x4x512xf32> to vector<4x512xf32>
    %c18 = arith.constant 18 : index
    %c0_110 = arith.constant 0 : index
    %c0_111 = arith.constant 0 : index
    %115 = vector.load %arg2[%c18, %c0_110, %c0_111] : memref<121x4x4xf32, #tpu.memory_space<vmem>>, vector<1x4x4xf32>
    %116 = vector.shape_cast %115 : vector<1x4x4xf32> to vector<4x4xf32>
    %cst_112 = arith.constant dense<0.000000e+00> : vector<4x512xf32>
    %117 = tpu.matmul %116, %114, %cst_112 {dimension_numbers = #tpu.dot_dimension_numbers<[1], [0], [0], [1], [0, 0, 1, 1], [], []>} : vector<4x4xf32>, vector<4x512xf32>, vector<4x512xf32> -> vector<4x512xf32>
    %118 = arith.addf %112, %117 : vector<4x512xf32>
    %c0_113 = arith.constant 0 : index
    %c0_114 = arith.constant 0 : index
    %c34 = arith.constant 34 : index
    %119 = vector.load %arg1[%c0_113, %c0_114, %c34] : memref<1x4x896xf32, #tpu.memory_space<vmem>>, vector<1x4x512xf32>
    %120 = vector.shape_cast %119 : vector<1x4x512xf32> to vector<4x512xf32>
    %c19 = arith.constant 19 : index
    %c0_115 = arith.constant 0 : index
    %c0_116 = arith.constant 0 : index
    %121 = vector.load %arg2[%c19, %c0_115, %c0_116] : memref<121x4x4xf32, #tpu.memory_space<vmem>>, vector<1x4x4xf32>
    %122 = vector.shape_cast %121 : vector<1x4x4xf32> to vector<4x4xf32>
    %cst_117 = arith.constant dense<0.000000e+00> : vector<4x512xf32>
    %123 = tpu.matmul %122, %120, %cst_117 {dimension_numbers = #tpu.dot_dimension_numbers<[1], [0], [0], [1], [0, 0, 1, 1], [], []>} : vector<4x4xf32>, vector<4x512xf32>, vector<4x512xf32> -> vector<4x512xf32>
    %124 = arith.addf %118, %123 : vector<4x512xf32>
    %c0_118 = arith.constant 0 : index
    %c0_119 = arith.constant 0 : index
    %c35 = arith.constant 35 : index
    %125 = vector.load %arg1[%c0_118, %c0_119, %c35] : memref<1x4x896xf32, #tpu.memory_space<vmem>>, vector<1x4x512xf32>
    %126 = vector.shape_cast %125 : vector<1x4x512xf32> to vector<4x512xf32>
    %c20 = arith.constant 20 : index
    %c0_120 = arith.constant 0 : index
    %c0_121 = arith.constant 0 : index
    %127 = vector.load %arg2[%c20, %c0_120, %c0_121] : memref<121x4x4xf32, #tpu.memory_space<vmem>>, vector<1x4x4xf32>
    %128 = vector.shape_cast %127 : vector<1x4x4xf32> to vector<4x4xf32>
    %cst_122 = arith.constant dense<0.000000e+00> : vector<4x512xf32>
    %129 = tpu.matmul %128, %126, %cst_122 {dimension_numbers = #tpu.dot_dimension_numbers<[1], [0], [0], [1], [0, 0, 1, 1], [], []>} : vector<4x4xf32>, vector<4x512xf32>, vector<4x512xf32> -> vector<4x512xf32>
    %130 = arith.addf %124, %129 : vector<4x512xf32>
    %c0_123 = arith.constant 0 : index
    %c0_124 = arith.constant 0 : index
    %c36 = arith.constant 36 : index
    %131 = vector.load %arg1[%c0_123, %c0_124, %c36] : memref<1x4x896xf32, #tpu.memory_space<vmem>>, vector<1x4x512xf32>
    %132 = vector.shape_cast %131 : vector<1x4x512xf32> to vector<4x512xf32>
    %c21 = arith.constant 21 : index
    %c0_125 = arith.constant 0 : index
    %c0_126 = arith.constant 0 : index
    %133 = vector.load %arg2[%c21, %c0_125, %c0_126] : memref<121x4x4xf32, #tpu.memory_space<vmem>>, vector<1x4x4xf32>
    %134 = vector.shape_cast %133 : vector<1x4x4xf32> to vector<4x4xf32>
    %cst_127 = arith.constant dense<0.000000e+00> : vector<4x512xf32>
    %135 = tpu.matmul %134, %132, %cst_127 {dimension_numbers = #tpu.dot_dimension_numbers<[1], [0], [0], [1], [0, 0, 1, 1], [], []>} : vector<4x4xf32>, vector<4x512xf32>, vector<4x512xf32> -> vector<4x512xf32>
    %136 = arith.addf %130, %135 : vector<4x512xf32>
    %c0_128 = arith.constant 0 : index
    %c0_129 = arith.constant 0 : index
    %137 = vector.load %arg5[%c0_128, %c0_129] : memref<4x512xf32, #tpu.memory_space<vmem>>, vector<4x512xf32>
    %138 = arith.addf %137, %136 : vector<4x512xf32>
    %c0_130 = arith.constant 0 : index
    %c0_131 = arith.constant 0 : index
    %139 = vector.load %arg5[%c0_130, %c0_131] : memref<4x512xf32, #tpu.memory_space<vmem>>, vector<4x512xf32>
    tpu.vector_store %arg5[%c0_130, %c0_131], %138 {strides = array<i32>} : memref<4x512xf32, #tpu.memory_space<vmem>>, vector<4x512xf32>,
    %c0_132 = arith.constant 0 : index
    %c0_133 = arith.constant 0 : index
    %c52 = arith.constant 52 : index
    %140 = vector.load %arg1[%c0_132, %c0_133, %c52] : memref<1x4x896xf32, #tpu.memory_space<vmem>>, vector<1x4x512xf32>
    %141 = vector.shape_cast %140 : vector<1x4x512xf32> to vector<4x512xf32>
    %c22 = arith.constant 22 : index
    %c0_134 = arith.constant 0 : index
    %c0_135 = arith.constant 0 : index
    %142 = vector.load %arg2[%c22, %c0_134, %c0_135] : memref<121x4x4xf32, #tpu.memory_space<vmem>>, vector<1x4x4xf32>
    %143 = vector.shape_cast %142 : vector<1x4x4xf32> to vector<4x4xf32>
    %cst_136 = arith.constant dense<0.000000e+00> : vector<4x512xf32>
    %144 = tpu.matmul %143, %141, %cst_136 {dimension_numbers = #tpu.dot_dimension_numbers<[1], [0], [0], [1], [0, 0, 1, 1], [], []>} : vector<4x4xf32>, vector<4x512xf32>, vector<4x512xf32> -> vector<4x512xf32>
    %c0_137 = arith.constant 0 : index
    %c0_138 = arith.constant 0 : index
    %c53 = arith.constant 53 : index
    %145 = vector.load %arg1[%c0_137, %c0_138, %c53] : memref<1x4x896xf32, #tpu.memory_space<vmem>>, vector<1x4x512xf32>
    %146 = vector.shape_cast %145 : vector<1x4x512xf32> to vector<4x512xf32>
    %c23 = arith.constant 23 : index
    %c0_139 = arith.constant 0 : index
    %c0_140 = arith.constant 0 : index
    %147 = vector.load %arg2[%c23, %c0_139, %c0_140] : memref<121x4x4xf32, #tpu.memory_space<vmem>>, vector<1x4x4xf32>
    %148 = vector.shape_cast %147 : vector<1x4x4xf32> to vector<4x4xf32>
    %cst_141 = arith.constant dense<0.000000e+00> : vector<4x512xf32>
    %149 = tpu.matmul %148, %146, %cst_141 {dimension_numbers = #tpu.dot_dimension_numbers<[1], [0], [0], [1], [0, 0, 1, 1], [], []>} : vector<4x4xf32>, vector<4x512xf32>, vector<4x512xf32> -> vector<4x512xf32>
    %150 = arith.addf %144, %149 : vector<4x512xf32>
    %c0_142 = arith.constant 0 : index
    %c0_143 = arith.constant 0 : index
    %c54 = arith.constant 54 : index
    %151 = vector.load %arg1[%c0_142, %c0_143, %c54] : memref<1x4x896xf32, #tpu.memory_space<vmem>>, vector<1x4x512xf32>
    %152 = vector.shape_cast %151 : vector<1x4x512xf32> to vector<4x512xf32>
    %c24 = arith.constant 24 : index
    %c0_144 = arith.constant 0 : index
    %c0_145 = arith.constant 0 : index
    %153 = vector.load %arg2[%c24, %c0_144, %c0_145] : memref<121x4x4xf32, #tpu.memory_space<vmem>>, vector<1x4x4xf32>
    %154 = vector.shape_cast %153 : vector<1x4x4xf32> to vector<4x4xf32>
    %cst_146 = arith.constant dense<0.000000e+00> : vector<4x512xf32>
    %155 = tpu.matmul %154, %152, %cst_146 {dimension_numbers = #tpu.dot_dimension_numbers<[1], [0], [0], [1], [0, 0, 1, 1], [], []>} : vector<4x4xf32>, vector<4x512xf32>, vector<4x512xf32> -> vector<4x512xf32>
    %156 = arith.addf %150, %155 : vector<4x512xf32>
    %c0_147 = arith.constant 0 : index
    %c0_148 = arith.constant 0 : index
    %c55 = arith.constant 55 : index
    %157 = vector.load %arg1[%c0_147, %c0_148, %c55] : memref<1x4x896xf32, #tpu.memory_space<vmem>>, vector<1x4x512xf32>
    %158 = vector.shape_cast %157 : vector<1x4x512xf32> to vector<4x512xf32>
    %c25 = arith.constant 25 : index
    %c0_149 = arith.constant 0 : index
    %c0_150 = arith.constant 0 : index
    %159 = vector.load %arg2[%c25, %c0_149, %c0_150] : memref<121x4x4xf32, #tpu.memory_space<vmem>>, vector<1x4x4xf32>
    %160 = vector.shape_cast %159 : vector<1x4x4xf32> to vector<4x4xf32>
    %cst_151 = arith.constant dense<0.000000e+00> : vector<4x512xf32>
    %161 = tpu.matmul %160, %158, %cst_151 {dimension_numbers = #tpu.dot_dimension_numbers<[1], [0], [0], [1], [0, 0, 1, 1], [], []>} : vector<4x4xf32>, vector<4x512xf32>, vector<4x512xf32> -> vector<4x512xf32>
    %162 = arith.addf %156, %161 : vector<4x512xf32>
    %c0_152 = arith.constant 0 : index
    %c0_153 = arith.constant 0 : index
    %c56 = arith.constant 56 : index
    %163 = vector.load %arg1[%c0_152, %c0_153, %c56] : memref<1x4x896xf32, #tpu.memory_space<vmem>>, vector<1x4x512xf32>
    %164 = vector.shape_cast %163 : vector<1x4x512xf32> to vector<4x512xf32>
    %c26_154 = arith.constant 26 : index
    %c0_155 = arith.constant 0 : index
    %c0_156 = arith.constant 0 : index
    %165 = vector.load %arg2[%c26_154, %c0_155, %c0_156] : memref<121x4x4xf32, #tpu.memory_space<vmem>>, vector<1x4x4xf32>
    %166 = vector.shape_cast %165 : vector<1x4x4xf32> to vector<4x4xf32>
    %cst_157 = arith.constant dense<0.000000e+00> : vector<4x512xf32>
    %167 = tpu.matmul %166, %164, %cst_157 {dimension_numbers = #tpu.dot_dimension_numbers<[1], [0], [0], [1], [0, 0, 1, 1], [], []>} : vector<4x4xf32>, vector<4x512xf32>, vector<4x512xf32> -> vector<4x512xf32>
    %168 = arith.addf %162, %167 : vector<4x512xf32>
    %c0_158 = arith.constant 0 : index
    %c0_159 = arith.constant 0 : index
    %c57 = arith.constant 57 : index
    %169 = vector.load %arg1[%c0_158, %c0_159, %c57] : memref<1x4x896xf32, #tpu.memory_space<vmem>>, vector<1x4x512xf32>
    %170 = vector.shape_cast %169 : vector<1x4x512xf32> to vector<4x512xf32>
    %c27_160 = arith.constant 27 : index
    %c0_161 = arith.constant 0 : index
    %c0_162 = arith.constant 0 : index
    %171 = vector.load %arg2[%c27_160, %c0_161, %c0_162] : memref<121x4x4xf32, #tpu.memory_space<vmem>>, vector<1x4x4xf32>
    %172 = vector.shape_cast %171 : vector<1x4x4xf32> to vector<4x4xf32>
    %cst_163 = arith.constant dense<0.000000e+00> : vector<4x512xf32>
    %173 = tpu.matmul %172, %170, %cst_163 {dimension_numbers = #tpu.dot_dimension_numbers<[1], [0], [0], [1], [0, 0, 1, 1], [], []>} : vector<4x4xf32>, vector<4x512xf32>, vector<4x512xf32> -> vector<4x512xf32>
    %174 = arith.addf %168, %173 : vector<4x512xf32>
    %c0_164 = arith.constant 0 : index
    %c0_165 = arith.constant 0 : index
    %c58 = arith.constant 58 : index
    %175 = vector.load %arg1[%c0_164, %c0_165, %c58] : memref<1x4x896xf32, #tpu.memory_space<vmem>>, vector<1x4x512xf32>
    %176 = vector.shape_cast %175 : vector<1x4x512xf32> to vector<4x512xf32>
    %c28_166 = arith.constant 28 : index
    %c0_167 = arith.constant 0 : index
    %c0_168 = arith.constant 0 : index
    %177 = vector.load %arg2[%c28_166, %c0_167, %c0_168] : memref<121x4x4xf32, #tpu.memory_space<vmem>>, vector<1x4x4xf32>
    %178 = vector.shape_cast %177 : vector<1x4x4xf32> to vector<4x4xf32>
    %cst_169 = arith.constant dense<0.000000e+00> : vector<4x512xf32>
    %179 = tpu.matmul %178, %176, %cst_169 {dimension_numbers = #tpu.dot_dimension_numbers<[1], [0], [0], [1], [0, 0, 1, 1], [], []>} : vector<4x4xf32>, vector<4x512xf32>, vector<4x512xf32> -> vector<4x512xf32>
    %180 = arith.addf %174, %179 : vector<4x512xf32>
    %c0_170 = arith.constant 0 : index
    %c0_171 = arith.constant 0 : index
    %c59 = arith.constant 59 : index
    %181 = vector.load %arg1[%c0_170, %c0_171, %c59] : memref<1x4x896xf32, #tpu.memory_space<vmem>>, vector<1x4x512xf32>
    %182 = vector.shape_cast %181 : vector<1x4x512xf32> to vector<4x512xf32>
    %c29_172 = arith.constant 29 : index
    %c0_173 = arith.constant 0 : index
    %c0_174 = arith.constant 0 : index
    %183 = vector.load %arg2[%c29_172, %c0_173, %c0_174] : memref<121x4x4xf32, #tpu.memory_space<vmem>>, vector<1x4x4xf32>
    %184 = vector.shape_cast %183 : vector<1x4x4xf32> to vector<4x4xf32>
    %cst_175 = arith.constant dense<0.000000e+00> : vector<4x512xf32>
    %185 = tpu.matmul %184, %182, %cst_175 {dimension_numbers = #tpu.dot_dimension_numbers<[1], [0], [0], [1], [0, 0, 1, 1], [], []>} : vector<4x4xf32>, vector<4x512xf32>, vector<4x512xf32> -> vector<4x512xf32>
    %186 = arith.addf %180, %185 : vector<4x512xf32>
    %c0_176 = arith.constant 0 : index
    %c0_177 = arith.constant 0 : index
    %c60 = arith.constant 60 : index
    %187 = vector.load %arg1[%c0_176, %c0_177, %c60] : memref<1x4x896xf32, #tpu.memory_space<vmem>>, vector<1x4x512xf32>
    %188 = vector.shape_cast %187 : vector<1x4x512xf32> to vector<4x512xf32>
    %c30_178 = arith.constant 30 : index
    %c0_179 = arith.constant 0 : index
    %c0_180 = arith.constant 0 : index
    %189 = vector.load %arg2[%c30_178, %c0_179, %c0_180] : memref<121x4x4xf32, #tpu.memory_space<vmem>>, vector<1x4x4xf32>
    %190 = vector.shape_cast %189 : vector<1x4x4xf32> to vector<4x4xf32>
    %cst_181 = arith.constant dense<0.000000e+00> : vector<4x512xf32>
    %191 = tpu.matmul %190, %188, %cst_181 {dimension_numbers = #tpu.dot_dimension_numbers<[1], [0], [0], [1], [0, 0, 1, 1], [], []>} : vector<4x4xf32>, vector<4x512xf32>, vector<4x512xf32> -> vector<4x512xf32>
    %192 = arith.addf %186, %191 : vector<4x512xf32>
    %c0_182 = arith.constant 0 : index
    %c0_183 = arith.constant 0 : index
    %c61 = arith.constant 61 : index
    %193 = vector.load %arg1[%c0_182, %c0_183, %c61] : memref<1x4x896xf32, #tpu.memory_space<vmem>>, vector<1x4x512xf32>
    %194 = vector.shape_cast %193 : vector<1x4x512xf32> to vector<4x512xf32>
    %c31_184 = arith.constant 31 : index
    %c0_185 = arith.constant 0 : index
    %c0_186 = arith.constant 0 : index
    %195 = vector.load %arg2[%c31_184, %c0_185, %c0_186] : memref<121x4x4xf32, #tpu.memory_space<vmem>>, vector<1x4x4xf32>
    %196 = vector.shape_cast %195 : vector<1x4x4xf32> to vector<4x4xf32>
    %cst_187 = arith.constant dense<0.000000e+00> : vector<4x512xf32>
    %197 = tpu.matmul %196, %194, %cst_187 {dimension_numbers = #tpu.dot_dimension_numbers<[1], [0], [0], [1], [0, 0, 1, 1], [], []>} : vector<4x4xf32>, vector<4x512xf32>, vector<4x512xf32> -> vector<4x512xf32>
    %198 = arith.addf %192, %197 : vector<4x512xf32>
    %c0_188 = arith.constant 0 : index
    %c0_189 = arith.constant 0 : index
    %c62 = arith.constant 62 : index
    %199 = vector.load %arg1[%c0_188, %c0_189, %c62] : memref<1x4x896xf32, #tpu.memory_space<vmem>>, vector<1x4x512xf32>
    %200 = vector.shape_cast %199 : vector<1x4x512xf32> to vector<4x512xf32>
    %c32_190 = arith.constant 32 : index
    %c0_191 = arith.constant 0 : index
    %c0_192 = arith.constant 0 : index
    %201 = vector.load %arg2[%c32_190, %c0_191, %c0_192] : memref<121x4x4xf32, #tpu.memory_space<vmem>>, vector<1x4x4xf32>
    %202 = vector.shape_cast %201 : vector<1x4x4xf32> to vector<4x4xf32>
    %cst_193 = arith.constant dense<0.000000e+00> : vector<4x512xf32>
    %203 = tpu.matmul %202, %200, %cst_193 {dimension_numbers = #tpu.dot_dimension_numbers<[1], [0], [0], [1], [0, 0, 1, 1], [], []>} : vector<4x4xf32>, vector<4x512xf32>, vector<4x512xf32> -> vector<4x512xf32>
    %204 = arith.addf %198, %203 : vector<4x512xf32>
    %c0_194 = arith.constant 0 : index
    %c0_195 = arith.constant 0 : index
    %205 = vector.load %arg5[%c0_194, %c0_195] : memref<4x512xf32, #tpu.memory_space<vmem>>, vector<4x512xf32>
    %206 = arith.addf %205, %204 : vector<4x512xf32>
    %c0_196 = arith.constant 0 : index
    %c0_197 = arith.constant 0 : index
    %207 = vector.load %arg5[%c0_196, %c0_197] : memref<4x512xf32, #tpu.memory_space<vmem>>, vector<4x512xf32>
    tpu.vector_store %arg5[%c0_196, %c0_197], %206 {strides = array<i32>} : memref<4x512xf32, #tpu.memory_space<vmem>>, vector<4x512xf32>,
    %c0_198 = arith.constant 0 : index
    %c0_199 = arith.constant 0 : index
    %c78 = arith.constant 78 : index
    %208 = vector.load %arg1[%c0_198, %c0_199, %c78] : memref<1x4x896xf32, #tpu.memory_space<vmem>>, vector<1x4x512xf32>
    %209 = vector.shape_cast %208 : vector<1x4x512xf32> to vector<4x512xf32>
    %c33_200 = arith.constant 33 : index
    %c0_201 = arith.constant 0 : index
    %c0_202 = arith.constant 0 : index
    %210 = vector.load %arg2[%c33_200, %c0_201, %c0_202] : memref<121x4x4xf32, #tpu.memory_space<vmem>>, vector<1x4x4xf32>
    %211 = vector.shape_cast %210 : vector<1x4x4xf32> to vector<4x4xf32>
    %cst_203 = arith.constant dense<0.000000e+00> : vector<4x512xf32>
    %212 = tpu.matmul %211, %209, %cst_203 {dimension_numbers = #tpu.dot_dimension_numbers<[1], [0], [0], [1], [0, 0, 1, 1], [], []>} : vector<4x4xf32>, vector<4x512xf32>, vector<4x512xf32> -> vector<4x512xf32>
    %c0_204 = arith.constant 0 : index
    %c0_205 = arith.constant 0 : index
    %c79 = arith.constant 79 : index
    %213 = vector.load %arg1[%c0_204, %c0_205, %c79] : memref<1x4x896xf32, #tpu.memory_space<vmem>>, vector<1x4x512xf32>
    %214 = vector.shape_cast %213 : vector<1x4x512xf32> to vector<4x512xf32>
    %c34_206 = arith.constant 34 : index
    %c0_207 = arith.constant 0 : index
    %c0_208 = arith.constant 0 : index
    %215 = vector.load %arg2[%c34_206, %c0_207, %c0_208] : memref<121x4x4xf32, #tpu.memory_space<vmem>>, vector<1x4x4xf32>
    %216 = vector.shape_cast %215 : vector<1x4x4xf32> to vector<4x4xf32>
    %cst_209 = arith.constant dense<0.000000e+00> : vector<4x512xf32>
    %217 = tpu.matmul %216, %214, %cst_209 {dimension_numbers = #tpu.dot_dimension_numbers<[1], [0], [0], [1], [0, 0, 1, 1], [], []>} : vector<4x4xf32>, vector<4x512xf32>, vector<4x512xf32> -> vector<4x512xf32>
    %218 = arith.addf %212, %217 : vector<4x512xf32>
    %c0_210 = arith.constant 0 : index
    %c0_211 = arith.constant 0 : index
    %c80 = arith.constant 80 : index
    %219 = vector.load %arg1[%c0_210, %c0_211, %c80] : memref<1x4x896xf32, #tpu.memory_space<vmem>>, vector<1x4x512xf32>
    %220 = vector.shape_cast %219 : vector<1x4x512xf32> to vector<4x512xf32>
    %c35_212 = arith.constant 35 : index
    %c0_213 = arith.constant 0 : index
    %c0_214 = arith.constant 0 : index
    %221 = vector.load %arg2[%c35_212, %c0_213, %c0_214] : memref<121x4x4xf32, #tpu.memory_space<vmem>>, vector<1x4x4xf32>
    %222 = vector.shape_cast %221 : vector<1x4x4xf32> to vector<4x4xf32>
    %cst_215 = arith.constant dense<0.000000e+00> : vector<4x512xf32>
    %223 = tpu.matmul %222, %220, %cst_215 {dimension_numbers = #tpu.dot_dimension_numbers<[1], [0], [0], [1], [0, 0, 1, 1], [], []>} : vector<4x4xf32>, vector<4x512xf32>, vector<4x512xf32> -> vector<4x512xf32>
    %224 = arith.addf %218, %223 : vector<4x512xf32>
    %c0_216 = arith.constant 0 : index
    %c0_217 = arith.constant 0 : index
    %c81 = arith.constant 81 : index
    %225 = vector.load %arg1[%c0_216, %c0_217, %c81] : memref<1x4x896xf32, #tpu.memory_space<vmem>>, vector<1x4x512xf32>
    %226 = vector.shape_cast %225 : vector<1x4x512xf32> to vector<4x512xf32>
    %c36_218 = arith.constant 36 : index
    %c0_219 = arith.constant 0 : index
    %c0_220 = arith.constant 0 : index
    %227 = vector.load %arg2[%c36_218, %c0_219, %c0_220] : memref<121x4x4xf32, #tpu.memory_space<vmem>>, vector<1x4x4xf32>
    %228 = vector.shape_cast %227 : vector<1x4x4xf32> to vector<4x4xf32>
    %cst_221 = arith.constant dense<0.000000e+00> : vector<4x512xf32>
    %229 = tpu.matmul %228, %226, %cst_221 {dimension_numbers = #tpu.dot_dimension_numbers<[1], [0], [0], [1], [0, 0, 1, 1], [], []>} : vector<4x4xf32>, vector<4x512xf32>, vector<4x512xf32> -> vector<4x512xf32>
    %230 = arith.addf %224, %229 : vector<4x512xf32>
    %c0_222 = arith.constant 0 : index
    %c0_223 = arith.constant 0 : index
    %c82 = arith.constant 82 : index
    %231 = vector.load %arg1[%c0_222, %c0_223, %c82] : memref<1x4x896xf32, #tpu.memory_space<vmem>>, vector<1x4x512xf32>
    %232 = vector.shape_cast %231 : vector<1x4x512xf32> to vector<4x512xf32>
    %c37 = arith.constant 37 : index
    %c0_224 = arith.constant 0 : index
    %c0_225 = arith.constant 0 : index
    %233 = vector.load %arg2[%c37, %c0_224, %c0_225] : memref<121x4x4xf32, #tpu.memory_space<vmem>>, vector<1x4x4xf32>
    %234 = vector.shape_cast %233 : vector<1x4x4xf32> to vector<4x4xf32>
    %cst_226 = arith.constant dense<0.000000e+00> : vector<4x512xf32>
    %235 = tpu.matmul %234, %232, %cst_226 {dimension_numbers = #tpu.dot_dimension_numbers<[1], [0], [0], [1], [0, 0, 1, 1], [], []>} : vector<4x4xf32>, vector<4x512xf32>, vector<4x512xf32> -> vector<4x512xf32>
    %236 = arith.addf %230, %235 : vector<4x512xf32>
    %c0_227 = arith.constant 0 : index
    %c0_228 = arith.constant 0 : index
    %c83 = arith.constant 83 : index
    %237 = vector.load %arg1[%c0_227, %c0_228, %c83] : memref<1x4x896xf32, #tpu.memory_space<vmem>>, vector<1x4x512xf32>
    %238 = vector.shape_cast %237 : vector<1x4x512xf32> to vector<4x512xf32>
    %c38 = arith.constant 38 : index
    %c0_229 = arith.constant 0 : index
    %c0_230 = arith.constant 0 : index
    %239 = vector.load %arg2[%c38, %c0_229, %c0_230] : memref<121x4x4xf32, #tpu.memory_space<vmem>>, vector<1x4x4xf32>
    %240 = vector.shape_cast %239 : vector<1x4x4xf32> to vector<4x4xf32>
    %cst_231 = arith.constant dense<0.000000e+00> : vector<4x512xf32>
    %241 = tpu.matmul %240, %238, %cst_231 {dimension_numbers = #tpu.dot_dimension_numbers<[1], [0], [0], [1], [0, 0, 1, 1], [], []>} : vector<4x4xf32>, vector<4x512xf32>, vector<4x512xf32> -> vector<4x512xf32>
    %242 = arith.addf %236, %241 : vector<4x512xf32>
    %c0_232 = arith.constant 0 : index
    %c0_233 = arith.constant 0 : index
    %c84 = arith.constant 84 : index
    %243 = vector.load %arg1[%c0_232, %c0_233, %c84] : memref<1x4x896xf32, #tpu.memory_space<vmem>>, vector<1x4x512xf32>
    %244 = vector.shape_cast %243 : vector<1x4x512xf32> to vector<4x512xf32>
    %c39 = arith.constant 39 : index
    %c0_234 = arith.constant 0 : index
    %c0_235 = arith.constant 0 : index
    %245 = vector.load %arg2[%c39, %c0_234, %c0_235] : memref<121x4x4xf32, #tpu.memory_space<vmem>>, vector<1x4x4xf32>
    %246 = vector.shape_cast %245 : vector<1x4x4xf32> to vector<4x4xf32>
    %cst_236 = arith.constant dense<0.000000e+00> : vector<4x512xf32>
    %247 = tpu.matmul %246, %244, %cst_236 {dimension_numbers = #tpu.dot_dimension_numbers<[1], [0], [0], [1], [0, 0, 1, 1], [], []>} : vector<4x4xf32>, vector<4x512xf32>, vector<4x512xf32> -> vector<4x512xf32>
    %248 = arith.addf %242, %247 : vector<4x512xf32>
    %c0_237 = arith.constant 0 : index
    %c0_238 = arith.constant 0 : index
    %c85 = arith.constant 85 : index
    %249 = vector.load %arg1[%c0_237, %c0_238, %c85] : memref<1x4x896xf32, #tpu.memory_space<vmem>>, vector<1x4x512xf32>
    %250 = vector.shape_cast %249 : vector<1x4x512xf32> to vector<4x512xf32>
    %c40 = arith.constant 40 : index
    %c0_239 = arith.constant 0 : index
    %c0_240 = arith.constant 0 : index
    %251 = vector.load %arg2[%c40, %c0_239, %c0_240] : memref<121x4x4xf32, #tpu.memory_space<vmem>>, vector<1x4x4xf32>
    %252 = vector.shape_cast %251 : vector<1x4x4xf32> to vector<4x4xf32>
    %cst_241 = arith.constant dense<0.000000e+00> : vector<4x512xf32>
    %253 = tpu.matmul %252, %250, %cst_241 {dimension_numbers = #tpu.dot_dimension_numbers<[1], [0], [0], [1], [0, 0, 1, 1], [], []>} : vector<4x4xf32>, vector<4x512xf32>, vector<4x512xf32> -> vector<4x512xf32>
    %254 = arith.addf %248, %253 : vector<4x512xf32>
    %c0_242 = arith.constant 0 : index
    %c0_243 = arith.constant 0 : index
    %c86 = arith.constant 86 : index
    %255 = vector.load %arg1[%c0_242, %c0_243, %c86] : memref<1x4x896xf32, #tpu.memory_space<vmem>>, vector<1x4x512xf32>
    %256 = vector.shape_cast %255 : vector<1x4x512xf32> to vector<4x512xf32>
    %c41 = arith.constant 41 : index
    %c0_244 = arith.constant 0 : index
    %c0_245 = arith.constant 0 : index
    %257 = vector.load %arg2[%c41, %c0_244, %c0_245] : memref<121x4x4xf32, #tpu.memory_space<vmem>>, vector<1x4x4xf32>
    %258 = vector.shape_cast %257 : vector<1x4x4xf32> to vector<4x4xf32>
    %cst_246 = arith.constant dense<0.000000e+00> : vector<4x512xf32>
    %259 = tpu.matmul %258, %256, %cst_246 {dimension_numbers = #tpu.dot_dimension_numbers<[1], [0], [0], [1], [0, 0, 1, 1], [], []>} : vector<4x4xf32>, vector<4x512xf32>, vector<4x512xf32> -> vector<4x512xf32>
    %260 = arith.addf %254, %259 : vector<4x512xf32>
    %c0_247 = arith.constant 0 : index
    %c0_248 = arith.constant 0 : index
    %c87 = arith.constant 87 : index
    %261 = vector.load %arg1[%c0_247, %c0_248, %c87] : memref<1x4x896xf32, #tpu.memory_space<vmem>>, vector<1x4x512xf32>
    %262 = vector.shape_cast %261 : vector<1x4x512xf32> to vector<4x512xf32>
    %c42 = arith.constant 42 : index
    %c0_249 = arith.constant 0 : index
    %c0_250 = arith.constant 0 : index
    %263 = vector.load %arg2[%c42, %c0_249, %c0_250] : memref<121x4x4xf32, #tpu.memory_space<vmem>>, vector<1x4x4xf32>
    %264 = vector.shape_cast %263 : vector<1x4x4xf32> to vector<4x4xf32>
    %cst_251 = arith.constant dense<0.000000e+00> : vector<4x512xf32>
    %265 = tpu.matmul %264, %262, %cst_251 {dimension_numbers = #tpu.dot_dimension_numbers<[1], [0], [0], [1], [0, 0, 1, 1], [], []>} : vector<4x4xf32>, vector<4x512xf32>, vector<4x512xf32> -> vector<4x512xf32>
    %266 = arith.addf %260, %265 : vector<4x512xf32>
    %c0_252 = arith.constant 0 : index
    %c0_253 = arith.constant 0 : index
    %c88 = arith.constant 88 : index
    %267 = vector.load %arg1[%c0_252, %c0_253, %c88] : memref<1x4x896xf32, #tpu.memory_space<vmem>>, vector<1x4x512xf32>
    %268 = vector.shape_cast %267 : vector<1x4x512xf32> to vector<4x512xf32>
    %c43 = arith.constant 43 : index
    %c0_254 = arith.constant 0 : index
    %c0_255 = arith.constant 0 : index
    %269 = vector.load %arg2[%c43, %c0_254, %c0_255] : memref<121x4x4xf32, #tpu.memory_space<vmem>>, vector<1x4x4xf32>
    %270 = vector.shape_cast %269 : vector<1x4x4xf32> to vector<4x4xf32>
    %cst_256 = arith.constant dense<0.000000e+00> : vector<4x512xf32>
    %271 = tpu.matmul %270, %268, %cst_256 {dimension_numbers = #tpu.dot_dimension_numbers<[1], [0], [0], [1], [0, 0, 1, 1], [], []>} : vector<4x4xf32>, vector<4x512xf32>, vector<4x512xf32> -> vector<4x512xf32>
    %272 = arith.addf %266, %271 : vector<4x512xf32>
    %c0_257 = arith.constant 0 : index
    %c0_258 = arith.constant 0 : index
    %273 = vector.load %arg5[%c0_257, %c0_258] : memref<4x512xf32, #tpu.memory_space<vmem>>, vector<4x512xf32>
    %274 = arith.addf %273, %272 : vector<4x512xf32>
    %c0_259 = arith.constant 0 : index
    %c0_260 = arith.constant 0 : index
    %275 = vector.load %arg5[%c0_259, %c0_260] : memref<4x512xf32, #tpu.memory_space<vmem>>, vector<4x512xf32>
    tpu.vector_store %arg5[%c0_259, %c0_260], %274 {strides = array<i32>} : memref<4x512xf32, #tpu.memory_space<vmem>>, vector<4x512xf32>,
    %c0_261 = arith.constant 0 : index
    %c0_262 = arith.constant 0 : index
    %c104 = arith.constant 104 : index
    %276 = vector.load %arg1[%c0_261, %c0_262, %c104] : memref<1x4x896xf32, #tpu.memory_space<vmem>>, vector<1x4x512xf32>
    %277 = vector.shape_cast %276 : vector<1x4x512xf32> to vector<4x512xf32>
    %c44 = arith.constant 44 : index
    %c0_263 = arith.constant 0 : index
    %c0_264 = arith.constant 0 : index
    %278 = vector.load %arg2[%c44, %c0_263, %c0_264] : memref<121x4x4xf32, #tpu.memory_space<vmem>>, vector<1x4x4xf32>
    %279 = vector.shape_cast %278 : vector<1x4x4xf32> to vector<4x4xf32>
    %cst_265 = arith.constant dense<0.000000e+00> : vector<4x512xf32>
    %280 = tpu.matmul %279, %277, %cst_265 {dimension_numbers = #tpu.dot_dimension_numbers<[1], [0], [0], [1], [0, 0, 1, 1], [], []>} : vector<4x4xf32>, vector<4x512xf32>, vector<4x512xf32> -> vector<4x512xf32>
    %c0_266 = arith.constant 0 : index
    %c0_267 = arith.constant 0 : index
    %c105 = arith.constant 105 : index
    %281 = vector.load %arg1[%c0_266, %c0_267, %c105] : memref<1x4x896xf32, #tpu.memory_space<vmem>>, vector<1x4x512xf32>
    %282 = vector.shape_cast %281 : vector<1x4x512xf32> to vector<4x512xf32>
    %c45 = arith.constant 45 : index
    %c0_268 = arith.constant 0 : index
    %c0_269 = arith.constant 0 : index
    %283 = vector.load %arg2[%c45, %c0_268, %c0_269] : memref<121x4x4xf32, #tpu.memory_space<vmem>>, vector<1x4x4xf32>
    %284 = vector.shape_cast %283 : vector<1x4x4xf32> to vector<4x4xf32>
    %cst_270 = arith.constant dense<0.000000e+00> : vector<4x512xf32>
    %285 = tpu.matmul %284, %282, %cst_270 {dimension_numbers = #tpu.dot_dimension_numbers<[1], [0], [0], [1], [0, 0, 1, 1], [], []>} : vector<4x4xf32>, vector<4x512xf32>, vector<4x512xf32> -> vector<4x512xf32>
    %286 = arith.addf %280, %285 : vector<4x512xf32>
    %c0_271 = arith.constant 0 : index
    %c0_272 = arith.constant 0 : index
    %c106 = arith.constant 106 : index
    %287 = vector.load %arg1[%c0_271, %c0_272, %c106] : memref<1x4x896xf32, #tpu.memory_space<vmem>>, vector<1x4x512xf32>
    %288 = vector.shape_cast %287 : vector<1x4x512xf32> to vector<4x512xf32>
    %c46 = arith.constant 46 : index
    %c0_273 = arith.constant 0 : index
    %c0_274 = arith.constant 0 : index
    %289 = vector.load %arg2[%c46, %c0_273, %c0_274] : memref<121x4x4xf32, #tpu.memory_space<vmem>>, vector<1x4x4xf32>
    %290 = vector.shape_cast %289 : vector<1x4x4xf32> to vector<4x4xf32>
    %cst_275 = arith.constant dense<0.000000e+00> : vector<4x512xf32>
    %291 = tpu.matmul %290, %288, %cst_275 {dimension_numbers = #tpu.dot_dimension_numbers<[1], [0], [0], [1], [0, 0, 1, 1], [], []>} : vector<4x4xf32>, vector<4x512xf32>, vector<4x512xf32> -> vector<4x512xf32>
    %292 = arith.addf %286, %291 : vector<4x512xf32>
    %c0_276 = arith.constant 0 : index
    %c0_277 = arith.constant 0 : index
    %c107 = arith.constant 107 : index
    %293 = vector.load %arg1[%c0_276, %c0_277, %c107] : memref<1x4x896xf32, #tpu.memory_space<vmem>>, vector<1x4x512xf32>
    %294 = vector.shape_cast %293 : vector<1x4x512xf32> to vector<4x512xf32>
    %c47 = arith.constant 47 : index
    %c0_278 = arith.constant 0 : index
    %c0_279 = arith.constant 0 : index
    %295 = vector.load %arg2[%c47, %c0_278, %c0_279] : memref<121x4x4xf32, #tpu.memory_space<vmem>>, vector<1x4x4xf32>
    %296 = vector.shape_cast %295 : vector<1x4x4xf32> to vector<4x4xf32>
    %cst_280 = arith.constant dense<0.000000e+00> : vector<4x512xf32>
    %297 = tpu.matmul %296, %294, %cst_280 {dimension_numbers = #tpu.dot_dimension_numbers<[1], [0], [0], [1], [0, 0, 1, 1], [], []>} : vector<4x4xf32>, vector<4x512xf32>, vector<4x512xf32> -> vector<4x512xf32>
    %298 = arith.addf %292, %297 : vector<4x512xf32>
    %c0_281 = arith.constant 0 : index
    %c0_282 = arith.constant 0 : index
    %c108 = arith.constant 108 : index
    %299 = vector.load %arg1[%c0_281, %c0_282, %c108] : memref<1x4x896xf32, #tpu.memory_space<vmem>>, vector<1x4x512xf32>
    %300 = vector.shape_cast %299 : vector<1x4x512xf32> to vector<4x512xf32>
    %c48 = arith.constant 48 : index
    %c0_283 = arith.constant 0 : index
    %c0_284 = arith.constant 0 : index
    %301 = vector.load %arg2[%c48, %c0_283, %c0_284] : memref<121x4x4xf32, #tpu.memory_space<vmem>>, vector<1x4x4xf32>
    %302 = vector.shape_cast %301 : vector<1x4x4xf32> to vector<4x4xf32>
    %cst_285 = arith.constant dense<0.000000e+00> : vector<4x512xf32>
    %303 = tpu.matmul %302, %300, %cst_285 {dimension_numbers = #tpu.dot_dimension_numbers<[1], [0], [0], [1], [0, 0, 1, 1], [], []>} : vector<4x4xf32>, vector<4x512xf32>, vector<4x512xf32> -> vector<4x512xf32>
    %304 = arith.addf %298, %303 : vector<4x512xf32>
    %c0_286 = arith.constant 0 : index
    %c0_287 = arith.constant 0 : index
    %c109 = arith.constant 109 : index
    %305 = vector.load %arg1[%c0_286, %c0_287, %c109] : memref<1x4x896xf32, #tpu.memory_space<vmem>>, vector<1x4x512xf32>
    %306 = vector.shape_cast %305 : vector<1x4x512xf32> to vector<4x512xf32>
    %c49 = arith.constant 49 : index
    %c0_288 = arith.constant 0 : index
    %c0_289 = arith.constant 0 : index
    %307 = vector.load %arg2[%c49, %c0_288, %c0_289] : memref<121x4x4xf32, #tpu.memory_space<vmem>>, vector<1x4x4xf32>
    %308 = vector.shape_cast %307 : vector<1x4x4xf32> to vector<4x4xf32>
    %cst_290 = arith.constant dense<0.000000e+00> : vector<4x512xf32>
    %309 = tpu.matmul %308, %306, %cst_290 {dimension_numbers = #tpu.dot_dimension_numbers<[1], [0], [0], [1], [0, 0, 1, 1], [], []>} : vector<4x4xf32>, vector<4x512xf32>, vector<4x512xf32> -> vector<4x512xf32>
    %310 = arith.addf %304, %309 : vector<4x512xf32>
    %c0_291 = arith.constant 0 : index
    %c0_292 = arith.constant 0 : index
    %c110 = arith.constant 110 : index
    %311 = vector.load %arg1[%c0_291, %c0_292, %c110] : memref<1x4x896xf32, #tpu.memory_space<vmem>>, vector<1x4x512xf32>
    %312 = vector.shape_cast %311 : vector<1x4x512xf32> to vector<4x512xf32>
    %c50 = arith.constant 50 : index
    %c0_293 = arith.constant 0 : index
    %c0_294 = arith.constant 0 : index
    %313 = vector.load %arg2[%c50, %c0_293, %c0_294] : memref<121x4x4xf32, #tpu.memory_space<vmem>>, vector<1x4x4xf32>
    %314 = vector.shape_cast %313 : vector<1x4x4xf32> to vector<4x4xf32>
    %cst_295 = arith.constant dense<0.000000e+00> : vector<4x512xf32>
    %315 = tpu.matmul %314, %312, %cst_295 {dimension_numbers = #tpu.dot_dimension_numbers<[1], [0], [0], [1], [0, 0, 1, 1], [], []>} : vector<4x4xf32>, vector<4x512xf32>, vector<4x512xf32> -> vector<4x512xf32>
    %316 = arith.addf %310, %315 : vector<4x512xf32>
    %c0_296 = arith.constant 0 : index
    %c0_297 = arith.constant 0 : index
    %c111 = arith.constant 111 : index
    %317 = vector.load %arg1[%c0_296, %c0_297, %c111] : memref<1x4x896xf32, #tpu.memory_space<vmem>>, vector<1x4x512xf32>
    %318 = vector.shape_cast %317 : vector<1x4x512xf32> to vector<4x512xf32>
    %c51 = arith.constant 51 : index
    %c0_298 = arith.constant 0 : index
    %c0_299 = arith.constant 0 : index
    %319 = vector.load %arg2[%c51, %c0_298, %c0_299] : memref<121x4x4xf32, #tpu.memory_space<vmem>>, vector<1x4x4xf32>
    %320 = vector.shape_cast %319 : vector<1x4x4xf32> to vector<4x4xf32>
    %cst_300 = arith.constant dense<0.000000e+00> : vector<4x512xf32>
    %321 = tpu.matmul %320, %318, %cst_300 {dimension_numbers = #tpu.dot_dimension_numbers<[1], [0], [0], [1], [0, 0, 1, 1], [], []>} : vector<4x4xf32>, vector<4x512xf32>, vector<4x512xf32> -> vector<4x512xf32>
    %322 = arith.addf %316, %321 : vector<4x512xf32>
    %c0_301 = arith.constant 0 : index
    %c0_302 = arith.constant 0 : index
    %c112 = arith.constant 112 : index
    %323 = vector.load %arg1[%c0_301, %c0_302, %c112] : memref<1x4x896xf32, #tpu.memory_space<vmem>>, vector<1x4x512xf32>
    %324 = vector.shape_cast %323 : vector<1x4x512xf32> to vector<4x512xf32>
    %c52_303 = arith.constant 52 : index
    %c0_304 = arith.constant 0 : index
    %c0_305 = arith.constant 0 : index
    %325 = vector.load %arg2[%c52_303, %c0_304, %c0_305] : memref<121x4x4xf32, #tpu.memory_space<vmem>>, vector<1x4x4xf32>
    %326 = vector.shape_cast %325 : vector<1x4x4xf32> to vector<4x4xf32>
    %cst_306 = arith.constant dense<0.000000e+00> : vector<4x512xf32>
    %327 = tpu.matmul %326, %324, %cst_306 {dimension_numbers = #tpu.dot_dimension_numbers<[1], [0], [0], [1], [0, 0, 1, 1], [], []>} : vector<4x4xf32>, vector<4x512xf32>, vector<4x512xf32> -> vector<4x512xf32>
    %328 = arith.addf %322, %327 : vector<4x512xf32>
    %c0_307 = arith.constant 0 : index
    %c0_308 = arith.constant 0 : index
    %c113 = arith.constant 113 : index
    %329 = vector.load %arg1[%c0_307, %c0_308, %c113] : memref<1x4x896xf32, #tpu.memory_space<vmem>>, vector<1x4x512xf32>
    %330 = vector.shape_cast %329 : vector<1x4x512xf32> to vector<4x512xf32>
    %c53_309 = arith.constant 53 : index
    %c0_310 = arith.constant 0 : index
    %c0_311 = arith.constant 0 : index
    %331 = vector.load %arg2[%c53_309, %c0_310, %c0_311] : memref<121x4x4xf32, #tpu.memory_space<vmem>>, vector<1x4x4xf32>
    %332 = vector.shape_cast %331 : vector<1x4x4xf32> to vector<4x4xf32>
    %cst_312 = arith.constant dense<0.000000e+00> : vector<4x512xf32>
    %333 = tpu.matmul %332, %330, %cst_312 {dimension_numbers = #tpu.dot_dimension_numbers<[1], [0], [0], [1], [0, 0, 1, 1], [], []>} : vector<4x4xf32>, vector<4x512xf32>, vector<4x512xf32> -> vector<4x512xf32>
    %334 = arith.addf %328, %333 : vector<4x512xf32>
    %c0_313 = arith.constant 0 : index
    %c0_314 = arith.constant 0 : index
    %c114 = arith.constant 114 : index
    %335 = vector.load %arg1[%c0_313, %c0_314, %c114] : memref<1x4x896xf32, #tpu.memory_space<vmem>>, vector<1x4x512xf32>
    %336 = vector.shape_cast %335 : vector<1x4x512xf32> to vector<4x512xf32>
    %c54_315 = arith.constant 54 : index
    %c0_316 = arith.constant 0 : index
    %c0_317 = arith.constant 0 : index
    %337 = vector.load %arg2[%c54_315, %c0_316, %c0_317] : memref<121x4x4xf32, #tpu.memory_space<vmem>>, vector<1x4x4xf32>
    %338 = vector.shape_cast %337 : vector<1x4x4xf32> to vector<4x4xf32>
    %cst_318 = arith.constant dense<0.000000e+00> : vector<4x512xf32>
    %339 = tpu.matmul %338, %336, %cst_318 {dimension_numbers = #tpu.dot_dimension_numbers<[1], [0], [0], [1], [0, 0, 1, 1], [], []>} : vector<4x4xf32>, vector<4x512xf32>, vector<4x512xf32> -> vector<4x512xf32>
    %340 = arith.addf %334, %339 : vector<4x512xf32>
    %c0_319 = arith.constant 0 : index
    %c0_320 = arith.constant 0 : index
    %341 = vector.load %arg5[%c0_319, %c0_320] : memref<4x512xf32, #tpu.memory_space<vmem>>, vector<4x512xf32>
    %342 = arith.addf %341, %340 : vector<4x512xf32>
    %c0_321 = arith.constant 0 : index
    %c0_322 = arith.constant 0 : index
    %343 = vector.load %arg5[%c0_321, %c0_322] : memref<4x512xf32, #tpu.memory_space<vmem>>, vector<4x512xf32>
    tpu.vector_store %arg5[%c0_321, %c0_322], %342 {strides = array<i32>} : memref<4x512xf32, #tpu.memory_space<vmem>>, vector<4x512xf32>,
    %c0_323 = arith.constant 0 : index
    %c0_324 = arith.constant 0 : index
    %c130 = arith.constant 130 : index
    %344 = vector.load %arg1[%c0_323, %c0_324, %c130] : memref<1x4x896xf32, #tpu.memory_space<vmem>>, vector<1x4x512xf32>
    %345 = vector.shape_cast %344 : vector<1x4x512xf32> to vector<4x512xf32>
    %c55_325 = arith.constant 55 : index
    %c0_326 = arith.constant 0 : index
    %c0_327 = arith.constant 0 : index
    %346 = vector.load %arg2[%c55_325, %c0_326, %c0_327] : memref<121x4x4xf32, #tpu.memory_space<vmem>>, vector<1x4x4xf32>
    %347 = vector.shape_cast %346 : vector<1x4x4xf32> to vector<4x4xf32>
    %cst_328 = arith.constant dense<0.000000e+00> : vector<4x512xf32>
    %348 = tpu.matmul %347, %345, %cst_328 {dimension_numbers = #tpu.dot_dimension_numbers<[1], [0], [0], [1], [0, 0, 1, 1], [], []>} : vector<4x4xf32>, vector<4x512xf32>, vector<4x512xf32> -> vector<4x512xf32>
    %c0_329 = arith.constant 0 : index
    %c0_330 = arith.constant 0 : index
    %c131 = arith.constant 131 : index
    %349 = vector.load %arg1[%c0_329, %c0_330, %c131] : memref<1x4x896xf32, #tpu.memory_space<vmem>>, vector<1x4x512xf32>
    %350 = vector.shape_cast %349 : vector<1x4x512xf32> to vector<4x512xf32>
    %c56_331 = arith.constant 56 : index
    %c0_332 = arith.constant 0 : index
    %c0_333 = arith.constant 0 : index
    %351 = vector.load %arg2[%c56_331, %c0_332, %c0_333] : memref<121x4x4xf32, #tpu.memory_space<vmem>>, vector<1x4x4xf32>
    %352 = vector.shape_cast %351 : vector<1x4x4xf32> to vector<4x4xf32>
    %cst_334 = arith.constant dense<0.000000e+00> : vector<4x512xf32>
    %353 = tpu.matmul %352, %350, %cst_334 {dimension_numbers = #tpu.dot_dimension_numbers<[1], [0], [0], [1], [0, 0, 1, 1], [], []>} : vector<4x4xf32>, vector<4x512xf32>, vector<4x512xf32> -> vector<4x512xf32>
    %354 = arith.addf %348, %353 : vector<4x512xf32>
    %c0_335 = arith.constant 0 : index
    %c0_336 = arith.constant 0 : index
    %c132 = arith.constant 132 : index
    %355 = vector.load %arg1[%c0_335, %c0_336, %c132] : memref<1x4x896xf32, #tpu.memory_space<vmem>>, vector<1x4x512xf32>
    %356 = vector.shape_cast %355 : vector<1x4x512xf32> to vector<4x512xf32>
    %c57_337 = arith.constant 57 : index
    %c0_338 = arith.constant 0 : index
    %c0_339 = arith.constant 0 : index
    %357 = vector.load %arg2[%c57_337, %c0_338, %c0_339] : memref<121x4x4xf32, #tpu.memory_space<vmem>>, vector<1x4x4xf32>
    %358 = vector.shape_cast %357 : vector<1x4x4xf32> to vector<4x4xf32>
    %cst_340 = arith.constant dense<0.000000e+00> : vector<4x512xf32>
    %359 = tpu.matmul %358, %356, %cst_340 {dimension_numbers = #tpu.dot_dimension_numbers<[1], [0], [0], [1], [0, 0, 1, 1], [], []>} : vector<4x4xf32>, vector<4x512xf32>, vector<4x512xf32> -> vector<4x512xf32>
    %360 = arith.addf %354, %359 : vector<4x512xf32>
    %c0_341 = arith.constant 0 : index
    %c0_342 = arith.constant 0 : index
    %c133 = arith.constant 133 : index
    %361 = vector.load %arg1[%c0_341, %c0_342, %c133] : memref<1x4x896xf32, #tpu.memory_space<vmem>>, vector<1x4x512xf32>
    %362 = vector.shape_cast %361 : vector<1x4x512xf32> to vector<4x512xf32>
    %c58_343 = arith.constant 58 : index
    %c0_344 = arith.constant 0 : index
    %c0_345 = arith.constant 0 : index
    %363 = vector.load %arg2[%c58_343, %c0_344, %c0_345] : memref<121x4x4xf32, #tpu.memory_space<vmem>>, vector<1x4x4xf32>
    %364 = vector.shape_cast %363 : vector<1x4x4xf32> to vector<4x4xf32>
    %cst_346 = arith.constant dense<0.000000e+00> : vector<4x512xf32>
    %365 = tpu.matmul %364, %362, %cst_346 {dimension_numbers = #tpu.dot_dimension_numbers<[1], [0], [0], [1], [0, 0, 1, 1], [], []>} : vector<4x4xf32>, vector<4x512xf32>, vector<4x512xf32> -> vector<4x512xf32>
    %366 = arith.addf %360, %365 : vector<4x512xf32>
    %c0_347 = arith.constant 0 : index
    %c0_348 = arith.constant 0 : index
    %c134 = arith.constant 134 : index
    %367 = vector.load %arg1[%c0_347, %c0_348, %c134] : memref<1x4x896xf32, #tpu.memory_space<vmem>>, vector<1x4x512xf32>
    %368 = vector.shape_cast %367 : vector<1x4x512xf32> to vector<4x512xf32>
    %c59_349 = arith.constant 59 : index
    %c0_350 = arith.constant 0 : index
    %c0_351 = arith.constant 0 : index
    %369 = vector.load %arg2[%c59_349, %c0_350, %c0_351] : memref<121x4x4xf32, #tpu.memory_space<vmem>>, vector<1x4x4xf32>
    %370 = vector.shape_cast %369 : vector<1x4x4xf32> to vector<4x4xf32>
    %cst_352 = arith.constant dense<0.000000e+00> : vector<4x512xf32>
    %371 = tpu.matmul %370, %368, %cst_352 {dimension_numbers = #tpu.dot_dimension_numbers<[1], [0], [0], [1], [0, 0, 1, 1], [], []>} : vector<4x4xf32>, vector<4x512xf32>, vector<4x512xf32> -> vector<4x512xf32>
    %372 = arith.addf %366, %371 : vector<4x512xf32>
    %c0_353 = arith.constant 0 : index
    %c0_354 = arith.constant 0 : index
    %c135 = arith.constant 135 : index
    %373 = vector.load %arg1[%c0_353, %c0_354, %c135] : memref<1x4x896xf32, #tpu.memory_space<vmem>>, vector<1x4x512xf32>
    %374 = vector.shape_cast %373 : vector<1x4x512xf32> to vector<4x512xf32>
    %c60_355 = arith.constant 60 : index
    %c0_356 = arith.constant 0 : index
    %c0_357 = arith.constant 0 : index
    %375 = vector.load %arg2[%c60_355, %c0_356, %c0_357] : memref<121x4x4xf32, #tpu.memory_space<vmem>>, vector<1x4x4xf32>
    %376 = vector.shape_cast %375 : vector<1x4x4xf32> to vector<4x4xf32>
    %cst_358 = arith.constant dense<0.000000e+00> : vector<4x512xf32>
    %377 = tpu.matmul %376, %374, %cst_358 {dimension_numbers = #tpu.dot_dimension_numbers<[1], [0], [0], [1], [0, 0, 1, 1], [], []>} : vector<4x4xf32>, vector<4x512xf32>, vector<4x512xf32> -> vector<4x512xf32>
    %378 = arith.addf %372, %377 : vector<4x512xf32>
    %c0_359 = arith.constant 0 : index
    %c0_360 = arith.constant 0 : index
    %c136 = arith.constant 136 : index
    %379 = vector.load %arg1[%c0_359, %c0_360, %c136] : memref<1x4x896xf32, #tpu.memory_space<vmem>>, vector<1x4x512xf32>
    %380 = vector.shape_cast %379 : vector<1x4x512xf32> to vector<4x512xf32>
    %c61_361 = arith.constant 61 : index
    %c0_362 = arith.constant 0 : index
    %c0_363 = arith.constant 0 : index
    %381 = vector.load %arg2[%c61_361, %c0_362, %c0_363] : memref<121x4x4xf32, #tpu.memory_space<vmem>>, vector<1x4x4xf32>
    %382 = vector.shape_cast %381 : vector<1x4x4xf32> to vector<4x4xf32>
    %cst_364 = arith.constant dense<0.000000e+00> : vector<4x512xf32>
    %383 = tpu.matmul %382, %380, %cst_364 {dimension_numbers = #tpu.dot_dimension_numbers<[1], [0], [0], [1], [0, 0, 1, 1], [], []>} : vector<4x4xf32>, vector<4x512xf32>, vector<4x512xf32> -> vector<4x512xf32>
    %384 = arith.addf %378, %383 : vector<4x512xf32>
    %c0_365 = arith.constant 0 : index
    %c0_366 = arith.constant 0 : index
    %c137 = arith.constant 137 : index
    %385 = vector.load %arg1[%c0_365, %c0_366, %c137] : memref<1x4x896xf32, #tpu.memory_space<vmem>>, vector<1x4x512xf32>
    %386 = vector.shape_cast %385 : vector<1x4x512xf32> to vector<4x512xf32>
    %c62_367 = arith.constant 62 : index
    %c0_368 = arith.constant 0 : index
    %c0_369 = arith.constant 0 : index
    %387 = vector.load %arg2[%c62_367, %c0_368, %c0_369] : memref<121x4x4xf32, #tpu.memory_space<vmem>>, vector<1x4x4xf32>
    %388 = vector.shape_cast %387 : vector<1x4x4xf32> to vector<4x4xf32>
    %cst_370 = arith.constant dense<0.000000e+00> : vector<4x512xf32>
    %389 = tpu.matmul %388, %386, %cst_370 {dimension_numbers = #tpu.dot_dimension_numbers<[1], [0], [0], [1], [0, 0, 1, 1], [], []>} : vector<4x4xf32>, vector<4x512xf32>, vector<4x512xf32> -> vector<4x512xf32>
    %390 = arith.addf %384, %389 : vector<4x512xf32>
    %c0_371 = arith.constant 0 : index
    %c0_372 = arith.constant 0 : index
    %c138 = arith.constant 138 : index
    %391 = vector.load %arg1[%c0_371, %c0_372, %c138] : memref<1x4x896xf32, #tpu.memory_space<vmem>>, vector<1x4x512xf32>
    %392 = vector.shape_cast %391 : vector<1x4x512xf32> to vector<4x512xf32>
    %c63 = arith.constant 63 : index
    %c0_373 = arith.constant 0 : index
    %c0_374 = arith.constant 0 : index
    %393 = vector.load %arg2[%c63, %c0_373, %c0_374] : memref<121x4x4xf32, #tpu.memory_space<vmem>>, vector<1x4x4xf32>
    %394 = vector.shape_cast %393 : vector<1x4x4xf32> to vector<4x4xf32>
    %cst_375 = arith.constant dense<0.000000e+00> : vector<4x512xf32>
    %395 = tpu.matmul %394, %392, %cst_375 {dimension_numbers = #tpu.dot_dimension_numbers<[1], [0], [0], [1], [0, 0, 1, 1], [], []>} : vector<4x4xf32>, vector<4x512xf32>, vector<4x512xf32> -> vector<4x512xf32>
    %396 = arith.addf %390, %395 : vector<4x512xf32>
    %c0_376 = arith.constant 0 : index
    %c0_377 = arith.constant 0 : index
    %c139 = arith.constant 139 : index
    %397 = vector.load %arg1[%c0_376, %c0_377, %c139] : memref<1x4x896xf32, #tpu.memory_space<vmem>>, vector<1x4x512xf32>
    %398 = vector.shape_cast %397 : vector<1x4x512xf32> to vector<4x512xf32>
    %c64 = arith.constant 64 : index
    %c0_378 = arith.constant 0 : index
    %c0_379 = arith.constant 0 : index
    %399 = vector.load %arg2[%c64, %c0_378, %c0_379] : memref<121x4x4xf32, #tpu.memory_space<vmem>>, vector<1x4x4xf32>
    %400 = vector.shape_cast %399 : vector<1x4x4xf32> to vector<4x4xf32>
    %cst_380 = arith.constant dense<0.000000e+00> : vector<4x512xf32>
    %401 = tpu.matmul %400, %398, %cst_380 {dimension_numbers = #tpu.dot_dimension_numbers<[1], [0], [0], [1], [0, 0, 1, 1], [], []>} : vector<4x4xf32>, vector<4x512xf32>, vector<4x512xf32> -> vector<4x512xf32>
    %402 = arith.addf %396, %401 : vector<4x512xf32>
    %c0_381 = arith.constant 0 : index
    %c0_382 = arith.constant 0 : index
    %c140 = arith.constant 140 : index
    %403 = vector.load %arg1[%c0_381, %c0_382, %c140] : memref<1x4x896xf32, #tpu.memory_space<vmem>>, vector<1x4x512xf32>
    %404 = vector.shape_cast %403 : vector<1x4x512xf32> to vector<4x512xf32>
    %c65 = arith.constant 65 : index
    %c0_383 = arith.constant 0 : index
    %c0_384 = arith.constant 0 : index
    %405 = vector.load %arg2[%c65, %c0_383, %c0_384] : memref<121x4x4xf32, #tpu.memory_space<vmem>>, vector<1x4x4xf32>
    %406 = vector.shape_cast %405 : vector<1x4x4xf32> to vector<4x4xf32>
    %cst_385 = arith.constant dense<0.000000e+00> : vector<4x512xf32>
    %407 = tpu.matmul %406, %404, %cst_385 {dimension_numbers = #tpu.dot_dimension_numbers<[1], [0], [0], [1], [0, 0, 1, 1], [], []>} : vector<4x4xf32>, vector<4x512xf32>, vector<4x512xf32> -> vector<4x512xf32>
    %408 = arith.addf %402, %407 : vector<4x512xf32>
    %c0_386 = arith.constant 0 : index
    %c0_387 = arith.constant 0 : index
    %409 = vector.load %arg5[%c0_386, %c0_387] : memref<4x512xf32, #tpu.memory_space<vmem>>, vector<4x512xf32>
    %410 = arith.addf %409, %408 : vector<4x512xf32>
    %c0_388 = arith.constant 0 : index
    %c0_389 = arith.constant 0 : index
    %411 = vector.load %arg5[%c0_388, %c0_389] : memref<4x512xf32, #tpu.memory_space<vmem>>, vector<4x512xf32>
    tpu.vector_store %arg5[%c0_388, %c0_389], %410 {strides = array<i32>} : memref<4x512xf32, #tpu.memory_space<vmem>>, vector<4x512xf32>,
    %c0_390 = arith.constant 0 : index
    %c0_391 = arith.constant 0 : index
    %c156 = arith.constant 156 : index
    %412 = vector.load %arg1[%c0_390, %c0_391, %c156] : memref<1x4x896xf32, #tpu.memory_space<vmem>>, vector<1x4x512xf32>
    %413 = vector.shape_cast %412 : vector<1x4x512xf32> to vector<4x512xf32>
    %c66 = arith.constant 66 : index
    %c0_392 = arith.constant 0 : index
    %c0_393 = arith.constant 0 : index
    %414 = vector.load %arg2[%c66, %c0_392, %c0_393] : memref<121x4x4xf32, #tpu.memory_space<vmem>>, vector<1x4x4xf32>
    %415 = vector.shape_cast %414 : vector<1x4x4xf32> to vector<4x4xf32>
    %cst_394 = arith.constant dense<0.000000e+00> : vector<4x512xf32>
    %416 = tpu.matmul %415, %413, %cst_394 {dimension_numbers = #tpu.dot_dimension_numbers<[1], [0], [0], [1], [0, 0, 1, 1], [], []>} : vector<4x4xf32>, vector<4x512xf32>, vector<4x512xf32> -> vector<4x512xf32>
    %c0_395 = arith.constant 0 : index
    %c0_396 = arith.constant 0 : index
    %c157 = arith.constant 157 : index
    %417 = vector.load %arg1[%c0_395, %c0_396, %c157] : memref<1x4x896xf32, #tpu.memory_space<vmem>>, vector<1x4x512xf32>
    %418 = vector.shape_cast %417 : vector<1x4x512xf32> to vector<4x512xf32>
    %c67 = arith.constant 67 : index
    %c0_397 = arith.constant 0 : index
    %c0_398 = arith.constant 0 : index
    %419 = vector.load %arg2[%c67, %c0_397, %c0_398] : memref<121x4x4xf32, #tpu.memory_space<vmem>>, vector<1x4x4xf32>
    %420 = vector.shape_cast %419 : vector<1x4x4xf32> to vector<4x4xf32>
    %cst_399 = arith.constant dense<0.000000e+00> : vector<4x512xf32>
    %421 = tpu.matmul %420, %418, %cst_399 {dimension_numbers = #tpu.dot_dimension_numbers<[1], [0], [0], [1], [0, 0, 1, 1], [], []>} : vector<4x4xf32>, vector<4x512xf32>, vector<4x512xf32> -> vector<4x512xf32>
    %422 = arith.addf %416, %421 : vector<4x512xf32>
    %c0_400 = arith.constant 0 : index
    %c0_401 = arith.constant 0 : index
    %c158 = arith.constant 158 : index
    %423 = vector.load %arg1[%c0_400, %c0_401, %c158] : memref<1x4x896xf32, #tpu.memory_space<vmem>>, vector<1x4x512xf32>
    %424 = vector.shape_cast %423 : vector<1x4x512xf32> to vector<4x512xf32>
    %c68 = arith.constant 68 : index
    %c0_402 = arith.constant 0 : index
    %c0_403 = arith.constant 0 : index
    %425 = vector.load %arg2[%c68, %c0_402, %c0_403] : memref<121x4x4xf32, #tpu.memory_space<vmem>>, vector<1x4x4xf32>
    %426 = vector.shape_cast %425 : vector<1x4x4xf32> to vector<4x4xf32>
    %cst_404 = arith.constant dense<0.000000e+00> : vector<4x512xf32>
    %427 = tpu.matmul %426, %424, %cst_404 {dimension_numbers = #tpu.dot_dimension_numbers<[1], [0], [0], [1], [0, 0, 1, 1], [], []>} : vector<4x4xf32>, vector<4x512xf32>, vector<4x512xf32> -> vector<4x512xf32>
    %428 = arith.addf %422, %427 : vector<4x512xf32>
    %c0_405 = arith.constant 0 : index
    %c0_406 = arith.constant 0 : index
    %c159 = arith.constant 159 : index
    %429 = vector.load %arg1[%c0_405, %c0_406, %c159] : memref<1x4x896xf32, #tpu.memory_space<vmem>>, vector<1x4x512xf32>
    %430 = vector.shape_cast %429 : vector<1x4x512xf32> to vector<4x512xf32>
    %c69 = arith.constant 69 : index
    %c0_407 = arith.constant 0 : index
    %c0_408 = arith.constant 0 : index
    %431 = vector.load %arg2[%c69, %c0_407, %c0_408] : memref<121x4x4xf32, #tpu.memory_space<vmem>>, vector<1x4x4xf32>
    %432 = vector.shape_cast %431 : vector<1x4x4xf32> to vector<4x4xf32>
    %cst_409 = arith.constant dense<0.000000e+00> : vector<4x512xf32>
    %433 = tpu.matmul %432, %430, %cst_409 {dimension_numbers = #tpu.dot_dimension_numbers<[1], [0], [0], [1], [0, 0, 1, 1], [], []>} : vector<4x4xf32>, vector<4x512xf32>, vector<4x512xf32> -> vector<4x512xf32>
    %434 = arith.addf %428, %433 : vector<4x512xf32>
    %c0_410 = arith.constant 0 : index
    %c0_411 = arith.constant 0 : index
    %c160 = arith.constant 160 : index
    %435 = vector.load %arg1[%c0_410, %c0_411, %c160] : memref<1x4x896xf32, #tpu.memory_space<vmem>>, vector<1x4x512xf32>
    %436 = vector.shape_cast %435 : vector<1x4x512xf32> to vector<4x512xf32>
    %c70 = arith.constant 70 : index
    %c0_412 = arith.constant 0 : index
    %c0_413 = arith.constant 0 : index
    %437 = vector.load %arg2[%c70, %c0_412, %c0_413] : memref<121x4x4xf32, #tpu.memory_space<vmem>>, vector<1x4x4xf32>
    %438 = vector.shape_cast %437 : vector<1x4x4xf32> to vector<4x4xf32>
    %cst_414 = arith.constant dense<0.000000e+00> : vector<4x512xf32>
    %439 = tpu.matmul %438, %436, %cst_414 {dimension_numbers = #tpu.dot_dimension_numbers<[1], [0], [0], [1], [0, 0, 1, 1], [], []>} : vector<4x4xf32>, vector<4x512xf32>, vector<4x512xf32> -> vector<4x512xf32>
    %440 = arith.addf %434, %439 : vector<4x512xf32>
    %c0_415 = arith.constant 0 : index
    %c0_416 = arith.constant 0 : index
    %c161 = arith.constant 161 : index
    %441 = vector.load %arg1[%c0_415, %c0_416, %c161] : memref<1x4x896xf32, #tpu.memory_space<vmem>>, vector<1x4x512xf32>
    %442 = vector.shape_cast %441 : vector<1x4x512xf32> to vector<4x512xf32>
    %c71 = arith.constant 71 : index
    %c0_417 = arith.constant 0 : index
    %c0_418 = arith.constant 0 : index
    %443 = vector.load %arg2[%c71, %c0_417, %c0_418] : memref<121x4x4xf32, #tpu.memory_space<vmem>>, vector<1x4x4xf32>
    %444 = vector.shape_cast %443 : vector<1x4x4xf32> to vector<4x4xf32>
    %cst_419 = arith.constant dense<0.000000e+00> : vector<4x512xf32>
    %445 = tpu.matmul %444, %442, %cst_419 {dimension_numbers = #tpu.dot_dimension_numbers<[1], [0], [0], [1], [0, 0, 1, 1], [], []>} : vector<4x4xf32>, vector<4x512xf32>, vector<4x512xf32> -> vector<4x512xf32>
    %446 = arith.addf %440, %445 : vector<4x512xf32>
    %c0_420 = arith.constant 0 : index
    %c0_421 = arith.constant 0 : index
    %c162 = arith.constant 162 : index
    %447 = vector.load %arg1[%c0_420, %c0_421, %c162] : memref<1x4x896xf32, #tpu.memory_space<vmem>>, vector<1x4x512xf32>
    %448 = vector.shape_cast %447 : vector<1x4x512xf32> to vector<4x512xf32>
    %c72 = arith.constant 72 : index
    %c0_422 = arith.constant 0 : index
    %c0_423 = arith.constant 0 : index
    %449 = vector.load %arg2[%c72, %c0_422, %c0_423] : memref<121x4x4xf32, #tpu.memory_space<vmem>>, vector<1x4x4xf32>
    %450 = vector.shape_cast %449 : vector<1x4x4xf32> to vector<4x4xf32>
    %cst_424 = arith.constant dense<0.000000e+00> : vector<4x512xf32>
    %451 = tpu.matmul %450, %448, %cst_424 {dimension_numbers = #tpu.dot_dimension_numbers<[1], [0], [0], [1], [0, 0, 1, 1], [], []>} : vector<4x4xf32>, vector<4x512xf32>, vector<4x512xf32> -> vector<4x512xf32>
    %452 = arith.addf %446, %451 : vector<4x512xf32>
    %c0_425 = arith.constant 0 : index
    %c0_426 = arith.constant 0 : index
    %c163 = arith.constant 163 : index
    %453 = vector.load %arg1[%c0_425, %c0_426, %c163] : memref<1x4x896xf32, #tpu.memory_space<vmem>>, vector<1x4x512xf32>
    %454 = vector.shape_cast %453 : vector<1x4x512xf32> to vector<4x512xf32>
    %c73 = arith.constant 73 : index
    %c0_427 = arith.constant 0 : index
    %c0_428 = arith.constant 0 : index
    %455 = vector.load %arg2[%c73, %c0_427, %c0_428] : memref<121x4x4xf32, #tpu.memory_space<vmem>>, vector<1x4x4xf32>
    %456 = vector.shape_cast %455 : vector<1x4x4xf32> to vector<4x4xf32>
    %cst_429 = arith.constant dense<0.000000e+00> : vector<4x512xf32>
    %457 = tpu.matmul %456, %454, %cst_429 {dimension_numbers = #tpu.dot_dimension_numbers<[1], [0], [0], [1], [0, 0, 1, 1], [], []>} : vector<4x4xf32>, vector<4x512xf32>, vector<4x512xf32> -> vector<4x512xf32>
    %458 = arith.addf %452, %457 : vector<4x512xf32>
    %c0_430 = arith.constant 0 : index
    %c0_431 = arith.constant 0 : index
    %c164 = arith.constant 164 : index
    %459 = vector.load %arg1[%c0_430, %c0_431, %c164] : memref<1x4x896xf32, #tpu.memory_space<vmem>>, vector<1x4x512xf32>
    %460 = vector.shape_cast %459 : vector<1x4x512xf32> to vector<4x512xf32>
    %c74 = arith.constant 74 : index
    %c0_432 = arith.constant 0 : index
    %c0_433 = arith.constant 0 : index
    %461 = vector.load %arg2[%c74, %c0_432, %c0_433] : memref<121x4x4xf32, #tpu.memory_space<vmem>>, vector<1x4x4xf32>
    %462 = vector.shape_cast %461 : vector<1x4x4xf32> to vector<4x4xf32>
    %cst_434 = arith.constant dense<0.000000e+00> : vector<4x512xf32>
    %463 = tpu.matmul %462, %460, %cst_434 {dimension_numbers = #tpu.dot_dimension_numbers<[1], [0], [0], [1], [0, 0, 1, 1], [], []>} : vector<4x4xf32>, vector<4x512xf32>, vector<4x512xf32> -> vector<4x512xf32>
    %464 = arith.addf %458, %463 : vector<4x512xf32>
    %c0_435 = arith.constant 0 : index
    %c0_436 = arith.constant 0 : index
    %c165 = arith.constant 165 : index
    %465 = vector.load %arg1[%c0_435, %c0_436, %c165] : memref<1x4x896xf32, #tpu.memory_space<vmem>>, vector<1x4x512xf32>
    %466 = vector.shape_cast %465 : vector<1x4x512xf32> to vector<4x512xf32>
    %c75 = arith.constant 75 : index
    %c0_437 = arith.constant 0 : index
    %c0_438 = arith.constant 0 : index
    %467 = vector.load %arg2[%c75, %c0_437, %c0_438] : memref<121x4x4xf32, #tpu.memory_space<vmem>>, vector<1x4x4xf32>
    %468 = vector.shape_cast %467 : vector<1x4x4xf32> to vector<4x4xf32>
    %cst_439 = arith.constant dense<0.000000e+00> : vector<4x512xf32>
    %469 = tpu.matmul %468, %466, %cst_439 {dimension_numbers = #tpu.dot_dimension_numbers<[1], [0], [0], [1], [0, 0, 1, 1], [], []>} : vector<4x4xf32>, vector<4x512xf32>, vector<4x512xf32> -> vector<4x512xf32>
    %470 = arith.addf %464, %469 : vector<4x512xf32>
    %c0_440 = arith.constant 0 : index
    %c0_441 = arith.constant 0 : index
    %c166 = arith.constant 166 : index
    %471 = vector.load %arg1[%c0_440, %c0_441, %c166] : memref<1x4x896xf32, #tpu.memory_space<vmem>>, vector<1x4x512xf32>
    %472 = vector.shape_cast %471 : vector<1x4x512xf32> to vector<4x512xf32>
    %c76 = arith.constant 76 : index
    %c0_442 = arith.constant 0 : index
    %c0_443 = arith.constant 0 : index
    %473 = vector.load %arg2[%c76, %c0_442, %c0_443] : memref<121x4x4xf32, #tpu.memory_space<vmem>>, vector<1x4x4xf32>
    %474 = vector.shape_cast %473 : vector<1x4x4xf32> to vector<4x4xf32>
    %cst_444 = arith.constant dense<0.000000e+00> : vector<4x512xf32>
    %475 = tpu.matmul %474, %472, %cst_444 {dimension_numbers = #tpu.dot_dimension_numbers<[1], [0], [0], [1], [0, 0, 1, 1], [], []>} : vector<4x4xf32>, vector<4x512xf32>, vector<4x512xf32> -> vector<4x512xf32>
    %476 = arith.addf %470, %475 : vector<4x512xf32>
    %c0_445 = arith.constant 0 : index
    %c0_446 = arith.constant 0 : index
    %477 = vector.load %arg5[%c0_445, %c0_446] : memref<4x512xf32, #tpu.memory_space<vmem>>, vector<4x512xf32>
    %478 = arith.addf %477, %476 : vector<4x512xf32>
    %c0_447 = arith.constant 0 : index
    %c0_448 = arith.constant 0 : index
    %479 = vector.load %arg5[%c0_447, %c0_448] : memref<4x512xf32, #tpu.memory_space<vmem>>, vector<4x512xf32>
    tpu.vector_store %arg5[%c0_447, %c0_448], %478 {strides = array<i32>} : memref<4x512xf32, #tpu.memory_space<vmem>>, vector<4x512xf32>,
    %c0_449 = arith.constant 0 : index
    %c0_450 = arith.constant 0 : index
    %c182 = arith.constant 182 : index
    %480 = vector.load %arg1[%c0_449, %c0_450, %c182] : memref<1x4x896xf32, #tpu.memory_space<vmem>>, vector<1x4x512xf32>
    %481 = vector.shape_cast %480 : vector<1x4x512xf32> to vector<4x512xf32>
    %c77 = arith.constant 77 : index
    %c0_451 = arith.constant 0 : index
    %c0_452 = arith.constant 0 : index
    %482 = vector.load %arg2[%c77, %c0_451, %c0_452] : memref<121x4x4xf32, #tpu.memory_space<vmem>>, vector<1x4x4xf32>
    %483 = vector.shape_cast %482 : vector<1x4x4xf32> to vector<4x4xf32>
    %cst_453 = arith.constant dense<0.000000e+00> : vector<4x512xf32>
    %484 = tpu.matmul %483, %481, %cst_453 {dimension_numbers = #tpu.dot_dimension_numbers<[1], [0], [0], [1], [0, 0, 1, 1], [], []>} : vector<4x4xf32>, vector<4x512xf32>, vector<4x512xf32> -> vector<4x512xf32>
    %c0_454 = arith.constant 0 : index
    %c0_455 = arith.constant 0 : index
    %c183 = arith.constant 183 : index
    %485 = vector.load %arg1[%c0_454, %c0_455, %c183] : memref<1x4x896xf32, #tpu.memory_space<vmem>>, vector<1x4x512xf32>
    %486 = vector.shape_cast %485 : vector<1x4x512xf32> to vector<4x512xf32>
    %c78_456 = arith.constant 78 : index
    %c0_457 = arith.constant 0 : index
    %c0_458 = arith.constant 0 : index
    %487 = vector.load %arg2[%c78_456, %c0_457, %c0_458] : memref<121x4x4xf32, #tpu.memory_space<vmem>>, vector<1x4x4xf32>
    %488 = vector.shape_cast %487 : vector<1x4x4xf32> to vector<4x4xf32>
    %cst_459 = arith.constant dense<0.000000e+00> : vector<4x512xf32>
    %489 = tpu.matmul %488, %486, %cst_459 {dimension_numbers = #tpu.dot_dimension_numbers<[1], [0], [0], [1], [0, 0, 1, 1], [], []>} : vector<4x4xf32>, vector<4x512xf32>, vector<4x512xf32> -> vector<4x512xf32>
    %490 = arith.addf %484, %489 : vector<4x512xf32>
    %c0_460 = arith.constant 0 : index
    %c0_461 = arith.constant 0 : index
    %c184 = arith.constant 184 : index
    %491 = vector.load %arg1[%c0_460, %c0_461, %c184] : memref<1x4x896xf32, #tpu.memory_space<vmem>>, vector<1x4x512xf32>
    %492 = vector.shape_cast %491 : vector<1x4x512xf32> to vector<4x512xf32>
    %c79_462 = arith.constant 79 : index
    %c0_463 = arith.constant 0 : index
    %c0_464 = arith.constant 0 : index
    %493 = vector.load %arg2[%c79_462, %c0_463, %c0_464] : memref<121x4x4xf32, #tpu.memory_space<vmem>>, vector<1x4x4xf32>
    %494 = vector.shape_cast %493 : vector<1x4x4xf32> to vector<4x4xf32>
    %cst_465 = arith.constant dense<0.000000e+00> : vector<4x512xf32>
    %495 = tpu.matmul %494, %492, %cst_465 {dimension_numbers = #tpu.dot_dimension_numbers<[1], [0], [0], [1], [0, 0, 1, 1], [], []>} : vector<4x4xf32>, vector<4x512xf32>, vector<4x512xf32> -> vector<4x512xf32>
    %496 = arith.addf %490, %495 : vector<4x512xf32>
    %c0_466 = arith.constant 0 : index
    %c0_467 = arith.constant 0 : index
    %c185 = arith.constant 185 : index
    %497 = vector.load %arg1[%c0_466, %c0_467, %c185] : memref<1x4x896xf32, #tpu.memory_space<vmem>>, vector<1x4x512xf32>
    %498 = vector.shape_cast %497 : vector<1x4x512xf32> to vector<4x512xf32>
    %c80_468 = arith.constant 80 : index
    %c0_469 = arith.constant 0 : index
    %c0_470 = arith.constant 0 : index
    %499 = vector.load %arg2[%c80_468, %c0_469, %c0_470] : memref<121x4x4xf32, #tpu.memory_space<vmem>>, vector<1x4x4xf32>
    %500 = vector.shape_cast %499 : vector<1x4x4xf32> to vector<4x4xf32>
    %cst_471 = arith.constant dense<0.000000e+00> : vector<4x512xf32>
    %501 = tpu.matmul %500, %498, %cst_471 {dimension_numbers = #tpu.dot_dimension_numbers<[1], [0], [0], [1], [0, 0, 1, 1], [], []>} : vector<4x4xf32>, vector<4x512xf32>, vector<4x512xf32> -> vector<4x512xf32>
    %502 = arith.addf %496, %501 : vector<4x512xf32>
    %c0_472 = arith.constant 0 : index
    %c0_473 = arith.constant 0 : index
    %c186 = arith.constant 186 : index
    %503 = vector.load %arg1[%c0_472, %c0_473, %c186] : memref<1x4x896xf32, #tpu.memory_space<vmem>>, vector<1x4x512xf32>
    %504 = vector.shape_cast %503 : vector<1x4x512xf32> to vector<4x512xf32>
    %c81_474 = arith.constant 81 : index
    %c0_475 = arith.constant 0 : index
    %c0_476 = arith.constant 0 : index
    %505 = vector.load %arg2[%c81_474, %c0_475, %c0_476] : memref<121x4x4xf32, #tpu.memory_space<vmem>>, vector<1x4x4xf32>
    %506 = vector.shape_cast %505 : vector<1x4x4xf32> to vector<4x4xf32>
    %cst_477 = arith.constant dense<0.000000e+00> : vector<4x512xf32>
    %507 = tpu.matmul %506, %504, %cst_477 {dimension_numbers = #tpu.dot_dimension_numbers<[1], [0], [0], [1], [0, 0, 1, 1], [], []>} : vector<4x4xf32>, vector<4x512xf32>, vector<4x512xf32> -> vector<4x512xf32>
    %508 = arith.addf %502, %507 : vector<4x512xf32>
    %c0_478 = arith.constant 0 : index
    %c0_479 = arith.constant 0 : index
    %c187 = arith.constant 187 : index
    %509 = vector.load %arg1[%c0_478, %c0_479, %c187] : memref<1x4x896xf32, #tpu.memory_space<vmem>>, vector<1x4x512xf32>
    %510 = vector.shape_cast %509 : vector<1x4x512xf32> to vector<4x512xf32>
    %c82_480 = arith.constant 82 : index
    %c0_481 = arith.constant 0 : index
    %c0_482 = arith.constant 0 : index
    %511 = vector.load %arg2[%c82_480, %c0_481, %c0_482] : memref<121x4x4xf32, #tpu.memory_space<vmem>>, vector<1x4x4xf32>
    %512 = vector.shape_cast %511 : vector<1x4x4xf32> to vector<4x4xf32>
    %cst_483 = arith.constant dense<0.000000e+00> : vector<4x512xf32>
    %513 = tpu.matmul %512, %510, %cst_483 {dimension_numbers = #tpu.dot_dimension_numbers<[1], [0], [0], [1], [0, 0, 1, 1], [], []>} : vector<4x4xf32>, vector<4x512xf32>, vector<4x512xf32> -> vector<4x512xf32>
    %514 = arith.addf %508, %513 : vector<4x512xf32>
    %c0_484 = arith.constant 0 : index
    %c0_485 = arith.constant 0 : index
    %c188 = arith.constant 188 : index
    %515 = vector.load %arg1[%c0_484, %c0_485, %c188] : memref<1x4x896xf32, #tpu.memory_space<vmem>>, vector<1x4x512xf32>
    %516 = vector.shape_cast %515 : vector<1x4x512xf32> to vector<4x512xf32>
    %c83_486 = arith.constant 83 : index
    %c0_487 = arith.constant 0 : index
    %c0_488 = arith.constant 0 : index
    %517 = vector.load %arg2[%c83_486, %c0_487, %c0_488] : memref<121x4x4xf32, #tpu.memory_space<vmem>>, vector<1x4x4xf32>
    %518 = vector.shape_cast %517 : vector<1x4x4xf32> to vector<4x4xf32>
    %cst_489 = arith.constant dense<0.000000e+00> : vector<4x512xf32>
    %519 = tpu.matmul %518, %516, %cst_489 {dimension_numbers = #tpu.dot_dimension_numbers<[1], [0], [0], [1], [0, 0, 1, 1], [], []>} : vector<4x4xf32>, vector<4x512xf32>, vector<4x512xf32> -> vector<4x512xf32>
    %520 = arith.addf %514, %519 : vector<4x512xf32>
    %c0_490 = arith.constant 0 : index
    %c0_491 = arith.constant 0 : index
    %c189 = arith.constant 189 : index
    %521 = vector.load %arg1[%c0_490, %c0_491, %c189] : memref<1x4x896xf32, #tpu.memory_space<vmem>>, vector<1x4x512xf32>
    %522 = vector.shape_cast %521 : vector<1x4x512xf32> to vector<4x512xf32>
    %c84_492 = arith.constant 84 : index
    %c0_493 = arith.constant 0 : index
    %c0_494 = arith.constant 0 : index
    %523 = vector.load %arg2[%c84_492, %c0_493, %c0_494] : memref<121x4x4xf32, #tpu.memory_space<vmem>>, vector<1x4x4xf32>
    %524 = vector.shape_cast %523 : vector<1x4x4xf32> to vector<4x4xf32>
    %cst_495 = arith.constant dense<0.000000e+00> : vector<4x512xf32>
    %525 = tpu.matmul %524, %522, %cst_495 {dimension_numbers = #tpu.dot_dimension_numbers<[1], [0], [0], [1], [0, 0, 1, 1], [], []>} : vector<4x4xf32>, vector<4x512xf32>, vector<4x512xf32> -> vector<4x512xf32>
    %526 = arith.addf %520, %525 : vector<4x512xf32>
    %c0_496 = arith.constant 0 : index
    %c0_497 = arith.constant 0 : index
    %c190 = arith.constant 190 : index
    %527 = vector.load %arg1[%c0_496, %c0_497, %c190] : memref<1x4x896xf32, #tpu.memory_space<vmem>>, vector<1x4x512xf32>
    %528 = vector.shape_cast %527 : vector<1x4x512xf32> to vector<4x512xf32>
    %c85_498 = arith.constant 85 : index
    %c0_499 = arith.constant 0 : index
    %c0_500 = arith.constant 0 : index
    %529 = vector.load %arg2[%c85_498, %c0_499, %c0_500] : memref<121x4x4xf32, #tpu.memory_space<vmem>>, vector<1x4x4xf32>
    %530 = vector.shape_cast %529 : vector<1x4x4xf32> to vector<4x4xf32>
    %cst_501 = arith.constant dense<0.000000e+00> : vector<4x512xf32>
    %531 = tpu.matmul %530, %528, %cst_501 {dimension_numbers = #tpu.dot_dimension_numbers<[1], [0], [0], [1], [0, 0, 1, 1], [], []>} : vector<4x4xf32>, vector<4x512xf32>, vector<4x512xf32> -> vector<4x512xf32>
    %532 = arith.addf %526, %531 : vector<4x512xf32>
    %c0_502 = arith.constant 0 : index
    %c0_503 = arith.constant 0 : index
    %c191 = arith.constant 191 : index
    %533 = vector.load %arg1[%c0_502, %c0_503, %c191] : memref<1x4x896xf32, #tpu.memory_space<vmem>>, vector<1x4x512xf32>
    %534 = vector.shape_cast %533 : vector<1x4x512xf32> to vector<4x512xf32>
    %c86_504 = arith.constant 86 : index
    %c0_505 = arith.constant 0 : index
    %c0_506 = arith.constant 0 : index
    %535 = vector.load %arg2[%c86_504, %c0_505, %c0_506] : memref<121x4x4xf32, #tpu.memory_space<vmem>>, vector<1x4x4xf32>
    %536 = vector.shape_cast %535 : vector<1x4x4xf32> to vector<4x4xf32>
    %cst_507 = arith.constant dense<0.000000e+00> : vector<4x512xf32>
    %537 = tpu.matmul %536, %534, %cst_507 {dimension_numbers = #tpu.dot_dimension_numbers<[1], [0], [0], [1], [0, 0, 1, 1], [], []>} : vector<4x4xf32>, vector<4x512xf32>, vector<4x512xf32> -> vector<4x512xf32>
    %538 = arith.addf %532, %537 : vector<4x512xf32>
    %c0_508 = arith.constant 0 : index
    %c0_509 = arith.constant 0 : index
    %c192 = arith.constant 192 : index
    %539 = vector.load %arg1[%c0_508, %c0_509, %c192] : memref<1x4x896xf32, #tpu.memory_space<vmem>>, vector<1x4x512xf32>
    %540 = vector.shape_cast %539 : vector<1x4x512xf32> to vector<4x512xf32>
    %c87_510 = arith.constant 87 : index
    %c0_511 = arith.constant 0 : index
    %c0_512 = arith.constant 0 : index
    %541 = vector.load %arg2[%c87_510, %c0_511, %c0_512] : memref<121x4x4xf32, #tpu.memory_space<vmem>>, vector<1x4x4xf32>
    %542 = vector.shape_cast %541 : vector<1x4x4xf32> to vector<4x4xf32>
    %cst_513 = arith.constant dense<0.000000e+00> : vector<4x512xf32>
    %543 = tpu.matmul %542, %540, %cst_513 {dimension_numbers = #tpu.dot_dimension_numbers<[1], [0], [0], [1], [0, 0, 1, 1], [], []>} : vector<4x4xf32>, vector<4x512xf32>, vector<4x512xf32> -> vector<4x512xf32>
    %544 = arith.addf %538, %543 : vector<4x512xf32>
    %c0_514 = arith.constant 0 : index
    %c0_515 = arith.constant 0 : index
    %545 = vector.load %arg5[%c0_514, %c0_515] : memref<4x512xf32, #tpu.memory_space<vmem>>, vector<4x512xf32>
    %546 = arith.addf %545, %544 : vector<4x512xf32>
    %c0_516 = arith.constant 0 : index
    %c0_517 = arith.constant 0 : index
    %547 = vector.load %arg5[%c0_516, %c0_517] : memref<4x512xf32, #tpu.memory_space<vmem>>, vector<4x512xf32>
    tpu.vector_store %arg5[%c0_516, %c0_517], %546 {strides = array<i32>} : memref<4x512xf32, #tpu.memory_space<vmem>>, vector<4x512xf32>,
    %c0_518 = arith.constant 0 : index
    %c0_519 = arith.constant 0 : index
    %c208 = arith.constant 208 : index
    %548 = vector.load %arg1[%c0_518, %c0_519, %c208] : memref<1x4x896xf32, #tpu.memory_space<vmem>>, vector<1x4x512xf32>
    %549 = vector.shape_cast %548 : vector<1x4x512xf32> to vector<4x512xf32>
    %c88_520 = arith.constant 88 : index
    %c0_521 = arith.constant 0 : index
    %c0_522 = arith.constant 0 : index
    %550 = vector.load %arg2[%c88_520, %c0_521, %c0_522] : memref<121x4x4xf32, #tpu.memory_space<vmem>>, vector<1x4x4xf32>
    %551 = vector.shape_cast %550 : vector<1x4x4xf32> to vector<4x4xf32>
    %cst_523 = arith.constant dense<0.000000e+00> : vector<4x512xf32>
    %552 = tpu.matmul %551, %549, %cst_523 {dimension_numbers = #tpu.dot_dimension_numbers<[1], [0], [0], [1], [0, 0, 1, 1], [], []>} : vector<4x4xf32>, vector<4x512xf32>, vector<4x512xf32> -> vector<4x512xf32>
    %c0_524 = arith.constant 0 : index
    %c0_525 = arith.constant 0 : index
    %c209 = arith.constant 209 : index
    %553 = vector.load %arg1[%c0_524, %c0_525, %c209] : memref<1x4x896xf32, #tpu.memory_space<vmem>>, vector<1x4x512xf32>
    %554 = vector.shape_cast %553 : vector<1x4x512xf32> to vector<4x512xf32>
    %c89 = arith.constant 89 : index
    %c0_526 = arith.constant 0 : index
    %c0_527 = arith.constant 0 : index
    %555 = vector.load %arg2[%c89, %c0_526, %c0_527] : memref<121x4x4xf32, #tpu.memory_space<vmem>>, vector<1x4x4xf32>
    %556 = vector.shape_cast %555 : vector<1x4x4xf32> to vector<4x4xf32>
    %cst_528 = arith.constant dense<0.000000e+00> : vector<4x512xf32>
    %557 = tpu.matmul %556, %554, %cst_528 {dimension_numbers = #tpu.dot_dimension_numbers<[1], [0], [0], [1], [0, 0, 1, 1], [], []>} : vector<4x4xf32>, vector<4x512xf32>, vector<4x512xf32> -> vector<4x512xf32>
    %558 = arith.addf %552, %557 : vector<4x512xf32>
    %c0_529 = arith.constant 0 : index
    %c0_530 = arith.constant 0 : index
    %c210 = arith.constant 210 : index
    %559 = vector.load %arg1[%c0_529, %c0_530, %c210] : memref<1x4x896xf32, #tpu.memory_space<vmem>>, vector<1x4x512xf32>
    %560 = vector.shape_cast %559 : vector<1x4x512xf32> to vector<4x512xf32>
    %c90 = arith.constant 90 : index
    %c0_531 = arith.constant 0 : index
    %c0_532 = arith.constant 0 : index
    %561 = vector.load %arg2[%c90, %c0_531, %c0_532] : memref<121x4x4xf32, #tpu.memory_space<vmem>>, vector<1x4x4xf32>
    %562 = vector.shape_cast %561 : vector<1x4x4xf32> to vector<4x4xf32>
    %cst_533 = arith.constant dense<0.000000e+00> : vector<4x512xf32>
    %563 = tpu.matmul %562, %560, %cst_533 {dimension_numbers = #tpu.dot_dimension_numbers<[1], [0], [0], [1], [0, 0, 1, 1], [], []>} : vector<4x4xf32>, vector<4x512xf32>, vector<4x512xf32> -> vector<4x512xf32>
    %564 = arith.addf %558, %563 : vector<4x512xf32>
    %c0_534 = arith.constant 0 : index
    %c0_535 = arith.constant 0 : index
    %c211 = arith.constant 211 : index
    %565 = vector.load %arg1[%c0_534, %c0_535, %c211] : memref<1x4x896xf32, #tpu.memory_space<vmem>>, vector<1x4x512xf32>
    %566 = vector.shape_cast %565 : vector<1x4x512xf32> to vector<4x512xf32>
    %c91 = arith.constant 91 : index
    %c0_536 = arith.constant 0 : index
    %c0_537 = arith.constant 0 : index
    %567 = vector.load %arg2[%c91, %c0_536, %c0_537] : memref<121x4x4xf32, #tpu.memory_space<vmem>>, vector<1x4x4xf32>
    %568 = vector.shape_cast %567 : vector<1x4x4xf32> to vector<4x4xf32>
    %cst_538 = arith.constant dense<0.000000e+00> : vector<4x512xf32>
    %569 = tpu.matmul %568, %566, %cst_538 {dimension_numbers = #tpu.dot_dimension_numbers<[1], [0], [0], [1], [0, 0, 1, 1], [], []>} : vector<4x4xf32>, vector<4x512xf32>, vector<4x512xf32> -> vector<4x512xf32>
    %570 = arith.addf %564, %569 : vector<4x512xf32>
    %c0_539 = arith.constant 0 : index
    %c0_540 = arith.constant 0 : index
    %c212 = arith.constant 212 : index
    %571 = vector.load %arg1[%c0_539, %c0_540, %c212] : memref<1x4x896xf32, #tpu.memory_space<vmem>>, vector<1x4x512xf32>
    %572 = vector.shape_cast %571 : vector<1x4x512xf32> to vector<4x512xf32>
    %c92 = arith.constant 92 : index
    %c0_541 = arith.constant 0 : index
    %c0_542 = arith.constant 0 : index
    %573 = vector.load %arg2[%c92, %c0_541, %c0_542] : memref<121x4x4xf32, #tpu.memory_space<vmem>>, vector<1x4x4xf32>
    %574 = vector.shape_cast %573 : vector<1x4x4xf32> to vector<4x4xf32>
    %cst_543 = arith.constant dense<0.000000e+00> : vector<4x512xf32>
    %575 = tpu.matmul %574, %572, %cst_543 {dimension_numbers = #tpu.dot_dimension_numbers<[1], [0], [0], [1], [0, 0, 1, 1], [], []>} : vector<4x4xf32>, vector<4x512xf32>, vector<4x512xf32> -> vector<4x512xf32>
    %576 = arith.addf %570, %575 : vector<4x512xf32>
    %c0_544 = arith.constant 0 : index
    %c0_545 = arith.constant 0 : index
    %c213 = arith.constant 213 : index
    %577 = vector.load %arg1[%c0_544, %c0_545, %c213] : memref<1x4x896xf32, #tpu.memory_space<vmem>>, vector<1x4x512xf32>
    %578 = vector.shape_cast %577 : vector<1x4x512xf32> to vector<4x512xf32>
    %c93 = arith.constant 93 : index
    %c0_546 = arith.constant 0 : index
    %c0_547 = arith.constant 0 : index
    %579 = vector.load %arg2[%c93, %c0_546, %c0_547] : memref<121x4x4xf32, #tpu.memory_space<vmem>>, vector<1x4x4xf32>
    %580 = vector.shape_cast %579 : vector<1x4x4xf32> to vector<4x4xf32>
    %cst_548 = arith.constant dense<0.000000e+00> : vector<4x512xf32>
    %581 = tpu.matmul %580, %578, %cst_548 {dimension_numbers = #tpu.dot_dimension_numbers<[1], [0], [0], [1], [0, 0, 1, 1], [], []>} : vector<4x4xf32>, vector<4x512xf32>, vector<4x512xf32> -> vector<4x512xf32>
    %582 = arith.addf %576, %581 : vector<4x512xf32>
    %c0_549 = arith.constant 0 : index
    %c0_550 = arith.constant 0 : index
    %c214 = arith.constant 214 : index
    %583 = vector.load %arg1[%c0_549, %c0_550, %c214] : memref<1x4x896xf32, #tpu.memory_space<vmem>>, vector<1x4x512xf32>
    %584 = vector.shape_cast %583 : vector<1x4x512xf32> to vector<4x512xf32>
    %c94 = arith.constant 94 : index
    %c0_551 = arith.constant 0 : index
    %c0_552 = arith.constant 0 : index
    %585 = vector.load %arg2[%c94, %c0_551, %c0_552] : memref<121x4x4xf32, #tpu.memory_space<vmem>>, vector<1x4x4xf32>
    %586 = vector.shape_cast %585 : vector<1x4x4xf32> to vector<4x4xf32>
    %cst_553 = arith.constant dense<0.000000e+00> : vector<4x512xf32>
    %587 = tpu.matmul %586, %584, %cst_553 {dimension_numbers = #tpu.dot_dimension_numbers<[1], [0], [0], [1], [0, 0, 1, 1], [], []>} : vector<4x4xf32>, vector<4x512xf32>, vector<4x512xf32> -> vector<4x512xf32>
    %588 = arith.addf %582, %587 : vector<4x512xf32>
    %c0_554 = arith.constant 0 : index
    %c0_555 = arith.constant 0 : index
    %c215 = arith.constant 215 : index
    %589 = vector.load %arg1[%c0_554, %c0_555, %c215] : memref<1x4x896xf32, #tpu.memory_space<vmem>>, vector<1x4x512xf32>
    %590 = vector.shape_cast %589 : vector<1x4x512xf32> to vector<4x512xf32>
    %c95 = arith.constant 95 : index
    %c0_556 = arith.constant 0 : index
    %c0_557 = arith.constant 0 : index
    %591 = vector.load %arg2[%c95, %c0_556, %c0_557] : memref<121x4x4xf32, #tpu.memory_space<vmem>>, vector<1x4x4xf32>
    %592 = vector.shape_cast %591 : vector<1x4x4xf32> to vector<4x4xf32>
    %cst_558 = arith.constant dense<0.000000e+00> : vector<4x512xf32>
    %593 = tpu.matmul %592, %590, %cst_558 {dimension_numbers = #tpu.dot_dimension_numbers<[1], [0], [0], [1], [0, 0, 1, 1], [], []>} : vector<4x4xf32>, vector<4x512xf32>, vector<4x512xf32> -> vector<4x512xf32>
    %594 = arith.addf %588, %593 : vector<4x512xf32>
    %c0_559 = arith.constant 0 : index
    %c0_560 = arith.constant 0 : index
    %c216 = arith.constant 216 : index
    %595 = vector.load %arg1[%c0_559, %c0_560, %c216] : memref<1x4x896xf32, #tpu.memory_space<vmem>>, vector<1x4x512xf32>
    %596 = vector.shape_cast %595 : vector<1x4x512xf32> to vector<4x512xf32>
    %c96 = arith.constant 96 : index
    %c0_561 = arith.constant 0 : index
    %c0_562 = arith.constant 0 : index
    %597 = vector.load %arg2[%c96, %c0_561, %c0_562] : memref<121x4x4xf32, #tpu.memory_space<vmem>>, vector<1x4x4xf32>
    %598 = vector.shape_cast %597 : vector<1x4x4xf32> to vector<4x4xf32>
    %cst_563 = arith.constant dense<0.000000e+00> : vector<4x512xf32>
    %599 = tpu.matmul %598, %596, %cst_563 {dimension_numbers = #tpu.dot_dimension_numbers<[1], [0], [0], [1], [0, 0, 1, 1], [], []>} : vector<4x4xf32>, vector<4x512xf32>, vector<4x512xf32> -> vector<4x512xf32>
    %600 = arith.addf %594, %599 : vector<4x512xf32>
    %c0_564 = arith.constant 0 : index
    %c0_565 = arith.constant 0 : index
    %c217 = arith.constant 217 : index
    %601 = vector.load %arg1[%c0_564, %c0_565, %c217] : memref<1x4x896xf32, #tpu.memory_space<vmem>>, vector<1x4x512xf32>
    %602 = vector.shape_cast %601 : vector<1x4x512xf32> to vector<4x512xf32>
    %c97 = arith.constant 97 : index
    %c0_566 = arith.constant 0 : index
    %c0_567 = arith.constant 0 : index
    %603 = vector.load %arg2[%c97, %c0_566, %c0_567] : memref<121x4x4xf32, #tpu.memory_space<vmem>>, vector<1x4x4xf32>
    %604 = vector.shape_cast %603 : vector<1x4x4xf32> to vector<4x4xf32>
    %cst_568 = arith.constant dense<0.000000e+00> : vector<4x512xf32>
    %605 = tpu.matmul %604, %602, %cst_568 {dimension_numbers = #tpu.dot_dimension_numbers<[1], [0], [0], [1], [0, 0, 1, 1], [], []>} : vector<4x4xf32>, vector<4x512xf32>, vector<4x512xf32> -> vector<4x512xf32>
    %606 = arith.addf %600, %605 : vector<4x512xf32>
    %c0_569 = arith.constant 0 : index
    %c0_570 = arith.constant 0 : index
    %c218 = arith.constant 218 : index
    %607 = vector.load %arg1[%c0_569, %c0_570, %c218] : memref<1x4x896xf32, #tpu.memory_space<vmem>>, vector<1x4x512xf32>
    %608 = vector.shape_cast %607 : vector<1x4x512xf32> to vector<4x512xf32>
    %c98 = arith.constant 98 : index
    %c0_571 = arith.constant 0 : index
    %c0_572 = arith.constant 0 : index
    %609 = vector.load %arg2[%c98, %c0_571, %c0_572] : memref<121x4x4xf32, #tpu.memory_space<vmem>>, vector<1x4x4xf32>
    %610 = vector.shape_cast %609 : vector<1x4x4xf32> to vector<4x4xf32>
    %cst_573 = arith.constant dense<0.000000e+00> : vector<4x512xf32>
    %611 = tpu.matmul %610, %608, %cst_573 {dimension_numbers = #tpu.dot_dimension_numbers<[1], [0], [0], [1], [0, 0, 1, 1], [], []>} : vector<4x4xf32>, vector<4x512xf32>, vector<4x512xf32> -> vector<4x512xf32>
    %612 = arith.addf %606, %611 : vector<4x512xf32>
    %c0_574 = arith.constant 0 : index
    %c0_575 = arith.constant 0 : index
    %613 = vector.load %arg5[%c0_574, %c0_575] : memref<4x512xf32, #tpu.memory_space<vmem>>, vector<4x512xf32>
    %614 = arith.addf %613, %612 : vector<4x512xf32>
    %c0_576 = arith.constant 0 : index
    %c0_577 = arith.constant 0 : index
    %615 = vector.load %arg5[%c0_576, %c0_577] : memref<4x512xf32, #tpu.memory_space<vmem>>, vector<4x512xf32>
    tpu.vector_store %arg5[%c0_576, %c0_577], %614 {strides = array<i32>} : memref<4x512xf32, #tpu.memory_space<vmem>>, vector<4x512xf32>,
    %c0_578 = arith.constant 0 : index
    %c0_579 = arith.constant 0 : index
    %c234 = arith.constant 234 : index
    %616 = vector.load %arg1[%c0_578, %c0_579, %c234] : memref<1x4x896xf32, #tpu.memory_space<vmem>>, vector<1x4x512xf32>
    %617 = vector.shape_cast %616 : vector<1x4x512xf32> to vector<4x512xf32>
    %c99 = arith.constant 99 : index
    %c0_580 = arith.constant 0 : index
    %c0_581 = arith.constant 0 : index
    %618 = vector.load %arg2[%c99, %c0_580, %c0_581] : memref<121x4x4xf32, #tpu.memory_space<vmem>>, vector<1x4x4xf32>
    %619 = vector.shape_cast %618 : vector<1x4x4xf32> to vector<4x4xf32>
    %cst_582 = arith.constant dense<0.000000e+00> : vector<4x512xf32>
    %620 = tpu.matmul %619, %617, %cst_582 {dimension_numbers = #tpu.dot_dimension_numbers<[1], [0], [0], [1], [0, 0, 1, 1], [], []>} : vector<4x4xf32>, vector<4x512xf32>, vector<4x512xf32> -> vector<4x512xf32>
    %c0_583 = arith.constant 0 : index
    %c0_584 = arith.constant 0 : index
    %c235 = arith.constant 235 : index
    %621 = vector.load %arg1[%c0_583, %c0_584, %c235] : memref<1x4x896xf32, #tpu.memory_space<vmem>>, vector<1x4x512xf32>
    %622 = vector.shape_cast %621 : vector<1x4x512xf32> to vector<4x512xf32>
    %c100 = arith.constant 100 : index
    %c0_585 = arith.constant 0 : index
    %c0_586 = arith.constant 0 : index
    %623 = vector.load %arg2[%c100, %c0_585, %c0_586] : memref<121x4x4xf32, #tpu.memory_space<vmem>>, vector<1x4x4xf32>
    %624 = vector.shape_cast %623 : vector<1x4x4xf32> to vector<4x4xf32>
    %cst_587 = arith.constant dense<0.000000e+00> : vector<4x512xf32>
    %625 = tpu.matmul %624, %622, %cst_587 {dimension_numbers = #tpu.dot_dimension_numbers<[1], [0], [0], [1], [0, 0, 1, 1], [], []>} : vector<4x4xf32>, vector<4x512xf32>, vector<4x512xf32> -> vector<4x512xf32>
    %626 = arith.addf %620, %625 : vector<4x512xf32>
    %c0_588 = arith.constant 0 : index
    %c0_589 = arith.constant 0 : index
    %c236 = arith.constant 236 : index
    %627 = vector.load %arg1[%c0_588, %c0_589, %c236] : memref<1x4x896xf32, #tpu.memory_space<vmem>>, vector<1x4x512xf32>
    %628 = vector.shape_cast %627 : vector<1x4x512xf32> to vector<4x512xf32>
    %c101 = arith.constant 101 : index
    %c0_590 = arith.constant 0 : index
    %c0_591 = arith.constant 0 : index
    %629 = vector.load %arg2[%c101, %c0_590, %c0_591] : memref<121x4x4xf32, #tpu.memory_space<vmem>>, vector<1x4x4xf32>
    %630 = vector.shape_cast %629 : vector<1x4x4xf32> to vector<4x4xf32>
    %cst_592 = arith.constant dense<0.000000e+00> : vector<4x512xf32>
    %631 = tpu.matmul %630, %628, %cst_592 {dimension_numbers = #tpu.dot_dimension_numbers<[1], [0], [0], [1], [0, 0, 1, 1], [], []>} : vector<4x4xf32>, vector<4x512xf32>, vector<4x512xf32> -> vector<4x512xf32>
    %632 = arith.addf %626, %631 : vector<4x512xf32>
    %c0_593 = arith.constant 0 : index
    %c0_594 = arith.constant 0 : index
    %c237 = arith.constant 237 : index
    %633 = vector.load %arg1[%c0_593, %c0_594, %c237] : memref<1x4x896xf32, #tpu.memory_space<vmem>>, vector<1x4x512xf32>
    %634 = vector.shape_cast %633 : vector<1x4x512xf32> to vector<4x512xf32>
    %c102 = arith.constant 102 : index
    %c0_595 = arith.constant 0 : index
    %c0_596 = arith.constant 0 : index
    %635 = vector.load %arg2[%c102, %c0_595, %c0_596] : memref<121x4x4xf32, #tpu.memory_space<vmem>>, vector<1x4x4xf32>
    %636 = vector.shape_cast %635 : vector<1x4x4xf32> to vector<4x4xf32>
    %cst_597 = arith.constant dense<0.000000e+00> : vector<4x512xf32>
    %637 = tpu.matmul %636, %634, %cst_597 {dimension_numbers = #tpu.dot_dimension_numbers<[1], [0], [0], [1], [0, 0, 1, 1], [], []>} : vector<4x4xf32>, vector<4x512xf32>, vector<4x512xf32> -> vector<4x512xf32>
    %638 = arith.addf %632, %637 : vector<4x512xf32>
    %c0_598 = arith.constant 0 : index
    %c0_599 = arith.constant 0 : index
    %c238 = arith.constant 238 : index
    %639 = vector.load %arg1[%c0_598, %c0_599, %c238] : memref<1x4x896xf32, #tpu.memory_space<vmem>>, vector<1x4x512xf32>
    %640 = vector.shape_cast %639 : vector<1x4x512xf32> to vector<4x512xf32>
    %c103 = arith.constant 103 : index
    %c0_600 = arith.constant 0 : index
    %c0_601 = arith.constant 0 : index
    %641 = vector.load %arg2[%c103, %c0_600, %c0_601] : memref<121x4x4xf32, #tpu.memory_space<vmem>>, vector<1x4x4xf32>
    %642 = vector.shape_cast %641 : vector<1x4x4xf32> to vector<4x4xf32>
    %cst_602 = arith.constant dense<0.000000e+00> : vector<4x512xf32>
    %643 = tpu.matmul %642, %640, %cst_602 {dimension_numbers = #tpu.dot_dimension_numbers<[1], [0], [0], [1], [0, 0, 1, 1], [], []>} : vector<4x4xf32>, vector<4x512xf32>, vector<4x512xf32> -> vector<4x512xf32>
    %644 = arith.addf %638, %643 : vector<4x512xf32>
    %c0_603 = arith.constant 0 : index
    %c0_604 = arith.constant 0 : index
    %c239 = arith.constant 239 : index
    %645 = vector.load %arg1[%c0_603, %c0_604, %c239] : memref<1x4x896xf32, #tpu.memory_space<vmem>>, vector<1x4x512xf32>
    %646 = vector.shape_cast %645 : vector<1x4x512xf32> to vector<4x512xf32>
    %c104_605 = arith.constant 104 : index
    %c0_606 = arith.constant 0 : index
    %c0_607 = arith.constant 0 : index
    %647 = vector.load %arg2[%c104_605, %c0_606, %c0_607] : memref<121x4x4xf32, #tpu.memory_space<vmem>>, vector<1x4x4xf32>
    %648 = vector.shape_cast %647 : vector<1x4x4xf32> to vector<4x4xf32>
    %cst_608 = arith.constant dense<0.000000e+00> : vector<4x512xf32>
    %649 = tpu.matmul %648, %646, %cst_608 {dimension_numbers = #tpu.dot_dimension_numbers<[1], [0], [0], [1], [0, 0, 1, 1], [], []>} : vector<4x4xf32>, vector<4x512xf32>, vector<4x512xf32> -> vector<4x512xf32>
    %650 = arith.addf %644, %649 : vector<4x512xf32>
    %c0_609 = arith.constant 0 : index
    %c0_610 = arith.constant 0 : index
    %c240 = arith.constant 240 : index
    %651 = vector.load %arg1[%c0_609, %c0_610, %c240] : memref<1x4x896xf32, #tpu.memory_space<vmem>>, vector<1x4x512xf32>
    %652 = vector.shape_cast %651 : vector<1x4x512xf32> to vector<4x512xf32>
    %c105_611 = arith.constant 105 : index
    %c0_612 = arith.constant 0 : index
    %c0_613 = arith.constant 0 : index
    %653 = vector.load %arg2[%c105_611, %c0_612, %c0_613] : memref<121x4x4xf32, #tpu.memory_space<vmem>>, vector<1x4x4xf32>
    %654 = vector.shape_cast %653 : vector<1x4x4xf32> to vector<4x4xf32>
    %cst_614 = arith.constant dense<0.000000e+00> : vector<4x512xf32>
    %655 = tpu.matmul %654, %652, %cst_614 {dimension_numbers = #tpu.dot_dimension_numbers<[1], [0], [0], [1], [0, 0, 1, 1], [], []>} : vector<4x4xf32>, vector<4x512xf32>, vector<4x512xf32> -> vector<4x512xf32>
    %656 = arith.addf %650, %655 : vector<4x512xf32>
    %c0_615 = arith.constant 0 : index
    %c0_616 = arith.constant 0 : index
    %c241 = arith.constant 241 : index
    %657 = vector.load %arg1[%c0_615, %c0_616, %c241] : memref<1x4x896xf32, #tpu.memory_space<vmem>>, vector<1x4x512xf32>
    %658 = vector.shape_cast %657 : vector<1x4x512xf32> to vector<4x512xf32>
    %c106_617 = arith.constant 106 : index
    %c0_618 = arith.constant 0 : index
    %c0_619 = arith.constant 0 : index
    %659 = vector.load %arg2[%c106_617, %c0_618, %c0_619] : memref<121x4x4xf32, #tpu.memory_space<vmem>>, vector<1x4x4xf32>
    %660 = vector.shape_cast %659 : vector<1x4x4xf32> to vector<4x4xf32>
    %cst_620 = arith.constant dense<0.000000e+00> : vector<4x512xf32>
    %661 = tpu.matmul %660, %658, %cst_620 {dimension_numbers = #tpu.dot_dimension_numbers<[1], [0], [0], [1], [0, 0, 1, 1], [], []>} : vector<4x4xf32>, vector<4x512xf32>, vector<4x512xf32> -> vector<4x512xf32>
    %662 = arith.addf %656, %661 : vector<4x512xf32>
    %c0_621 = arith.constant 0 : index
    %c0_622 = arith.constant 0 : index
    %c242 = arith.constant 242 : index
    %663 = vector.load %arg1[%c0_621, %c0_622, %c242] : memref<1x4x896xf32, #tpu.memory_space<vmem>>, vector<1x4x512xf32>
    %664 = vector.shape_cast %663 : vector<1x4x512xf32> to vector<4x512xf32>
    %c107_623 = arith.constant 107 : index
    %c0_624 = arith.constant 0 : index
    %c0_625 = arith.constant 0 : index
    %665 = vector.load %arg2[%c107_623, %c0_624, %c0_625] : memref<121x4x4xf32, #tpu.memory_space<vmem>>, vector<1x4x4xf32>
    %666 = vector.shape_cast %665 : vector<1x4x4xf32> to vector<4x4xf32>
    %cst_626 = arith.constant dense<0.000000e+00> : vector<4x512xf32>
    %667 = tpu.matmul %666, %664, %cst_626 {dimension_numbers = #tpu.dot_dimension_numbers<[1], [0], [0], [1], [0, 0, 1, 1], [], []>} : vector<4x4xf32>, vector<4x512xf32>, vector<4x512xf32> -> vector<4x512xf32>
    %668 = arith.addf %662, %667 : vector<4x512xf32>
    %c0_627 = arith.constant 0 : index
    %c0_628 = arith.constant 0 : index
    %c243 = arith.constant 243 : index
    %669 = vector.load %arg1[%c0_627, %c0_628, %c243] : memref<1x4x896xf32, #tpu.memory_space<vmem>>, vector<1x4x512xf32>
    %670 = vector.shape_cast %669 : vector<1x4x512xf32> to vector<4x512xf32>
    %c108_629 = arith.constant 108 : index
    %c0_630 = arith.constant 0 : index
    %c0_631 = arith.constant 0 : index
    %671 = vector.load %arg2[%c108_629, %c0_630, %c0_631] : memref<121x4x4xf32, #tpu.memory_space<vmem>>, vector<1x4x4xf32>
    %672 = vector.shape_cast %671 : vector<1x4x4xf32> to vector<4x4xf32>
    %cst_632 = arith.constant dense<0.000000e+00> : vector<4x512xf32>
    %673 = tpu.matmul %672, %670, %cst_632 {dimension_numbers = #tpu.dot_dimension_numbers<[1], [0], [0], [1], [0, 0, 1, 1], [], []>} : vector<4x4xf32>, vector<4x512xf32>, vector<4x512xf32> -> vector<4x512xf32>
    %674 = arith.addf %668, %673 : vector<4x512xf32>
    %c0_633 = arith.constant 0 : index
    %c0_634 = arith.constant 0 : index
    %c244 = arith.constant 244 : index
    %675 = vector.load %arg1[%c0_633, %c0_634, %c244] : memref<1x4x896xf32, #tpu.memory_space<vmem>>, vector<1x4x512xf32>
    %676 = vector.shape_cast %675 : vector<1x4x512xf32> to vector<4x512xf32>
    %c109_635 = arith.constant 109 : index
    %c0_636 = arith.constant 0 : index
    %c0_637 = arith.constant 0 : index
    %677 = vector.load %arg2[%c109_635, %c0_636, %c0_637] : memref<121x4x4xf32, #tpu.memory_space<vmem>>, vector<1x4x4xf32>
    %678 = vector.shape_cast %677 : vector<1x4x4xf32> to vector<4x4xf32>
    %cst_638 = arith.constant dense<0.000000e+00> : vector<4x512xf32>
    %679 = tpu.matmul %678, %676, %cst_638 {dimension_numbers = #tpu.dot_dimension_numbers<[1], [0], [0], [1], [0, 0, 1, 1], [], []>} : vector<4x4xf32>, vector<4x512xf32>, vector<4x512xf32> -> vector<4x512xf32>
    %680 = arith.addf %674, %679 : vector<4x512xf32>
    %c0_639 = arith.constant 0 : index
    %c0_640 = arith.constant 0 : index
    %681 = vector.load %arg5[%c0_639, %c0_640] : memref<4x512xf32, #tpu.memory_space<vmem>>, vector<4x512xf32>
    %682 = arith.addf %681, %680 : vector<4x512xf32>
    %c0_641 = arith.constant 0 : index
    %c0_642 = arith.constant 0 : index
    %683 = vector.load %arg5[%c0_641, %c0_642] : memref<4x512xf32, #tpu.memory_space<vmem>>, vector<4x512xf32>
    tpu.vector_store %arg5[%c0_641, %c0_642], %682 {strides = array<i32>} : memref<4x512xf32, #tpu.memory_space<vmem>>, vector<4x512xf32>,
    %c0_643 = arith.constant 0 : index
    %c0_644 = arith.constant 0 : index
    %c260 = arith.constant 260 : index
    %684 = vector.load %arg1[%c0_643, %c0_644, %c260] : memref<1x4x896xf32, #tpu.memory_space<vmem>>, vector<1x4x512xf32>
    %685 = vector.shape_cast %684 : vector<1x4x512xf32> to vector<4x512xf32>
    %c110_645 = arith.constant 110 : index
    %c0_646 = arith.constant 0 : index
    %c0_647 = arith.constant 0 : index
    %686 = vector.load %arg2[%c110_645, %c0_646, %c0_647] : memref<121x4x4xf32, #tpu.memory_space<vmem>>, vector<1x4x4xf32>
    %687 = vector.shape_cast %686 : vector<1x4x4xf32> to vector<4x4xf32>
    %cst_648 = arith.constant dense<0.000000e+00> : vector<4x512xf32>
    %688 = tpu.matmul %687, %685, %cst_648 {dimension_numbers = #tpu.dot_dimension_numbers<[1], [0], [0], [1], [0, 0, 1, 1], [], []>} : vector<4x4xf32>, vector<4x512xf32>, vector<4x512xf32> -> vector<4x512xf32>
    %c0_649 = arith.constant 0 : index
    %c0_650 = arith.constant 0 : index
    %c261 = arith.constant 261 : index
    %689 = vector.load %arg1[%c0_649, %c0_650, %c261] : memref<1x4x896xf32, #tpu.memory_space<vmem>>, vector<1x4x512xf32>
    %690 = vector.shape_cast %689 : vector<1x4x512xf32> to vector<4x512xf32>
    %c111_651 = arith.constant 111 : index
    %c0_652 = arith.constant 0 : index
    %c0_653 = arith.constant 0 : index
    %691 = vector.load %arg2[%c111_651, %c0_652, %c0_653] : memref<121x4x4xf32, #tpu.memory_space<vmem>>, vector<1x4x4xf32>
    %692 = vector.shape_cast %691 : vector<1x4x4xf32> to vector<4x4xf32>
    %cst_654 = arith.constant dense<0.000000e+00> : vector<4x512xf32>
    %693 = tpu.matmul %692, %690, %cst_654 {dimension_numbers = #tpu.dot_dimension_numbers<[1], [0], [0], [1], [0, 0, 1, 1], [], []>} : vector<4x4xf32>, vector<4x512xf32>, vector<4x512xf32> -> vector<4x512xf32>
    %694 = arith.addf %688, %693 : vector<4x512xf32>
    %c0_655 = arith.constant 0 : index
    %c0_656 = arith.constant 0 : index
    %c262 = arith.constant 262 : index
    %695 = vector.load %arg1[%c0_655, %c0_656, %c262] : memref<1x4x896xf32, #tpu.memory_space<vmem>>, vector<1x4x512xf32>
    %696 = vector.shape_cast %695 : vector<1x4x512xf32> to vector<4x512xf32>
    %c112_657 = arith.constant 112 : index
    %c0_658 = arith.constant 0 : index
    %c0_659 = arith.constant 0 : index
    %697 = vector.load %arg2[%c112_657, %c0_658, %c0_659] : memref<121x4x4xf32, #tpu.memory_space<vmem>>, vector<1x4x4xf32>
    %698 = vector.shape_cast %697 : vector<1x4x4xf32> to vector<4x4xf32>
    %cst_660 = arith.constant dense<0.000000e+00> : vector<4x512xf32>
    %699 = tpu.matmul %698, %696, %cst_660 {dimension_numbers = #tpu.dot_dimension_numbers<[1], [0], [0], [1], [0, 0, 1, 1], [], []>} : vector<4x4xf32>, vector<4x512xf32>, vector<4x512xf32> -> vector<4x512xf32>
    %700 = arith.addf %694, %699 : vector<4x512xf32>
    %c0_661 = arith.constant 0 : index
    %c0_662 = arith.constant 0 : index
    %c263 = arith.constant 263 : index
    %701 = vector.load %arg1[%c0_661, %c0_662, %c263] : memref<1x4x896xf32, #tpu.memory_space<vmem>>, vector<1x4x512xf32>
    %702 = vector.shape_cast %701 : vector<1x4x512xf32> to vector<4x512xf32>
    %c113_663 = arith.constant 113 : index
    %c0_664 = arith.constant 0 : index
    %c0_665 = arith.constant 0 : index
    %703 = vector.load %arg2[%c113_663, %c0_664, %c0_665] : memref<121x4x4xf32, #tpu.memory_space<vmem>>, vector<1x4x4xf32>
    %704 = vector.shape_cast %703 : vector<1x4x4xf32> to vector<4x4xf32>
    %cst_666 = arith.constant dense<0.000000e+00> : vector<4x512xf32>
    %705 = tpu.matmul %704, %702, %cst_666 {dimension_numbers = #tpu.dot_dimension_numbers<[1], [0], [0], [1], [0, 0, 1, 1], [], []>} : vector<4x4xf32>, vector<4x512xf32>, vector<4x512xf32> -> vector<4x512xf32>
    %706 = arith.addf %700, %705 : vector<4x512xf32>
    %c0_667 = arith.constant 0 : index
    %c0_668 = arith.constant 0 : index
    %c264 = arith.constant 264 : index
    %707 = vector.load %arg1[%c0_667, %c0_668, %c264] : memref<1x4x896xf32, #tpu.memory_space<vmem>>, vector<1x4x512xf32>
    %708 = vector.shape_cast %707 : vector<1x4x512xf32> to vector<4x512xf32>
    %c114_669 = arith.constant 114 : index
    %c0_670 = arith.constant 0 : index
    %c0_671 = arith.constant 0 : index
    %709 = vector.load %arg2[%c114_669, %c0_670, %c0_671] : memref<121x4x4xf32, #tpu.memory_space<vmem>>, vector<1x4x4xf32>
    %710 = vector.shape_cast %709 : vector<1x4x4xf32> to vector<4x4xf32>
    %cst_672 = arith.constant dense<0.000000e+00> : vector<4x512xf32>
    %711 = tpu.matmul %710, %708, %cst_672 {dimension_numbers = #tpu.dot_dimension_numbers<[1], [0], [0], [1], [0, 0, 1, 1], [], []>} : vector<4x4xf32>, vector<4x512xf32>, vector<4x512xf32> -> vector<4x512xf32>
    %712 = arith.addf %706, %711 : vector<4x512xf32>
    %c0_673 = arith.constant 0 : index
    %c0_674 = arith.constant 0 : index
    %c265 = arith.constant 265 : index
    %713 = vector.load %arg1[%c0_673, %c0_674, %c265] : memref<1x4x896xf32, #tpu.memory_space<vmem>>, vector<1x4x512xf32>
    %714 = vector.shape_cast %713 : vector<1x4x512xf32> to vector<4x512xf32>
    %c115 = arith.constant 115 : index
    %c0_675 = arith.constant 0 : index
    %c0_676 = arith.constant 0 : index
    %715 = vector.load %arg2[%c115, %c0_675, %c0_676] : memref<121x4x4xf32, #tpu.memory_space<vmem>>, vector<1x4x4xf32>
    %716 = vector.shape_cast %715 : vector<1x4x4xf32> to vector<4x4xf32>
    %cst_677 = arith.constant dense<0.000000e+00> : vector<4x512xf32>
    %717 = tpu.matmul %716, %714, %cst_677 {dimension_numbers = #tpu.dot_dimension_numbers<[1], [0], [0], [1], [0, 0, 1, 1], [], []>} : vector<4x4xf32>, vector<4x512xf32>, vector<4x512xf32> -> vector<4x512xf32>
    %718 = arith.addf %712, %717 : vector<4x512xf32>
    %c0_678 = arith.constant 0 : index
    %c0_679 = arith.constant 0 : index
    %c266 = arith.constant 266 : index
    %719 = vector.load %arg1[%c0_678, %c0_679, %c266] : memref<1x4x896xf32, #tpu.memory_space<vmem>>, vector<1x4x512xf32>
    %720 = vector.shape_cast %719 : vector<1x4x512xf32> to vector<4x512xf32>
    %c116 = arith.constant 116 : index
    %c0_680 = arith.constant 0 : index
    %c0_681 = arith.constant 0 : index
    %721 = vector.load %arg2[%c116, %c0_680, %c0_681] : memref<121x4x4xf32, #tpu.memory_space<vmem>>, vector<1x4x4xf32>
    %722 = vector.shape_cast %721 : vector<1x4x4xf32> to vector<4x4xf32>
    %cst_682 = arith.constant dense<0.000000e+00> : vector<4x512xf32>
    %723 = tpu.matmul %722, %720, %cst_682 {dimension_numbers = #tpu.dot_dimension_numbers<[1], [0], [0], [1], [0, 0, 1, 1], [], []>} : vector<4x4xf32>, vector<4x512xf32>, vector<4x512xf32> -> vector<4x512xf32>
    %724 = arith.addf %718, %723 : vector<4x512xf32>
    %c0_683 = arith.constant 0 : index
    %c0_684 = arith.constant 0 : index
    %c267 = arith.constant 267 : index
    %725 = vector.load %arg1[%c0_683, %c0_684, %c267] : memref<1x4x896xf32, #tpu.memory_space<vmem>>, vector<1x4x512xf32>
    %726 = vector.shape_cast %725 : vector<1x4x512xf32> to vector<4x512xf32>
    %c117 = arith.constant 117 : index
    %c0_685 = arith.constant 0 : index
    %c0_686 = arith.constant 0 : index
    %727 = vector.load %arg2[%c117, %c0_685, %c0_686] : memref<121x4x4xf32, #tpu.memory_space<vmem>>, vector<1x4x4xf32>
    %728 = vector.shape_cast %727 : vector<1x4x4xf32> to vector<4x4xf32>
    %cst_687 = arith.constant dense<0.000000e+00> : vector<4x512xf32>
    %729 = tpu.matmul %728, %726, %cst_687 {dimension_numbers = #tpu.dot_dimension_numbers<[1], [0], [0], [1], [0, 0, 1, 1], [], []>} : vector<4x4xf32>, vector<4x512xf32>, vector<4x512xf32> -> vector<4x512xf32>
    %730 = arith.addf %724, %729 : vector<4x512xf32>
    %c0_688 = arith.constant 0 : index
    %c0_689 = arith.constant 0 : index
    %c268 = arith.constant 268 : index
    %731 = vector.load %arg1[%c0_688, %c0_689, %c268] : memref<1x4x896xf32, #tpu.memory_space<vmem>>, vector<1x4x512xf32>
    %732 = vector.shape_cast %731 : vector<1x4x512xf32> to vector<4x512xf32>
    %c118 = arith.constant 118 : index
    %c0_690 = arith.constant 0 : index
    %c0_691 = arith.constant 0 : index
    %733 = vector.load %arg2[%c118, %c0_690, %c0_691] : memref<121x4x4xf32, #tpu.memory_space<vmem>>, vector<1x4x4xf32>
    %734 = vector.shape_cast %733 : vector<1x4x4xf32> to vector<4x4xf32>
    %cst_692 = arith.constant dense<0.000000e+00> : vector<4x512xf32>
    %735 = tpu.matmul %734, %732, %cst_692 {dimension_numbers = #tpu.dot_dimension_numbers<[1], [0], [0], [1], [0, 0, 1, 1], [], []>} : vector<4x4xf32>, vector<4x512xf32>, vector<4x512xf32> -> vector<4x512xf32>
    %736 = arith.addf %730, %735 : vector<4x512xf32>
    %c0_693 = arith.constant 0 : index
    %c0_694 = arith.constant 0 : index
    %c269 = arith.constant 269 : index
    %737 = vector.load %arg1[%c0_693, %c0_694, %c269] : memref<1x4x896xf32, #tpu.memory_space<vmem>>, vector<1x4x512xf32>
    %738 = vector.shape_cast %737 : vector<1x4x512xf32> to vector<4x512xf32>
    %c119 = arith.constant 119 : index
    %c0_695 = arith.constant 0 : index
    %c0_696 = arith.constant 0 : index
    %739 = vector.load %arg2[%c119, %c0_695, %c0_696] : memref<121x4x4xf32, #tpu.memory_space<vmem>>, vector<1x4x4xf32>
    %740 = vector.shape_cast %739 : vector<1x4x4xf32> to vector<4x4xf32>
    %cst_697 = arith.constant dense<0.000000e+00> : vector<4x512xf32>
    %741 = tpu.matmul %740, %738, %cst_697 {dimension_numbers = #tpu.dot_dimension_numbers<[1], [0], [0], [1], [0, 0, 1, 1], [], []>} : vector<4x4xf32>, vector<4x512xf32>, vector<4x512xf32> -> vector<4x512xf32>
    %742 = arith.addf %736, %741 : vector<4x512xf32>
    %c0_698 = arith.constant 0 : index
    %c0_699 = arith.constant 0 : index
    %c270 = arith.constant 270 : index
    %743 = vector.load %arg1[%c0_698, %c0_699, %c270] : memref<1x4x896xf32, #tpu.memory_space<vmem>>, vector<1x4x512xf32>
    %744 = vector.shape_cast %743 : vector<1x4x512xf32> to vector<4x512xf32>
    %c120 = arith.constant 120 : index
    %c0_700 = arith.constant 0 : index
    %c0_701 = arith.constant 0 : index
    %745 = vector.load %arg2[%c120, %c0_700, %c0_701] : memref<121x4x4xf32, #tpu.memory_space<vmem>>, vector<1x4x4xf32>
    %746 = vector.shape_cast %745 : vector<1x4x4xf32> to vector<4x4xf32>
    %cst_702 = arith.constant dense<0.000000e+00> : vector<4x512xf32>
    %747 = tpu.matmul %746, %744, %cst_702 {dimension_numbers = #tpu.dot_dimension_numbers<[1], [0], [0], [1], [0, 0, 1, 1], [], []>} : vector<4x4xf32>, vector<4x512xf32>, vector<4x512xf32> -> vector<4x512xf32>
    %748 = arith.addf %742, %747 : vector<4x512xf32>
    %c0_703 = arith.constant 0 : index
    %c0_704 = arith.constant 0 : index
    %749 = vector.load %arg5[%c0_703, %c0_704] : memref<4x512xf32, #tpu.memory_space<vmem>>, vector<4x512xf32>
    %750 = arith.addf %749, %748 : vector<4x512xf32>
    %c0_705 = arith.constant 0 : index
    %c0_706 = arith.constant 0 : index
    %751 = vector.load %arg5[%c0_705, %c0_706] : memref<4x512xf32, #tpu.memory_space<vmem>>, vector<4x512xf32>
    tpu.vector_store %arg5[%c0_705, %c0_706], %750 {strides = array<i32>} : memref<4x512xf32, #tpu.memory_space<vmem>>, vector<4x512xf32>,
    %c0_707 = arith.constant 0 : index
    %c0_708 = arith.constant 0 : index
    %752 = vector.load %arg5[%c0_707, %c0_708] : memref<4x512xf32, #tpu.memory_space<vmem>>, vector<4x512xf32>
    %c0_709 = arith.constant 0 : index
    %c0_710 = arith.constant 0 : index
    %c0_711 = arith.constant 0 : index
    %753 = vector.load %arg4[%c0_709, %c0_710, %c0_711] : memref<1x4x512xf32, #tpu.memory_space<vmem>>, vector<1x4x512xf32>
    %754 = vector.shape_cast %753 : vector<1x4x512xf32> to vector<4x512xf32>
    %755 = vector.shape_cast %752 : vector<4x512xf32> to vector<1x4x512xf32>
    tpu.vector_store %arg4[%c0_709, %c0_710, %c0_711], %755 {strides = array<i32>} : memref<1x4x512xf32, #tpu.memory_space<vmem>>, vector<1x4x512xf32>,
    return
  }
  func.func @transform_0(%arg0: i32) -> (i32, i32, i32) {
    %c0_i32 = arith.constant 0 : i32
    %c0_i32_0 = arith.constant 0 : i32
    %c0_i32_1 = arith.constant 0 : i32
    return %arg0, %c0_i32, %c0_i32_0 : i32, i32, i32
  }
  func.func @transform_1(%arg0: i32) -> (i32, i32, i32) {
    %c0_i32 = arith.constant 0 : i32
    %c0_i32_0 = arith.constant 0 : i32
    %c0_i32_1 = arith.constant 0 : i32
    %c0_i32_2 = arith.constant 0 : i32
    return %c0_i32, %c0_i32_0, %c0_i32_1 : i32, i32, i32
  }
  func.func @transform_2(%arg0: i32) -> (i32, i32) {
    %c0_i32 = arith.constant 0 : i32
    %c0_i32_0 = arith.constant 0 : i32
    %c0_i32_1 = arith.constant 0 : i32
    return %c0_i32, %c0_i32_0 : i32, i32
  }
  func.func @transform_3(%arg0: i32) -> (i32, i32, i32) {
    %c0_i32 = arith.constant 0 : i32
    %c0_i32_0 = arith.constant 0 : i32
    %c0_i32_1 = arith.constant 0 : i32
    return %arg0, %c0_i32, %c0_i32_0 : i32, i32, i32
  }
}

</mosaic_0001>

<bundles_post_ra>
// kernel: tpu_custom_call.1
= control target key start
LH: loop header
LB: loop body
LE: loop exit
PB: predicated region body
PF: predicated region fallthrough
CT: control target
= control target key end

     0   :  { %8 = vsyncpa [#allocation4], 0  ;;  %s26942_s0 = inlined_call_operand.vmem [shape: f32[2,4,896], index: 0, kind: input, shape index: {}]   ;;  %s26943_s1 = inlined_call_operand.vmem [shape: f32[121,4,4], index: 1, kind: input, shape index: {}]   ;;  %s26944_s2 = inlined_call_operand.vmem [shape: f32[4,1], index: 2, kind: input, shape index: {}]   ;;  %s26945_s3 = inlined_call_operand.hbm [shape: f32[2,4,512], index: 3, kind: output, shape index: {}]  }
   0x1   :  { %10 = vsyncpa [#allocation4 + $0x1], 0  ;;  %s23770_s12 = smov 0   ;;  %s23772_s13 = smov 0  }
   0x2   :  { %s23774_s14 = smov 0   ;;  %s23776_s15 = smov 0  }
   0x3 LB: > { %s23791_s16 = sadd.s32 4294967295, %s23678_s15   ;;  %s22194_s17 = sadd.s32 4294967294, %s23678_s15   ;;  %s23678_s15 = sphi %s23776_s15, %s27186_s15   ;;  %s23674_s14 = sphi %s23774_s14, %s27185_s14   ;;  %s23670_s13 = sphi %s23772_s13, %s27184_s13   ;;  %s23666_s12 = sphi %s23770_s12, %s27183_s12  }
   0x4   : > { %s23795_s18 = sadd.s32 1, %s23678_s15   ;;  %s91_s19 = sadd.s32 1, %s23674_s14 }
   0x5   : > { %s88_s20 = ssub.s32 %s23678_s15, %s23795_s18  ;;  %p101_p0 = scmp.ne.s32.totalorder %s23674_s14, %s23670_s13 }
   0x6   : > { %p89_p1 = scmp.eq.s32.totalorder %s88_s20, 0  ;;  %p102_p2 = scmp.eq.s32.totalorder %s23791_s16, 1 }
   0x7   : > { %p107_p3 = scmp.ne.s32.totalorder %s23670_s13, %s23666_s12  ;;  %p108_p4 = scmp.eq.s32.totalorder %s22194_s17, 1 }
   0x8   : > { %s23806_s21 = scalar_select %p89_p1, %s23674_s14, %s91_s19  }
   0x9   : > { %p23808_p5 = por %p102_p2, %p101_p0  ;;  %p23812_p6 = por %p108_p4, %p107_p3 }
   0xa   : > { %p22197_p7 = scmp.ge.s32.totalorder %s23678_s15, 1  ;;  %p140_p8 = scmp.lt.s32.totalorder %s23678_s15, 3 }
   0xc   : > { %p141_p9 = pnand %p22197_p7, %p140_p8 }
   0xd   : > { %v169_v0 = vld [vmem:[%s26944_s2] sm:$0xf] (!%p141_p9)  ;;  %p164_p10 = scmp.lt.s32.totalorder (!%p141_p9), %s23791_s16, 1  ;;  %v23680_v1 = vmov (!%p141_p9), 0   ;;  %s23681_s4 = smov (!%p141_p9), 127   ;;  %v23682_v7 = vmov (!%p141_p9), 0.0  }
   0xe   : > { %144 = sbr.rel (%p141_p9) target bundleno = 1577 (0x629), region = 32  ;;  %23601 = vset.pattern.permute.xlu0 (!%p141_p9), %v23680_v1  ;;  %287 = vmatprep.mubr.f32.mxu0 (!%p141_p9), %v23682_v7  ;;  %s23683_s5 = smov (!%p141_p9), 126   ;;  %vm205_vm0 = vcmask (!%p141_p9), 1039360   ;;  %vm214_vm1 = vcmask (!%p141_p9), 1043456   ;;  %v22200_v25 = vld [vmem:[%s26943_s1 + $0x4] sm:$0xf] (!%p141_p9) }
   0xf   : > { %172 = vperm.xlu0 (!%p141_p9), %23601, %v169_v0   ;;  %358 = vmatprep.mubr.f32.mxu1 (!%p141_p9), %v23682_v7  ;;  %s23684_s6 = smov (!%p141_p9), 125   ;;  %s23685_s7 = smov (!%p141_p9), 124   ;;  %vm210_vm2 = vcmask (!%p141_p9), 31744   ;;  %v186_v34 = vld [vmem:[%s26943_s1] sm:$0xf] (!%p141_p9)  ;;  %vm538_vm3 = vcmask (!%p141_p9), 1031168  }
  0x10   : > { %s23686_s8 = smov (!%p141_p9), 123   ;;  %s23687_s9 = smov (!%p141_p9), 122   ;;  %v22213_v43 = vld [vmem:[%s26943_s1 + $0x8] sm:$0xf] (!%p141_p9)  ;;  %vm720_vm4 = vcmask (!%p141_p9), 1022976   ;;  %vm902_vm5 = vcmask (!%p141_p9), 1014784  }
  0x11   : > { %s23688_s10 = smov (!%p141_p9), 121   ;;  %s23689_s11 = smov (!%p141_p9), 120   ;;  %v22220_v54 = vld [vmem:[%s26943_s1 + $0xc] sm:$0xf] (!%p141_p9)  ;;  %v22227_v61 = vld [vmem:[%s26943_s1 + $0x10] sm:$0xf] (!%p141_p9) }
  0x12   : > { %s23690_s17 = smov (!%p141_p9), 119   ;;  %s23691_s19 = smov (!%p141_p9), 118   ;;  %vm1084_vm6 = vcmask (!%p141_p9), 1006592   ;;  %vm1266_vm7 = vcmask (!%p141_p9), 998400   ;;  %vm1448_vm8 = vcmask (!%p141_p9), 990208   ;;  %vm1630_vm9 = vcmask (!%p141_p9), 982016  }
  0x13   : > { %s23692_s20 = smov (!%p141_p9), 101   ;;  %s23693_s24 = smov (!%p141_p9), 102   ;;  %vm1812_vm10 = vcmask (!%p141_p9), 973824   ;;  %vm1994_vm11 = vcmask (!%p141_p9), 965632   ;;  %vm2192_vm12 = vcmask (!%p141_p9), 826368   ;;  %vm2360_vm13 = vcmask (!%p141_p9), 834560  }
  0x14   : > { %s23694_s25 = smov (!%p141_p9), 100   ;;  %s23695_s28 = smov (!%p141_p9), 99   ;;  %vm2538_vm14 = vcmask (!%p141_p9), 818176   ;;  %vm2720_vm15 = vcmask (!%p141_p9), 809984  }
  0x15   : > { %s165_s26 = scalar_select %p164_p10, %s23791_s16, 1 }
  0x16   : > { %s26946_s29 = smov 96  }
  0x17   : > { %s23492_s27 = smul.u32 28, %s165_s26  ;;  %s26948_s26 = smov 95  }
  0x19   : > { %s23826_s30 = scalar_lea.vmem %s26942_s0, %s23492_s27  ;;  %s23697_s27 = smov 97  }
  0x1a   : > { %v23829_v2 = vld [vmem:[%s23826_s30 + $0x8] sm:$0xff]  ;;  %v23832_v3 = vld [vmem:[%s23826_s30] sm:$0xff]  ;;  %v187_v5 = vld [vmem:[%s23826_s30 + $0x10] sm:$0xf] }
  0x1b   : > { %199 = vrot.lane.b32.xlu1 %v23829_v2, %s23681_s4  ;;  %195 = vrot.lane.b32.xlu0 %v23832_v3, %s23681_s4  ;;  %v23838_v4 = vcombine.high %v23829_v2, %v23829_v2  ;;  %v23843_v6 = vcombine.high %v23832_v3, %v23832_v3  ;;  %v520_v8 = vld [vmem:[%s23826_s30 + $0x10] sm:$0xf] }
  0x1c   : > { %v702_v9 = vld [vmem:[%s23826_s30 + $0x10] sm:$0xf] }
  0x1d   : > { %v884_v10 = vld [vmem:[%s23826_s30 + $0x10] sm:$0xf] }
  0x1e   : > { %v1066_v11 = vld [vmem:[%s23826_s30 + $0x10] sm:$0xf] }
  0x1f   : > { %203 = vrot.lane.b32.xlu1 %v187_v5, %s23681_s4  ;;  %201 = vrot.lane.b32.xlu0 %v23838_v4, %s23681_s4  ;;  %v1248_v12 = vld [vmem:[%s23826_s30 + $0x10] sm:$0xf] }
  0x20   : > { %v1430_v13 = vld [vmem:[%s23826_s30 + $0x10] sm:$0xf] }
  0x21   : > { %v1612_v14 = vld [vmem:[%s23826_s30 + $0x10] sm:$0xf] }
  0x22   : > { %v1794_v15 = vld [vmem:[%s23826_s30 + $0x10] sm:$0xf] }
  0x23   : > { %197 = vrot.lane.b32.xlu1 %v23843_v6, %s23681_s4  ;;  %528 = vrot.lane.b32.xlu0 %v23832_v3, %s23683_s5  ;;  %v1976_v16 = vld [vmem:[%s23826_s30 + $0x10] sm:$0xf]  ;;  %s26980_s4 = smov 48  }
  0x24   : > { %v2172_v17 = vld [vmem:[%s23826_s30 + $0x10] sm:$0xf] }
  0x25   : > { %v2520_v22 = vld [vmem:[%s23826_s30 + $0x10] sm:$0xf] }
  0x26   : > { %v2702_v33 = vld [vmem:[%s23826_s30 + $0x10] sm:$0xf] }
  0x27   : > { %530 = vrot.lane.b32.xlu1 %v23843_v6, %s23683_s5  ;;  %532 = vrot.lane.b32.xlu0 %v23829_v2, %s23683_s5  ;;  %v2884_v45 = vld [vmem:[%s23826_s30 + $0x10] sm:$0xf] }
  0x28   : > { %v3066_v56 = vld [vmem:[%s23826_s30 + $0x10] sm:$0xf] }
  0x2b   : > { %534 = vrot.lane.b32.xlu1 %v23838_v4, %s23683_s5  ;;  %536 = vrot.lane.b32.xlu0 %v520_v8, %s23683_s5  ;;  %v3248_v8 = vld [vmem:[%s23826_s30 + $0x10] sm:$0xf] }
  0x2f   : > { %710 = vrot.lane.b32.xlu1 %v23832_v3, %s23684_s6  ;;  %712 = vrot.lane.b32.xlu0 %v23843_v6, %s23684_s6 }
  0x33   : > { %714 = vrot.lane.b32.xlu1 %v23829_v2, %s23684_s6  ;;  %716 = vrot.lane.b32.xlu0 %v23838_v4, %s23684_s6 }
  0x37   : > { %718 = vrot.lane.b32.xlu1 %v702_v9, %s23684_s6  ;;  %892 = vrot.lane.b32.xlu0 %v23832_v3, %s23685_s7 }
  0x3b   : > { %894 = vrot.lane.b32.xlu1 %v23843_v6, %s23685_s7  ;;  %896 = vrot.lane.b32.xlu0 %v23829_v2, %s23685_s7 }
  0x3f   : > { %898 = vrot.lane.b32.xlu1 %v23838_v4, %s23685_s7  ;;  %900 = vrot.lane.b32.xlu0 %v884_v10, %s23685_s7 }
  0x43   : > { %1074 = vrot.lane.b32.xlu1 %v23832_v3, %s23686_s8  ;;  %1076 = vrot.lane.b32.xlu0 %v23843_v6, %s23686_s8 }
  0x47   : > { %1078 = vrot.lane.b32.xlu1 %v23829_v2, %s23686_s8  ;;  %1080 = vrot.lane.b32.xlu0 %v23838_v4, %s23686_s8 }
  0x4b   : > { %1082 = vrot.lane.b32.xlu1 %v1066_v11, %s23686_s8  ;;  %1258 = vrot.lane.b32.xlu0 %v23843_v6, %s23687_s9 }
  0x4f   : > { %1260 = vrot.lane.b32.xlu1 %v23829_v2, %s23687_s9  ;;  %1262 = vrot.lane.b32.xlu0 %v23838_v4, %s23687_s9 }
  0x53   : > { %1264 = vrot.lane.b32.xlu1 %v1248_v12, %s23687_s9  ;;  %1256 = vrot.lane.b32.xlu0 %v23832_v3, %s23687_s9 }
  0x57   : > { %1440 = vrot.lane.b32.xlu1 %v23843_v6, %s23688_s10  ;;  %1442 = vrot.lane.b32.xlu0 %v23829_v2, %s23688_s10 }
  0x5b   : > { %1444 = vrot.lane.b32.xlu1 %v23838_v4, %s23688_s10  ;;  %1446 = vrot.lane.b32.xlu0 %v1430_v13, %s23688_s10  ;;  %v22234_v13 = vld [vmem:[%s26943_s1 + $0x14] sm:$0xf] }
  0x5f   : > { %1438 = vrot.lane.b32.xlu1 %v23832_v3, %s23688_s10  ;;  %1622 = vrot.lane.b32.xlu0 %v23843_v6, %s23689_s11 }
  0x63   : > { %1624 = vrot.lane.b32.xlu1 %v23829_v2, %s23689_s11  ;;  %1626 = vrot.lane.b32.xlu0 %v23838_v4, %s23689_s11 }
  0x67   : > { %1628 = vrot.lane.b32.xlu1 %v1612_v14, %s23689_s11  ;;  %1620 = vrot.lane.b32.xlu0 %v23832_v3, %s23689_s11 }
  0x6b   : > { %1804 = vrot.lane.b32.xlu1 %v23843_v6, %s23690_s17  ;;  %1806 = vrot.lane.b32.xlu0 %v23829_v2, %s23690_s17 }
  0x6f   : > { %1808 = vrot.lane.b32.xlu1 %v23838_v4, %s23690_s17  ;;  %1810 = vrot.lane.b32.xlu0 %v1794_v15, %s23690_s17 }
  0x73   : > { %1802 = vrot.lane.b32.xlu1 %v23832_v3, %s23690_s17  ;;  %1986 = vrot.lane.b32.xlu0 %v23843_v6, %s23691_s19 }
  0x77   : > { %1988 = vrot.lane.b32.xlu1 %v23829_v2, %s23691_s19  ;;  %1990 = vrot.lane.b32.xlu0 %v23838_v4, %s23691_s19 }
  0x7b   : > { %1992 = vrot.lane.b32.xlu1 %v1976_v16, %s23691_s19  ;;  %1984 = vrot.lane.b32.xlu0 %v23832_v3, %s23691_s19 }
  0x7f   : > { %2184 = vrot.lane.b32.xlu1 %v23843_v6, %s23692_s20  ;;  %2186 = vrot.lane.b32.xlu0 %v23829_v2, %s23692_s20 }
  0x83   : > { %2188 = vrot.lane.b32.xlu1 %v23838_v4, %s23692_s20  ;;  %2190 = vrot.lane.b32.xlu0 %v2172_v17, %s23692_s20 }
  0x87   : > { %2182 = vrot.lane.b32.xlu1 %v23832_v3, %s23692_s20  ;;  %2352 = vrot.lane.b32.xlu0 %v23843_v6, %s23693_s24  ;;  %s23696_s20 = smov 98  }
  0x8b   : > { %2354 = vrot.lane.b32.xlu1 %v23829_v2, %s23693_s24  ;;  %2356 = vrot.lane.b32.xlu0 %v23838_v4, %s23693_s24 }
  0x8d   : > { %v200_v18 = vpop.permute.xlu1 %199 }
  0x8e   : > { %v23952_v20 = vpop.permute.xlu0 %172 }
  0x8f   : > { %2358 = vrot.lane.b32.xlu1 %v2172_v17, %s23693_s24  ;;  %2350 = vrot.lane.b32.xlu0 %v23832_v3, %s23693_s24  ;;  %s26956_s24 = smov 74  }
  0x91   : > { %v204_v19 = vpop.permute.xlu1 %203 }
  0x92   : > { %v196_v24 = vpop.permute.xlu0 %195 }
  0x93   : > { %2530 = vrot.lane.b32.xlu1 %v23843_v6, %s23694_s25  ;;  %2532 = vrot.lane.b32.xlu0 %v23829_v2, %s23694_s25 }
  0x95   : > { %v198_v21 = vpop.permute.xlu1 %197 }
  0x96   : > { %v207_v23 = vsel %vm205_vm0, %v198_v21, %v200_v18  ;;  %v206_v26 = vsel %vm205_vm0, %v196_v24, %v198_v21  ;;  %v202_v28 = vpop.permute.xlu0 %201 }
  0x97   : > { %2534 = vrot.lane.b32.xlu1 %v23838_v4, %s23694_s25  ;;  %22201 = vmatprep.subr.msk.mxu0 %vm214_vm1, %v207_v23  ;;  %v209_v29 = vsel %vm205_vm0, %v202_v28, %v204_v19  ;;  %v208_v30 = vsel %vm205_vm0, %v200_v18, %v202_v28  ;;  %v3430_v19 = vld [vmem:[%s23826_s30 + $0x10] sm:$0xf]  ;;  %vm2902_vm0 = vcmask 801792  }
  0x98   : > { %2536 = vrot.lane.b32.xlu0 %v2520_v22, %s23694_s25  ;;  %22202 = vmatpush1.msk.msra.mxu0 %vm214_vm1, %v206_v26 }
  0x99   : > { %v531_v27 = vpop.permute.xlu1 %530  ;;  %22203 = vmatmul.mubr.msk.f32.vlgmr.msra.gmra.mrb[0].mxu0 %vm210_vm2, %v22200_v25  ;;  %22207 = vmatprep.subr.msk.mxu0 %vm214_vm1, %v23843_v6 }
  0x9a   : > { %22208 = vmatpush1.msk.msra.mxu0 %vm214_vm1, %v23832_v3  ;;  %440 = vmatprep.mubr.f32.mxu0 %v23682_v7  ;;  %v529_v32 = vpop.permute.xlu0 %528 }
  0x9b   : > { %2528 = vrot.lane.b32.xlu1 %v23832_v3, %s23694_s25  ;;  %22204 = vmatprep.subr.msk.mxu1 %vm214_vm1, %v209_v29  ;;  %v539_v39 = vsel %vm538_vm3, %v529_v32, %v531_v27 }
  0x9c   : > { %2712 = vrot.lane.b32.xlu0 %v23843_v6, %s23695_s28  ;;  %22205 = vmatpush1.msk.msra.mxu1 %vm214_vm1, %v208_v30 }
  0x9d   : > { %v535_v31 = vpop.permute.xlu1 %534  ;;  %22206 = vmatmul.mubr.msk.f32.vlgmr.msra.gmra.mrb[0].mxu1 %vm210_vm2, %v22200_v25  ;;  %22210 = vmatprep.subr.msk.mxu1 %vm214_vm1, %v23838_v4 }
  0x9e   : > { %22211 = vmatpush1.msk.msra.mxu1 %vm214_vm1, %v23829_v2  ;;  %511 = vmatprep.mubr.f32.mxu1 %v23682_v7  ;;  %v533_v36 = vpop.permute.xlu0 %532 }
  0x9f   : > { %2714 = vrot.lane.b32.xlu1 %v23829_v2, %s23695_s28  ;;  %v540_v37 = vsel %vm538_vm3, %v531_v27, %v533_v36  ;;  %v541_v44 = vsel %vm538_vm3, %v533_v36, %v535_v31  ;;  %v22241_v27 = vld [vmem:[%s26943_s1 + $0x18] sm:$0xf] }
  0xa0   : > { %2716 = vrot.lane.b32.xlu0 %v23838_v4, %s23695_s28  ;;  %22214 = vmatprep.subr.msk.mxu0 %vm214_vm1, %v540_v37 }
  0xa1   : > { %v711_v35 = vpop.permute.xlu1 %710  ;;  %22209 = vmatmul.mubr.msk.f32.vlgmr.msra.gmra.mrb[0].mxu0 %vm210_vm2, %v186_v34 }
  0xa2   : > { %618 = vmatprep.mubr.f32.mxu0 %v23682_v7  ;;  %22215 = vmatpush1.msk.msra.mxu0 %vm214_vm1, %v539_v39  ;;  %v537_v40 = vpop.permute.xlu0 %536  ;;  %v22248_v39 = vld [vmem:[%s26943_s1 + $0x1c] sm:$0xf] }
  0xa3   : > { %2718 = vrot.lane.b32.xlu1 %v2702_v33, %s23695_s28  ;;  %v542_v41 = vsel %vm538_vm3, %v535_v31, %v537_v40  ;;  %v3612_v31 = vld [vmem:[%s23826_s30 + $0x10] sm:$0xf] }
  0xa4   : > { %2710 = vrot.lane.b32.xlu0 %v23832_v3, %s23695_s28  ;;  %22217 = vmatprep.subr.msk.mxu1 %vm214_vm1, %v542_v41 }
  0xa5   : > { %v715_v38 = vpop.permute.xlu1 %714  ;;  %22212 = vmatmul.mubr.msk.f32.vlgmr.msra.gmra.mrb[0].mxu1 %vm210_vm2, %v186_v34 }
  0xa6   : > { %689 = vmatprep.mubr.f32.mxu1 %v23682_v7  ;;  %22218 = vmatpush1.msk.msra.mxu1 %vm214_vm1, %v541_v44  ;;  %v713_v46 = vpop.permute.xlu0 %712 }
  0xa7   : > { %2894 = vrot.lane.b32.xlu1 %v23843_v6, %s23696_s20  ;;  %v721_v47 = vsel %vm720_vm4, %v711_v35, %v713_v46  ;;  %v722_v48 = vsel %vm720_vm4, %v713_v46, %v715_v38 }
  0xa8   : > { %2896 = vrot.lane.b32.xlu0 %v23829_v2, %s23696_s20  ;;  %22221 = vmatprep.subr.msk.mxu0 %vm214_vm1, %v722_v48 }
  0xa9   : > { %v719_v42 = vpop.permute.xlu1 %718  ;;  %22216 = vmatmul.mubr.msk.f32.vlgmr.msra.gmra.mrb[0].mxu0 %vm210_vm2, %v22213_v43 }
  0xaa   : > { %800 = vmatprep.mubr.f32.mxu0 %v23682_v7  ;;  %22222 = vmatpush1.msk.msra.mxu0 %vm214_vm1, %v721_v47  ;;  %v717_v50 = vpop.permute.xlu0 %716 }
  0xab   : > { %2898 = vrot.lane.b32.xlu1 %v23838_v4, %s23696_s20  ;;  %v723_v51 = vsel %vm720_vm4, %v715_v38, %v717_v50  ;;  %v724_v52 = vsel %vm720_vm4, %v717_v50, %v719_v42  ;;  %v3794_v42 = vld [vmem:[%s23826_s30 + $0x10] sm:$0xf] }
  0xac   : > { %2900 = vrot.lane.b32.xlu0 %v2884_v45, %s23696_s20  ;;  %22224 = vmatprep.subr.msk.mxu1 %vm214_vm1, %v724_v52 }
  0xad   : > { %v895_v49 = vpop.permute.xlu1 %894  ;;  %22219 = vmatmul.mubr.msk.f32.vlgmr.msra.gmra.mrb[0].mxu1 %vm210_vm2, %v22213_v43 }
  0xae   : > { %871 = vmatprep.mubr.f32.mxu1 %v23682_v7  ;;  %22225 = vmatpush1.msk.msra.mxu1 %vm214_vm1, %v723_v51  ;;  %v893_v55 = vpop.permute.xlu0 %892 }
  0xaf   : > { %2892 = vrot.lane.b32.xlu1 %v23832_v3, %s23696_s20  ;;  %v903_v62 = vsel %vm902_vm5, %v893_v55, %v895_v49 }
  0xb0   : > { %3076 = vrot.lane.b32.xlu0 %v23843_v6, %s23697_s27 }
  0xb1   : > { %v899_v53 = vpop.permute.xlu1 %898  ;;  %22223 = vmatmul.mubr.msk.f32.vlgmr.msra.gmra.mrb[0].mxu0 %vm210_vm2, %v22220_v54 }
  0xb2   : > { %982 = vmatprep.mubr.f32.mxu0 %v23682_v7  ;;  %v897_v58 = vpop.permute.xlu0 %896 }
  0xb3   : > { %3078 = vrot.lane.b32.xlu1 %v23829_v2, %s23697_s27  ;;  %v904_v59 = vsel %vm902_vm5, %v895_v49, %v897_v58  ;;  %v905_v5 = vsel %vm902_vm5, %v897_v58, %v899_v53  ;;  %v22255_v49 = vld [vmem:[%s26943_s1 + $0x20] sm:$0xf] }
  0xb4   : > { %3080 = vrot.lane.b32.xlu0 %v23838_v4, %s23697_s27  ;;  %22228 = vmatprep.subr.msk.mxu0 %vm214_vm1, %v904_v59 }
  0xb5   : > { %v1075_v57 = vpop.permute.xlu1 %1074  ;;  %22226 = vmatmul.mubr.msk.f32.vlgmr.msra.gmra.mrb[0].mxu1 %vm210_vm2, %v22220_v54  ;;  %22229 = vmatpush1.msk.msra.mxu0 %vm214_vm1, %v903_v62 }
  0xb6   : > { %1053 = vmatprep.mubr.f32.mxu1 %v23682_v7  ;;  %v901_v63 = vpop.permute.xlu0 %900 }
  0xb7   : > { %3082 = vrot.lane.b32.xlu1 %v3066_v56, %s23697_s27  ;;  %v906_v0 = vsel %vm902_vm5, %v899_v53, %v901_v63  ;;  %v3976_v53 = vld [vmem:[%s23826_s30 + $0x10] sm:$0xf] }
  0xb8   : > { %3074 = vrot.lane.b32.xlu0 %v23832_v3, %s23697_s27  ;;  %22231 = vmatprep.subr.msk.mxu1 %vm214_vm1, %v906_v0  ;;  %v4172_v0 = vld [vmem:[%s23826_s30 + $0x10] sm:$0xf] }
  0xb9   : > { %v1079_v60 = vpop.permute.xlu1 %1078  ;;  %22230 = vmatmul.mubr.msk.f32.vlgmr.msra.gmra.mrb[0].mxu0 %vm210_vm2, %v22227_v61  ;;  %22232 = vmatpush1.msk.msra.mxu1 %vm214_vm1, %v905_v5 }
  0xba   : > { %1164 = vmatprep.mubr.f32.mxu0 %v23682_v7  ;;  %v1077_v9 = vpop.permute.xlu0 %1076 }
  0xbb   : > { %3258 = vrot.lane.b32.xlu1 %v23843_v6, %s26946_s29  ;;  %v1085_v10 = vsel %vm1084_vm6, %v1075_v57, %v1077_v9  ;;  %v1086_v11 = vsel %vm1084_vm6, %v1077_v9, %v1079_v60 }
  0xbc   : > { %3260 = vrot.lane.b32.xlu0 %v23829_v2, %s26946_s29  ;;  %22235 = vmatprep.subr.msk.mxu0 %vm214_vm1, %v1086_v11 }
  0xbd   : > { %v1083_v1 = vpop.permute.xlu1 %1082  ;;  %22233 = vmatmul.mubr.msk.f32.vlgmr.msra.gmra.mrb[0].mxu1 %vm210_vm2, %v22227_v61  ;;  %22236 = vmatpush1.msk.msra.mxu0 %vm214_vm1, %v1085_v10  ;;  %v22262_v61 = vld [vmem:[%s26943_s1 + $0x24] sm:$0xf] }
  0xbe   : > { %1235 = vmatprep.mubr.f32.mxu1 %v23682_v7  ;;  %v1081_v14 = vpop.permute.xlu0 %1080 }
  0xbf   : > { %3262 = vrot.lane.b32.xlu1 %v23838_v4, %s26946_s29  ;;  %v1087_v15 = vsel %vm1084_vm6, %v1079_v60, %v1081_v14  ;;  %v1088_v16 = vsel %vm1084_vm6, %v1081_v14, %v1083_v1 }
  0xc0   : > { %3264 = vrot.lane.b32.xlu0 %v3248_v8, %s26946_s29  ;;  %22238 = vmatprep.subr.msk.mxu1 %vm214_vm1, %v1088_v16 }
  0xc1   : > { %v1261_v12 = vpop.permute.xlu1 %1260  ;;  %22237 = vmatmul.mubr.msk.f32.vlgmr.msra.gmra.mrb[0].mxu0 %vm210_vm2, %v22234_v13  ;;  %22239 = vmatpush1.msk.msra.mxu1 %vm214_vm1, %v1087_v15 }
  0xc2   : > { %1346 = vmatprep.mubr.f32.mxu0 %v23682_v7  ;;  %v1259_v18 = vpop.permute.xlu0 %1258 }
  0xc3   : > { %3256 = vrot.lane.b32.xlu1 %v23832_v3, %s26946_s29  ;;  %v1268_v21 = vsel %vm1266_vm7, %v1259_v18, %v1261_v12  ;;  %s26950_s29 = smov 94  }
  0xc4   : > { %3440 = vrot.lane.b32.xlu0 %v23843_v6, %s26948_s26  ;;  %22242 = vmatprep.subr.msk.mxu0 %vm214_vm1, %v1268_v21 }
  0xc5   : > { %v1265_v17 = vpop.permute.xlu1 %1264  ;;  %22240 = vmatmul.mubr.msk.f32.vlgmr.msra.gmra.mrb[0].mxu1 %vm210_vm2, %v22234_v13 }
  0xc6   : > { %1417 = vmatprep.mubr.f32.mxu1 %v23682_v7  ;;  %v1263_v23 = vpop.permute.xlu0 %1262 }
  0xc7   : > { %3442 = vrot.lane.b32.xlu1 %v23829_v2, %s26948_s26  ;;  %v1269_v24 = vsel %vm1266_vm7, %v1261_v12, %v1263_v23  ;;  %v1270_v25 = vsel %vm1266_vm7, %v1263_v23, %v1265_v17  ;;  %v22269_v12 = vld [vmem:[%s26943_s1 + $0x28] sm:$0xf] }
  0xc8   : > { %3444 = vrot.lane.b32.xlu0 %v23838_v4, %s26948_s26  ;;  %22245 = vmatprep.subr.msk.mxu1 %vm214_vm1, %v1270_v25 }
  0xc9   : > { %v1441_v22 = vpop.permute.xlu1 %1440  ;;  %22246 = vmatpush1.msk.msra.mxu1 %vm214_vm1, %v1269_v24 }
  0xca   : > { %v1257_v28 = vpop.permute.xlu0 %1256 }
  0xcb   : > { %3446 = vrot.lane.b32.xlu1 %v3430_v19, %s26948_s26  ;;  %v1267_v29 = vsel %vm1266_vm7, %v1257_v28, %v1259_v18  ;;  %v22277_v19 = vld [vmem:[%s26943_s1 + $0x30] sm:$0xf] }
  0xcc   : > { %3438 = vrot.lane.b32.xlu0 %v23832_v3, %s26948_s26  ;;  %22243 = vmatpush1.msk.msra.mxu0 %vm214_vm1, %v1267_v29  ;;  %s26952_s26 = smov 93  }
  0xcd   : > { %v1445_v26 = vpop.permute.xlu1 %1444  ;;  %22247 = vmatmul.mubr.msk.f32.vlgmr.msra.gmra.mrb[0].mxu1 %vm210_vm2, %v22241_v27  ;;  %22244 = vmatmul.mubr.msk.f32.vlgmr.msra.gmra.mrb[0].mxu0 %vm210_vm2, %v22241_v27  ;;  %v4520_v27 = vld [vmem:[%s23826_s30 + $0x10] sm:$0xf] }
  0xce   : > { %1599 = vmatprep.mubr.f32.mxu1 %v23682_v7  ;;  %v1443_v32 = vpop.permute.xlu0 %1442  ;;  %1528 = vmatprep.mubr.f32.mxu0 %v23682_v7 }
  0xcf   : > { %3622 = vrot.lane.b32.xlu1 %v23843_v6, %s26950_s29  ;;  %v1450_v33 = vsel %vm1448_vm8, %v1441_v22, %v1443_v32  ;;  %v1451_v40 = vsel %vm1448_vm8, %v1443_v32, %v1445_v26 }
  0xd0   : > { %3624 = vrot.lane.b32.xlu0 %v23829_v2, %s26950_s29  ;;  %22249 = vmatprep.subr.msk.mxu0 %vm214_vm1, %v1450_v33 }
  0xd1   : > { %v1439_v30 = vpop.permute.xlu1 %1438 }
  0xd2   : > { %v1449_v35 = vsel %vm1448_vm8, %v1439_v30, %v1441_v22  ;;  %v1447_v36 = vpop.permute.xlu0 %1446 }
  0xd3   : > { %3626 = vrot.lane.b32.xlu1 %v23838_v4, %s26950_s29  ;;  %22250 = vmatpush1.msk.msra.mxu0 %vm214_vm1, %v1449_v35  ;;  %v1452_v37 = vsel %vm1448_vm8, %v1445_v26, %v1447_v36 }
  0xd4   : > { %3628 = vrot.lane.b32.xlu0 %v3612_v31, %s26950_s29  ;;  %22252 = vmatprep.subr.msk.mxu1 %vm214_vm1, %v1452_v37 }
  0xd5   : > { %v1625_v34 = vpop.permute.xlu1 %1624  ;;  %22253 = vmatpush1.msk.msra.mxu1 %vm214_vm1, %v1451_v40  ;;  %22251 = vmatmul.mubr.msk.f32.vlgmr.msra.gmra.mrb[0].mxu0 %vm210_vm2, %v22248_v39 }
  0xd6   : > { %v1623_v41 = vpop.permute.xlu0 %1622  ;;  %22254 = vmatmul.mubr.msk.f32.vlgmr.msra.gmra.mrb[0].mxu1 %vm210_vm2, %v22248_v39  ;;  %1710 = vmatprep.mubr.f32.mxu0 %v23682_v7 }
  0xd7   : > { %3620 = vrot.lane.b32.xlu1 %v23832_v3, %s26950_s29  ;;  %v1632_v43 = vsel %vm1630_vm9, %v1623_v41, %v1625_v34  ;;  %1781 = vmatprep.mubr.f32.mxu1 %v23682_v7  ;;  %s26954_s29 = smov 92  }
  0xd8   : > { %3804 = vrot.lane.b32.xlu0 %v23843_v6, %s26952_s26  ;;  %22256 = vmatprep.subr.msk.mxu0 %vm214_vm1, %v1632_v43  ;;  %v24276_v43 = vld [vmem:[%s23826_s30 + $0x8] sm:$0xff] }
  0xd9   : > { %v1629_v38 = vpop.permute.xlu1 %1628 }
  0xda   : > { %v1627_v45 = vpop.permute.xlu0 %1626 }
  0xdb   : > { %3806 = vrot.lane.b32.xlu1 %v23829_v2, %s26952_s26  ;;  %v1633_v46 = vsel %vm1630_vm9, %v1625_v34, %v1627_v45  ;;  %v1634_v47 = vsel %vm1630_vm9, %v1627_v45, %v1629_v38  ;;  %v22276_v34 = vld [vmem:[%s26943_s1 + $0x2c] sm:$0xf]  ;;  %v24258_v38 = vld [vmem:[%s23826_s30] sm:$0xff] }
  0xdc   : > { %3808 = vrot.lane.b32.xlu0 %v23838_v4, %s26952_s26  ;;  %22259 = vmatprep.subr.msk.mxu1 %vm214_vm1, %v1634_v47  ;;  %v22290_v47 = vld [vmem:[%s26943_s1 + $0x34] sm:$0xf] }
  0xdd   : > { %v1805_v44 = vpop.permute.xlu1 %1804  ;;  %22260 = vmatpush1.msk.msra.mxu1 %vm214_vm1, %v1633_v46  ;;  %v24281_v46 = vcombine.high %v24276_v43, %v24276_v43 }
  0xde   : > { %v1621_v50 = vpop.permute.xlu0 %1620  ;;  %22261 = vmatmul.mubr.msk.f32.vlgmr.msra.gmra.mrb[0].mxu1 %vm210_vm2, %v22255_v49 }
  0xdf   : > { %3810 = vrot.lane.b32.xlu1 %v3794_v42, %s26952_s26  ;;  %v1631_v51 = vsel %vm1630_vm9, %v1621_v50, %v1623_v41  ;;  %1963 = vmatprep.mubr.f32.mxu1 %v23682_v7  ;;  %v24268_v41 = vcombine.high %v24258_v38, %v24258_v38 }
  0xe0   : > { %3802 = vrot.lane.b32.xlu0 %v23832_v3, %s26952_s26  ;;  %22257 = vmatpush1.msk.msra.mxu0 %vm214_vm1, %v1631_v51  ;;  %s23703_s26 = smov 75  }
  0xe1   : > { %v1809_v48 = vpop.permute.xlu1 %1808  ;;  %22258 = vmatmul.mubr.msk.f32.vlgmr.msra.gmra.mrb[0].mxu0 %vm210_vm2, %v22255_v49  ;;  %v4884_v49 = vld [vmem:[%s23826_s30 + $0x10] sm:$0xf] }
  0xe2   : > { %v1807_v54 = vpop.permute.xlu0 %1806  ;;  %1892 = vmatprep.mubr.f32.mxu0 %v23682_v7 }
  0xe3   : > { %3986 = vrot.lane.b32.xlu1 %v23843_v6, %s26954_s29  ;;  %v1814_v55 = vsel %vm1812_vm10, %v1805_v44, %v1807_v54  ;;  %v1815_v62 = vsel %vm1812_vm10, %v1807_v54, %v1809_v48 }
  0xe4   : > { %3988 = vrot.lane.b32.xlu0 %v23829_v2, %s26954_s29  ;;  %22263 = vmatprep.subr.msk.mxu0 %vm214_vm1, %v1814_v55 }
  0xe5   : > { %v1803_v52 = vpop.permute.xlu1 %1802 }
  0xe6   : > { %v1813_v57 = vsel %vm1812_vm10, %v1803_v52, %v1805_v44  ;;  %v1811_v58 = vpop.permute.xlu0 %1810 }
  0xe7   : > { %3990 = vrot.lane.b32.xlu1 %v23838_v4, %s26954_s29  ;;  %22264 = vmatpush1.msk.msra.mxu0 %vm214_vm1, %v1813_v57  ;;  %v1816_v59 = vsel %vm1812_vm10, %v1809_v48, %v1811_v58 }
  0xe8   : > { %3992 = vrot.lane.b32.xlu0 %v3976_v53, %s26954_s29  ;;  %22266 = vmatprep.subr.msk.mxu1 %vm214_vm1, %v1816_v59 }
  0xe9   : > { %v1989_v56 = vpop.permute.xlu1 %1988  ;;  %22267 = vmatpush1.msk.msra.mxu1 %vm214_vm1, %v1815_v62  ;;  %22265 = vmatmul.mubr.msk.f32.vlgmr.msra.gmra.mrb[0].mxu0 %vm210_vm2, %v22262_v61 }
  0xea   : > { %v1987_v63 = vpop.permute.xlu0 %1986  ;;  %22268 = vmatmul.mubr.msk.f32.vlgmr.msra.gmra.mrb[0].mxu1 %vm210_vm2, %v22262_v61  ;;  %2074 = vmatprep.mubr.f32.mxu0 %v23682_v7 }
  0xeb   : > { %3984 = vrot.lane.b32.xlu1 %v23832_v3, %s26954_s29  ;;  %v1996_v1 = vsel %vm1994_vm11, %v1987_v63, %v1989_v56  ;;  %2145 = vmatprep.mubr.f32.mxu1 %v23682_v7  ;;  %s23704_s29 = smov 76  }
  0xec   : > { %4184 = vrot.lane.b32.xlu0 %v23843_v6, %s23703_s26  ;;  %22270 = vmatprep.subr.msk.mxu0 %vm214_vm1, %v1996_v1 }
  0xed   : > { %v1993_v60 = vpop.permute.xlu1 %1992 }
  0xee   : > { %v1991_v8 = vpop.permute.xlu0 %1990 }
  0xef   : > { %4186 = vrot.lane.b32.xlu1 %v23829_v2, %s23703_s26  ;;  %v1997_v9 = vsel %vm1994_vm11, %v1989_v56, %v1991_v8  ;;  %v1998_v10 = vsel %vm1994_vm11, %v1991_v8, %v1993_v60  ;;  %v22297_v56 = vld [vmem:[%s26943_s1 + $0x38] sm:$0xf]  ;;  %v5066_v60 = vld [vmem:[%s23826_s30 + $0x10] sm:$0xf] }
  0xf0   : > { %4188 = vrot.lane.b32.xlu0 %v23838_v4, %s23703_s26  ;;  %22273 = vmatprep.subr.msk.mxu1 %vm214_vm1, %v1998_v10 }
  0xf1   : > { %v2185_v5 = vpop.permute.xlu1 %2184  ;;  %22274 = vmatpush1.msk.msra.mxu1 %vm214_vm1, %v1997_v9  ;;  %v22304_v9 = vld [vmem:[%s26943_s1 + $0x3c] sm:$0xf] }
  0xf2   : > { %v1985_v13 = vpop.permute.xlu0 %1984  ;;  %22275 = vmatmul.mubr.msk.f32.vlgmr.msra.gmra.mrb[0].mxu1 %vm210_vm2, %v22269_v12 }
  0xf3   : > { %4190 = vrot.lane.b32.xlu1 %v4172_v0, %s23703_s26  ;;  %v1995_v14 = vsel %vm1994_vm11, %v1985_v13, %v1987_v63  ;;  %2343 = vmatprep.mubr.f32.mxu1 %v23682_v7 }
  0xf4   : > { %4182 = vrot.lane.b32.xlu0 %v23832_v3, %s23703_s26  ;;  %22271 = vmatpush1.msk.msra.mxu0 %vm214_vm1, %v1995_v14  ;;  %s26960_s26 = smov 72  }
  0xf5   : > { %v2189_v11 = vpop.permute.xlu1 %2188  ;;  %22272 = vmatmul.mubr.msk.f32.vlgmr.msra.gmra.mrb[0].mxu0 %vm210_vm2, %v22269_v12  ;;  %v5248_v12 = vld [vmem:[%s23826_s30 + $0x10] sm:$0xf] }
  0xf6   : > { %v2187_v16 = vpop.permute.xlu0 %2186  ;;  %2272 = vmatprep.mubr.f32.mxu0 %v23682_v7 }
  0xf7   : > { %4352 = vrot.lane.b32.xlu1 %v23843_v6, %s23704_s29  ;;  %v2194_v17 = vsel %vm2192_vm12, %v2185_v5, %v2187_v16  ;;  %v2195_v25 = vsel %vm2192_vm12, %v2187_v16, %v2189_v11 }
  0xf8   : > { %4354 = vrot.lane.b32.xlu0 %v23829_v2, %s23704_s29  ;;  %22278 = vmatprep.subr.msk.mxu0 %vm214_vm1, %v2194_v17 }
  0xf9   : > { %v2183_v15 = vpop.permute.xlu1 %2182 }
  0xfa   : > { %v2193_v21 = vsel %vm2192_vm12, %v2183_v15, %v2185_v5  ;;  %v2191_v22 = vpop.permute.xlu0 %2190 }
  0xfb   : > { %4356 = vrot.lane.b32.xlu1 %v23838_v4, %s23704_s29  ;;  %22279 = vmatpush1.msk.msra.mxu0 %vm214_vm1, %v2193_v21  ;;  %v2196_v23 = vsel %vm2192_vm12, %v2189_v11, %v2191_v22  ;;  %vm26966_vm12 = vcmask 793600  }
  0xfc   : > { %4358 = vrot.lane.b32.xlu0 %v4172_v0, %s23704_s29  ;;  %22280 = vmatmul.mubr.msk.f32.vlgmr.msra.gmra.mrb[2].mxu0 %vm210_vm2, %v22277_v19 }
  0xfd   : > { %v2355_v18 = vpop.permute.xlu1 %2354  ;;  %2440 = vmatprep.mubr.f32.mxu0 %v23682_v7  ;;  %22281 = vmatprep.subr.msk.mxu1 %vm214_vm1, %v2196_v23 }
  0xfe   : > { %22282 = vmatpush1.msk.msra.mxu1 %vm214_vm1, %v2195_v25  ;;  %v2353_v26 = vpop.permute.xlu0 %2352 }
  0xff   : > { %4350 = vrot.lane.b32.xlu1 %v23832_v3, %s23704_s29  ;;  %22283 = vmatmul.mubr.msk.f32.vlgmr.msra.gmra.mrb[2].mxu1 %vm210_vm2, %v22277_v19  ;;  %v2362_v28 = vsel %vm2360_vm13, %v2353_v26, %v2355_v18  ;;  %s26958_s29 = smov 73   ;;  %v22311_v19 = vld [vmem:[%s26943_s1 + $0x40] sm:$0xf] }
 0x100   : > { %4530 = vrot.lane.b32.xlu0 %v23843_v6, %s26956_s24  ;;  %2511 = vmatprep.mubr.f32.mxu1 %v23682_v7 }
 0x101   : > { %v2359_v24 = vpop.permute.xlu1 %2358  ;;  %22284 = vmatprep.subr.msk.mxu0 %vm214_vm1, %v2362_v28 }
 0x102   : > { %v2357_v30 = vpop.permute.xlu0 %2356 }
 0x103   : > { %4532 = vrot.lane.b32.xlu1 %v23829_v2, %s26956_s24  ;;  %v2363_v31 = vsel %vm2360_vm13, %v2355_v18, %v2357_v30  ;;  %v2364_v32 = vsel %vm2360_vm13, %v2357_v30, %v2359_v24  ;;  %v5430_v24 = vld [vmem:[%s23826_s30 + $0x10] sm:$0xf] }
 0x104   : > { %4534 = vrot.lane.b32.xlu0 %v23838_v4, %s26956_s24  ;;  %22287 = vmatprep.subr.msk.mxu1 %vm214_vm1, %v2364_v32  ;;  %v22318_v32 = vld [vmem:[%s26943_s1 + $0x44] sm:$0xf] }
 0x105   : > { %v2531_v29 = vpop.permute.xlu1 %2530  ;;  %22288 = vmatpush1.msk.msra.mxu1 %vm214_vm1, %v2363_v31 }
 0x106   : > { %v2351_v35 = vpop.permute.xlu0 %2350 }
 0x107   : > { %4536 = vrot.lane.b32.xlu1 %v4520_v27, %s26956_s24  ;;  %22289 = vmatmul.mubr.msk.f32.vlgmr.msra.gmra.mrb[2].mxu1 %vm210_vm2, %v22276_v34  ;;  %v2361_v36 = vsel %vm2360_vm13, %v2351_v35, %v2353_v26  ;;  %vm26969_vm13 = vcmask 785408   ;;  %v5612_v35 = vld [vmem:[%s23826_s30 + $0x10] sm:$0xf] }
 0x108   : > { %4528 = vrot.lane.b32.xlu0 %v23832_v3, %s26956_s24  ;;  %2689 = vmatprep.mubr.f32.mxu1 %v23682_v7  ;;  %s26962_s24 = smov 71  }
 0x109   : > { %v2535_v33 = vpop.permute.xlu1 %2534  ;;  %22285 = vmatpush1.msk.msra.mxu0 %vm214_vm1, %v2361_v36 }
 0x10a   : > { %22286 = vmatmul.mubr.msk.f32.vlgmr.msra.gmra.mrb[2].mxu0 %vm210_vm2, %v22276_v34  ;;  %v2533_v39 = vpop.permute.xlu0 %2532 }
 0x10b   : > { %4712 = vrot.lane.b32.xlu1 %v23843_v6, %s26958_s29  ;;  %v4702_v6 = vld [vmem:[%s23826_s30 + $0x10] sm:$0xf]  ;;  %2618 = vmatprep.mubr.f32.mxu0 %v23682_v7  ;;  %v2540_v40 = vsel %vm2538_vm14, %v2531_v29, %v2533_v39 }
 0x10c   : > { %4714 = vrot.lane.b32.xlu0 %v23829_v2, %s26958_s29  ;;  %22291 = vmatprep.subr.msk.mxu0 %vm214_vm1, %v2540_v40 }
 0x10d   : > { %v2529_v37 = vpop.permute.xlu1 %2528 }
 0x10e   : > { %v2539_v42 = vsel %vm2538_vm14, %v2529_v37, %v2531_v29 }
 0x10f   : > { %4716 = vrot.lane.b32.xlu1 %v23838_v4, %s26958_s29  ;;  %22292 = vmatpush1.msk.msra.mxu0 %vm214_vm1, %v2539_v42  ;;  %v2537_v4 = vpop.permute.xlu0 %2536  ;;  %v22325_v42 = vld [vmem:[%s26943_s1 + $0x48] sm:$0xf] }
 0x110   : > { %4718 = vrot.lane.b32.xlu0 %v4702_v6, %s26958_s29  ;;  %v2542_v44 = vsel %vm2538_vm14, %v2535_v33, %v2537_v4 }
 0x111   : > { %v2715_v2 = vpop.permute.xlu1 %2714  ;;  %22294 = vmatprep.subr.msk.mxu1 %vm214_vm1, %v2542_v44 }
 0x112   : > { %22293 = vmatmul.mubr.msk.f32.vlgmr.msra.gmra.mrb[2].mxu0 %vm210_vm2, %v22290_v47 }
 0x113   : > { %4710 = vrot.lane.b32.xlu1 %v23832_v3, %s26958_s29  ;;  %v2541_v3 = vsel %vm2538_vm14, %v2533_v39, %v2535_v33  ;;  %v2713_v48 = vpop.permute.xlu0 %2712  ;;  %2800 = vmatprep.mubr.f32.mxu0 %v23682_v7  ;;  %s26964_s29 = smov 70  }
 0x114   : > { %4894 = vrot.lane.b32.xlu0 %v24268_v41, %s26960_s26  ;;  %22295 = vmatpush1.msk.msra.mxu1 %vm214_vm1, %v2541_v3  ;;  %v2722_v50 = vsel %vm2720_vm15, %v2713_v48, %v2715_v2 }
 0x115   : > { %v2719_v45 = vpop.permute.xlu1 %2718  ;;  %22296 = vmatmul.mubr.msk.f32.vlgmr.msra.gmra.mrb[2].mxu1 %vm210_vm2, %v22290_v47  ;;  %22298 = vmatprep.subr.msk.mxu0 %vm214_vm1, %v2722_v50  ;;  %v5794_v47 = vld [vmem:[%s23826_s30 + $0x10] sm:$0xf] }
 0x116   : > { %2871 = vmatprep.mubr.f32.mxu1 %v23682_v7 }
 0x117   : > { %4896 = vrot.lane.b32.xlu1 %v24276_v43, %s26960_s26  ;;  %v2717_v52 = vpop.permute.xlu0 %2716 }
 0x118   : > { %4898 = vrot.lane.b32.xlu0 %v24281_v46, %s26960_s26  ;;  %v2723_v53 = vsel %vm2720_vm15, %v2715_v2, %v2717_v52  ;;  %v2724_v54 = vsel %vm2720_vm15, %v2717_v52, %v2719_v45 }
 0x119   : > { %v2895_v51 = vpop.permute.xlu1 %2894  ;;  %22301 = vmatprep.subr.msk.mxu1 %vm214_vm1, %v2724_v54  ;;  %v22332_v54 = vld [vmem:[%s26943_s1 + $0x4c] sm:$0xf] }
 0x11a   : > { %22302 = vmatpush1.msk.msra.mxu1 %vm214_vm1, %v2723_v53 }
 0x11b   : > { %4900 = vrot.lane.b32.xlu1 %v4884_v49, %s26960_s26  ;;  %v2711_v57 = vpop.permute.xlu0 %2710 }
 0x11c   : > { %4892 = vrot.lane.b32.xlu0 %v24258_v38, %s26960_s26  ;;  %v2721_v58 = vsel %vm2720_vm15, %v2711_v57, %v2713_v48  ;;  %s26967_s26 = smov 69   ;;  %v5976_v57 = vld [vmem:[%s23826_s30 + $0x10] sm:$0xf] }
 0x11d   : > { %v2899_v55 = vpop.permute.xlu1 %2898  ;;  %22303 = vmatmul.mubr.msk.f32.vlgmr.msra.gmra.mrb[2].mxu1 %vm210_vm2, %v22297_v56  ;;  %22299 = vmatpush1.msk.msra.mxu0 %vm214_vm1, %v2721_v58 }
 0x11e   : > { %3053 = vmatprep.mubr.f32.mxu1 %v23682_v7  ;;  %22300 = vmatmul.mubr.msk.f32.vlgmr.msra.gmra.mrb[2].mxu0 %vm210_vm2, %v22297_v56 }
 0x11f   : > { %5076 = vrot.lane.b32.xlu1 %v24268_v41, %s26962_s24  ;;  %v2897_v61 = vpop.permute.xlu0 %2896  ;;  %2982 = vmatprep.mubr.f32.mxu0 %v23682_v7 }
 0x120   : > { %5078 = vrot.lane.b32.xlu0 %v24276_v43, %s26962_s24  ;;  %v2904_v62 = vsel %vm2902_vm0, %v2895_v51, %v2897_v61  ;;  %v2905_v10 = vsel %vm2902_vm0, %v2897_v61, %v2899_v55 }
 0x121   : > { %v2893_v59 = vpop.permute.xlu1 %2892  ;;  %22305 = vmatprep.subr.msk.mxu0 %vm214_vm1, %v2904_v62 }
 0x122   : > { %v2903_v0 = vsel %vm2902_vm0, %v2893_v59, %v2895_v51 }
 0x123   : > { %5080 = vrot.lane.b32.xlu1 %v24281_v46, %s26962_s24  ;;  %22306 = vmatpush1.msk.msra.mxu0 %vm214_vm1, %v2903_v0  ;;  %v2901_v1 = vpop.permute.xlu0 %2900  ;;  %v22339_v0 = vld [vmem:[%s26943_s1 + $0x50] sm:$0xf] }
 0x124   : > { %5082 = vrot.lane.b32.xlu0 %v5066_v60, %s26962_s24  ;;  %v2906_v5 = vsel %vm2902_vm0, %v2899_v55, %v2901_v1 }
 0x125   : > { %v3079_v63 = vpop.permute.xlu1 %3078  ;;  %22308 = vmatprep.subr.msk.mxu1 %vm214_vm1, %v2906_v5 }
 0x126   : > { %22309 = vmatpush1.msk.msra.mxu1 %vm214_vm1, %v2905_v10  ;;  %22307 = vmatmul.mubr.msk.f32.vlgmr.msra.gmra.mrb[2].mxu0 %vm210_vm2, %v22304_v9 }
 0x127   : > { %5074 = vrot.lane.b32.xlu1 %v24258_v38, %s26962_s24  ;;  %v3077_v11 = vpop.permute.xlu0 %3076  ;;  %22310 = vmatmul.mubr.msk.f32.vlgmr.msra.gmra.mrb[2].mxu1 %vm210_vm2, %v22304_v9  ;;  %s26970_s24 = smov 68   ;;  %v6172_v9 = vld [vmem:[%s23826_s30 + $0x10] sm:$0xf] }
 0x128   : > { %5258 = vrot.lane.b32.xlu0 %v24268_v41, %s26964_s29  ;;  %v3086_v13 = vsel %vm26966_vm12, %v3077_v11, %v3079_v63  ;;  %3164 = vmatprep.mubr.f32.mxu0 %v23682_v7 }
 0x129   : > { %v3083_v8 = vpop.permute.xlu1 %3082  ;;  %22312 = vmatprep.subr.msk.mxu0 %vm214_vm1, %v3086_v13  ;;  %3235 = vmatprep.mubr.f32.mxu1 %v23682_v7 }
 0x12b   : > { %5260 = vrot.lane.b32.xlu1 %v24276_v43, %s26964_s29  ;;  %v3081_v15 = vpop.permute.xlu0 %3080 }
 0x12c   : > { %5262 = vrot.lane.b32.xlu0 %v24281_v46, %s26964_s29  ;;  %v3087_v16 = vsel %vm26966_vm12, %v3079_v63, %v3081_v15  ;;  %v3088_v17 = vsel %vm26966_vm12, %v3081_v15, %v3083_v8  ;;  %v22346_v15 = vld [vmem:[%s26943_s1 + $0x54] sm:$0xf] }
 0x12d   : > { %v3259_v14 = vpop.permute.xlu1 %3258  ;;  %22315 = vmatprep.subr.msk.mxu1 %vm214_vm1, %v3088_v17 }
 0x12e   : > { %22316 = vmatpush1.msk.msra.mxu1 %vm214_vm1, %v3087_v16 }
 0x12f   : > { %5264 = vrot.lane.b32.xlu1 %v5248_v12, %s26964_s29  ;;  %v3075_v21 = vpop.permute.xlu0 %3074  ;;  %22317 = vmatmul.mubr.msk.f32.vlgmr.msra.gmra.mrb[2].mxu1 %vm210_vm2, %v22311_v19 }
 0x130   : > { %5256 = vrot.lane.b32.xlu0 %v24258_v38, %s26964_s29  ;;  %v3085_v22 = vsel %vm26966_vm12, %v3075_v21, %v3077_v11  ;;  %3417 = vmatprep.mubr.f32.mxu1 %v23682_v7  ;;  %vm26972_vm12 = vcmask 777216   ;;  %s26982_s29 = smov 47  }
 0x131   : > { %v3263_v18 = vpop.permute.xlu1 %3262  ;;  %22313 = vmatpush1.msk.msra.mxu0 %vm214_vm1, %v3085_v22 }
 0x132   : > { %22314 = vmatmul.mubr.msk.f32.vlgmr.msra.gmra.mrb[2].mxu0 %vm210_vm2, %v22311_v19 }
 0x133   : > { %5440 = vrot.lane.b32.xlu1 %v24268_v41, %s26967_s26  ;;  %v3261_v25 = vpop.permute.xlu0 %3260  ;;  %3346 = vmatprep.mubr.f32.mxu0 %v23682_v7 }
 0x134   : > { %5442 = vrot.lane.b32.xlu0 %v24276_v43, %s26967_s26  ;;  %v3268_v26 = vsel %vm26969_vm13, %v3259_v14, %v3261_v25  ;;  %v3269_v33 = vsel %vm26969_vm13, %v3261_v25, %v3263_v18 }
 0x135   : > { %v3257_v23 = vpop.permute.xlu1 %3256  ;;  %22319 = vmatprep.subr.msk.mxu0 %vm214_vm1, %v3268_v26 }
 0x136   : > { %v3267_v28 = vsel %vm26969_vm13, %v3257_v23, %v3259_v14 }
 0x137   : > { %5444 = vrot.lane.b32.xlu1 %v24281_v46, %s26967_s26  ;;  %22320 = vmatpush1.msk.msra.mxu0 %vm214_vm1, %v3267_v28  ;;  %v3265_v29 = vpop.permute.xlu0 %3264 }
 0x138   : > { %5446 = vrot.lane.b32.xlu0 %v5430_v24, %s26967_s26  ;;  %v3270_v30 = vsel %vm26969_vm13, %v3263_v18, %v3265_v29  ;;  %vm26975_vm13 = vcmask 769024  }
 0x139   : > { %v3443_v27 = vpop.permute.xlu1 %3442  ;;  %22322 = vmatprep.subr.msk.mxu1 %vm214_vm1, %v3270_v30 }
 0x13a   : > { %22323 = vmatpush1.msk.msra.mxu1 %vm214_vm1, %v3269_v33  ;;  %22321 = vmatmul.mubr.msk.f32.vlgmr.msra.gmra.mrb[2].mxu0 %vm210_vm2, %v22318_v32 }
 0x13b   : > { %5438 = vrot.lane.b32.xlu1 %v24258_v38, %s26967_s26  ;;  %v3441_v34 = vpop.permute.xlu0 %3440  ;;  %22324 = vmatmul.mubr.msk.f32.vlgmr.msra.gmra.mrb[2].mxu1 %vm210_vm2, %v22318_v32  ;;  %s26973_s26 = smov 67  }
 0x13c   : > { %5622 = vrot.lane.b32.xlu0 %v24268_v41, %s26970_s24  ;;  %v3450_v36 = vsel %vm26972_vm12, %v3441_v34, %v3443_v27  ;;  %3528 = vmatprep.mubr.f32.mxu0 %v23682_v7 }
 0x13d   : > { %v3447_v31 = vpop.permute.xlu1 %3446  ;;  %22326 = vmatprep.subr.msk.mxu0 %vm214_vm1, %v3450_v36  ;;  %3599 = vmatprep.mubr.f32.mxu1 %v23682_v7 }
 0x13f   : > { %5624 = vrot.lane.b32.xlu1 %v24276_v43, %s26970_s24  ;;  %v3445_v6 = vpop.permute.xlu0 %3444 }
 0x140   : > { %5626 = vrot.lane.b32.xlu0 %v24281_v46, %s26970_s24  ;;  %v3451_v39 = vsel %vm26972_vm12, %v3443_v27, %v3445_v6  ;;  %v3452_v40 = vsel %vm26972_vm12, %v3445_v6, %v3447_v31  ;;  %v22354_v27 = vld [vmem:[%s26943_s1 + $0x5c] sm:$0xf]  ;;  %v6520_v31 = vld [vmem:[%s23826_s30 + $0x10] sm:$0xf] }
 0x141   : > { %v3623_v37 = vpop.permute.xlu1 %3622  ;;  %22329 = vmatprep.subr.msk.mxu1 %vm214_vm1, %v3452_v40 }
 0x142   : > { %22330 = vmatpush1.msk.msra.mxu1 %vm214_vm1, %v3451_v39 }
 0x143   : > { %5628 = vrot.lane.b32.xlu1 %v5612_v35, %s26970_s24  ;;  %v3439_v4 = vpop.permute.xlu0 %3438  ;;  %22331 = vmatmul.mubr.msk.f32.vlgmr.msra.gmra.mrb[2].mxu1 %vm210_vm2, %v22325_v42 }
 0x144   : > { %5620 = vrot.lane.b32.xlu0 %v24258_v38, %s26970_s24  ;;  %v3449_v44 = vsel %vm26972_vm12, %v3439_v4, %v3441_v34  ;;  %3781 = vmatprep.mubr.f32.mxu1 %v23682_v7  ;;  %s26976_s24 = smov 66   ;;  %vm26978_vm12 = vcmask 760832  }
 0x145   : > { %v3627_v2 = vpop.permute.xlu1 %3626  ;;  %22327 = vmatpush1.msk.msra.mxu0 %vm214_vm1, %v3449_v44  ;;  %v6702_v44 = vld [vmem:[%s23826_s30 + $0x10] sm:$0xf] }
 0x146   : > { %22328 = vmatmul.mubr.msk.f32.vlgmr.msra.gmra.mrb[2].mxu0 %vm210_vm2, %v22325_v42 }
 0x147   : > { %5804 = vrot.lane.b32.xlu1 %v24268_v41, %s26973_s26  ;;  %v3625_v3 = vpop.permute.xlu0 %3624  ;;  %3710 = vmatprep.mubr.f32.mxu0 %v23682_v7 }
 0x148   : > { %5806 = vrot.lane.b32.xlu0 %v24276_v43, %s26973_s26  ;;  %v3632_v48 = vsel %vm26975_vm13, %v3623_v37, %v3625_v3  ;;  %v3633_v55 = vsel %vm26975_vm13, %v3625_v3, %v3627_v2 }
 0x149   : > { %v3621_v45 = vpop.permute.xlu1 %3620  ;;  %22333 = vmatprep.subr.msk.mxu0 %vm214_vm1, %v3632_v48 }
 0x14a   : > { %v3631_v50 = vsel %vm26975_vm13, %v3621_v45, %v3623_v37  ;;  %v22353_v37 = vld [vmem:[%s26943_s1 + $0x58] sm:$0xf] }
 0x14b   : > { %5808 = vrot.lane.b32.xlu1 %v24281_v46, %s26973_s26  ;;  %22334 = vmatpush1.msk.msra.mxu0 %vm214_vm1, %v3631_v50  ;;  %v3629_v51 = vpop.permute.xlu0 %3628 }
 0x14c   : > { %5810 = vrot.lane.b32.xlu0 %v5794_v47, %s26973_s26  ;;  %v3634_v52 = vsel %vm26975_vm13, %v3627_v2, %v3629_v51  ;;  %vm26979_vm13 = vcmask 752640  }
 0x14d   : > { %v3807_v49 = vpop.permute.xlu1 %3806  ;;  %22336 = vmatprep.subr.msk.mxu1 %vm214_vm1, %v3634_v52 }
 0x14e   : > { %22337 = vmatpush1.msk.msra.mxu1 %vm214_vm1, %v3633_v55  ;;  %22335 = vmatmul.mubr.msk.f32.vlgmr.msra.gmra.mrb[2].mxu0 %vm210_vm2, %v22332_v54 }
 0x14f   : > { %5802 = vrot.lane.b32.xlu1 %v24258_v38, %s26973_s26  ;;  %v3805_v56 = vpop.permute.xlu0 %3804  ;;  %22338 = vmatmul.mubr.msk.f32.vlgmr.msra.gmra.mrb[2].mxu1 %vm210_vm2, %v22332_v54  ;;  %s23714_s26 = smov 49  }
 0x150   : > { %5986 = vrot.lane.b32.xlu0 %v24268_v41, %s26976_s24  ;;  %v3814_v58 = vsel %vm26978_vm12, %v3805_v56, %v3807_v49  ;;  %3892 = vmatprep.mubr.f32.mxu0 %v23682_v7 }
 0x151   : > { %v3811_v53 = vpop.permute.xlu1 %3810  ;;  %22340 = vmatprep.subr.msk.mxu0 %vm214_vm1, %v3814_v58  ;;  %3963 = vmatprep.mubr.f32.mxu1 %v23682_v7 }
 0x153   : > { %5988 = vrot.lane.b32.xlu1 %v24276_v43, %s26976_s24  ;;  %v3809_v60 = vpop.permute.xlu0 %3808 }
 0x154   : > { %5990 = vrot.lane.b32.xlu0 %v24281_v46, %s26976_s24  ;;  %v3815_v61 = vsel %vm26978_vm12, %v3807_v49, %v3809_v60  ;;  %v3816_v62 = vsel %vm26978_vm12, %v3809_v60, %v3811_v53  ;;  %v22367_v49 = vld [vmem:[%s26943_s1 + $0x60] sm:$0xf]  ;;  %v6884_v53 = vld [vmem:[%s23826_s30 + $0x10] sm:$0xf] }
 0x155   : > { %v3987_v59 = vpop.permute.xlu1 %3986  ;;  %22343 = vmatprep.subr.msk.mxu1 %vm214_vm1, %v3816_v62 }
 0x156   : > { %22344 = vmatpush1.msk.msra.mxu1 %vm214_vm1, %v3815_v61 }
 0x157   : > { %5992 = vrot.lane.b32.xlu1 %v5976_v57, %s26976_s24  ;;  %v3803_v1 = vpop.permute.xlu0 %3802  ;;  %22345 = vmatmul.mubr.msk.f32.vlgmr.msra.gmra.mrb[2].mxu1 %vm210_vm2, %v22339_v0 }
 0x158   : > { %5984 = vrot.lane.b32.xlu0 %v24258_v38, %s26976_s24  ;;  %v3813_v5 = vsel %vm26978_vm12, %v3803_v1, %v3805_v56  ;;  %4145 = vmatprep.mubr.f32.mxu1 %v23682_v7  ;;  %s23715_s24 = smov 50   ;;  %vm4192_vm12 = vcmask 613376  }
 0x159   : > { %v3991_v63 = vpop.permute.xlu1 %3990  ;;  %22341 = vmatpush1.msk.msra.mxu0 %vm214_vm1, %v3813_v5  ;;  %v7066_v5 = vld [vmem:[%s23826_s30 + $0x10] sm:$0xf] }
 0x15a   : > { %22342 = vmatmul.mubr.msk.f32.vlgmr.msra.gmra.mrb[2].mxu0 %vm210_vm2, %v22339_v0 }
 0x15b   : > { %6184 = vrot.lane.b32.xlu1 %v24268_v41, %s23714_s26  ;;  %v3989_v10 = vpop.permute.xlu0 %3988  ;;  %4074 = vmatprep.mubr.f32.mxu0 %v23682_v7 }
 0x15c   : > { %6186 = vrot.lane.b32.xlu0 %v24276_v43, %s23714_s26  ;;  %v3996_v11 = vsel %vm26979_vm13, %v3987_v59, %v3989_v10  ;;  %v3997_v18 = vsel %vm26979_vm13, %v3989_v10, %v3991_v63 }
 0x15d   : > { %v3985_v8 = vpop.permute.xlu1 %3984  ;;  %22347 = vmatprep.subr.msk.mxu0 %vm214_vm1, %v3996_v11 }
 0x15e   : > { %v3995_v13 = vsel %vm26979_vm13, %v3985_v8, %v3987_v59  ;;  %v22374_v59 = vld [vmem:[%s26943_s1 + $0x64] sm:$0xf] }
 0x15f   : > { %6188 = vrot.lane.b32.xlu1 %v24281_v46, %s23714_s26  ;;  %22348 = vmatpush1.msk.msra.mxu0 %vm214_vm1, %v3995_v13  ;;  %v3993_v14 = vpop.permute.xlu0 %3992 }
 0x160   : > { %6190 = vrot.lane.b32.xlu0 %v6172_v9, %s23714_s26  ;;  %v3998_v16 = vsel %vm26979_vm13, %v3991_v63, %v3993_v14  ;;  %vm4360_vm13 = vcmask 621568  }
 0x161   : > { %v4187_v12 = vpop.permute.xlu1 %4186  ;;  %22350 = vmatprep.subr.msk.mxu1 %vm214_vm1, %v3998_v16  ;;  %v7248_v16 = vld [vmem:[%s23826_s30 + $0x10] sm:$0xf] }
 0x162   : > { %22349 = vmatmul.mubr.msk.f32.vlgmr.msra.gmra.mrb[2].mxu0 %vm210_vm2, %v22346_v15  ;;  %22351 = vmatpush1.msk.msra.mxu1 %vm214_vm1, %v3997_v18 }
 0x163   : > { %6182 = vrot.lane.b32.xlu1 %v24258_v38, %s23714_s26  ;;  %v4185_v19 = vpop.permute.xlu0 %4184  ;;  %22352 = vmatmul.mubr.msk.f32.vlgmr.msra.gmra.mrb[2].mxu1 %vm210_vm2, %v22346_v15  ;;  %s27007_s26 = smov 22  }
 0x164   : > { %6352 = vrot.lane.b32.xlu0 %v24268_v41, %s23715_s24  ;;  %v4194_v21 = vsel %vm4192_vm12, %v4185_v19, %v4187_v12  ;;  %4272 = vmatprep.mubr.f32.mxu0 %v23682_v7 }
 0x165   : > { %v4191_v17 = vpop.permute.xlu1 %4190  ;;  %22355 = vmatprep.subr.msk.mxu0 %vm214_vm1, %v4194_v21  ;;  %4343 = vmatprep.mubr.f32.mxu1 %v23682_v7 }
 0x167   : > { %6354 = vrot.lane.b32.xlu1 %v24276_v43, %s23715_s24  ;;  %v4189_v23 = vpop.permute.xlu0 %4188 }
 0x168   : > { %6356 = vrot.lane.b32.xlu0 %v24281_v46, %s23715_s24  ;;  %v4195_v24 = vsel %vm4192_vm12, %v4187_v12, %v4189_v23  ;;  %v4196_v25 = vsel %vm4192_vm12, %v4189_v23, %v4191_v17  ;;  %v22381_v12 = vld [vmem:[%s26943_s1 + $0x68] sm:$0xf]  ;;  %v22388_v23 = vld [vmem:[%s26943_s1 + $0x6c] sm:$0xf] }
 0x169   : > { %v4353_v22 = vpop.permute.xlu1 %4352  ;;  %22358 = vmatprep.subr.msk.mxu1 %vm214_vm1, %v4196_v25 }
 0x16a   : > { %22359 = vmatpush1.msk.msra.mxu1 %vm214_vm1, %v4195_v24 }
 0x16b   : > { %6358 = vrot.lane.b32.xlu1 %v6172_v9, %s23715_s24  ;;  %v4183_v28 = vpop.permute.xlu0 %4182  ;;  %22360 = vmatmul.mubr.msk.f32.vlgmr.msra.gmra.mrb[4].mxu1 %vm210_vm2, %v22354_v27 }
 0x16c   : > { %6350 = vrot.lane.b32.xlu0 %v24258_v38, %s23715_s24  ;;  %v4193_v29 = vsel %vm4192_vm12, %v4183_v28, %v4185_v19  ;;  %4511 = vmatprep.mubr.f32.mxu1 %v23682_v7  ;;  %vm26984_vm12 = vcmask 605184   ;;  %s27009_s24 = smov 21  }
 0x16d   : > { %v4357_v26 = vpop.permute.xlu1 %4356  ;;  %22356 = vmatpush1.msk.msra.mxu0 %vm214_vm1, %v4193_v29 }
 0x16e   : > { %22357 = vmatmul.mubr.msk.f32.vlgmr.msra.gmra.mrb[4].mxu0 %vm210_vm2, %v22354_v27 }
 0x16f   : > { %6530 = vrot.lane.b32.xlu1 %v24268_v41, %s26980_s4  ;;  %v4355_v32 = vpop.permute.xlu0 %4354  ;;  %4440 = vmatprep.mubr.f32.mxu0 %v23682_v7 }
 0x170   : > { %6532 = vrot.lane.b32.xlu0 %v24276_v43, %s26980_s4  ;;  %v4362_v33 = vsel %vm4360_vm13, %v4353_v22, %v4355_v32  ;;  %v4363_v40 = vsel %vm4360_vm13, %v4355_v32, %v4357_v26 }
 0x171   : > { %v4351_v30 = vpop.permute.xlu1 %4350  ;;  %22361 = vmatprep.subr.msk.mxu0 %vm214_vm1, %v4362_v33 }
 0x172   : > { %v4361_v35 = vsel %vm4360_vm13, %v4351_v30, %v4353_v22  ;;  %v7430_v30 = vld [vmem:[%s23826_s30 + $0x10] sm:$0xf] }
 0x173   : > { %6534 = vrot.lane.b32.xlu1 %v24281_v46, %s26980_s4  ;;  %22362 = vmatpush1.msk.msra.mxu0 %vm214_vm1, %v4361_v35  ;;  %v4359_v36 = vpop.permute.xlu0 %4358  ;;  %v22395_v35 = vld [vmem:[%s26943_s1 + $0x70] sm:$0xf] }
 0x174   : > { %6536 = vrot.lane.b32.xlu0 %v6520_v31, %s26980_s4  ;;  %v4364_v6 = vsel %vm4360_vm13, %v4357_v26, %v4359_v36  ;;  %vm26987_vm13 = vcmask 596992  }
 0x175   : > { %v4533_v34 = vpop.permute.xlu1 %4532  ;;  %22364 = vmatprep.subr.msk.mxu1 %vm214_vm1, %v4364_v6 }
 0x176   : > { %22365 = vmatpush1.msk.msra.mxu1 %vm214_vm1, %v4363_v40  ;;  %22363 = vmatmul.mubr.msk.f32.vlgmr.msra.gmra.mrb[4].mxu0 %vm210_vm2, %v22353_v37 }
 0x177   : > { %6528 = vrot.lane.b32.xlu1 %v24258_v38, %s26980_s4  ;;  %v4531_v2 = vpop.permute.xlu0 %4530  ;;  %22366 = vmatmul.mubr.msk.f32.vlgmr.msra.gmra.mrb[4].mxu1 %vm210_vm2, %v22353_v37  ;;  %s26985_s4 = smov 46  }
 0x178   : > { %6712 = vrot.lane.b32.xlu0 %v24268_v41, %s26982_s29  ;;  %v4540_v42 = vsel %vm26984_vm12, %v4531_v2, %v4533_v34  ;;  %4618 = vmatprep.mubr.f32.mxu0 %v23682_v7 }
 0x179   : > { %v4537_v39 = vpop.permute.xlu1 %4536  ;;  %22368 = vmatprep.subr.msk.mxu0 %vm214_vm1, %v4540_v42  ;;  %4689 = vmatprep.mubr.f32.mxu1 %v23682_v7 }
 0x17b   : > { %6714 = vrot.lane.b32.xlu1 %v24276_v43, %s26982_s29  ;;  %v4535_v45 = vpop.permute.xlu0 %4534 }
 0x17c   : > { %6716 = vrot.lane.b32.xlu0 %v24281_v46, %s26982_s29  ;;  %v4541_v47 = vsel %vm26984_vm12, %v4533_v34, %v4535_v45  ;;  %v4542_v3 = vsel %vm26984_vm12, %v4535_v45, %v4537_v39  ;;  %v7612_v39 = vld [vmem:[%s23826_s30 + $0x10] sm:$0xf] }
 0x17d   : > { %v4713_v4 = vpop.permute.xlu1 %4712  ;;  %22371 = vmatprep.subr.msk.mxu1 %vm214_vm1, %v4542_v3  ;;  %v22402_v3 = vld [vmem:[%s26943_s1 + $0x74] sm:$0xf] }
 0x17e   : > { %22372 = vmatpush1.msk.msra.mxu1 %vm214_vm1, %v4541_v47 }
 0x17f   : > { %6718 = vrot.lane.b32.xlu1 %v6702_v44, %s26982_s29  ;;  %v4529_v50 = vpop.permute.xlu0 %4528  ;;  %22373 = vmatmul.mubr.msk.f32.vlgmr.msra.gmra.mrb[4].mxu1 %vm210_vm2, %v22367_v49 }
 0x180   : > { %6710 = vrot.lane.b32.xlu0 %v24258_v38, %s26982_s29  ;;  %v4539_v51 = vsel %vm26984_vm12, %v4529_v50, %v4531_v2  ;;  %4871 = vmatprep.mubr.f32.mxu1 %v23682_v7  ;;  %s26988_s29 = smov 45   ;;  %vm26990_vm12 = vcmask 588800  }
 0x181   : > { %v4717_v48 = vpop.permute.xlu1 %4716  ;;  %22369 = vmatpush1.msk.msra.mxu0 %vm214_vm1, %v4539_v51 }
 0x182   : > { %22370 = vmatmul.mubr.msk.f32.vlgmr.msra.gmra.mrb[4].mxu0 %vm210_vm2, %v22367_v49 }
 0x183   : > { %6894 = vrot.lane.b32.xlu1 %v24268_v41, %s26985_s4  ;;  %v4715_v54 = vpop.permute.xlu0 %4714  ;;  %4800 = vmatprep.mubr.f32.mxu0 %v23682_v7 }
 0x184   : > { %6896 = vrot.lane.b32.xlu0 %v24276_v43, %s26985_s4  ;;  %v4722_v55 = vsel %vm26987_vm13, %v4713_v4, %v4715_v54  ;;  %v4723_v62 = vsel %vm26987_vm13, %v4715_v54, %v4717_v48 }
 0x185   : > { %v4711_v52 = vpop.permute.xlu1 %4710  ;;  %22375 = vmatprep.subr.msk.mxu0 %vm214_vm1, %v4722_v55 }
 0x186   : > { %v4721_v57 = vsel %vm26987_vm13, %v4711_v52, %v4713_v4  ;;  %v7794_v52 = vld [vmem:[%s23826_s30 + $0x10] sm:$0xf] }
 0x187   : > { %6898 = vrot.lane.b32.xlu1 %v24281_v46, %s26985_s4  ;;  %22376 = vmatpush1.msk.msra.mxu0 %vm214_vm1, %v4721_v57  ;;  %v4719_v58 = vpop.permute.xlu0 %4718 }
 0x188   : > { %6900 = vrot.lane.b32.xlu0 %v6884_v53, %s26985_s4  ;;  %v4724_v60 = vsel %vm26987_vm13, %v4717_v48, %v4719_v58  ;;  %vm26993_vm13 = vcmask 580608  }
 0x189   : > { %v4897_v56 = vpop.permute.xlu1 %4896  ;;  %22378 = vmatprep.subr.msk.mxu1 %vm214_vm1, %v4724_v60 }
 0x18a   : > { %22379 = vmatpush1.msk.msra.mxu1 %vm214_vm1, %v4723_v62  ;;  %22377 = vmatmul.mubr.msk.f32.vlgmr.msra.gmra.mrb[4].mxu0 %vm210_vm2, %v22374_v59  ;;  %v24718_v62 = vld [vmem:[%s23826_s30] sm:$0xff] }
 0x18b   : > { %6892 = vrot.lane.b32.xlu1 %v24258_v38, %s26985_s4  ;;  %v4895_v63 = vpop.permute.xlu0 %4894  ;;  %22380 = vmatmul.mubr.msk.f32.vlgmr.msra.gmra.mrb[4].mxu1 %vm210_vm2, %v22374_v59  ;;  %s26991_s4 = smov 44  }
 0x18c   : > { %7076 = vrot.lane.b32.xlu0 %v24268_v41, %s26988_s29  ;;  %v4904_v0 = vsel %vm26990_vm12, %v4895_v63, %v4897_v56  ;;  %4982 = vmatprep.mubr.f32.mxu0 %v23682_v7 }
 0x18d   : > { %v4901_v61 = vpop.permute.xlu1 %4900  ;;  %22382 = vmatprep.subr.msk.mxu0 %vm214_vm1, %v4904_v0  ;;  %5053 = vmatprep.mubr.f32.mxu1 %v23682_v7 }
 0x18f   : > { %7078 = vrot.lane.b32.xlu1 %v24276_v43, %s26988_s29  ;;  %v4899_v8 = vpop.permute.xlu0 %4898 }
 0x190   : > { %7080 = vrot.lane.b32.xlu0 %v24281_v46, %s26988_s29  ;;  %v4905_v9 = vsel %vm26990_vm12, %v4897_v56, %v4899_v8  ;;  %v4906_v10 = vsel %vm26990_vm12, %v4899_v8, %v4901_v61  ;;  %v22409_v56 = vld [vmem:[%s26943_s1 + $0x78] sm:$0xf]  ;;  %v7976_v61 = vld [vmem:[%s23826_s30 + $0x10] sm:$0xf] }
 0x191   : > { %v5077_v1 = vpop.permute.xlu1 %5076  ;;  %22385 = vmatprep.subr.msk.mxu1 %vm214_vm1, %v4906_v10 }
 0x192   : > { %22386 = vmatpush1.msk.msra.mxu1 %vm214_vm1, %v4905_v9 }
 0x193   : > { %7082 = vrot.lane.b32.xlu1 %v7066_v5, %s26988_s29  ;;  %v4893_v13 = vpop.permute.xlu0 %4892  ;;  %22387 = vmatmul.mubr.msk.f32.vlgmr.msra.gmra.mrb[4].mxu1 %vm210_vm2, %v22381_v12 }
 0x194   : > { %7074 = vrot.lane.b32.xlu0 %v24258_v38, %s26988_s29  ;;  %v4903_v14 = vsel %vm26990_vm12, %v4893_v13, %v4895_v63  ;;  %5235 = vmatprep.mubr.f32.mxu1 %v23682_v7  ;;  %s26994_s29 = smov 43   ;;  %vm26996_vm12 = vcmask 572416  }
 0x195   : > { %v5081_v11 = vpop.permute.xlu1 %5080  ;;  %22383 = vmatpush1.msk.msra.mxu0 %vm214_vm1, %v4903_v14 }
 0x196   : > { %22384 = vmatmul.mubr.msk.f32.vlgmr.msra.gmra.mrb[4].mxu0 %vm210_vm2, %v22381_v12 }
 0x197   : > { %7258 = vrot.lane.b32.xlu1 %v24268_v41, %s26991_s4  ;;  %v5079_v17 = vpop.permute.xlu0 %5078  ;;  %5164 = vmatprep.mubr.f32.mxu0 %v23682_v7 }
 0x198   : > { %7260 = vrot.lane.b32.xlu0 %v24276_v43, %s26991_s4  ;;  %v5086_v18 = vsel %vm26993_vm13, %v5077_v1, %v5079_v17  ;;  %v5087_v26 = vsel %vm26993_vm13, %v5079_v17, %v5081_v11 }
 0x199   : > { %v5075_v15 = vpop.permute.xlu1 %5074  ;;  %22389 = vmatprep.subr.msk.mxu0 %vm214_vm1, %v5086_v18  ;;  %v8172_v18 = vld [vmem:[%s23826_s30 + $0x10] sm:$0xf] }
 0x19a   : > { %v5085_v21 = vsel %vm26993_vm13, %v5075_v15, %v5077_v1  ;;  %v24728_v1 = vcombine.high %v24718_v62, %v24718_v62 }
 0x19b   : > { %7262 = vrot.lane.b32.xlu1 %v24281_v46, %s26991_s4  ;;  %22390 = vmatpush1.msk.msra.mxu0 %vm214_vm1, %v5085_v21  ;;  %v5083_v22 = vpop.permute.xlu0 %5082 }
 0x19c   : > { %7264 = vrot.lane.b32.xlu0 %v7248_v16, %s26991_s4  ;;  %v5088_v24 = vsel %vm26993_vm13, %v5081_v11, %v5083_v22  ;;  %vm26999_vm13 = vcmask 564224   ;;  %v22416_v11 = vld [vmem:[%s26943_s1 + $0x7c] sm:$0xf] }
 0x19d   : > { %v5261_v19 = vpop.permute.xlu1 %5260  ;;  %22392 = vmatprep.subr.msk.mxu1 %vm214_vm1, %v5088_v24 }
 0x19e   : > { %22393 = vmatpush1.msk.msra.mxu1 %vm214_vm1, %v5087_v26  ;;  %22391 = vmatmul.mubr.msk.f32.vlgmr.msra.gmra.mrb[4].mxu0 %vm210_vm2, %v22388_v23 }
 0x19f   : > { %7256 = vrot.lane.b32.xlu1 %v24258_v38, %s26991_s4  ;;  %v5259_v27 = vpop.permute.xlu0 %5258  ;;  %22394 = vmatmul.mubr.msk.f32.vlgmr.msra.gmra.mrb[4].mxu1 %vm210_vm2, %v22388_v23  ;;  %s26997_s4 = smov 42  }
 0x1a0   : > { %7440 = vrot.lane.b32.xlu0 %v24268_v41, %s26994_s29  ;;  %v5268_v28 = vsel %vm26996_vm12, %v5259_v27, %v5261_v19  ;;  %5346 = vmatprep.mubr.f32.mxu0 %v23682_v7 }
 0x1a1   : > { %v5265_v25 = vpop.permute.xlu1 %5264  ;;  %22396 = vmatprep.subr.msk.mxu0 %vm214_vm1, %v5268_v28  ;;  %5417 = vmatprep.mubr.f32.mxu1 %v23682_v7 }
 0x1a3   : > { %7442 = vrot.lane.b32.xlu1 %v24276_v43, %s26994_s29  ;;  %v5263_v31 = vpop.permute.xlu0 %5262 }
 0x1a4   : > { %7444 = vrot.lane.b32.xlu0 %v24281_v46, %s26994_s29  ;;  %v5269_v32 = vsel %vm26996_vm12, %v5261_v19, %v5263_v31  ;;  %v5270_v33 = vsel %vm26996_vm12, %v5263_v31, %v5265_v25 }
 0x1a5   : > { %v5441_v29 = vpop.permute.xlu1 %5440  ;;  %22399 = vmatprep.subr.msk.mxu1 %vm214_vm1, %v5270_v33  ;;  %v22431_v33 = vld [vmem:[%s26943_s1 + $0x88] sm:$0xf] }
 0x1a6   : > { %22400 = vmatpush1.msk.msra.mxu1 %vm214_vm1, %v5269_v32 }
 0x1a7   : > { %7446 = vrot.lane.b32.xlu1 %v7430_v30, %s26994_s29  ;;  %v5257_v36 = vpop.permute.xlu0 %5256  ;;  %22401 = vmatmul.mubr.msk.f32.vlgmr.msra.gmra.mrb[4].mxu1 %vm210_vm2, %v22395_v35 }
 0x1a8   : > { %7438 = vrot.lane.b32.xlu0 %v24258_v38, %s26994_s29  ;;  %v5267_v37 = vsel %vm26996_vm12, %v5257_v36, %v5259_v27  ;;  %5599 = vmatprep.mubr.f32.mxu1 %v23682_v7  ;;  %s27000_s29 = smov 41   ;;  %vm27002_vm12 = vcmask 556032   ;;  %v22423_v27 = vld [vmem:[%s26943_s1 + $0x80] sm:$0xf] }
 0x1a9   : > { %v5445_v34 = vpop.permute.xlu1 %5444  ;;  %22397 = vmatpush1.msk.msra.mxu0 %vm214_vm1, %v5267_v37 }
 0x1aa   : > { %22398 = vmatmul.mubr.msk.f32.vlgmr.msra.gmra.mrb[4].mxu0 %vm210_vm2, %v22395_v35 }
 0x1ab   : > { %7622 = vrot.lane.b32.xlu1 %v24268_v41, %s26997_s4  ;;  %v5443_v40 = vpop.permute.xlu0 %5442  ;;  %5528 = vmatprep.mubr.f32.mxu0 %v23682_v7 }
 0x1ac   : > { %7624 = vrot.lane.b32.xlu0 %v24276_v43, %s26997_s4  ;;  %v5450_v2 = vsel %vm26999_vm13, %v5441_v29, %v5443_v40  ;;  %v5451_v48 = vsel %vm26999_vm13, %v5443_v40, %v5445_v34 }
 0x1ad   : > { %v5439_v6 = vpop.permute.xlu1 %5438  ;;  %22403 = vmatprep.subr.msk.mxu0 %vm214_vm1, %v5450_v2 }
 0x1ae   : > { %v5449_v4 = vsel %vm26999_vm13, %v5439_v6, %v5441_v29 }
 0x1af   : > { %7626 = vrot.lane.b32.xlu1 %v24281_v46, %s26997_s4  ;;  %22404 = vmatpush1.msk.msra.mxu0 %vm214_vm1, %v5449_v4  ;;  %v5447_v44 = vpop.permute.xlu0 %5446 }
 0x1b0   : > { %7628 = vrot.lane.b32.xlu0 %v7612_v39, %s26997_s4  ;;  %v5452_v45 = vsel %vm26999_vm13, %v5445_v34, %v5447_v44  ;;  %vm27005_vm13 = vcmask 547840  }
 0x1b1   : > { %v5625_v42 = vpop.permute.xlu1 %5624  ;;  %22406 = vmatprep.subr.msk.mxu1 %vm214_vm1, %v5452_v45 }
 0x1b2   : > { %22407 = vmatpush1.msk.msra.mxu1 %vm214_vm1, %v5451_v48  ;;  %22405 = vmatmul.mubr.msk.f32.vlgmr.msra.gmra.mrb[4].mxu0 %vm210_vm2, %v22402_v3  ;;  %v22430_v48 = vld [vmem:[%s26943_s1 + $0x84] sm:$0xf] }
 0x1b3   : > { %7620 = vrot.lane.b32.xlu1 %v24258_v38, %s26997_s4  ;;  %v5623_v49 = vpop.permute.xlu0 %5622  ;;  %22408 = vmatmul.mubr.msk.f32.vlgmr.msra.gmra.mrb[4].mxu1 %vm210_vm2, %v22402_v3  ;;  %s27003_s4 = smov 40  }
 0x1b4   : > { %7804 = vrot.lane.b32.xlu0 %v24268_v41, %s27000_s29  ;;  %v5632_v50 = vsel %vm27002_vm12, %v5623_v49, %v5625_v42  ;;  %5781 = vmatprep.mubr.f32.mxu1 %v23682_v7 }
 0x1b5   : > { %v5629_v47 = vpop.permute.xlu1 %5628  ;;  %22410 = vmatprep.subr.msk.mxu0 %vm214_vm1, %v5632_v50  ;;  %5710 = vmatprep.mubr.f32.mxu0 %v23682_v7 }
 0x1b7   : > { %7806 = vrot.lane.b32.xlu1 %v24276_v43, %s27000_s29  ;;  %v5627_v53 = vpop.permute.xlu0 %5626 }
 0x1b8   : > { %7808 = vrot.lane.b32.xlu0 %v24281_v46, %s27000_s29  ;;  %v5633_v43 = vsel %vm27002_vm12, %v5625_v42, %v5627_v53  ;;  %v5634_v54 = vsel %vm27002_vm12, %v5627_v53, %v5629_v47  ;;  %v24698_v46 = vld [vmem:[%s23826_s30 + $0x8] sm:$0xff]  ;;  %v8520_v42 = vld [vmem:[%s23826_s30 + $0x10] sm:$0xf] }
 0x1b9   : > { %v5805_v51 = vpop.permute.xlu1 %5804  ;;  %22413 = vmatprep.subr.msk.mxu1 %vm214_vm1, %v5634_v54  ;;  %v24709_v58 = vcombine.high %v24698_v46, %v24698_v46 }
 0x1ba   : > { %22414 = vmatpush1.msk.msra.mxu1 %vm214_vm1, %v5633_v43 }
 0x1bb   : > { %7810 = vrot.lane.b32.xlu1 %v7794_v52, %s27000_s29  ;;  %v5621_v57 = vpop.permute.xlu0 %5620  ;;  %22415 = vmatmul.mubr.msk.f32.vlgmr.msra.gmra.mrb[4].mxu1 %vm210_vm2, %v22409_v56  ;;  %v8702_v52 = vld [vmem:[%s23826_s30 + $0x10] sm:$0xf] }
 0x1bc   : > { %7802 = vrot.lane.b32.xlu0 %v24258_v38, %s27000_s29  ;;  %v5631_v59 = vsel %vm27002_vm12, %v5621_v57, %v5623_v49  ;;  %5963 = vmatprep.mubr.f32.mxu1 %v23682_v7  ;;  %s23725_s29 = smov 23   ;;  %vm27006_vm12 = vcmask 539648   ;;  %v22444_v57 = vld [vmem:[%s26943_s1 + $0x8c] sm:$0xf] }
 0x1bd   : > { %v5809_v55 = vpop.permute.xlu1 %5808  ;;  %22411 = vmatpush1.msk.msra.mxu0 %vm214_vm1, %v5631_v59 }
 0x1be   : > { %22412 = vmatmul.mubr.msk.f32.vlgmr.msra.gmra.mrb[4].mxu0 %vm210_vm2, %v22409_v56 }
 0x1bf   : > { %7986 = vrot.lane.b32.xlu1 %v24268_v41, %s27003_s4  ;;  %v5807_v41 = vpop.permute.xlu0 %5806  ;;  %5892 = vmatprep.mubr.f32.mxu0 %v23682_v7 }
 0x1c0   : > { %7988 = vrot.lane.b32.xlu0 %v24698_v46, %s27003_s4  ;;  %v5814_v63 = vsel %vm27005_vm13, %v5805_v51, %v5807_v41  ;;  %v5815_v12 = vsel %vm27005_vm13, %v5807_v41, %v5809_v55 }
 0x1c1   : > { %v5803_v60 = vpop.permute.xlu1 %5802  ;;  %22417 = vmatprep.subr.msk.mxu0 %vm214_vm1, %v5814_v63 }
 0x1c2   : > { %v5813_v5 = vsel %vm27005_vm13, %v5803_v60, %v5805_v51 }
 0x1c3   : > { %7990 = vrot.lane.b32.xlu1 %v24709_v58, %s27003_s4  ;;  %22418 = vmatpush1.msk.msra.mxu0 %vm214_vm1, %v5813_v5  ;;  %v5811_v8 = vpop.permute.xlu0 %5810 }
 0x1c4   : > { %7992 = vrot.lane.b32.xlu0 %v7976_v61, %s27003_s4  ;;  %v5816_v9 = vsel %vm27005_vm13, %v5809_v55, %v5811_v8  ;;  %vm6192_vm13 = vcmask 400384  }
 0x1c5   : > { %v5989_v0 = vpop.permute.xlu1 %5988  ;;  %22420 = vmatprep.subr.msk.mxu1 %vm214_vm1, %v5816_v9  ;;  %v24742_v13 = vpop.f32.mrb[0].mxu1 }
 0x1c6   : > { %22421 = vmatpush1.msk.msra.mxu1 %vm214_vm1, %v5815_v12  ;;  %22419 = vmatmul.mubr.msk.f32.vlgmr.msra.gmra.mrb[4].mxu0 %vm210_vm2, %v22416_v11  ;;  %v24746_v14 = vpop.f32.mrb[1].mxu1  ;;  %v22451_v12 = vld [vmem:[%s26943_s1 + $0x90] sm:$0xf] }
 0x1c7   : > { %7984 = vrot.lane.b32.xlu1 %v24258_v38, %s27003_s4  ;;  %v5987_v38 = vpop.permute.xlu0 %5986  ;;  %22422 = vmatmul.mubr.msk.f32.vlgmr.msra.gmra.mrb[4].mxu1 %vm210_vm2, %v22416_v11  ;;  %v2163_v15 = vcombine.low %v24742_v13, %v24746_v14  ;;  %s23726_s4 = smov 24   ;;  %v22500_v13 = vld [vmem:[%s26943_s1 + $0xac] sm:$0xf] }
 0x1c8   : > { %8184 = vrot.lane.b32.xlu0 %v24728_v1, %s23725_s29  ;;  %v5996_v16 = vsel %vm27006_vm12, %v5987_v38, %v5989_v0  ;;  %6145 = vmatprep.mubr.f32.mxu1 %v23682_v7  ;;  %v24756_v19 = vpop.f32.mrb[0].mxu0 }
 0x1c9   : > { %v5993_v10 = vpop.permute.xlu1 %5992  ;;  %22424 = vmatprep.subr.msk.mxu0 %vm214_vm1, %v5996_v16  ;;  %6074 = vmatprep.mubr.f32.mxu0 %v23682_v7  ;;  %v24760_v21 = vpop.f32.mrb[1].mxu0 }
 0x1ca   : > { %v2162_v22 = vcombine.low %v24756_v19, %v24760_v21 }
 0x1cb   : > { %8186 = vrot.lane.b32.xlu1 %v24698_v46, %s23725_s29  ;;  %v5991_v23 = vpop.permute.xlu0 %5990 }
 0x1cc   : > { %8188 = vrot.lane.b32.xlu0 %v24709_v58, %s23725_s29  ;;  %v5997_v24 = vsel %vm27006_vm12, %v5989_v0, %v5991_v23  ;;  %v5998_v25 = vsel %vm27006_vm12, %v5991_v23, %v5993_v10  ;;  %v8884_v0 = vld [vmem:[%s23826_s30 + $0x10] sm:$0xf] }
 0x1cd   : > { %v6185_v17 = vpop.permute.xlu1 %6184  ;;  %22427 = vmatprep.subr.msk.mxu1 %vm214_vm1, %v5998_v25 }
 0x1ce   : > { %22428 = vmatpush1.msk.msra.mxu1 %vm214_vm1, %v5997_v24 }
 0x1cf   : > { %8190 = vrot.lane.b32.xlu1 %v8172_v18, %s23725_s29  ;;  %v5985_v28 = vpop.permute.xlu0 %5984  ;;  %22429 = vmatmul.mubr.msk.f32.vlgmr.msra.gmra.mrb[4].mxu1 %vm210_vm2, %v22423_v27 }
 0x1d0   : > { %8182 = vrot.lane.b32.xlu0 %v24718_v62, %s23725_s29  ;;  %v5995_v29 = vsel %vm27006_vm12, %v5985_v28, %v5987_v38  ;;  %6343 = vmatprep.mubr.f32.mxu1 %v23682_v7  ;;  %vm6360_vm12 = vcmask 408576   ;;  %v22458_v28 = vld [vmem:[%s26943_s1 + $0x94] sm:$0xf]  ;;  %s23738_s29 = smov 116  }
 0x1d1   : > { %v6189_v26 = vpop.permute.xlu1 %6188  ;;  %22425 = vmatpush1.msk.msra.mxu0 %vm214_vm1, %v5995_v29 }
 0x1d2   : > { %22426 = vmatmul.mubr.msk.f32.vlgmr.msra.gmra.mrb[4].mxu0 %vm210_vm2, %v22423_v27 }
 0x1d3   : > { %8352 = vrot.lane.b32.xlu1 %v24728_v1, %s23726_s4  ;;  %v6187_v31 = vpop.permute.xlu0 %6186  ;;  %6272 = vmatprep.mubr.f32.mxu0 %v23682_v7 }
 0x1d4   : > { %8354 = vrot.lane.b32.xlu0 %v24698_v46, %s23726_s4  ;;  %v6194_v32 = vsel %vm6192_vm13, %v6185_v17, %v6187_v31  ;;  %v6195_v6 = vsel %vm6192_vm13, %v6187_v31, %v6189_v26 }
 0x1d5   : > { %v6183_v30 = vpop.permute.xlu1 %6182  ;;  %22432 = vmatprep.subr.msk.mxu0 %vm214_vm1, %v6194_v32 }
 0x1d6   : > { %v6193_v34 = vsel %vm6192_vm13, %v6183_v30, %v6185_v17 }
 0x1d7   : > { %8356 = vrot.lane.b32.xlu1 %v24709_v58, %s23726_s4  ;;  %22433 = vmatpush1.msk.msra.mxu0 %vm214_vm1, %v6193_v34  ;;  %v6191_v36 = vpop.permute.xlu0 %6190  ;;  %v9248_v34 = vld [vmem:[%s23826_s30 + $0x10] sm:$0xf] }
 0x1d8   : > { %8358 = vrot.lane.b32.xlu0 %v8172_v18, %s23726_s4  ;;  %22434 = vmatmul.mubr.msk.f32.vlgmr.msra.gmra.mrb[6].mxu0 %vm210_vm2, %v22431_v33  ;;  %v6196_v37 = vsel %vm6192_vm13, %v6189_v26, %v6191_v36  ;;  %vm27011_vm13 = vcmask 392192   ;;  %v9066_v18 = vld [vmem:[%s23826_s30 + $0x10] sm:$0xf] }
 0x1d9   : > { %v6355_v35 = vpop.permute.xlu1 %6354  ;;  %6440 = vmatprep.mubr.f32.mxu0 %v23682_v7  ;;  %22435 = vmatprep.subr.msk.mxu1 %vm214_vm1, %v6196_v37 }
 0x1da   : > { %22436 = vmatpush1.msk.msra.mxu1 %vm214_vm1, %v6195_v6 }
 0x1db   : > { %8350 = vrot.lane.b32.xlu1 %v24718_v62, %s23726_s4  ;;  %v6353_v40 = vpop.permute.xlu0 %6352  ;;  %22437 = vmatmul.mubr.msk.f32.vlgmr.msra.gmra.mrb[6].mxu1 %vm210_vm2, %v22431_v33  ;;  %s27039_s4 = smov 96  }
 0x1dc   : > { %8530 = vrot.lane.b32.xlu0 %v24728_v1, %s27007_s26  ;;  %v6362_v2 = vsel %vm6360_vm12, %v6353_v40, %v6355_v35  ;;  %6511 = vmatprep.mubr.f32.mxu1 %v23682_v7 }
 0x1dd   : > { %v6359_v39 = vpop.permute.xlu1 %6358  ;;  %22438 = vmatprep.subr.msk.mxu0 %vm214_vm1, %v6362_v2 }
 0x1df   : > { %8532 = vrot.lane.b32.xlu1 %v24698_v46, %s27007_s26  ;;  %v6357_v44 = vpop.permute.xlu0 %6356 }
 0x1e0   : > { %8534 = vrot.lane.b32.xlu0 %v24709_v58, %s27007_s26  ;;  %v6363_v45 = vsel %vm6360_vm12, %v6355_v35, %v6357_v44  ;;  %v6364_v47 = vsel %vm6360_vm12, %v6357_v44, %v6359_v39  ;;  %v9430_v44 = vld [vmem:[%s23826_s30 + $0x10] sm:$0xf] }
 0x1e1   : > { %v6531_v4 = vpop.permute.xlu1 %6530  ;;  %22441 = vmatprep.subr.msk.mxu1 %vm214_vm1, %v6364_v47 }
 0x1e2   : > { %22442 = vmatpush1.msk.msra.mxu1 %vm214_vm1, %v6363_v45 }
 0x1e3   : > { %8536 = vrot.lane.b32.xlu1 %v8520_v42, %s27007_s26  ;;  %v6351_v49 = vpop.permute.xlu0 %6350  ;;  %22443 = vmatmul.mubr.msk.f32.vlgmr.msra.gmra.mrb[6].mxu1 %vm210_vm2, %v22430_v48 }
 0x1e4   : > { %8528 = vrot.lane.b32.xlu0 %v24718_v62, %s27007_s26  ;;  %v6361_v50 = vsel %vm6360_vm12, %v6351_v49, %v6353_v40  ;;  %6689 = vmatprep.mubr.f32.mxu1 %v23682_v7  ;;  %s27012_s26 = smov 20   ;;  %vm27014_vm12 = vcmask 384000   ;;  %v22465_v40 = vld [vmem:[%s26943_s1 + $0x98] sm:$0xf] }
 0x1e5   : > { %v6535_v3 = vpop.permute.xlu1 %6534  ;;  %22439 = vmatpush1.msk.msra.mxu0 %vm214_vm1, %v6361_v50  ;;  %v22472_v50 = vld [vmem:[%s26943_s1 + $0x9c] sm:$0xf] }
 0x1e6   : > { %22440 = vmatmul.mubr.msk.f32.vlgmr.msra.gmra.mrb[6].mxu0 %vm210_vm2, %v22430_v48 }
 0x1e7   : > { %8712 = vrot.lane.b32.xlu1 %v24728_v1, %s27009_s24  ;;  %v6533_v53 = vpop.permute.xlu0 %6532  ;;  %6618 = vmatprep.mubr.f32.mxu0 %v23682_v7 }
 0x1e8   : > { %8714 = vrot.lane.b32.xlu0 %v24698_v46, %s27009_s24  ;;  %v6540_v43 = vsel %vm27011_vm13, %v6531_v4, %v6533_v53  ;;  %v6541_v60 = vsel %vm27011_vm13, %v6533_v53, %v6535_v3 }
 0x1e9   : > { %v6529_v51 = vpop.permute.xlu1 %6528  ;;  %22445 = vmatprep.subr.msk.mxu0 %vm214_vm1, %v6540_v43 }
 0x1ea   : > { %v6539_v54 = vsel %vm27011_vm13, %v6529_v51, %v6531_v4 }
 0x1eb   : > { %8716 = vrot.lane.b32.xlu1 %v24709_v58, %s27009_s24  ;;  %22446 = vmatpush1.msk.msra.mxu0 %vm214_vm1, %v6539_v54  ;;  %v6537_v56 = vpop.permute.xlu0 %6536 }
 0x1ec   : > { %8718 = vrot.lane.b32.xlu0 %v8702_v52, %s27009_s24  ;;  %v6542_v59 = vsel %vm27011_vm13, %v6535_v3, %v6537_v56  ;;  %vm27017_vm13 = vcmask 375808  }
 0x1ed   : > { %v6715_v55 = vpop.permute.xlu1 %6714  ;;  %22448 = vmatprep.subr.msk.mxu1 %vm214_vm1, %v6542_v59 }
 0x1ee   : > { %22449 = vmatpush1.msk.msra.mxu1 %vm214_vm1, %v6541_v60  ;;  %22447 = vmatmul.mubr.msk.f32.vlgmr.msra.gmra.mrb[6].mxu0 %vm210_vm2, %v22444_v57 }
 0x1ef   : > { %8710 = vrot.lane.b32.xlu1 %v24718_v62, %s27009_s24  ;;  %v6713_v41 = vpop.permute.xlu0 %6712  ;;  %22450 = vmatmul.mubr.msk.f32.vlgmr.msra.gmra.mrb[6].mxu1 %vm210_vm2, %v22444_v57  ;;  %s27015_s24 = smov 19  }
 0x1f0   : > { %8894 = vrot.lane.b32.xlu0 %v24728_v1, %s27012_s26  ;;  %v6722_v63 = vsel %vm27014_vm12, %v6713_v41, %v6715_v55  ;;  %6800 = vmatprep.mubr.f32.mxu0 %v23682_v7 }
 0x1f1   : > { %v6719_v61 = vpop.permute.xlu1 %6718  ;;  %22452 = vmatprep.subr.msk.mxu0 %vm214_vm1, %v6722_v63  ;;  %6871 = vmatprep.mubr.f32.mxu1 %v23682_v7 }
 0x1f3   : > { %8896 = vrot.lane.b32.xlu1 %v24698_v46, %s27012_s26  ;;  %v6717_v8 = vpop.permute.xlu0 %6716 }
 0x1f4   : > { %8898 = vrot.lane.b32.xlu0 %v24709_v58, %s27012_s26  ;;  %v6723_v9 = vsel %vm27014_vm12, %v6715_v55, %v6717_v8  ;;  %v6724_v10 = vsel %vm27014_vm12, %v6717_v8, %v6719_v61  ;;  %v9612_v55 = vld [vmem:[%s23826_s30 + $0x10] sm:$0xf]  ;;  %v22479_v61 = vld [vmem:[%s26943_s1 + $0xa0] sm:$0xf] }
 0x1f5   : > { %v6895_v5 = vpop.permute.xlu1 %6894  ;;  %22455 = vmatprep.subr.msk.mxu1 %vm214_vm1, %v6724_v10  ;;  %v9794_v8 = vld [vmem:[%s23826_s30 + $0x10] sm:$0xf] }
 0x1f6   : > { %22456 = vmatpush1.msk.msra.mxu1 %vm214_vm1, %v6723_v9 }
 0x1f7   : > { %8900 = vrot.lane.b32.xlu1 %v8884_v0, %s27012_s26  ;;  %v6711_v38 = vpop.permute.xlu0 %6710  ;;  %22457 = vmatmul.mubr.msk.f32.vlgmr.msra.gmra.mrb[6].mxu1 %vm210_vm2, %v22451_v12 }
 0x1f8   : > { %8892 = vrot.lane.b32.xlu0 %v24718_v62, %s27012_s26  ;;  %v6721_v16 = vsel %vm27014_vm12, %v6711_v38, %v6713_v41  ;;  %7053 = vmatprep.mubr.f32.mxu1 %v23682_v7  ;;  %s27018_s26 = smov 18   ;;  %vm27020_vm12 = vcmask 367616  }
 0x1f9   : > { %v6899_v11 = vpop.permute.xlu1 %6898  ;;  %22453 = vmatpush1.msk.msra.mxu0 %vm214_vm1, %v6721_v16  ;;  %v22486_v16 = vld [vmem:[%s26943_s1 + $0xa4] sm:$0xf] }
 0x1fa   : > { %22454 = vmatmul.mubr.msk.f32.vlgmr.msra.gmra.mrb[6].mxu0 %vm210_vm2, %v22451_v12 }
 0x1fb   : > { %9076 = vrot.lane.b32.xlu1 %v24728_v1, %s27015_s24  ;;  %v6897_v23 = vpop.permute.xlu0 %6896  ;;  %6982 = vmatprep.mubr.f32.mxu0 %v23682_v7 }
 0x1fc   : > { %9078 = vrot.lane.b32.xlu0 %v24698_v46, %s27015_s24  ;;  %v6904_v24 = vsel %vm27017_vm13, %v6895_v5, %v6897_v23  ;;  %v6905_v30 = vsel %vm27017_vm13, %v6897_v23, %v6899_v11 }
 0x1fd   : > { %v6893_v17 = vpop.permute.xlu1 %6892  ;;  %22459 = vmatprep.subr.msk.mxu0 %vm214_vm1, %v6904_v24  ;;  %v177_v24 = vlaneseq }
 0x1fe   : > { %v6903_v25 = vsel %vm27017_vm13, %v6893_v17, %v6895_v5 }
 0x1ff   : > { %9080 = vrot.lane.b32.xlu1 %v24709_v58, %s27015_s24  ;;  %22460 = vmatpush1.msk.msra.mxu0 %vm214_vm1, %v6903_v25  ;;  %v6901_v27 = vpop.permute.xlu0 %6900 }
 0x200   : > { %9082 = vrot.lane.b32.xlu0 %v9066_v18, %s27015_s24  ;;  %v6906_v29 = vsel %vm27017_vm13, %v6899_v11, %v6901_v27  ;;  %vm27023_vm13 = vcmask 359424   ;;  %v23736_v18 = vmov 839922192  }
 0x201   : > { %v7079_v26 = vpop.permute.xlu1 %7078  ;;  %22462 = vmatprep.subr.msk.mxu1 %vm214_vm1, %v6906_v29  ;;  %v175_v23 = vunpack.c.l.s4 %v23736_v18  ;;  %v25002_v29 = vld [vmem:[%s23826_s30 + $0x4] sm:$0xff] }
 0x202   : > { %22463 = vmatpush1.msk.msra.mxu1 %vm214_vm1, %v6905_v30  ;;  %22461 = vmatmul.mubr.msk.f32.vlgmr.msra.gmra.mrb[6].mxu0 %vm210_vm2, %v22458_v28 }
 0x203   : > { %9074 = vrot.lane.b32.xlu1 %v24718_v62, %s27015_s24  ;;  %v7077_v32 = vpop.permute.xlu0 %7076  ;;  %22464 = vmatmul.mubr.msk.f32.vlgmr.msra.gmra.mrb[6].mxu1 %vm210_vm2, %v22458_v28  ;;  %s27021_s24 = smov 17   ;;  %v9976_v28 = vld [vmem:[%s23826_s30 + $0x10] sm:$0xf]  ;;  %v176_v30 = vunpack.c.0.s8 %v175_v23 }
 0x204   : > { %9258 = vrot.lane.b32.xlu0 %v24728_v1, %s27018_s26  ;;  %v7086_v33 = vsel %vm27020_vm12, %v7077_v32, %v7079_v26  ;;  %7164 = vmatprep.mubr.f32.mxu0 %v23682_v7 }
 0x205   : > { %v7083_v31 = vpop.permute.xlu1 %7082  ;;  %22466 = vmatprep.subr.msk.mxu0 %vm214_vm1, %v7086_v33  ;;  %7235 = vmatprep.mubr.f32.mxu1 %v23682_v7  ;;  %v25012_v33 = vcombine.high %v25002_v29, %v25002_v29 }
 0x207   : > { %9260 = vrot.lane.b32.xlu1 %v24698_v46, %s27018_s26  ;;  %v7081_v36 = vpop.permute.xlu0 %7080 }
 0x208   : > { %9262 = vrot.lane.b32.xlu0 %v24709_v58, %s27018_s26  ;;  %v7087_v37 = vsel %vm27020_vm12, %v7079_v26, %v7081_v36  ;;  %v7088_v6 = vsel %vm27020_vm12, %v7081_v36, %v7083_v31  ;;  %v178_v31 = vshrl.u32 %v177_v24, 7  ;;  %v25020_v36 = vld [vmem:[%s23826_s30 + $0xc] sm:$0xff] }
 0x209   : > { %v7259_v35 = vpop.permute.xlu1 %7258  ;;  %22469 = vmatprep.subr.msk.mxu1 %vm214_vm1, %v7088_v6 }
 0x20a   : > { %22470 = vmatpush1.msk.msra.mxu1 %vm214_vm1, %v7087_v37  ;;  %v179_v37 = vsub.s32 %v176_v30, %v178_v31 }
 0x20b   : > { %9264 = vrot.lane.b32.xlu1 %v9248_v34, %s27018_s26  ;;  %v7075_v2 = vpop.permute.xlu0 %7074  ;;  %22471 = vmatmul.mubr.msk.f32.vlgmr.msra.gmra.mrb[6].mxu1 %vm210_vm2, %v22465_v40 }
 0x20c   : > { %9256 = vrot.lane.b32.xlu0 %v24718_v62, %s27018_s26  ;;  %v7085_v42 = vsel %vm27020_vm12, %v7075_v2, %v7077_v32  ;;  %7417 = vmatprep.mubr.f32.mxu1 %v23682_v7  ;;  %s27024_s26 = smov 16   ;;  %vm27026_vm12 = vcmask 351232  }
 0x20d   : > { %v7263_v39 = vpop.permute.xlu1 %7262  ;;  %22467 = vmatpush1.msk.msra.mxu0 %vm214_vm1, %v7085_v42 }
 0x20e   : > { %22468 = vmatmul.mubr.msk.f32.vlgmr.msra.gmra.mrb[6].mxu0 %vm210_vm2, %v22465_v40  ;;  %v25031_v40 = vcombine.high %v25020_v36, %v25020_v36 }
 0x20f   : > { %9440 = vrot.lane.b32.xlu1 %v24728_v1, %s27021_s24  ;;  %v7261_v45 = vpop.permute.xlu0 %7260  ;;  %7346 = vmatprep.mubr.f32.mxu0 %v23682_v7 }
 0x210   : > { %9442 = vrot.lane.b32.xlu0 %v24698_v46, %s27021_s24  ;;  %v7268_v47 = vsel %vm27023_vm13, %v7259_v35, %v7261_v45  ;;  %v7269_v52 = vsel %vm27023_vm13, %v7261_v45, %v7263_v39 }
 0x211   : > { %v7257_v4 = vpop.permute.xlu1 %7256  ;;  %22473 = vmatprep.subr.msk.mxu0 %vm214_vm1, %v7268_v47 }
 0x212   : > { %v7267_v3 = vsel %vm27023_vm13, %v7257_v4, %v7259_v35  ;;  %v22493_v35 = vld [vmem:[%s26943_s1 + $0xa8] sm:$0xf] }
 0x213   : > { %9444 = vrot.lane.b32.xlu1 %v24709_v58, %s27021_s24  ;;  %22474 = vmatpush1.msk.msra.mxu0 %vm214_vm1, %v7267_v3  ;;  %v7265_v49 = vpop.permute.xlu0 %7264 }
 0x214   : > { %9446 = vrot.lane.b32.xlu0 %v9430_v44, %s27021_s24  ;;  %v7270_v51 = vsel %vm27023_vm13, %v7263_v39, %v7265_v49  ;;  %vm27027_vm13 = vcmask 343040   ;;  %v10172_v44 = vld [vmem:[%s23826_s30 + $0x14] sm:$0xf] }
 0x215   : > { %v7443_v48 = vpop.permute.xlu1 %7442  ;;  %22476 = vmatprep.subr.msk.mxu1 %vm214_vm1, %v7270_v51 }
 0x216   : > { %22477 = vmatpush1.msk.msra.mxu1 %vm214_vm1, %v7269_v52  ;;  %22475 = vmatmul.mubr.msk.f32.vlgmr.msra.gmra.mrb[6].mxu0 %vm210_vm2, %v22472_v50 }
 0x217   : > { %9438 = vrot.lane.b32.xlu1 %v24718_v62, %s27021_s24  ;;  %v7441_v43 = vpop.permute.xlu0 %7440  ;;  %22478 = vmatmul.mubr.msk.f32.vlgmr.msra.gmra.mrb[6].mxu1 %vm210_vm2, %v22472_v50  ;;  %s23734_s24 = smov 15  }
 0x218   : > { %9622 = vrot.lane.b32.xlu0 %v24728_v1, %s27024_s26  ;;  %v7450_v54 = vsel %vm27026_vm12, %v7441_v43, %v7443_v48  ;;  %7528 = vmatprep.mubr.f32.mxu0 %v23682_v7 }
 0x219   : > { %v7447_v53 = vpop.permute.xlu1 %7446  ;;  %22480 = vmatprep.subr.msk.mxu0 %vm214_vm1, %v7450_v54  ;;  %7599 = vmatprep.mubr.f32.mxu1 %v23682_v7 }
 0x21b   : > { %9624 = vrot.lane.b32.xlu1 %v24698_v46, %s27024_s26  ;;  %v7445_v57 = vpop.permute.xlu0 %7444 }
 0x21c   : > { %9626 = vrot.lane.b32.xlu0 %v24709_v58, %s27024_s26  ;;  %v7451_v59 = vsel %vm27026_vm12, %v7443_v48, %v7445_v57  ;;  %v7452_v60 = vsel %vm27026_vm12, %v7445_v57, %v7447_v53 }
 0x21d   : > { %v7623_v56 = vpop.permute.xlu1 %7622  ;;  %22483 = vmatprep.subr.msk.mxu1 %vm214_vm1, %v7452_v60 }
 0x21e   : > { %22484 = vmatpush1.msk.msra.mxu1 %vm214_vm1, %v7451_v59 }
 0x21f   : > { %9628 = vrot.lane.b32.xlu1 %v9612_v55, %s27024_s26  ;;  %v7439_v63 = vpop.permute.xlu0 %7438  ;;  %22485 = vmatmul.mubr.msk.f32.vlgmr.msra.gmra.mrb[6].mxu1 %vm210_vm2, %v22479_v61 }
 0x220   : > { %9620 = vrot.lane.b32.xlu0 %v24718_v62, %s27024_s26  ;;  %v7449_v0 = vsel %vm27026_vm12, %v7439_v63, %v7441_v43  ;;  %7781 = vmatprep.mubr.f32.mxu1 %v23682_v7  ;;  %s23735_s26 = smov 14   ;;  %vm27028_vm12 = vcmask 334848   ;;  %v22508_v63 = vld [vmem:[%s26943_s1 + $0xb4] sm:$0xf] }
 0x221   : > { %v7627_v41 = vpop.permute.xlu1 %7626  ;;  %22481 = vmatpush1.msk.msra.mxu0 %vm214_vm1, %v7449_v0 }
 0x222   : > { %22482 = vmatmul.mubr.msk.f32.vlgmr.msra.gmra.mrb[6].mxu0 %vm210_vm2, %v22479_v61 }
 0x223   : > { %9804 = vrot.lane.b32.xlu1 %v24728_v1, %s23734_s24  ;;  %v7625_v9 = vpop.permute.xlu0 %7624  ;;  %7710 = vmatprep.mubr.f32.mxu0 %v23682_v7 }
 0x224   : > { %9806 = vrot.lane.b32.xlu0 %v24698_v46, %s23734_s24  ;;  %v7632_v10 = vsel %vm27027_vm13, %v7623_v56, %v7625_v9  ;;  %v7633_v25 = vsel %vm27027_vm13, %v7625_v9, %v7627_v41  ;;  %v10518_v9 = vld [vmem:[%s23826_s30 + $0x14] sm:$0xf] }
 0x225   : > { %v7621_v5 = vpop.permute.xlu1 %7620  ;;  %22487 = vmatprep.subr.msk.mxu0 %vm214_vm1, %v7632_v10 }
 0x226   : > { %v7631_v11 = vsel %vm27027_vm13, %v7621_v5, %v7623_v56 }
 0x227   : > { %9808 = vrot.lane.b32.xlu1 %v24709_v58, %s23734_s24  ;;  %22488 = vmatpush1.msk.msra.mxu0 %vm214_vm1, %v7631_v11  ;;  %v7629_v38 = vpop.permute.xlu0 %7628 }
 0x228   : > { %9810 = vrot.lane.b32.xlu0 %v9794_v8, %s23734_s24  ;;  %v7634_v17 = vsel %vm27027_vm13, %v7627_v41, %v7629_v38  ;;  %vm27029_vm13 = vcmask 326656  }
 0x229   : > { %v7807_v12 = vpop.permute.xlu1 %7806  ;;  %22490 = vmatprep.subr.msk.mxu1 %vm214_vm1, %v7634_v17  ;;  %v22507_v17 = vld [vmem:[%s26943_s1 + $0xb0] sm:$0xf] }
 0x22a   : > { %22491 = vmatpush1.msk.msra.mxu1 %vm214_vm1, %v7633_v25  ;;  %22489 = vmatmul.mubr.msk.f32.vlgmr.msra.gmra.mrb[6].mxu0 %vm210_vm2, %v22486_v16 }
 0x22b   : > { %9802 = vrot.lane.b32.xlu1 %v24718_v62, %s23734_s24  ;;  %v7805_v27 = vpop.permute.xlu0 %7804  ;;  %22492 = vmatmul.mubr.msk.f32.vlgmr.msra.gmra.mrb[6].mxu1 %vm210_vm2, %v22486_v16 }
 0x22c   : > { %9986 = vrot.lane.b32.xlu0 %v24728_v1, %s23735_s26  ;;  %v7814_v1 = vsel %vm27028_vm12, %v7805_v27, %v7807_v12  ;;  %7892 = vmatprep.mubr.f32.mxu0 %v23682_v7 }
 0x22d   : > { %v7811_v26 = vpop.permute.xlu1 %7810  ;;  %22494 = vmatprep.subr.msk.mxu0 %vm214_vm1, %v7814_v1  ;;  %7963 = vmatprep.mubr.f32.mxu1 %v23682_v7 }
 0x22f   : > { %9988 = vrot.lane.b32.xlu1 %v24698_v46, %s23735_s26  ;;  %v7809_v46 = vpop.permute.xlu0 %7808 }
 0x230   : > { %9990 = vrot.lane.b32.xlu0 %v24709_v58, %s23735_s26  ;;  %v7815_v34 = vsel %vm27028_vm12, %v7807_v12, %v7809_v46  ;;  %v7816_v58 = vsel %vm27028_vm12, %v7809_v46, %v7811_v26  ;;  %v22521_v46 = vld [vmem:[%s26943_s1 + $0xb8] sm:$0xf] }
 0x231   : > { %v7987_v32 = vpop.permute.xlu1 %7986  ;;  %22497 = vmatprep.subr.msk.mxu1 %vm214_vm1, %v7816_v58 }
 0x232   : > { %22498 = vmatpush1.msk.msra.mxu1 %vm214_vm1, %v7815_v34 }
 0x233   : > { %9992 = vrot.lane.b32.xlu1 %v9976_v28, %s23735_s26  ;;  %v7803_v39 = vpop.permute.xlu0 %7802  ;;  %22499 = vmatmul.mubr.msk.f32.vlgmr.msra.gmra.mrb[6].mxu1 %vm210_vm2, %v22493_v35 }
 0x234   : > { %9984 = vrot.lane.b32.xlu0 %v24718_v62, %s23735_s26  ;;  %v7813_v2 = vsel %vm27028_vm12, %v7803_v39, %v7805_v27  ;;  %8145 = vmatprep.mubr.f32.mxu1 %v23682_v7  ;;  %v180_v62 = vrot.slane %v23952_v20, %v179_v37  ;;  %vm8192_vm12 = vcmask 187392   ;;  %v10699_v27 = vld [vmem:[%s23826_s30 + $0x14] sm:$0xf] }
 0x235   : > { %v7991_v6 = vpop.permute.xlu1 %7990  ;;  %v4076_v42 = vpop.f32.mrb[2].mxu0  ;;  %22495 = vmatpush1.msk.msra.mxu0 %vm214_vm1, %v7813_v2  ;;  %v10880_v37 = vld [vmem:[%s23826_s30 + $0x14] sm:$0xf] }
 0x236   : > { %v4078_v45 = vpop.f32.mrb[3].mxu0  ;;  %v4147_v47 = vpop.f32.mrb[2].mxu1  ;;  %22496 = vmatmul.mubr.msk.f32.vlgmr.msra.gmra.mrb[6].mxu0 %vm210_vm2, %v22493_v35  ;;  %v2166_v3 = vadd.f32 %v2162_v22, %v180_v62  ;;  %v2167_v20 = vadd.f32 %v2163_v15, %v180_v62 }
 0x237   : > { %10184 = vrot.lane.b32.xlu1 %v25012_v33, %s23684_s6  ;;  %v4162_v48 = vcombine.low %v4076_v42, %v4078_v45  ;;  %v7989_v49 = vpop.permute.xlu0 %7988  ;;  %v4149_v50 = vpop.f32.mrb[3].mxu1  ;;  %8074 = vmatprep.mubr.f32.mxu0 %v23682_v7 }
 0x238   : > { %10186 = vrot.lane.b32.xlu0 %v25020_v36, %s23684_s6  ;;  %v4163_v51 = vcombine.low %v4147_v47, %v4149_v50  ;;  %v7996_v52 = vsel %vm27029_vm13, %v7987_v32, %v7989_v49  ;;  %v7997_v15 = vsel %vm27029_vm13, %v7989_v49, %v7991_v6  ;;  %v11061_v49 = vld [vmem:[%s23826_s30 + $0x14] sm:$0xf] }
 0x239   : > { %v7985_v4 = vpop.permute.xlu1 %7984  ;;  %v25052_v53 = vadd.f32 %v4162_v48, %v2166_v3  ;;  %22501 = vmatprep.subr.msk.mxu0 %vm214_vm1, %v7996_v52 }
 0x23a   : > { %v7995_v19 = vsel %vm27029_vm13, %v7985_v4, %v7987_v32  ;;  %v25056_v22 = vadd.f32 %v4163_v51, %v2167_v20  ;;  %v22528_v4 = vld [vmem:[%s26943_s1 + $0xbc] sm:$0xf] }
 0x23b   : > { %10188 = vrot.lane.b32.xlu1 %v25031_v40, %s23684_s6  ;;  %22502 = vmatpush1.msk.msra.mxu0 %vm214_vm1, %v7995_v19  ;;  %v7993_v43 = vpop.permute.xlu0 %7992 }
 0x23c   : > { %10190 = vrot.lane.b32.xlu0 %v10172_v44, %s23684_s6  ;;  %v7998_v14 = vsel %vm27029_vm13, %v7991_v6, %v7993_v43  ;;  %vm8360_vm13 = vcmask 195584  }
 0x23d   : > { %v8187_v21 = vpop.permute.xlu1 %8186  ;;  %22504 = vmatprep.subr.msk.mxu1 %vm214_vm1, %v7998_v14 }
 0x23e   : > { %22503 = vmatmul.mubr.msk.f32.vlgmr.msra.gmra.mrb[6].mxu0 %vm210_vm2, %v22500_v13  ;;  %22505 = vmatpush1.msk.msra.mxu1 %vm214_vm1, %v7997_v15  ;;  %v11242_v15 = vld [vmem:[%s23826_s30 + $0x14] sm:$0xf] }
 0x23f   : > { %10182 = vrot.lane.b32.xlu1 %v25002_v29, %s23684_s6  ;;  %v8185_v55 = vpop.permute.xlu0 %8184  ;;  %22506 = vmatmul.mubr.msk.f32.vlgmr.msra.gmra.mrb[6].mxu1 %vm210_vm2, %v22500_v13  ;;  %s23737_s6 = smov 117  }
 0x240   : > { %10351 = vrot.lane.b32.xlu0 %v25012_v33, %s23683_s5  ;;  %v8194_v56 = vsel %vm8192_vm12, %v8185_v55, %v8187_v21  ;;  %8272 = vmatprep.mubr.f32.mxu0 %v23682_v7 }
 0x241   : > { %v8191_v54 = vpop.permute.xlu1 %8190  ;;  %22509 = vmatprep.subr.msk.mxu0 %vm214_vm1, %v8194_v56  ;;  %8343 = vmatprep.mubr.f32.mxu1 %v23682_v7 }
 0x243   : > { %10353 = vrot.lane.b32.xlu1 %v25020_v36, %s23683_s5  ;;  %v8189_v59 = vpop.permute.xlu0 %8188 }
 0x244   : > { %10355 = vrot.lane.b32.xlu0 %v25031_v40, %s23683_s5  ;;  %v8195_v60 = vsel %vm8192_vm12, %v8187_v21, %v8189_v59  ;;  %v8196_v61 = vsel %vm8192_vm12, %v8189_v59, %v8191_v54  ;;  %v22535_v21 = vld [vmem:[%s26943_s1 + $0xc0] sm:$0xf] }
 0x245   : > { %v8353_v57 = vpop.permute.xlu1 %8352  ;;  %22512 = vmatprep.subr.msk.mxu1 %vm214_vm1, %v8196_v61 }
 0x246   : > { %22513 = vmatpush1.msk.msra.mxu1 %vm214_vm1, %v8195_v60  ;;  %v22542_v60 = vld [vmem:[%s26943_s1 + $0xc4] sm:$0xf] }
 0x247   : > { %10357 = vrot.lane.b32.xlu1 %v10172_v44, %s23683_s5  ;;  %v8183_v0 = vpop.permute.xlu0 %8182  ;;  %22514 = vmatmul.mubr.msk.f32.vlgmr.msra.gmra.mrb[8].mxu1 %vm210_vm2, %v22508_v63 }
 0x248   : > { %10349 = vrot.lane.b32.xlu0 %v25002_v29, %s23683_s5  ;;  %v8193_v5 = vsel %vm8192_vm12, %v8183_v0, %v8185_v55  ;;  %8511 = vmatprep.mubr.f32.mxu1 %v23682_v7  ;;  %vm27030_vm12 = vcmask 179200   ;;  %s27040_s5 = smov 95  }
 0x249   : > { %v8357_v41 = vpop.permute.xlu1 %8356  ;;  %22510 = vmatpush1.msk.msra.mxu0 %vm214_vm1, %v8193_v5 }
 0x24a   : > { %22511 = vmatmul.mubr.msk.f32.vlgmr.msra.gmra.mrb[8].mxu0 %vm210_vm2, %v22508_v63 }
 0x24b   : > { %10528 = vrot.lane.b32.xlu1 %v25012_v33, %s23685_s7  ;;  %v8355_v10 = vpop.permute.xlu0 %8354  ;;  %8440 = vmatprep.mubr.f32.mxu0 %v23682_v7 }
 0x24c   : > { %10530 = vrot.lane.b32.xlu0 %v25020_v36, %s23685_s7  ;;  %v8362_v11 = vsel %vm8360_vm13, %v8353_v57, %v8355_v10  ;;  %v8363_v23 = vsel %vm8360_vm13, %v8355_v10, %v8357_v41 }
 0x24d   : > { %v8351_v8 = vpop.permute.xlu1 %8350  ;;  %22515 = vmatprep.subr.msk.mxu0 %vm214_vm1, %v8362_v11 }
 0x24e   : > { %v8361_v12 = vsel %vm8360_vm13, %v8351_v8, %v8353_v57  ;;  %v11423_v8 = vld [vmem:[%s23826_s30 + $0x14] sm:$0xf] }
 0x24f   : > { %10532 = vrot.lane.b32.xlu1 %v25031_v40, %s23685_s7  ;;  %22516 = vmatpush1.msk.msra.mxu0 %vm214_vm1, %v8361_v12  ;;  %v8359_v16 = vpop.permute.xlu0 %8358 }
 0x250   : > { %10534 = vrot.lane.b32.xlu0 %v10518_v9, %s23685_s7  ;;  %v8364_v18 = vsel %vm8360_vm13, %v8357_v41, %v8359_v16  ;;  %vm27031_vm13 = vcmask 171008  }
 0x251   : > { %v8533_v38 = vpop.permute.xlu1 %8532  ;;  %22518 = vmatprep.subr.msk.mxu1 %vm214_vm1, %v8364_v18 }
 0x252   : > { %22519 = vmatpush1.msk.msra.mxu1 %vm214_vm1, %v8363_v23  ;;  %22517 = vmatmul.mubr.msk.f32.vlgmr.msra.gmra.mrb[8].mxu0 %vm210_vm2, %v22507_v17 }
 0x253   : > { %10526 = vrot.lane.b32.xlu1 %v25002_v29, %s23685_s7  ;;  %v8531_v25 = vpop.permute.xlu0 %8530  ;;  %22520 = vmatmul.mubr.msk.f32.vlgmr.msra.gmra.mrb[8].mxu1 %vm210_vm2, %v22507_v17 }
 0x254   : > { %10709 = vrot.lane.b32.xlu0 %v25012_v33, %s23686_s8  ;;  %v8540_v26 = vsel %vm27030_vm12, %v8531_v25, %v8533_v38  ;;  %8618 = vmatprep.mubr.f32.mxu0 %v23682_v7 }
 0x255   : > { %v8537_v24 = vpop.permute.xlu1 %8536  ;;  %22522 = vmatprep.subr.msk.mxu0 %vm214_vm1, %v8540_v26  ;;  %8689 = vmatprep.mubr.f32.mxu1 %v23682_v7 }
 0x257   : > { %10711 = vrot.lane.b32.xlu1 %v25020_v36, %s23686_s8  ;;  %v8535_v28 = vpop.permute.xlu0 %8534 }
 0x258   : > { %10713 = vrot.lane.b32.xlu0 %v25031_v40, %s23686_s8  ;;  %v8541_v30 = vsel %vm27030_vm12, %v8533_v38, %v8535_v28  ;;  %v8542_v31 = vsel %vm27030_vm12, %v8535_v28, %v8537_v24  ;;  %v22549_v38 = vld [vmem:[%s26943_s1 + $0xc8] sm:$0xf]  ;;  %v11604_v24 = vld [vmem:[%s23826_s30 + $0x14] sm:$0xf] }
 0x259   : > { %v8713_v1 = vpop.permute.xlu1 %8712  ;;  %22525 = vmatprep.subr.msk.mxu1 %vm214_vm1, %v8542_v31  ;;  %v22556_v31 = vld [vmem:[%s26943_s1 + $0xcc] sm:$0xf] }
 0x25a   : > { %22526 = vmatpush1.msk.msra.mxu1 %vm214_vm1, %v8541_v30 }
 0x25b   : > { %10715 = vrot.lane.b32.xlu1 %v10699_v27, %s23686_s8  ;;  %v8529_v34 = vpop.permute.xlu0 %8528  ;;  %22527 = vmatmul.mubr.msk.f32.vlgmr.msra.gmra.mrb[8].mxu1 %vm210_vm2, %v22521_v46 }
 0x25c   : > { %10707 = vrot.lane.b32.xlu0 %v25002_v29, %s23686_s8  ;;  %v8539_v58 = vsel %vm27030_vm12, %v8529_v34, %v8531_v25  ;;  %8871 = vmatprep.mubr.f32.mxu1 %v23682_v7  ;;  %vm27032_vm12 = vcmask 162816  }
 0x25d   : > { %v8717_v32 = vpop.permute.xlu1 %8716  ;;  %22523 = vmatpush1.msk.msra.mxu0 %vm214_vm1, %v8539_v58 }
 0x25e   : > { %22524 = vmatmul.mubr.msk.f32.vlgmr.msra.gmra.mrb[8].mxu0 %vm210_vm2, %v22521_v46 }
 0x25f   : > { %10890 = vrot.lane.b32.xlu1 %v25012_v33, %s23687_s9  ;;  %v8715_v6 = vpop.permute.xlu0 %8714  ;;  %8800 = vmatprep.mubr.f32.mxu0 %v23682_v7 }
 0x260   : > { %10892 = vrot.lane.b32.xlu0 %v25020_v36, %s23687_s9  ;;  %v8722_v39 = vsel %vm27031_vm13, %v8713_v1, %v8715_v6  ;;  %v8723_v45 = vsel %vm27031_vm13, %v8715_v6, %v8717_v32 }
 0x261   : > { %v8711_v35 = vpop.permute.xlu1 %8710  ;;  %22529 = vmatprep.subr.msk.mxu0 %vm214_vm1, %v8722_v39 }
 0x262   : > { %v8721_v2 = vsel %vm27031_vm13, %v8711_v35, %v8713_v1  ;;  %v11785_v35 = vld [vmem:[%s23826_s30 + $0x14] sm:$0xf] }
 0x263   : > { %10894 = vrot.lane.b32.xlu1 %v25031_v40, %s23687_s9  ;;  %22530 = vmatpush1.msk.msra.mxu0 %vm214_vm1, %v8721_v2  ;;  %v8719_v42 = vpop.permute.xlu0 %8718 }
 0x264   : > { %10896 = vrot.lane.b32.xlu0 %v10880_v37, %s23687_s9  ;;  %v8724_v44 = vsel %vm27031_vm13, %v8717_v32, %v8719_v42  ;;  %vm27033_vm13 = vcmask 154624  }
 0x265   : > { %v8897_v62 = vpop.permute.xlu1 %8896  ;;  %22532 = vmatprep.subr.msk.mxu1 %vm214_vm1, %v8724_v44 }
 0x266   : > { %22533 = vmatpush1.msk.msra.mxu1 %vm214_vm1, %v8723_v45  ;;  %22531 = vmatmul.mubr.msk.f32.vlgmr.msra.gmra.mrb[8].mxu0 %vm210_vm2, %v22528_v4 }
 0x267   : > { %10888 = vrot.lane.b32.xlu1 %v25002_v29, %s23687_s9  ;;  %v8895_v3 = vpop.permute.xlu0 %8894  ;;  %22534 = vmatmul.mubr.msk.f32.vlgmr.msra.gmra.mrb[8].mxu1 %vm210_vm2, %v22528_v4 }
 0x268   : > { %11071 = vrot.lane.b32.xlu0 %v25012_v33, %s23688_s10  ;;  %v8904_v48 = vsel %vm27032_vm12, %v8895_v3, %v8897_v62  ;;  %8982 = vmatprep.mubr.f32.mxu0 %v23682_v7 }
 0x269   : > { %v8901_v47 = vpop.permute.xlu1 %8900  ;;  %22536 = vmatprep.subr.msk.mxu0 %vm214_vm1, %v8904_v48  ;;  %9053 = vmatprep.mubr.f32.mxu1 %v23682_v7 }
 0x26b   : > { %11073 = vrot.lane.b32.xlu1 %v25020_v36, %s23688_s10  ;;  %v8899_v20 = vpop.permute.xlu0 %8898 }
 0x26c   : > { %11075 = vrot.lane.b32.xlu0 %v25031_v40, %s23688_s10  ;;  %v8905_v51 = vsel %vm27032_vm12, %v8897_v62, %v8899_v20  ;;  %v8906_v52 = vsel %vm27032_vm12, %v8899_v20, %v8901_v47  ;;  %v22563_v62 = vld [vmem:[%s26943_s1 + $0xd0] sm:$0xf]  ;;  %v11967_v47 = vld [vmem:[%s23826_s30 + $0x14] sm:$0xf] }
 0x26d   : > { %v9077_v50 = vpop.permute.xlu1 %9076  ;;  %22539 = vmatprep.subr.msk.mxu1 %vm214_vm1, %v8906_v52  ;;  %v22570_v52 = vld [vmem:[%s26943_s1 + $0xd4] sm:$0xf] }
 0x26e   : > { %22540 = vmatpush1.msk.msra.mxu1 %vm214_vm1, %v8905_v51 }
 0x26f   : > { %11077 = vrot.lane.b32.xlu1 %v11061_v49, %s23688_s10  ;;  %v8893_v43 = vpop.permute.xlu0 %8892  ;;  %22541 = vmatmul.mubr.msk.f32.vlgmr.msra.gmra.mrb[8].mxu1 %vm210_vm2, %v22535_v21 }
 0x270   : > { %11069 = vrot.lane.b32.xlu0 %v25002_v29, %s23688_s10  ;;  %v8903_v13 = vsel %vm27032_vm12, %v8893_v43, %v8895_v3  ;;  %9235 = vmatprep.mubr.f32.mxu1 %v23682_v7  ;;  %vm27034_vm12 = vcmask 146432  }
 0x271   : > { %v9081_v19 = vpop.permute.xlu1 %9080  ;;  %22537 = vmatpush1.msk.msra.mxu0 %vm214_vm1, %v8903_v13 }
 0x272   : > { %22538 = vmatmul.mubr.msk.f32.vlgmr.msra.gmra.mrb[8].mxu0 %vm210_vm2, %v22535_v21 }
 0x273   : > { %11252 = vrot.lane.b32.xlu1 %v25012_v33, %s23689_s11  ;;  %v9079_v54 = vpop.permute.xlu0 %9078  ;;  %9164 = vmatprep.mubr.f32.mxu0 %v23682_v7 }
 0x274   : > { %11254 = vrot.lane.b32.xlu0 %v25020_v36, %s23689_s11  ;;  %v9086_v55 = vsel %vm27033_vm13, %v9077_v50, %v9079_v54  ;;  %v9087_v41 = vsel %vm27033_vm13, %v9079_v54, %v9081_v19 }
 0x275   : > { %v9075_v14 = vpop.permute.xlu1 %9074  ;;  %22543 = vmatprep.subr.msk.mxu0 %vm214_vm1, %v9086_v55  ;;  %v12163_v55 = vld [vmem:[%s23826_s30 + $0x14] sm:$0xf] }
 0x276   : > { %v9085_v56 = vsel %vm27033_vm13, %v9075_v14, %v9077_v50 }
 0x277   : > { %11256 = vrot.lane.b32.xlu1 %v25031_v40, %s23689_s11  ;;  %22544 = vmatpush1.msk.msra.mxu0 %vm214_vm1, %v9085_v56  ;;  %v9083_v59 = vpop.permute.xlu0 %9082 }
 0x278   : > { %11258 = vrot.lane.b32.xlu0 %v11242_v15, %s23689_s11  ;;  %v9088_v61 = vsel %vm27033_vm13, %v9081_v19, %v9083_v59  ;;  %vm27035_vm13 = vcmask 138240  }
 0x279   : > { %v9261_v57 = vpop.permute.xlu1 %9260  ;;  %22546 = vmatprep.subr.msk.mxu1 %vm214_vm1, %v9088_v61 }
 0x27a   : > { %22547 = vmatpush1.msk.msra.mxu1 %vm214_vm1, %v9087_v41  ;;  %22545 = vmatmul.mubr.msk.f32.vlgmr.msra.gmra.mrb[8].mxu0 %vm210_vm2, %v22542_v60 }
 0x27b   : > { %11250 = vrot.lane.b32.xlu1 %v25002_v29, %s23689_s11  ;;  %v9259_v0 = vpop.permute.xlu0 %9258  ;;  %22548 = vmatmul.mubr.msk.f32.vlgmr.msra.gmra.mrb[8].mxu1 %vm210_vm2, %v22542_v60 }
 0x27c   : > { %11433 = vrot.lane.b32.xlu0 %v25012_v33, %s23690_s17  ;;  %v9268_v5 = vsel %vm27034_vm12, %v9259_v0, %v9261_v57  ;;  %9346 = vmatprep.mubr.f32.mxu0 %v23682_v7 }
 0x27d   : > { %v9265_v63 = vpop.permute.xlu1 %9264  ;;  %22550 = vmatprep.subr.msk.mxu0 %vm214_vm1, %v9268_v5  ;;  %9417 = vmatprep.mubr.f32.mxu1 %v23682_v7  ;;  %v22577_v5 = vld [vmem:[%s26943_s1 + $0xd8] sm:$0xf] }
 0x27f   : > { %11435 = vrot.lane.b32.xlu1 %v25020_v36, %s23690_s17  ;;  %v9263_v10 = vpop.permute.xlu0 %9262 }
 0x280   : > { %11437 = vrot.lane.b32.xlu0 %v25031_v40, %s23690_s17  ;;  %v9269_v11 = vsel %vm27034_vm12, %v9261_v57, %v9263_v10  ;;  %v9270_v12 = vsel %vm27034_vm12, %v9263_v10, %v9265_v63 }
 0x281   : > { %v9441_v9 = vpop.permute.xlu1 %9440  ;;  %22553 = vmatprep.subr.msk.mxu1 %vm214_vm1, %v9270_v12 }
 0x282   : > { %22554 = vmatpush1.msk.msra.mxu1 %vm214_vm1, %v9269_v11 }
 0x283   : > { %11439 = vrot.lane.b32.xlu1 %v11423_v8, %s23690_s17  ;;  %v9257_v17 = vpop.permute.xlu0 %9256  ;;  %22555 = vmatmul.mubr.msk.f32.vlgmr.msra.gmra.mrb[8].mxu1 %vm210_vm2, %v22549_v38 }
 0x284   : > { %11431 = vrot.lane.b32.xlu0 %v25002_v29, %s23690_s17  ;;  %v9267_v18 = vsel %vm27034_vm12, %v9257_v17, %v9259_v0  ;;  %9599 = vmatprep.mubr.f32.mxu1 %v23682_v7  ;;  %vm27036_vm12 = vcmask 130048  }
 0x285   : > { %v9445_v16 = vpop.permute.xlu1 %9444  ;;  %22551 = vmatpush1.msk.msra.mxu0 %vm214_vm1, %v9267_v18 }
 0x286   : > { %22552 = vmatmul.mubr.msk.f32.vlgmr.msra.gmra.mrb[8].mxu0 %vm210_vm2, %v22549_v38  ;;  %v22585_v38 = vld [vmem:[%s26943_s1 + $0xe0] sm:$0xf] }
 0x287   : > { %11614 = vrot.lane.b32.xlu1 %v25012_v33, %s23691_s19  ;;  %v9443_v25 = vpop.permute.xlu0 %9442  ;;  %9528 = vmatprep.mubr.f32.mxu0 %v23682_v7 }
 0x288   : > { %11616 = vrot.lane.b32.xlu0 %v25020_v36, %s23691_s19  ;;  %v9450_v26 = vsel %vm27035_vm13, %v9441_v9, %v9443_v25  ;;  %v9451_v32 = vsel %vm27035_vm13, %v9443_v25, %v9445_v16 }
 0x289   : > { %v9439_v23 = vpop.permute.xlu1 %9438  ;;  %22557 = vmatprep.subr.msk.mxu0 %vm214_vm1, %v9450_v26 }
 0x28a   : > { %v9449_v27 = vsel %vm27035_vm13, %v9439_v23, %v9441_v9 }
 0x28b   : > { %11618 = vrot.lane.b32.xlu1 %v25031_v40, %s23691_s19  ;;  %22558 = vmatpush1.msk.msra.mxu0 %vm214_vm1, %v9449_v27  ;;  %v9447_v28 = vpop.permute.xlu0 %9446 }
 0x28c   : > { %11620 = vrot.lane.b32.xlu0 %v11604_v24, %s23691_s19  ;;  %v9452_v30 = vsel %vm27035_vm13, %v9445_v16, %v9447_v28  ;;  %vm9812_vm13 = vcmask 121856  }
 0x28d   : > { %v9625_v1 = vpop.permute.xlu1 %9624  ;;  %22560 = vmatprep.subr.msk.mxu1 %vm214_vm1, %v9452_v30 }
 0x28e   : > { %22561 = vmatpush1.msk.msra.mxu1 %vm214_vm1, %v9451_v32  ;;  %22559 = vmatmul.mubr.msk.f32.vlgmr.msra.gmra.mrb[8].mxu0 %vm210_vm2, %v22556_v31 }
 0x28f   : > { %11612 = vrot.lane.b32.xlu1 %v25002_v29, %s23691_s19  ;;  %v9623_v34 = vpop.permute.xlu0 %9622  ;;  %22562 = vmatmul.mubr.msk.f32.vlgmr.msra.gmra.mrb[8].mxu1 %vm210_vm2, %v22556_v31 }
 0x290   : > { %11795 = vrot.lane.b32.xlu0 %v25012_v33, %s23737_s6  ;;  %v9632_v58 = vsel %vm27036_vm12, %v9623_v34, %v9625_v1  ;;  %9781 = vmatprep.mubr.f32.mxu1 %v23682_v7 }
 0x291   : > { %v9629_v46 = vpop.permute.xlu1 %9628  ;;  %22564 = vmatprep.subr.msk.mxu0 %vm214_vm1, %v9632_v58  ;;  %9710 = vmatprep.mubr.f32.mxu0 %v23682_v7 }
 0x293   : > { %11797 = vrot.lane.b32.xlu1 %v25020_v36, %s23737_s6  ;;  %v9627_v6 = vpop.permute.xlu0 %9626 }
 0x294   : > { %11799 = vrot.lane.b32.xlu0 %v25031_v40, %s23737_s6  ;;  %v9633_v39 = vsel %vm27036_vm12, %v9625_v1, %v9627_v6  ;;  %v9634_v2 = vsel %vm27036_vm12, %v9627_v6, %v9629_v46  ;;  %v12509_v1 = vld [vmem:[%s23826_s30 + $0x14] sm:$0xf] }
 0x295   : > { %v9805_v37 = vpop.permute.xlu1 %9804  ;;  %22567 = vmatprep.subr.msk.mxu1 %vm214_vm1, %v9634_v2  ;;  %v12690_v6 = vld [vmem:[%s23826_s30 + $0x14] sm:$0xf] }
 0x296   : > { %22568 = vmatpush1.msk.msra.mxu1 %vm214_vm1, %v9633_v39 }
 0x297   : > { %11801 = vrot.lane.b32.xlu1 %v11785_v35, %s23737_s6  ;;  %v9621_v4 = vpop.permute.xlu0 %9620  ;;  %22569 = vmatmul.mubr.msk.f32.vlgmr.msra.gmra.mrb[8].mxu1 %vm210_vm2, %v22563_v62 }
 0x298   : > { %11793 = vrot.lane.b32.xlu0 %v25002_v29, %s23737_s6  ;;  %v9631_v44 = vsel %vm27036_vm12, %v9621_v4, %v9623_v34  ;;  %9963 = vmatprep.mubr.f32.mxu1 %v23682_v7  ;;  %vm9994_vm12 = vcmask 113664   ;;  %v22584_v34 = vld [vmem:[%s26943_s1 + $0xdc] sm:$0xf] }
 0x299   : > { %v9809_v42 = vpop.permute.xlu1 %9808  ;;  %22565 = vmatpush1.msk.msra.mxu0 %vm214_vm1, %v9631_v44  ;;  %v22598_v44 = vld [vmem:[%s26943_s1 + $0xe4] sm:$0xf] }
 0x29a   : > { %22566 = vmatmul.mubr.msk.f32.vlgmr.msra.gmra.mrb[8].mxu0 %vm210_vm2, %v22563_v62 }
 0x29b   : > { %11977 = vrot.lane.b32.xlu1 %v25012_v33, %s23738_s29  ;;  %v9807_v3 = vpop.permute.xlu0 %9806  ;;  %9892 = vmatprep.mubr.f32.mxu0 %v23682_v7 }
 0x29c   : > { %11979 = vrot.lane.b32.xlu0 %v25020_v36, %s23738_s29  ;;  %v9814_v48 = vsel %vm9812_vm13, %v9805_v37, %v9807_v3  ;;  %v9815_v19 = vsel %vm9812_vm13, %v9807_v3, %v9809_v42 }
 0x29d   : > { %v9803_v45 = vpop.permute.xlu1 %9802  ;;  %22571 = vmatprep.subr.msk.mxu0 %vm214_vm1, %v9814_v48 }
 0x29e   : > { %v9813_v49 = vsel %vm9812_vm13, %v9803_v45, %v9805_v37 }
 0x29f   : > { %11981 = vrot.lane.b32.xlu1 %v25031_v40, %s23738_s29  ;;  %22572 = vmatpush1.msk.msra.mxu0 %vm214_vm1, %v9813_v49  ;;  %v9811_v20 = vpop.permute.xlu0 %9810 }
 0x2a0   : > { %11983 = vrot.lane.b32.xlu0 %v11967_v47, %s23738_s29  ;;  %v9816_v51 = vsel %vm9812_vm13, %v9809_v42, %v9811_v20 }
 0x2a1   : > { %v9989_v50 = vpop.permute.xlu1 %9988  ;;  %22574 = vmatprep.subr.msk.mxu1 %vm214_vm1, %v9816_v51 }
 0x2a2   : > { %v6147_v43 = vpop.f32.mrb[4].mxu1  ;;  %22575 = vmatpush1.msk.msra.mxu1 %vm214_vm1, %v9815_v19  ;;  %22573 = vmatmul.mubr.msk.f32.vlgmr.msra.gmra.mrb[8].mxu0 %vm210_vm2, %v22570_v52 }
 0x2a3   : > { %11975 = vrot.lane.b32.xlu1 %v25002_v29, %s23738_s29  ;;  %v9987_v13 = vpop.permute.xlu0 %9986  ;;  %v6149_v14 = vpop.f32.mrb[5].mxu1  ;;  %22576 = vmatmul.mubr.msk.f32.vlgmr.msra.gmra.mrb[8].mxu1 %vm210_vm2, %v22570_v52 }
 0x2a4   : > { %12175 = vrot.lane.b32.xlu0 %v25012_v33, %s23695_s28  ;;  %v6163_v15 = vcombine.low %v6147_v43, %v6149_v14  ;;  %v9996_v54 = vsel %vm9994_vm12, %v9987_v13, %v9989_v50  ;;  %10145 = vmatprep.mubr.f32.mxu1 %v23682_v7  ;;  %v22605_v43 = vld [vmem:[%s26943_s1 + $0xe8] sm:$0xf] }
 0x2a5   : > { %v9993_v21 = vpop.permute.xlu1 %9992  ;;  %v6076_v56 = vpop.f32.mrb[4].mxu0  ;;  %22578 = vmatprep.subr.msk.mxu0 %vm214_vm1, %v9996_v54  ;;  %10074 = vmatprep.mubr.f32.mxu0 %v23682_v7  ;;  %v13052_v54 = vld [vmem:[%s23826_s30 + $0x14] sm:$0xf] }
 0x2a6   : > { %v25331_v59 = vadd.f32 %v6163_v15, %v25056_v22  ;;  %v6078_v60 = vpop.f32.mrb[5].mxu0 }
 0x2a7   : > { %12177 = vrot.lane.b32.xlu1 %v25020_v36, %s23695_s28  ;;  %v6162_v61 = vcombine.low %v6076_v56, %v6078_v60  ;;  %v9991_v41 = vpop.permute.xlu0 %9990 }
 0x2a8   : > { %12179 = vrot.lane.b32.xlu0 %v25031_v40, %s23695_s28  ;;  %v9997_v63 = vsel %vm9994_vm12, %v9989_v50, %v9991_v41  ;;  %v9998_v0 = vsel %vm9994_vm12, %v9991_v41, %v9993_v21  ;;  %v12871_v50 = vld [vmem:[%s23826_s30 + $0x14] sm:$0xf]  ;;  %v22612_v41 = vld [vmem:[%s26943_s1 + $0xec] sm:$0xf] }
 0x2a9   : > { %v10185_v57 = vpop.permute.xlu1 %10184  ;;  %v25342_v8 = vadd.f32 %v6162_v61, %v25052_v53  ;;  %22581 = vmatprep.subr.msk.mxu1 %vm214_vm1, %v9998_v0 }
 0x2aa   : > { %22582 = vmatpush1.msk.msra.mxu1 %vm214_vm1, %v9997_v63 }
 0x2ab   : > { %12181 = vrot.lane.b32.xlu1 %v12163_v55, %s23695_s28  ;;  %v9985_v9 = vpop.permute.xlu0 %9984  ;;  %22583 = vmatmul.mubr.msk.f32.vlgmr.msra.gmra.mrb[8].mxu1 %vm210_vm2, %v22577_v5 }
 0x2ac   : > { %12173 = vrot.lane.b32.xlu0 %v25002_v29, %s23695_s28  ;;  %v9995_v10 = vsel %vm9994_vm12, %v9985_v9, %v9987_v13  ;;  %10342 = vmatprep.mubr.f32.mxu1 %v23682_v7  ;;  %s23746_s28 = smov 12  }
 0x2ad   : > { %v10189_v22 = vpop.permute.xlu1 %10188  ;;  %22579 = vmatpush1.msk.msra.mxu0 %vm214_vm1, %v9995_v10  ;;  %v13233_v10 = vld [vmem:[%s23826_s30 + $0x14] sm:$0xf] }
 0x2ae   : > { %22580 = vmatmul.mubr.msk.f32.vlgmr.msra.gmra.mrb[8].mxu0 %vm210_vm2, %v22577_v5 }
 0x2af   : > { %12342 = vrot.lane.b32.xlu1 %v25012_v33, %s23694_s25  ;;  %v10187_v11 = vpop.permute.xlu0 %10186  ;;  %10271 = vmatprep.mubr.f32.mxu0 %v23682_v7 }
 0x2b0   : > { %12344 = vrot.lane.b32.xlu0 %v25020_v36, %s23694_s25  ;;  %v10193_v12 = vsel %vm720_vm4, %v10185_v57, %v10187_v11  ;;  %v10194_v24 = vsel %vm720_vm4, %v10187_v11, %v10189_v22 }
 0x2b1   : > { %v10183_v53 = vpop.permute.xlu1 %10182  ;;  %22586 = vmatprep.subr.msk.mxu0 %vm214_vm1, %v10193_v12 }
 0x2b2   : > { %v10192_v16 = vsel %vm720_vm4, %v10183_v53, %v10185_v57  ;;  %v25481_v53 = vld [vmem:[%s23826_s30 + $0x4] sm:$0xff] }
 0x2b3   : > { %12346 = vrot.lane.b32.xlu1 %v25031_v40, %s23694_s25  ;;  %22587 = vmatpush1.msk.msra.mxu0 %vm214_vm1, %v10192_v16  ;;  %v10191_v18 = vpop.permute.xlu0 %10190  ;;  %v25491_v12 = vcombine.high %v25481_v53, %v25481_v53 }
 0x2b4   : > { %12348 = vrot.lane.b32.xlu0 %v12163_v55, %s23694_s25  ;;  %22588 = vmatmul.mubr.msk.f32.vlgmr.msra.gmra.mrb[10].mxu0 %vm210_vm2, %v22585_v38  ;;  %v10195_v23 = vsel %vm720_vm4, %v10189_v22, %v10191_v18  ;;  %v22619_v18 = vld [vmem:[%s26943_s1 + $0xf0] sm:$0xf]  ;;  %vm11985_vm4 = vcmask 949248  }
 0x2b5   : > { %v10354_v17 = vpop.permute.xlu1 %10353  ;;  %10438 = vmatprep.mubr.f32.mxu0 %v23682_v7  ;;  %22589 = vmatprep.subr.msk.mxu1 %vm214_vm1, %v10195_v23 }
 0x2b6   : > { %22590 = vmatpush1.msk.msra.mxu1 %vm214_vm1, %v10194_v24 }
 0x2b7   : > { %12340 = vrot.lane.b32.xlu1 %v25002_v29, %s23694_s25  ;;  %v10352_v26 = vpop.permute.xlu0 %10351  ;;  %22591 = vmatmul.mubr.msk.f32.vlgmr.msra.gmra.mrb[10].mxu1 %vm210_vm2, %v22585_v38 }
 0x2b8   : > { %12519 = vrot.lane.b32.xlu0 %v25012_v33, %s23696_s20  ;;  %v10360_v27 = vsel %vm538_vm3, %v10352_v26, %v10354_v17  ;;  %10509 = vmatprep.mubr.f32.mxu1 %v23682_v7 }
 0x2b9   : > { %v10358_v25 = vpop.permute.xlu1 %10357  ;;  %22592 = vmatprep.subr.msk.mxu0 %vm214_vm1, %v10360_v27 }
 0x2bb   : > { %12521 = vrot.lane.b32.xlu1 %v25020_v36, %s23696_s20  ;;  %v10356_v30 = vpop.permute.xlu0 %10355 }
 0x2bc   : > { %12523 = vrot.lane.b32.xlu0 %v25031_v40, %s23696_s20  ;;  %v10361_v31 = vsel %vm538_vm3, %v10354_v17, %v10356_v30  ;;  %v10362_v32 = vsel %vm538_vm3, %v10356_v30, %v10358_v25  ;;  %v13414_v25 = vld [vmem:[%s23826_s30 + $0x14] sm:$0xf]  ;;  %v25523_v30 = vld [vmem:[%s23826_s30 + $0xc] sm:$0xff] }
 0x2bd   : > { %v10529_v28 = vpop.permute.xlu1 %10528  ;;  %22595 = vmatprep.subr.msk.mxu1 %vm214_vm1, %v10362_v32  ;;  %v25531_v32 = vcombine.high %v25523_v30, %v25523_v30 }
 0x2be   : > { %22596 = vmatpush1.msk.msra.mxu1 %vm214_vm1, %v10361_v31 }
 0x2bf   : > { %12525 = vrot.lane.b32.xlu1 %v12509_v1, %s23696_s20  ;;  %v10350_v58 = vpop.permute.xlu0 %10349  ;;  %22597 = vmatmul.mubr.msk.f32.vlgmr.msra.gmra.mrb[10].mxu1 %vm210_vm2, %v22584_v34 }
 0x2c0   : > { %12517 = vrot.lane.b32.xlu0 %v25002_v29, %s23696_s20  ;;  %v10359_v35 = vsel %vm538_vm3, %v10350_v58, %v10352_v26  ;;  %10686 = vmatprep.mubr.f32.mxu1 %v23682_v7  ;;  %vm11803_vm3 = vcmask 957440  }
 0x2c1   : > { %v10533_v46 = vpop.permute.xlu1 %10532  ;;  %22593 = vmatpush1.msk.msra.mxu0 %vm214_vm1, %v10359_v35 }
 0x2c2   : > { %22594 = vmatmul.mubr.msk.f32.vlgmr.msra.gmra.mrb[10].mxu0 %vm210_vm2, %v22584_v34 }
 0x2c3   : > { %12700 = vrot.lane.b32.xlu1 %v25012_v33, %s23697_s27  ;;  %v10531_v39 = vpop.permute.xlu0 %10530  ;;  %10615 = vmatprep.mubr.f32.mxu0 %v23682_v7 }
 0x2c4   : > { %12702 = vrot.lane.b32.xlu0 %v25020_v36, %s23697_s27  ;;  %v10537_v2 = vsel %vm902_vm5, %v10529_v28, %v10531_v39  ;;  %v10538_v47 = vsel %vm902_vm5, %v10531_v39, %v10533_v46 }
 0x2c5   : > { %v10527_v37 = vpop.permute.xlu1 %10526  ;;  %22599 = vmatprep.subr.msk.mxu0 %vm214_vm1, %v10537_v2 }
 0x2c6   : > { %v10536_v62 = vsel %vm902_vm5, %v10527_v37, %v10529_v28  ;;  %v13595_v37 = vld [vmem:[%s23826_s30 + $0x14] sm:$0xf] }
 0x2c7   : > { %12704 = vrot.lane.b32.xlu1 %v25031_v40, %s23697_s27  ;;  %22600 = vmatpush1.msk.msra.mxu0 %vm214_vm1, %v10536_v62  ;;  %v10535_v4 = vpop.permute.xlu0 %10534 }
 0x2c8   : > { %12706 = vrot.lane.b32.xlu0 %v12690_v6, %s23697_s27  ;;  %v10539_v45 = vsel %vm902_vm5, %v10533_v46, %v10535_v4 }
 0x2c9   : > { %v10712_v42 = vpop.permute.xlu1 %10711  ;;  %22602 = vmatprep.subr.msk.mxu1 %vm214_vm1, %v10539_v45 }
 0x2ca   : > { %22603 = vmatpush1.msk.msra.mxu1 %vm214_vm1, %v10538_v47  ;;  %22601 = vmatmul.mubr.msk.f32.vlgmr.msra.gmra.mrb[10].mxu0 %vm210_vm2, %v22598_v44 }
 0x2cb   : > { %12698 = vrot.lane.b32.xlu1 %v25002_v29, %s23697_s27  ;;  %v10710_v48 = vpop.permute.xlu0 %10709  ;;  %22604 = vmatmul.mubr.msk.f32.vlgmr.msra.gmra.mrb[10].mxu1 %vm210_vm2, %v22598_v44 }
 0x2cc   : > { %12881 = vrot.lane.b32.xlu0 %v25012_v33, %s27039_s4  ;;  %v10718_v49 = vsel %vm1084_vm6, %v10710_v48, %v10712_v42  ;;  %10796 = vmatprep.mubr.f32.mxu0 %v23682_v7 }
 0x2cd   : > { %v10716_v3 = vpop.permute.xlu1 %10715  ;;  %22606 = vmatprep.subr.msk.mxu0 %vm214_vm1, %v10718_v49  ;;  %10867 = vmatprep.mubr.f32.mxu1 %v23682_v7 }
 0x2cf   : > { %12883 = vrot.lane.b32.xlu1 %v25020_v36, %s27039_s4  ;;  %v10714_v51 = vpop.permute.xlu0 %10713 }
 0x2d0   : > { %12885 = vrot.lane.b32.xlu0 %v25031_v40, %s27039_s4  ;;  %v10719_v52 = vsel %vm1084_vm6, %v10712_v42, %v10714_v51  ;;  %v10720_v19 = vsel %vm1084_vm6, %v10714_v51, %v10716_v3  ;;  %v22633_v42 = vld [vmem:[%s26943_s1 + $0xf8] sm:$0xf]  ;;  %v13776_v3 = vld [vmem:[%s23826_s30 + $0x14] sm:$0xf] }
 0x2d1   : > { %v10891_v20 = vpop.permute.xlu1 %10890  ;;  %22609 = vmatprep.subr.msk.mxu1 %vm214_vm1, %v10720_v19 }
 0x2d2   : > { %22610 = vmatpush1.msk.msra.mxu1 %vm214_vm1, %v10719_v52  ;;  %v22640_v52 = vld [vmem:[%s26943_s1 + $0xfc] sm:$0xf] }
 0x2d3   : > { %12887 = vrot.lane.b32.xlu1 %v12871_v50, %s27039_s4  ;;  %v10708_v13 = vpop.permute.xlu0 %10707  ;;  %22611 = vmatmul.mubr.msk.f32.vlgmr.msra.gmra.mrb[10].mxu1 %vm210_vm2, %v22605_v43 }
 0x2d4   : > { %12879 = vrot.lane.b32.xlu0 %v25002_v29, %s27039_s4  ;;  %v10717_v14 = vsel %vm1084_vm6, %v10708_v13, %v10710_v48  ;;  %11048 = vmatprep.mubr.f32.mxu1 %v23682_v7  ;;  %s27041_s4 = smov 94  }
 0x2d5   : > { %v10895_v21 = vpop.permute.xlu1 %10894  ;;  %22607 = vmatpush1.msk.msra.mxu0 %vm214_vm1, %v10717_v14 }
 0x2d6   : > { %22608 = vmatmul.mubr.msk.f32.vlgmr.msra.gmra.mrb[10].mxu0 %vm210_vm2, %v22605_v43 }
 0x2d7   : > { %13062 = vrot.lane.b32.xlu1 %v25012_v33, %s27040_s5  ;;  %v10893_v55 = vpop.permute.xlu0 %10892  ;;  %10977 = vmatprep.mubr.f32.mxu0 %v23682_v7 }
 0x2d8   : > { %13064 = vrot.lane.b32.xlu0 %v25020_v36, %s27040_s5  ;;  %v10899_v56 = vsel %vm1266_vm7, %v10891_v20, %v10893_v55  ;;  %v10900_v0 = vsel %vm1266_vm7, %v10893_v55, %v10895_v21 }
 0x2d9   : > { %v10889_v15 = vpop.permute.xlu1 %10888  ;;  %22613 = vmatprep.subr.msk.mxu0 %vm214_vm1, %v10899_v56 }
 0x2da   : > { %v10898_v57 = vsel %vm1266_vm7, %v10889_v15, %v10891_v20  ;;  %v13958_v15 = vld [vmem:[%s23826_s30 + $0x14] sm:$0xf] }
 0x2db   : > { %13066 = vrot.lane.b32.xlu1 %v25031_v40, %s27040_s5  ;;  %22614 = vmatpush1.msk.msra.mxu0 %vm214_vm1, %v10898_v57  ;;  %v10897_v61 = vpop.permute.xlu0 %10896 }
 0x2dc   : > { %13068 = vrot.lane.b32.xlu0 %v13052_v54, %s27040_s5  ;;  %v10901_v63 = vsel %vm1266_vm7, %v10895_v21, %v10897_v61 }
 0x2dd   : > { %v11074_v60 = vpop.permute.xlu1 %11073  ;;  %22616 = vmatprep.subr.msk.mxu1 %vm214_vm1, %v10901_v63 }
 0x2de   : > { %22617 = vmatpush1.msk.msra.mxu1 %vm214_vm1, %v10900_v0  ;;  %22615 = vmatmul.mubr.msk.f32.vlgmr.msra.gmra.mrb[10].mxu0 %vm210_vm2, %v22612_v41 }
 0x2df   : > { %13060 = vrot.lane.b32.xlu1 %v25002_v29, %s27040_s5  ;;  %v11072_v22 = vpop.permute.xlu0 %11071  ;;  %22618 = vmatmul.mubr.msk.f32.vlgmr.msra.gmra.mrb[10].mxu1 %vm210_vm2, %v22612_v41  ;;  %s27042_s5 = smov 93  }
 0x2e0   : > { %13243 = vrot.lane.b32.xlu0 %v25012_v33, %s27041_s4  ;;  %v11080_v9 = vsel %vm1448_vm8, %v11072_v22, %v11074_v60  ;;  %11158 = vmatprep.mubr.f32.mxu0 %v23682_v7 }
 0x2e1   : > { %v11078_v5 = vpop.permute.xlu1 %11077  ;;  %22620 = vmatprep.subr.msk.mxu0 %vm214_vm1, %v11080_v9  ;;  %11229 = vmatprep.mubr.f32.mxu1 %v23682_v7 }
 0x2e3   : > { %13245 = vrot.lane.b32.xlu1 %v25020_v36, %s27041_s4  ;;  %v11076_v11 = vpop.permute.xlu0 %11075 }
 0x2e4   : > { %13247 = vrot.lane.b32.xlu0 %v25031_v40, %s27041_s4  ;;  %v11081_v38 = vsel %vm1448_vm8, %v11074_v60, %v11076_v11  ;;  %v11082_v16 = vsel %vm1448_vm8, %v11076_v11, %v11078_v5  ;;  %v22647_v60 = vld [vmem:[%s26943_s1 + $0x100] sm:$0xf] }
 0x2e5   : > { %v11253_v33 = vpop.permute.xlu1 %11252  ;;  %22623 = vmatprep.subr.msk.mxu1 %vm214_vm1, %v11082_v16 }
 0x2e6   : > { %22624 = vmatpush1.msk.msra.mxu1 %vm214_vm1, %v11081_v38 }
 0x2e7   : > { %13249 = vrot.lane.b32.xlu1 %v13233_v10, %s27041_s4  ;;  %v11070_v23 = vpop.permute.xlu0 %11069  ;;  %22625 = vmatmul.mubr.msk.f32.vlgmr.msra.gmra.mrb[10].mxu1 %vm210_vm2, %v22619_v18 }
 0x2e8   : > { %13241 = vrot.lane.b32.xlu0 %v25002_v29, %s27041_s4  ;;  %v11079_v24 = vsel %vm1448_vm8, %v11070_v23, %v11072_v22  ;;  %11410 = vmatprep.mubr.f32.mxu1 %v23682_v7  ;;  %s27043_s4 = smov 92   ;;  %v14154_v22 = vld [vmem:[%s23826_s30 + $0x14] sm:$0xf] }
 0x2e9   : > { %v11257_v17 = vpop.permute.xlu1 %11256  ;;  %22621 = vmatpush1.msk.msra.mxu0 %vm214_vm1, %v11079_v24 }
 0x2ea   : > { %22622 = vmatmul.mubr.msk.f32.vlgmr.msra.gmra.mrb[10].mxu0 %vm210_vm2, %v22619_v18 }
 0x2eb   : > { %13424 = vrot.lane.b32.xlu1 %v25491_v12, %s27042_s5  ;;  %v11255_v26 = vpop.permute.xlu0 %11254  ;;  %11339 = vmatprep.mubr.f32.mxu0 %v23682_v7 }
 0x2ec   : > { %13426 = vrot.lane.b32.xlu0 %v25020_v36, %s27042_s5  ;;  %v11261_v27 = vsel %vm1630_vm9, %v11253_v33, %v11255_v26  ;;  %v11262_v46 = vsel %vm1630_vm9, %v11255_v26, %v11257_v17  ;;  %v22654_v26 = vld [vmem:[%s26943_s1 + $0x104] sm:$0xf] }
 0x2ed   : > { %v11251_v29 = vpop.permute.xlu1 %11250  ;;  %22627 = vmatprep.subr.msk.mxu0 %vm214_vm1, %v11261_v27 }
 0x2ee   : > { %v11260_v36 = vsel %vm1630_vm9, %v11251_v29, %v11253_v33 }
 0x2ef   : > { %13428 = vrot.lane.b32.xlu1 %v25031_v40, %s27042_s5  ;;  %22628 = vmatpush1.msk.msra.mxu0 %vm214_vm1, %v11260_v36  ;;  %v11259_v28 = vpop.permute.xlu0 %11258  ;;  %v22626_v40 = vld [vmem:[%s26943_s1 + $0xf4] sm:$0xf] }
 0x2f0   : > { %13430 = vrot.lane.b32.xlu0 %v13414_v25, %s27042_s5  ;;  %v11263_v31 = vsel %vm1630_vm9, %v11257_v17, %v11259_v28 }
 0x2f1   : > { %v11436_v1 = vpop.permute.xlu1 %11435  ;;  %22630 = vmatprep.subr.msk.mxu1 %vm214_vm1, %v11263_v31 }
 0x2f2   : > { %22631 = vmatpush1.msk.msra.mxu1 %vm214_vm1, %v11262_v46  ;;  %22629 = vmatmul.mubr.msk.f32.vlgmr.msra.gmra.mrb[10].mxu0 %vm210_vm2, %v22626_v40 }
 0x2f3   : > { %13422 = vrot.lane.b32.xlu1 %v25481_v53, %s27042_s5  ;;  %v11434_v58 = vpop.permute.xlu0 %11433  ;;  %22632 = vmatmul.mubr.msk.f32.vlgmr.msra.gmra.mrb[10].mxu1 %vm210_vm2, %v22626_v40  ;;  %s23739_s5 = smov 91  }
 0x2f4   : > { %13605 = vrot.lane.b32.xlu0 %v25491_v12, %s27043_s4  ;;  %v11442_v35 = vsel %vm1812_vm10, %v11434_v58, %v11436_v1  ;;  %11520 = vmatprep.mubr.f32.mxu0 %v23682_v7 }
 0x2f5   : > { %v11440_v34 = vpop.permute.xlu1 %11439  ;;  %22634 = vmatprep.subr.msk.mxu0 %vm214_vm1, %v11442_v35  ;;  %11591 = vmatprep.mubr.f32.mxu1 %v23682_v7 }
 0x2f7   : > { %13607 = vrot.lane.b32.xlu1 %v25523_v30, %s27043_s4  ;;  %v11438_v39 = vpop.permute.xlu0 %11437 }
 0x2f8   : > { %13609 = vrot.lane.b32.xlu0 %v25531_v32, %s27043_s4  ;;  %v11443_v2 = vsel %vm1812_vm10, %v11436_v1, %v11438_v39  ;;  %v11444_v62 = vsel %vm1812_vm10, %v11438_v39, %v11440_v34  ;;  %v14500_v39 = vld [vmem:[%s23826_s30 + $0x14] sm:$0xf] }
 0x2f9   : > { %v11615_v6 = vpop.permute.xlu1 %11614  ;;  %22637 = vmatprep.subr.msk.mxu1 %vm214_vm1, %v11444_v62 }
 0x2fa   : > { %22638 = vmatpush1.msk.msra.mxu1 %vm214_vm1, %v11443_v2 }
 0x2fb   : > { %13611 = vrot.lane.b32.xlu1 %v13595_v37, %s27043_s4  ;;  %v11432_v44 = vpop.permute.xlu0 %11431  ;;  %22639 = vmatmul.mubr.msk.f32.vlgmr.msra.gmra.mrb[10].mxu1 %vm210_vm2, %v22633_v42 }
 0x2fc   : > { %13603 = vrot.lane.b32.xlu0 %v25481_v53, %s27043_s4  ;;  %v11441_v45 = vsel %vm1812_vm10, %v11432_v44, %v11434_v58  ;;  %11772 = vmatprep.mubr.f32.mxu1 %v23682_v7  ;;  %s23740_s4 = smov 90   ;;  %v22662_v58 = vld [vmem:[%s26943_s1 + $0x10c] sm:$0xf] }
 0x2fd   : > { %v11619_v4 = vpop.permute.xlu1 %11618  ;;  %22635 = vmatpush1.msk.msra.mxu0 %vm214_vm1, %v11441_v45  ;;  %v22661_v45 = vld [vmem:[%s26943_s1 + $0x108] sm:$0xf] }
 0x2fe   : > { %22636 = vmatmul.mubr.msk.f32.vlgmr.msra.gmra.mrb[10].mxu0 %vm210_vm2, %v22633_v42 }
 0x2ff   : > { %13786 = vrot.lane.b32.xlu1 %v25491_v12, %s23739_s5  ;;  %v11617_v48 = vpop.permute.xlu0 %11616  ;;  %11701 = vmatprep.mubr.f32.mxu0 %v23682_v7 }
 0x300   : > { %13788 = vrot.lane.b32.xlu0 %v25523_v30, %s23739_s5  ;;  %v11623_v49 = vsel %vm1994_vm11, %v11615_v6, %v11617_v48  ;;  %v11624_v21 = vsel %vm1994_vm11, %v11617_v48, %v11619_v4 }
 0x301   : > { %v11613_v47 = vpop.permute.xlu1 %11612  ;;  %22641 = vmatprep.subr.msk.mxu0 %vm214_vm1, %v11623_v49 }
 0x302   : > { %v11622_v50 = vsel %vm1994_vm11, %v11613_v47, %v11615_v6 }
 0x303   : > { %13790 = vrot.lane.b32.xlu1 %v25531_v32, %s23739_s5  ;;  %22642 = vmatpush1.msk.msra.mxu0 %vm214_vm1, %v11622_v50  ;;  %v11621_v51 = vpop.permute.xlu0 %11620 }
 0x304   : > { %13792 = vrot.lane.b32.xlu0 %v13776_v3, %s23739_s5  ;;  %v11625_v19 = vsel %vm1994_vm11, %v11619_v4, %v11621_v51 }
 0x305   : > { %v11798_v20 = vpop.permute.xlu1 %11797  ;;  %22644 = vmatprep.subr.msk.mxu1 %vm214_vm1, %v11625_v19 }
 0x306   : > { %22645 = vmatpush1.msk.msra.mxu1 %vm214_vm1, %v11624_v21  ;;  %22643 = vmatmul.mubr.msk.f32.vlgmr.msra.gmra.mrb[10].mxu0 %vm210_vm2, %v22640_v52 }
 0x307   : > { %13784 = vrot.lane.b32.xlu1 %v25481_v53, %s23739_s5  ;;  %v11796_v13 = vpop.permute.xlu0 %11795  ;;  %22646 = vmatmul.mubr.msk.f32.vlgmr.msra.gmra.mrb[10].mxu1 %vm210_vm2, %v22640_v52  ;;  %s27044_s5 = smov 73  }
 0x308   : > { %13968 = vrot.lane.b32.xlu0 %v25491_v12, %s23740_s4  ;;  %v11805_v14 = vsel %vm11803_vm3, %v11796_v13, %v11798_v20  ;;  %11883 = vmatprep.mubr.f32.mxu0 %v23682_v7 }
 0x309   : > { %v11802_v43 = vpop.permute.xlu1 %11801  ;;  %22648 = vmatprep.subr.msk.mxu0 %vm214_vm1, %v11805_v14  ;;  %11954 = vmatprep.mubr.f32.mxu1 %v23682_v7 }
 0x30b   : > { %13970 = vrot.lane.b32.xlu1 %v25523_v30, %s23740_s4  ;;  %v11800_v55 = vpop.permute.xlu0 %11799 }
 0x30c   : > { %13972 = vrot.lane.b32.xlu0 %v25531_v32, %s23740_s4  ;;  %v11806_v56 = vsel %vm11803_vm3, %v11798_v20, %v11800_v55  ;;  %v11807_v57 = vsel %vm11803_vm3, %v11800_v55, %v11802_v43  ;;  %v14681_v20 = vld [vmem:[%s23826_s30 + $0x14] sm:$0xf] }
 0x30d   : > { %v11978_v54 = vpop.permute.xlu1 %11977  ;;  %22651 = vmatprep.subr.msk.mxu1 %vm214_vm1, %v11807_v57  ;;  %v14862_v55 = vld [vmem:[%s23826_s30 + $0x14] sm:$0xf] }
 0x30e   : > { %22652 = vmatpush1.msk.msra.mxu1 %vm214_vm1, %v11806_v56 }
 0x30f   : > { %13974 = vrot.lane.b32.xlu1 %v13958_v15, %s23740_s4  ;;  %v11794_v41 = vpop.permute.xlu0 %11793  ;;  %22653 = vmatmul.mubr.msk.f32.vlgmr.msra.gmra.mrb[10].mxu1 %vm210_vm2, %v22647_v60 }
 0x310   : > { %13966 = vrot.lane.b32.xlu0 %v25481_v53, %s23740_s4  ;;  %v11804_v63 = vsel %vm11803_vm3, %v11794_v41, %v11796_v13  ;;  %12136 = vmatprep.mubr.f32.mxu1 %v23682_v7  ;;  %s27045_s4 = smov 74   ;;  %v22675_v13 = vld [vmem:[%s26943_s1 + $0x110] sm:$0xf] }
 0x311   : > { %v11982_v61 = vpop.permute.xlu1 %11981  ;;  %v8076_v0 = vpop.f32.mrb[6].mxu0  ;;  %22649 = vmatpush1.msk.msra.mxu0 %vm214_vm1, %v11804_v63  ;;  %v22682_v63 = vld [vmem:[%s26943_s1 + $0x114] sm:$0xf] }
 0x312   : > { %v8078_v9 = vpop.f32.mrb[7].mxu0  ;;  %v8147_v10 = vpop.f32.mrb[6].mxu1  ;;  %22650 = vmatmul.mubr.msk.f32.vlgmr.msra.gmra.mrb[10].mxu0 %vm210_vm2, %v22647_v60 }
 0x313   : > { %14166 = vrot.lane.b32.xlu1 %v25491_v12, %s27044_s5  ;;  %v8162_v33 = vcombine.low %v8076_v0, %v8078_v9  ;;  %v11980_v11 = vpop.permute.xlu0 %11979  ;;  %v8149_v38 = vpop.f32.mrb[7].mxu1  ;;  %12065 = vmatprep.mubr.f32.mxu0 %v23682_v7 }
 0x314   : > { %14168 = vrot.lane.b32.xlu0 %v25523_v30, %s27044_s5  ;;  %v8163_v16 = vcombine.low %v8147_v10, %v8149_v38  ;;  %v11987_v17 = vsel %vm11985_vm4, %v11978_v54, %v11980_v11  ;;  %v11988_v27 = vsel %vm11985_vm4, %v11980_v11, %v11982_v61 }
 0x315   : > { %v11976_v5 = vpop.permute.xlu1 %11975  ;;  %v25615_v18 = vadd.f32 %v8162_v33, %v25342_v8  ;;  %22655 = vmatprep.subr.msk.mxu0 %vm214_vm1, %v11987_v17  ;;  %v15043_v33 = vld [vmem:[%s23826_s30 + $0x14] sm:$0xf] }
 0x316   : > { %v11986_v23 = vsel %vm11985_vm4, %v11976_v5, %v11978_v54  ;;  %v25620_v29 = vadd.f32 %v8163_v16, %v25331_v59 }
 0x317   : > { %14170 = vrot.lane.b32.xlu1 %v25531_v32, %s27044_s5  ;;  %22656 = vmatpush1.msk.msra.mxu0 %vm214_vm1, %v11986_v23  ;;  %v11984_v25 = vpop.permute.xlu0 %11983 }
 0x318   : > { %14172 = vrot.lane.b32.xlu0 %v14154_v22, %s27044_s5  ;;  %v11989_v8 = vsel %vm11985_vm4, %v11982_v61, %v11984_v25 }
 0x319   : > { %v12178_v24 = vpop.permute.xlu1 %12177  ;;  %22658 = vmatprep.subr.msk.mxu1 %vm214_vm1, %v11989_v8 }
 0x31a   : > { %22657 = vmatmul.mubr.msk.f32.vlgmr.msra.gmra.mrb[10].mxu0 %vm210_vm2, %v22654_v26  ;;  %22659 = vmatpush1.msk.msra.mxu1 %vm214_vm1, %v11988_v27  ;;  %v15224_v27 = vld [vmem:[%s23826_s30 + $0x14] sm:$0xf] }
 0x31b   : > { %14164 = vrot.lane.b32.xlu1 %v25481_v53, %s27044_s5  ;;  %v12176_v36 = vpop.permute.xlu0 %12175  ;;  %22660 = vmatmul.mubr.msk.f32.vlgmr.msra.gmra.mrb[10].mxu1 %vm210_vm2, %v22654_v26  ;;  %s27046_s5 = smov 72  }
 0x31c   : > { %14333 = vrot.lane.b32.xlu0 %v25491_v12, %s27045_s4  ;;  %v12184_v1 = vsel %vm2720_vm15, %v12176_v36, %v12178_v24  ;;  %12262 = vmatprep.mubr.f32.mxu0 %v23682_v7 }
 0x31d   : > { %v12182_v59 = vpop.permute.xlu1 %12181  ;;  %22663 = vmatprep.subr.msk.mxu0 %vm214_vm1, %v12184_v1  ;;  %12333 = vmatprep.mubr.f32.mxu1 %v23682_v7 }
 0x31f   : > { %14335 = vrot.lane.b32.xlu1 %v25523_v30, %s27045_s4  ;;  %v12180_v40 = vpop.permute.xlu0 %12179 }
 0x320   : > { %14337 = vrot.lane.b32.xlu0 %v25531_v32, %s27045_s4  ;;  %v12185_v31 = vsel %vm2720_vm15, %v12178_v24, %v12180_v40  ;;  %v12186_v46 = vsel %vm2720_vm15, %v12180_v40, %v12182_v59  ;;  %v22689_v24 = vld [vmem:[%s26943_s1 + $0x118] sm:$0xf] }
 0x321   : > { %v12343_v28 = vpop.permute.xlu1 %12342  ;;  %22666 = vmatprep.subr.msk.mxu1 %vm214_vm1, %v12186_v46 }
 0x322   : > { %22667 = vmatpush1.msk.msra.mxu1 %vm214_vm1, %v12185_v31  ;;  %v22696_v31 = vld [vmem:[%s26943_s1 + $0x11c] sm:$0xf] }
 0x323   : > { %14339 = vrot.lane.b32.xlu1 %v14154_v22, %s27045_s4  ;;  %v12174_v35 = vpop.permute.xlu0 %12173  ;;  %22668 = vmatmul.mubr.msk.f32.vlgmr.msra.gmra.mrb[12].mxu1 %vm210_vm2, %v22662_v58 }
 0x324   : > { %14331 = vrot.lane.b32.xlu0 %v25481_v53, %s27045_s4  ;;  %v12183_v37 = vsel %vm2720_vm15, %v12174_v35, %v12176_v36  ;;  %12500 = vmatprep.mubr.f32.mxu1 %v23682_v7  ;;  %s27047_s4 = smov 71  }
 0x325   : > { %v12347_v34 = vpop.permute.xlu1 %12346  ;;  %22664 = vmatpush1.msk.msra.mxu0 %vm214_vm1, %v12183_v37 }
 0x326   : > { %22665 = vmatmul.mubr.msk.f32.vlgmr.msra.gmra.mrb[12].mxu0 %vm210_vm2, %v22662_v58 }
 0x327   : > { %14510 = vrot.lane.b32.xlu1 %v25491_v12, %s27046_s5  ;;  %v12345_v2 = vpop.permute.xlu0 %12344  ;;  %12429 = vmatprep.mubr.f32.mxu0 %v23682_v7 }
 0x328   : > { %14512 = vrot.lane.b32.xlu0 %v25523_v30, %s27046_s5  ;;  %v12351_v62 = vsel %vm2538_vm14, %v12343_v28, %v12345_v2  ;;  %v12352_v3 = vsel %vm2538_vm14, %v12345_v2, %v12347_v34 }
 0x329   : > { %v12341_v6 = vpop.permute.xlu1 %12340  ;;  %22669 = vmatprep.subr.msk.mxu0 %vm214_vm1, %v12351_v62 }
 0x32a   : > { %v12350_v42 = vsel %vm2538_vm14, %v12341_v6, %v12343_v28  ;;  %v15405_v6 = vld [vmem:[%s23826_s30 + $0x14] sm:$0xf] }
 0x32b   : > { %14514 = vrot.lane.b32.xlu1 %v25531_v32, %s27046_s5  ;;  %22670 = vmatpush1.msk.msra.mxu0 %vm214_vm1, %v12350_v42  ;;  %v12349_v44 = vpop.permute.xlu0 %12348 }
 0x32c   : > { %14516 = vrot.lane.b32.xlu0 %v14500_v39, %s27046_s5  ;;  %v12353_v47 = vsel %vm2538_vm14, %v12347_v34, %v12349_v44  ;;  %vm27049_vm14 = vcmask 793600  }
 0x32d   : > { %v12522_v4 = vpop.permute.xlu1 %12521  ;;  %22672 = vmatprep.subr.msk.mxu1 %vm214_vm1, %v12353_v47  ;;  %vm27050_vm15 = vmmov %vm27049_vm14 }
 0x32e   : > { %22673 = vmatpush1.msk.msra.mxu1 %vm214_vm1, %v12352_v3  ;;  %22671 = vmatmul.mubr.msk.f32.vlgmr.msra.gmra.mrb[12].mxu0 %vm210_vm2, %v22661_v45 }
 0x32f   : > { %14508 = vrot.lane.b32.xlu1 %v25481_v53, %s27046_s5  ;;  %v12520_v49 = vpop.permute.xlu0 %12519  ;;  %22674 = vmatmul.mubr.msk.f32.vlgmr.msra.gmra.mrb[12].mxu1 %vm210_vm2, %v22661_v45  ;;  %s27048_s5 = smov 70  }
 0x330   : > { %14691 = vrot.lane.b32.xlu0 %v25491_v12, %s27047_s4  ;;  %v12528_v50 = vsel %vm2902_vm0, %v12520_v49, %v12522_v4  ;;  %12606 = vmatprep.mubr.f32.mxu0 %v23682_v7 }
 0x331   : > { %v12526_v48 = vpop.permute.xlu1 %12525  ;;  %22676 = vmatprep.subr.msk.mxu0 %vm214_vm1, %v12528_v50  ;;  %12677 = vmatprep.mubr.f32.mxu1 %v23682_v7 }
 0x333   : > { %14693 = vrot.lane.b32.xlu1 %v25523_v30, %s27047_s4  ;;  %v12524_v52 = vpop.permute.xlu0 %12523 }
 0x334   : > { %14695 = vrot.lane.b32.xlu0 %v25531_v32, %s27047_s4  ;;  %v12529_v19 = vsel %vm2902_vm0, %v12522_v4, %v12524_v52  ;;  %v12530_v21 = vsel %vm2902_vm0, %v12524_v52, %v12526_v48  ;;  %v22703_v4 = vld [vmem:[%s26943_s1 + $0x120] sm:$0xf]  ;;  %v15586_v48 = vld [vmem:[%s23826_s30 + $0x14] sm:$0xf] }
 0x335   : > { %v12701_v51 = vpop.permute.xlu1 %12700  ;;  %22679 = vmatprep.subr.msk.mxu1 %vm214_vm1, %v12530_v21  ;;  %v22710_v21 = vld [vmem:[%s26943_s1 + $0x124] sm:$0xf] }
 0x336   : > { %22680 = vmatpush1.msk.msra.mxu1 %vm214_vm1, %v12529_v19 }
 0x337   : > { %14697 = vrot.lane.b32.xlu1 %v14681_v20, %s27047_s4  ;;  %v12518_v14 = vpop.permute.xlu0 %12517  ;;  %22681 = vmatmul.mubr.msk.f32.vlgmr.msra.gmra.mrb[12].mxu1 %vm210_vm2, %v22675_v13 }
 0x338   : > { %14689 = vrot.lane.b32.xlu0 %v25481_v53, %s27047_s4  ;;  %v12527_v15 = vsel %vm2902_vm0, %v12518_v14, %v12520_v49  ;;  %12858 = vmatprep.mubr.f32.mxu1 %v23682_v7  ;;  %vm27051_vm0 = vmmov %vm27049_vm14  ;;  %s27052_s4 = smov 69  }
 0x339   : > { %v12705_v43 = vpop.permute.xlu1 %12704  ;;  %22677 = vmatpush1.msk.msra.mxu0 %vm214_vm1, %v12527_v15 }
 0x33a   : > { %22678 = vmatmul.mubr.msk.f32.vlgmr.msra.gmra.mrb[12].mxu0 %vm210_vm2, %v22675_v13 }
 0x33b   : > { %14872 = vrot.lane.b32.xlu1 %v25491_v12, %s27048_s5  ;;  %v12703_v56 = vpop.permute.xlu0 %12702  ;;  %12787 = vmatprep.mubr.f32.mxu0 %v23682_v7 }
 0x33c   : > { %14874 = vrot.lane.b32.xlu0 %v25523_v30, %s27048_s5  ;;  %v12709_v57 = vsel %vm27049_vm14, %v12701_v51, %v12703_v56  ;;  %vm27053_vm14 = vmmov %vm27051_vm0 }
 0x33d   : > { %v12699_v54 = vpop.permute.xlu1 %12698  ;;  %22683 = vmatprep.subr.msk.mxu0 %vm214_vm1, %v12709_v57  ;;  %v12710_v5 = vsel %vm27053_vm14, %v12703_v56, %v12705_v43 }
 0x33e   : > { %v12708_v60 = vsel %vm27050_vm15, %v12699_v54, %v12701_v51  ;;  %vm27054_vm15 = vcmask 785408   ;;  %v15767_v54 = vld [vmem:[%s23826_s30 + $0x14] sm:$0xf] }
 0x33f   : > { %14876 = vrot.lane.b32.xlu1 %v25531_v32, %s27048_s5  ;;  %22684 = vmatpush1.msk.msra.mxu0 %vm214_vm1, %v12708_v60  ;;  %v12707_v41 = vpop.permute.xlu0 %12706 }
 0x340   : > { %14878 = vrot.lane.b32.xlu0 %v14862_v55, %s27048_s5  ;;  %v12711_v0 = vsel %vm27051_vm0, %v12705_v43, %v12707_v41  ;;  %vm27055_vm0 = vmmov %vm27054_vm15 }
 0x341   : > { %v12884_v61 = vpop.permute.xlu1 %12883  ;;  %22686 = vmatprep.subr.msk.mxu1 %vm214_vm1, %v12711_v0  ;;  %vm27056_vm14 = vmmov %vm27055_vm0 }
 0x342   : > { %22687 = vmatpush1.msk.msra.mxu1 %vm214_vm1, %v12710_v5  ;;  %22685 = vmatmul.mubr.msk.f32.vlgmr.msra.gmra.mrb[12].mxu0 %vm210_vm2, %v22682_v63 }
 0x343   : > { %14870 = vrot.lane.b32.xlu1 %v25481_v53, %s27048_s5  ;;  %v12882_v9 = vpop.permute.xlu0 %12881  ;;  %22688 = vmatmul.mubr.msk.f32.vlgmr.msra.gmra.mrb[12].mxu1 %vm210_vm2, %v22682_v63  ;;  %s27057_s5 = smov 68  }
 0x344   : > { %15053 = vrot.lane.b32.xlu0 %v25491_v12, %s27052_s4  ;;  %v12890_v10 = vsel %vm27054_vm15, %v12882_v9, %v12884_v61  ;;  %12968 = vmatprep.mubr.f32.mxu0 %v23682_v7  ;;  %vm27058_vm15 = vmmov %vm27055_vm0 }
 0x345   : > { %v12888_v22 = vpop.permute.xlu1 %12887  ;;  %22690 = vmatprep.subr.msk.mxu0 %vm214_vm1, %v12890_v10  ;;  %13039 = vmatprep.mubr.f32.mxu1 %v23682_v7 }
 0x347   : > { %15055 = vrot.lane.b32.xlu1 %v25523_v30, %s27052_s4  ;;  %v12886_v38 = vpop.permute.xlu0 %12885 }
 0x348   : > { %15057 = vrot.lane.b32.xlu0 %v25531_v32, %s27052_s4  ;;  %v12891_v16 = vsel %vm27055_vm0, %v12884_v61, %v12886_v38  ;;  %v12892_v17 = vsel %vm27056_vm14, %v12886_v38, %v12888_v22  ;;  %vm27059_vm0 = vcmask 777216   ;;  %v22717_v61 = vld [vmem:[%s26943_s1 + $0x128] sm:$0xf]  ;;  %v15949_v22 = vld [vmem:[%s23826_s30 + $0x14] sm:$0xf] }
 0x349   : > { %v13063_v11 = vpop.permute.xlu1 %13062  ;;  %22693 = vmatprep.subr.msk.mxu1 %vm214_vm1, %v12892_v17  ;;  %vm27060_vm14 = vmmov %vm27059_vm0  ;;  %v22724_v17 = vld [vmem:[%s26943_s1 + $0x12c] sm:$0xf] }
 0x34a   : > { %22694 = vmatpush1.msk.msra.mxu1 %vm214_vm1, %v12891_v16 }
 0x34b   : > { %15059 = vrot.lane.b32.xlu1 %v15043_v33, %s27052_s4  ;;  %v12880_v25 = vpop.permute.xlu0 %12879  ;;  %22695 = vmatmul.mubr.msk.f32.vlgmr.msra.gmra.mrb[12].mxu1 %vm210_vm2, %v22689_v24 }
 0x34c   : > { %15051 = vrot.lane.b32.xlu0 %v25481_v53, %s27052_s4  ;;  %v12889_v26 = vsel %vm27058_vm15, %v12880_v25, %v12882_v9  ;;  %13220 = vmatprep.mubr.f32.mxu1 %v23682_v7  ;;  %vm27061_vm15 = vmmov %vm27059_vm0  ;;  %s27062_s4 = smov 67  }
 0x34d   : > { %v13067_v23 = vpop.permute.xlu1 %13066  ;;  %22691 = vmatpush1.msk.msra.mxu0 %vm214_vm1, %v12889_v26 }
 0x34e   : > { %22692 = vmatmul.mubr.msk.f32.vlgmr.msra.gmra.mrb[12].mxu0 %vm210_vm2, %v22689_v24 }
 0x34f   : > { %15234 = vrot.lane.b32.xlu1 %v25491_v12, %s27057_s5  ;;  %v13065_v59 = vpop.permute.xlu0 %13064  ;;  %13149 = vmatprep.mubr.f32.mxu0 %v23682_v7 }
 0x350   : > { %15236 = vrot.lane.b32.xlu0 %v25523_v30, %s27057_s5  ;;  %v13071_v36 = vsel %vm27059_vm0, %v13063_v11, %v13065_v59  ;;  %v13072_v34 = vsel %vm27059_vm0, %v13065_v59, %v13067_v23 }
 0x351   : > { %v13061_v8 = vpop.permute.xlu1 %13060  ;;  %22697 = vmatprep.subr.msk.mxu0 %vm214_vm1, %v13071_v36  ;;  %v16145_v36 = vld [vmem:[%s23826_s30 + $0x14] sm:$0xf] }
 0x352   : > { %v13070_v1 = vsel %vm27060_vm14, %v13061_v8, %v13063_v11  ;;  %vm27063_vm14 = vcmask 769024  }
 0x353   : > { %15238 = vrot.lane.b32.xlu1 %v25531_v32, %s27057_s5  ;;  %22698 = vmatpush1.msk.msra.mxu0 %vm214_vm1, %v13070_v1  ;;  %v13069_v40 = vpop.permute.xlu0 %13068  ;;  %vm27065_vm0 = vmmov %vm27063_vm14 }
 0x354   : > { %15240 = vrot.lane.b32.xlu0 %v15224_v27, %s27057_s5  ;;  %v13073_v46 = vsel %vm27061_vm15, %v13067_v23, %v13069_v40  ;;  %vm27064_vm15 = vmmov %vm27063_vm14 }
 0x355   : > { %v13246_v28 = vpop.permute.xlu1 %13245  ;;  %22700 = vmatprep.subr.msk.mxu1 %vm214_vm1, %v13073_v46 }
 0x356   : > { %22701 = vmatpush1.msk.msra.mxu1 %vm214_vm1, %v13072_v34  ;;  %22699 = vmatmul.mubr.msk.f32.vlgmr.msra.gmra.mrb[12].mxu0 %vm210_vm2, %v22696_v31 }
 0x357   : > { %15232 = vrot.lane.b32.xlu1 %v25481_v53, %s27057_s5  ;;  %v13244_v35 = vpop.permute.xlu0 %13243  ;;  %22702 = vmatmul.mubr.msk.f32.vlgmr.msra.gmra.mrb[12].mxu1 %vm210_vm2, %v22696_v31  ;;  %s27066_s5 = smov 66  }
 0x358   : > { %15415 = vrot.lane.b32.xlu0 %v25491_v12, %s27062_s4  ;;  %v13252_v37 = vsel %vm27063_vm14, %v13244_v35, %v13246_v28  ;;  %13330 = vmatprep.mubr.f32.mxu0 %v23682_v7  ;;  %vm27067_vm14 = vmmov %vm27065_vm0 }
 0x359   : > { %v13250_v58 = vpop.permute.xlu1 %13249  ;;  %22704 = vmatprep.subr.msk.mxu0 %vm214_vm1, %v13252_v37  ;;  %13401 = vmatprep.mubr.f32.mxu1 %v23682_v7  ;;  %v22731_v37 = vld [vmem:[%s26943_s1 + $0x130] sm:$0xf] }
 0x35b   : > { %15417 = vrot.lane.b32.xlu1 %v25523_v30, %s27062_s4  ;;  %v13248_v2 = vpop.permute.xlu0 %13247 }
 0x35c   : > { %15419 = vrot.lane.b32.xlu0 %v25531_v32, %s27062_s4  ;;  %v13253_v62 = vsel %vm27064_vm15, %v13246_v28, %v13248_v2  ;;  %v13254_v42 = vsel %vm27065_vm0, %v13248_v2, %v13250_v58  ;;  %vm27068_vm15 = vcmask 760832  }
 0x35d   : > { %v13425_v39 = vpop.permute.xlu1 %13424  ;;  %22707 = vmatprep.subr.msk.mxu1 %vm214_vm1, %v13254_v42  ;;  %vm27069_vm0 = vmmov %vm27068_vm15 }
 0x35e   : > { %22708 = vmatpush1.msk.msra.mxu1 %vm214_vm1, %v13253_v62 }
 0x35f   : > { %15421 = vrot.lane.b32.xlu1 %v15405_v6, %s27062_s4  ;;  %v13242_v45 = vpop.permute.xlu0 %13241  ;;  %22709 = vmatmul.mubr.msk.f32.vlgmr.msra.gmra.mrb[12].mxu1 %vm210_vm2, %v22703_v4 }
 0x360   : > { %15413 = vrot.lane.b32.xlu0 %v25481_v53, %s27062_s4  ;;  %v13251_v47 = vsel %vm27067_vm14, %v13242_v45, %v13244_v35  ;;  %13582 = vmatprep.mubr.f32.mxu1 %v23682_v7  ;;  %vm27070_vm14 = vmmov %vm27069_vm0  ;;  %s23741_s4 = smov 65  }
 0x361   : > { %v13429_v44 = vpop.permute.xlu1 %13428  ;;  %22705 = vmatpush1.msk.msra.mxu0 %vm214_vm1, %v13251_v47 }
 0x362   : > { %22706 = vmatmul.mubr.msk.f32.vlgmr.msra.gmra.mrb[12].mxu0 %vm210_vm2, %v22703_v4  ;;  %v22739_v4 = vld [vmem:[%s26943_s1 + $0x138] sm:$0xf] }
 0x363   : > { %15596 = vrot.lane.b32.xlu1 %v25491_v12, %s27066_s5  ;;  %v13427_v49 = vpop.permute.xlu0 %13426  ;;  %13511 = vmatprep.mubr.f32.mxu0 %v23682_v7 }
 0x364   : > { %15598 = vrot.lane.b32.xlu0 %v25523_v30, %s27066_s5  ;;  %v13433_v50 = vsel %vm27068_vm15, %v13425_v39, %v13427_v49  ;;  %vm27071_vm15 = vmmov %vm27069_vm0 }
 0x365   : > { %v13423_v3 = vpop.permute.xlu1 %13422  ;;  %22711 = vmatprep.subr.msk.mxu0 %vm214_vm1, %v13433_v50  ;;  %v13434_v43 = vsel %vm27071_vm15, %v13427_v49, %v13429_v44 }
 0x366   : > { %v13432_v20 = vsel %vm27069_vm0, %v13423_v3, %v13425_v39  ;;  %vm27072_vm0 = vcmask 752640  }
 0x367   : > { %15600 = vrot.lane.b32.xlu1 %v25531_v32, %s27066_s5  ;;  %22712 = vmatpush1.msk.msra.mxu0 %vm214_vm1, %v13432_v20  ;;  %v13431_v52 = vpop.permute.xlu0 %13430  ;;  %vm27074_vm15 = vmmov %vm27072_vm0 }
 0x368   : > { %15602 = vrot.lane.b32.xlu0 %v15586_v48, %s27066_s5  ;;  %v13435_v19 = vsel %vm27070_vm14, %v13429_v44, %v13431_v52  ;;  %vm27073_vm14 = vmmov %vm27072_vm0  ;;  %v25936_v52 = vld [vmem:[%s23826_s30 + $0x4] sm:$0xff] }
 0x369   : > { %v13608_v51 = vpop.permute.xlu1 %13607  ;;  %22714 = vmatprep.subr.msk.mxu1 %vm214_vm1, %v13435_v19 }
 0x36a   : > { %22715 = vmatpush1.msk.msra.mxu1 %vm214_vm1, %v13434_v43  ;;  %22713 = vmatmul.mubr.msk.f32.vlgmr.msra.gmra.mrb[12].mxu0 %vm210_vm2, %v22710_v21 }
 0x36b   : > { %15594 = vrot.lane.b32.xlu1 %v25481_v53, %s27066_s5  ;;  %v13606_v14 = vpop.permute.xlu0 %13605  ;;  %22716 = vmatmul.mubr.msk.f32.vlgmr.msra.gmra.mrb[12].mxu1 %vm210_vm2, %v22710_v21  ;;  %s23742_s5 = smov 64   ;;  %v25945_v21 = vcombine.high %v25936_v52, %v25936_v52 }
 0x36c   : > { %15777 = vrot.lane.b32.xlu0 %v25491_v12, %s23741_s4  ;;  %v13614_v15 = vsel %vm27072_vm0, %v13606_v14, %v13608_v51  ;;  %13763 = vmatprep.mubr.f32.mxu1 %v23682_v7 }
 0x36d   : > { %v13612_v13 = vpop.permute.xlu1 %13611  ;;  %22718 = vmatprep.subr.msk.mxu0 %vm214_vm1, %v13614_v15  ;;  %13692 = vmatprep.mubr.f32.mxu0 %v23682_v7  ;;  %v22738_v15 = vld [vmem:[%s26943_s1 + $0x134] sm:$0xf] }
 0x36f   : > { %15779 = vrot.lane.b32.xlu1 %v25523_v30, %s23741_s4  ;;  %v13610_v56 = vpop.permute.xlu0 %13609 }
 0x370   : > { %15781 = vrot.lane.b32.xlu0 %v25531_v32, %s23741_s4  ;;  %v13615_v57 = vsel %vm27073_vm14, %v13608_v51, %v13610_v56  ;;  %v13616_v60 = vsel %vm27074_vm15, %v13610_v56, %v13612_v13  ;;  %vm13794_vm14 = vcmask 744448   ;;  %vm13976_vm15 = vcmask 736256   ;;  %v16491_v51 = vld [vmem:[%s23826_s30 + $0x14] sm:$0xf] }
 0x371   : > { %v13787_v55 = vpop.permute.xlu1 %13786  ;;  %22721 = vmatprep.subr.msk.mxu1 %vm214_vm1, %v13616_v60  ;;  %v16672_v56 = vld [vmem:[%s23826_s30 + $0x14] sm:$0xf] }
 0x372   : > { %22722 = vmatpush1.msk.msra.mxu1 %vm214_vm1, %v13615_v57 }
 0x373   : > { %15783 = vrot.lane.b32.xlu1 %v15767_v54, %s23741_s4  ;;  %v13604_v63 = vpop.permute.xlu0 %13603  ;;  %22723 = vmatmul.mubr.msk.f32.vlgmr.msra.gmra.mrb[12].mxu1 %vm210_vm2, %v22717_v61 }
 0x374   : > { %15775 = vrot.lane.b32.xlu0 %v25481_v53, %s23741_s4  ;;  %v13613_v0 = vsel %vm27072_vm0, %v13604_v63, %v13606_v14  ;;  %13945 = vmatprep.mubr.f32.mxu1 %v23682_v7  ;;  %s27075_s4 = smov 47   ;;  %vm27077_vm0 = vcmask 596992   ;;  %v25977_v63 = vld [vmem:[%s23826_s30 + $0xc] sm:$0xff] }
 0x375   : > { %v13791_v41 = vpop.permute.xlu1 %13790  ;;  %22719 = vmatpush1.msk.msra.mxu0 %vm214_vm1, %v13613_v0 }
 0x376   : > { %22720 = vmatmul.mubr.msk.f32.vlgmr.msra.gmra.mrb[12].mxu0 %vm210_vm2, %v22717_v61 }
 0x377   : > { %15959 = vrot.lane.b32.xlu1 %v25491_v12, %s23742_s5  ;;  %v13789_v9 = vpop.permute.xlu0 %13788  ;;  %13874 = vmatprep.mubr.f32.mxu0 %v23682_v7 }
 0x378   : > { %15961 = vrot.lane.b32.xlu0 %v25523_v30, %s23742_s5  ;;  %v13796_v10 = vsel %vm13794_vm14, %v13787_v55, %v13789_v9  ;;  %v13797_v23 = vsel %vm13794_vm14, %v13789_v9, %v13791_v41 }
 0x379   : > { %v13785_v5 = vpop.permute.xlu1 %13784  ;;  %22725 = vmatprep.subr.msk.mxu0 %vm214_vm1, %v13796_v10 }
 0x37a   : > { %v13795_v33 = vsel %vm13794_vm14, %v13785_v5, %v13787_v55  ;;  %v25985_v5 = vcombine.high %v25977_v63, %v25977_v63 }
 0x37b   : > { %15963 = vrot.lane.b32.xlu1 %v25531_v32, %s23742_s5  ;;  %22726 = vmatpush1.msk.msra.mxu0 %vm214_vm1, %v13795_v33  ;;  %v13793_v38 = vpop.permute.xlu0 %13792 }
 0x37c   : > { %15965 = vrot.lane.b32.xlu0 %v15949_v22, %s23742_s5  ;;  %v13798_v16 = vsel %vm13794_vm14, %v13791_v41, %v13793_v38  ;;  %vm27078_vm14 = vmmov %vm27077_vm0 }
 0x37d   : > { %v13971_v11 = vpop.permute.xlu1 %13970  ;;  %22728 = vmatprep.subr.msk.mxu1 %vm214_vm1, %v13798_v16 }
 0x37e   : > { %v10147_v25 = vpop.f32.mrb[8].mxu1  ;;  %22729 = vmatpush1.msk.msra.mxu1 %vm214_vm1, %v13797_v23  ;;  %22727 = vmatmul.mubr.msk.f32.vlgmr.msra.gmra.mrb[12].mxu0 %vm210_vm2, %v22724_v17 }
 0x37f   : > { %15957 = vrot.lane.b32.xlu1 %v25481_v53, %s23742_s5  ;;  %v13969_v26 = vpop.permute.xlu0 %13968  ;;  %v10149_v8 = vpop.f32.mrb[9].mxu1  ;;  %22730 = vmatmul.mubr.msk.f32.vlgmr.msra.gmra.mrb[12].mxu1 %vm210_vm2, %v22724_v17  ;;  %s27076_s5 = smov 48  }
 0x380   : > { %16157 = vrot.lane.b32.xlu0 %v25491_v12, %s27075_s4  ;;  %v10163_v27 = vcombine.low %v10147_v25, %v10149_v8  ;;  %v13978_v59 = vsel %vm13976_vm15, %v13969_v26, %v13971_v11  ;;  %14127 = vmatprep.mubr.f32.mxu1 %v23682_v7  ;;  %v22759_v25 = vld [vmem:[%s26943_s1 + $0x140] sm:$0xf] }
 0x381   : > { %v13975_v24 = vpop.permute.xlu1 %13974  ;;  %v10076_v1 = vpop.f32.mrb[8].mxu0  ;;  %22732 = vmatprep.subr.msk.mxu0 %vm214_vm1, %v13978_v59  ;;  %14056 = vmatprep.mubr.f32.mxu0 %v23682_v7  ;;  %v17034_v59 = vld [vmem:[%s23826_s30 + $0x14] sm:$0xf] }
 0x382   : > { %v25885_v40 = vadd.f32 %v10163_v27, %v25620_v29  ;;  %v10078_v31 = vpop.f32.mrb[9].mxu0 }
 0x383   : > { %16159 = vrot.lane.b32.xlu1 %v25523_v30, %s27075_s4  ;;  %v10162_v46 = vcombine.low %v10076_v1, %v10078_v31  ;;  %v13973_v34 = vpop.permute.xlu0 %13972 }
 0x384   : > { %16161 = vrot.lane.b32.xlu0 %v25531_v32, %s27075_s4  ;;  %v13979_v58 = vsel %vm13976_vm15, %v13971_v11, %v13973_v34  ;;  %v13980_v35 = vsel %vm13976_vm15, %v13973_v34, %v13975_v24  ;;  %v16853_v11 = vld [vmem:[%s23826_s30 + $0x14] sm:$0xf]  ;;  %v22766_v34 = vld [vmem:[%s26943_s1 + $0x144] sm:$0xf] }
 0x385   : > { %v14167_v28 = vpop.permute.xlu1 %14166  ;;  %v25896_v6 = vadd.f32 %v10162_v46, %v25615_v18  ;;  %22735 = vmatprep.subr.msk.mxu1 %vm214_vm1, %v13980_v35 }
 0x386   : > { %22736 = vmatpush1.msk.msra.mxu1 %vm214_vm1, %v13979_v58 }
 0x387   : > { %16163 = vrot.lane.b32.xlu1 %v16145_v36, %s27075_s4  ;;  %v13967_v39 = vpop.permute.xlu0 %13966  ;;  %22737 = vmatmul.mubr.msk.f32.vlgmr.msra.gmra.mrb[12].mxu1 %vm210_vm2, %v22731_v37 }
 0x388   : > { %16155 = vrot.lane.b32.xlu0 %v25481_v53, %s27075_s4  ;;  %v13977_v2 = vsel %vm13976_vm15, %v13967_v39, %v13969_v26  ;;  %14324 = vmatprep.mubr.f32.mxu1 %v23682_v7  ;;  %vm27079_vm15 = vmmov %vm27077_vm0  ;;  %s27080_s4 = smov 46  }
 0x389   : > { %v14171_v29 = vpop.permute.xlu1 %14170  ;;  %22733 = vmatpush1.msk.msra.mxu0 %vm214_vm1, %v13977_v2  ;;  %v17215_v2 = vld [vmem:[%s23826_s30 + $0x14] sm:$0xf] }
 0x38a   : > { %22734 = vmatmul.mubr.msk.f32.vlgmr.msra.gmra.mrb[12].mxu0 %vm210_vm2, %v22731_v37 }
 0x38b   : > { %16324 = vrot.lane.b32.xlu1 %v25491_v12, %s27076_s5  ;;  %v14169_v62 = vpop.permute.xlu0 %14168  ;;  %14253 = vmatprep.mubr.f32.mxu0 %v23682_v7 }
 0x38c   : > { %16326 = vrot.lane.b32.xlu0 %v25523_v30, %s27076_s5  ;;  %v14175_v42 = vsel %vm27077_vm0, %v14167_v28, %v14169_v62  ;;  %v14176_v48 = vsel %vm27077_vm0, %v14169_v62, %v14171_v29 }
 0x38d   : > { %v14165_v18 = vpop.permute.xlu1 %14164  ;;  %22740 = vmatprep.subr.msk.mxu0 %vm214_vm1, %v14175_v42 }
 0x38e   : > { %v14174_v44 = vsel %vm27078_vm14, %v14165_v18, %v14167_v28  ;;  %vm27081_vm14 = vcmask 605184  }
 0x38f   : > { %16328 = vrot.lane.b32.xlu1 %v25531_v32, %s27076_s5  ;;  %22741 = vmatpush1.msk.msra.mxu0 %vm214_vm1, %v14174_v44  ;;  %v14173_v47 = vpop.permute.xlu0 %14172  ;;  %vm27083_vm0 = vmmov %vm27081_vm14 }
 0x390   : > { %16330 = vrot.lane.b32.xlu0 %v16145_v36, %s27076_s5  ;;  %22742 = vmatmul.mubr.msk.f32.vlgmr.msra.gmra.mrb[14].mxu0 %vm210_vm2, %v22739_v4  ;;  %v14177_v3 = vsel %vm27079_vm15, %v14171_v29, %v14173_v47  ;;  %vm27082_vm15 = vmmov %vm27081_vm14 }
 0x391   : > { %v14336_v45 = vpop.permute.xlu1 %14335  ;;  %14420 = vmatprep.mubr.f32.mxu0 %v23682_v7  ;;  %22743 = vmatprep.subr.msk.mxu1 %vm214_vm1, %v14177_v3 }
 0x392   : > { %22744 = vmatpush1.msk.msra.mxu1 %vm214_vm1, %v14176_v48 }
 0x393   : > { %16322 = vrot.lane.b32.xlu1 %v25481_v53, %s27076_s5  ;;  %v14334_v50 = vpop.permute.xlu0 %14333  ;;  %22745 = vmatmul.mubr.msk.f32.vlgmr.msra.gmra.mrb[14].mxu1 %vm210_vm2, %v22739_v4  ;;  %s27084_s5 = smov 45  }
 0x394   : > { %16501 = vrot.lane.b32.xlu0 %v25491_v12, %s27080_s4  ;;  %v14342_v20 = vsel %vm27081_vm14, %v14334_v50, %v14336_v45  ;;  %14491 = vmatprep.mubr.f32.mxu1 %v23682_v7  ;;  %vm27085_vm14 = vmmov %vm27083_vm0 }
 0x395   : > { %v14340_v49 = vpop.permute.xlu1 %14339  ;;  %22746 = vmatprep.subr.msk.mxu0 %vm214_vm1, %v14342_v20 }
 0x397   : > { %16503 = vrot.lane.b32.xlu1 %v25523_v30, %s27080_s4  ;;  %v14338_v19 = vpop.permute.xlu0 %14337 }
 0x398   : > { %16505 = vrot.lane.b32.xlu0 %v25531_v32, %s27080_s4  ;;  %v14343_v43 = vsel %vm27082_vm15, %v14336_v45, %v14338_v19  ;;  %v14344_v13 = vsel %vm27083_vm0, %v14338_v19, %v14340_v49  ;;  %vm27086_vm15 = vcmask 588800   ;;  %v22773_v45 = vld [vmem:[%s26943_s1 + $0x148] sm:$0xf]  ;;  %v17396_v49 = vld [vmem:[%s23826_s30 + $0x14] sm:$0xf] }
 0x399   : > { %v14511_v12 = vpop.permute.xlu1 %14510  ;;  %22749 = vmatprep.subr.msk.mxu1 %vm214_vm1, %v14344_v13  ;;  %vm27087_vm0 = vmmov %vm27086_vm15 }
 0x39a   : > { %22750 = vmatpush1.msk.msra.mxu1 %vm214_vm1, %v14343_v43  ;;  %v22780_v43 = vld [vmem:[%s26943_s1 + $0x14c] sm:$0xf] }
 0x39b   : > { %16507 = vrot.lane.b32.xlu1 %v16491_v51, %s27080_s4  ;;  %v14332_v54 = vpop.permute.xlu0 %14331  ;;  %22751 = vmatmul.mubr.msk.f32.vlgmr.msra.gmra.mrb[14].mxu1 %vm210_vm2, %v22738_v15 }
 0x39c   : > { %16499 = vrot.lane.b32.xlu0 %v25481_v53, %s27080_s4  ;;  %v14341_v55 = vsel %vm27085_vm14, %v14332_v54, %v14334_v50  ;;  %14668 = vmatprep.mubr.f32.mxu1 %v23682_v7  ;;  %vm27088_vm14 = vmmov %vm27087_vm0  ;;  %s27089_s4 = smov 44  }
 0x39d   : > { %v14515_v14 = vpop.permute.xlu1 %14514  ;;  %22747 = vmatpush1.msk.msra.mxu0 %vm214_vm1, %v14341_v55 }
 0x39e   : > { %22748 = vmatmul.mubr.msk.f32.vlgmr.msra.gmra.mrb[14].mxu0 %vm210_vm2, %v22738_v15 }
 0x39f   : > { %16682 = vrot.lane.b32.xlu1 %v25945_v21, %s27084_s5  ;;  %v14513_v57 = vpop.permute.xlu0 %14512  ;;  %14597 = vmatprep.mubr.f32.mxu0 %v23682_v7 }
 0x3a0   : > { %16684 = vrot.lane.b32.xlu0 %v25523_v30, %s27084_s5  ;;  %v14519_v60 = vsel %vm27086_vm15, %v14511_v12, %v14513_v57  ;;  %vm27090_vm15 = vmmov %vm27087_vm0 }
 0x3a1   : > { %v14509_v53 = vpop.permute.xlu1 %14508  ;;  %22753 = vmatprep.subr.msk.mxu0 %vm214_vm1, %v14519_v60  ;;  %v14520_v22 = vsel %vm27090_vm15, %v14513_v57, %v14515_v14 }
 0x3a2   : > { %v14518_v30 = vsel %vm27087_vm0, %v14509_v53, %v14511_v12  ;;  %vm27091_vm0 = vcmask 580608   ;;  %v17577_v53 = vld [vmem:[%s23826_s30 + $0x14] sm:$0xf] }
 0x3a3   : > { %16686 = vrot.lane.b32.xlu1 %v25531_v32, %s27084_s5  ;;  %22754 = vmatpush1.msk.msra.mxu0 %vm214_vm1, %v14518_v30  ;;  %v14517_v41 = vpop.permute.xlu0 %14516  ;;  %v22752_v32 = vld [vmem:[%s26943_s1 + $0x13c] sm:$0xf]  ;;  %vm27093_vm15 = vmmov %vm27091_vm0 }
 0x3a4   : > { %16688 = vrot.lane.b32.xlu0 %v16672_v56, %s27084_s5  ;;  %v14521_v0 = vsel %vm27088_vm14, %v14515_v14, %v14517_v41  ;;  %vm27092_vm14 = vmmov %vm27091_vm0 }
 0x3a5   : > { %v14694_v61 = vpop.permute.xlu1 %14693  ;;  %22756 = vmatprep.subr.msk.mxu1 %vm214_vm1, %v14521_v0 }
 0x3a6   : > { %22757 = vmatpush1.msk.msra.mxu1 %vm214_vm1, %v14520_v22  ;;  %22755 = vmatmul.mubr.msk.f32.vlgmr.msra.gmra.mrb[14].mxu0 %vm210_vm2, %v22752_v32 }
 0x3a7   : > { %16680 = vrot.lane.b32.xlu1 %v25936_v52, %s27084_s5  ;;  %v14692_v10 = vpop.permute.xlu0 %14691  ;;  %22758 = vmatmul.mubr.msk.f32.vlgmr.msra.gmra.mrb[14].mxu1 %vm210_vm2, %v22752_v32  ;;  %s27094_s5 = smov 43  }
 0x3a8   : > { %16863 = vrot.lane.b32.xlu0 %v25945_v21, %s27089_s4  ;;  %v14700_v33 = vsel %vm27091_vm0, %v14692_v10, %v14694_v61  ;;  %14778 = vmatprep.mubr.f32.mxu0 %v23682_v7 }
 0x3a9   : > { %v14698_v9 = vpop.permute.xlu1 %14697  ;;  %22760 = vmatprep.subr.msk.mxu0 %vm214_vm1, %v14700_v33  ;;  %14849 = vmatprep.mubr.f32.mxu1 %v23682_v7 }
 0x3ab   : > { %16865 = vrot.lane.b32.xlu1 %v25977_v63, %s27089_s4  ;;  %v14696_v16 = vpop.permute.xlu0 %14695 }
 0x3ac   : > { %16867 = vrot.lane.b32.xlu0 %v25985_v5, %s27089_s4  ;;  %v14701_v17 = vsel %vm27092_vm14, %v14694_v61, %v14696_v16  ;;  %v14702_v23 = vsel %vm27093_vm15, %v14696_v16, %v14698_v9  ;;  %vm27095_vm14 = vcmask 572416   ;;  %v22787_v61 = vld [vmem:[%s26943_s1 + $0x150] sm:$0xf]  ;;  %v17758_v9 = vld [vmem:[%s23826_s30 + $0x14] sm:$0xf] }
 0x3ad   : > { %v14873_v38 = vpop.permute.xlu1 %14872  ;;  %22763 = vmatprep.subr.msk.mxu1 %vm214_vm1, %v14702_v23  ;;  %vm27096_vm15 = vmmov %vm27095_vm14 }
 0x3ae   : > { %22764 = vmatpush1.msk.msra.mxu1 %vm214_vm1, %v14701_v17  ;;  %v22794_v17 = vld [vmem:[%s26943_s1 + $0x154] sm:$0xf] }
 0x3af   : > { %16869 = vrot.lane.b32.xlu1 %v16853_v11, %s27089_s4  ;;  %v14690_v26 = vpop.permute.xlu0 %14689  ;;  %22765 = vmatmul.mubr.msk.f32.vlgmr.msra.gmra.mrb[14].mxu1 %vm210_vm2, %v22759_v25 }
 0x3b0   : > { %16861 = vrot.lane.b32.xlu0 %v25936_v52, %s27089_s4  ;;  %v14699_v8 = vsel %vm27091_vm0, %v14690_v26, %v14692_v10  ;;  %15030 = vmatprep.mubr.f32.mxu1 %v23682_v7  ;;  %vm27097_vm0 = vmmov %vm27095_vm14  ;;  %s27098_s4 = smov 42  }
 0x3b1   : > { %v14877_v24 = vpop.permute.xlu1 %14876  ;;  %22761 = vmatpush1.msk.msra.mxu0 %vm214_vm1, %v14699_v8 }
 0x3b2   : > { %22762 = vmatmul.mubr.msk.f32.vlgmr.msra.gmra.mrb[14].mxu0 %vm210_vm2, %v22759_v25 }
 0x3b3   : > { %17044 = vrot.lane.b32.xlu1 %v25945_v21, %s27094_s5  ;;  %v14875_v36 = vpop.permute.xlu0 %14874  ;;  %14959 = vmatprep.mubr.f32.mxu0 %v23682_v7 }
 0x3b4   : > { %17046 = vrot.lane.b32.xlu0 %v25977_v63, %s27094_s5  ;;  %v14881_v1 = vsel %vm27095_vm14, %v14873_v38, %v14875_v36  ;;  %vm27099_vm14 = vmmov %vm27097_vm0 }
 0x3b5   : > { %v14871_v27 = vpop.permute.xlu1 %14870  ;;  %22767 = vmatprep.subr.msk.mxu0 %vm214_vm1, %v14881_v1  ;;  %v14882_v35 = vsel %vm27099_vm14, %v14875_v36, %v14877_v24 }
 0x3b6   : > { %v14880_v28 = vsel %vm27096_vm15, %v14871_v27, %v14873_v38  ;;  %vm27100_vm15 = vcmask 564224   ;;  %v17940_v27 = vld [vmem:[%s23826_s30 + $0x14] sm:$0xf] }
 0x3b7   : > { %17048 = vrot.lane.b32.xlu1 %v25985_v5, %s27094_s5  ;;  %22768 = vmatpush1.msk.msra.mxu0 %vm214_vm1, %v14880_v28  ;;  %v14879_v46 = vpop.permute.xlu0 %14878 }
 0x3b8   : > { %17050 = vrot.lane.b32.xlu0 %v17034_v59, %s27094_s5  ;;  %v14883_v58 = vsel %vm27097_vm0, %v14877_v24, %v14879_v46  ;;  %vm27101_vm0 = vmmov %vm27100_vm15 }
 0x3b9   : > { %v15056_v31 = vpop.permute.xlu1 %15055  ;;  %22770 = vmatprep.subr.msk.mxu1 %vm214_vm1, %v14883_v58  ;;  %vm27102_vm14 = vmmov %vm27101_vm0 }
 0x3ba   : > { %22771 = vmatpush1.msk.msra.mxu1 %vm214_vm1, %v14882_v35  ;;  %22769 = vmatmul.mubr.msk.f32.vlgmr.msra.gmra.mrb[14].mxu0 %vm210_vm2, %v22766_v34 }
 0x3bb   : > { %17042 = vrot.lane.b32.xlu1 %v25936_v52, %s27094_s5  ;;  %v15054_v29 = vpop.permute.xlu0 %15053  ;;  %22772 = vmatmul.mubr.msk.f32.vlgmr.msra.gmra.mrb[14].mxu1 %vm210_vm2, %v22766_v34  ;;  %s27103_s5 = smov 41  }
 0x3bc   : > { %17225 = vrot.lane.b32.xlu0 %v25945_v21, %s27098_s4  ;;  %v15062_v39 = vsel %vm27100_vm15, %v15054_v29, %v15056_v31  ;;  %15140 = vmatprep.mubr.f32.mxu0 %v23682_v7  ;;  %vm27104_vm15 = vmmov %vm27101_vm0 }
 0x3bd   : > { %v15060_v37 = vpop.permute.xlu1 %15059  ;;  %22774 = vmatprep.subr.msk.mxu0 %vm214_vm1, %v15062_v39  ;;  %15211 = vmatprep.mubr.f32.mxu1 %v23682_v7 }
 0x3bf   : > { %17227 = vrot.lane.b32.xlu1 %v25977_v63, %s27098_s4  ;;  %v15058_v62 = vpop.permute.xlu0 %15057 }
 0x3c0   : > { %17229 = vrot.lane.b32.xlu0 %v25985_v5, %s27098_s4  ;;  %v15063_v42 = vsel %vm27101_vm0, %v15056_v31, %v15058_v62  ;;  %v15064_v4 = vsel %vm27102_vm14, %v15058_v62, %v15060_v37  ;;  %vm27105_vm0 = vcmask 556032   ;;  %v22801_v31 = vld [vmem:[%s26943_s1 + $0x158] sm:$0xf] }
 0x3c1   : > { %v15235_v18 = vpop.permute.xlu1 %15234  ;;  %22777 = vmatprep.subr.msk.mxu1 %vm214_vm1, %v15064_v4  ;;  %vm27106_vm14 = vmmov %vm27105_vm0 }
 0x3c2   : > { %22778 = vmatpush1.msk.msra.mxu1 %vm214_vm1, %v15063_v42 }
 0x3c3   : > { %17231 = vrot.lane.b32.xlu1 %v17215_v2, %s27098_s4  ;;  %v15052_v47 = vpop.permute.xlu0 %15051  ;;  %22779 = vmatmul.mubr.msk.f32.vlgmr.msra.gmra.mrb[14].mxu1 %vm210_vm2, %v22773_v45 }
 0x3c4   : > { %17223 = vrot.lane.b32.xlu0 %v25936_v52, %s27098_s4  ;;  %v15061_v3 = vsel %vm27104_vm15, %v15052_v47, %v15054_v29  ;;  %15392 = vmatprep.mubr.f32.mxu1 %v23682_v7  ;;  %vm27107_vm15 = vmmov %vm27105_vm0  ;;  %s27108_s4 = smov 40   ;;  %v18136_v29 = vld [vmem:[%s23826_s30 + $0x14] sm:$0xf] }
 0x3c5   : > { %v15239_v44 = vpop.permute.xlu1 %15238  ;;  %22775 = vmatpush1.msk.msra.mxu0 %vm214_vm1, %v15061_v3 }
 0x3c6   : > { %22776 = vmatmul.mubr.msk.f32.vlgmr.msra.gmra.mrb[14].mxu0 %vm210_vm2, %v22773_v45 }
 0x3c7   : > { %17406 = vrot.lane.b32.xlu1 %v25945_v21, %s27103_s5  ;;  %v15237_v50 = vpop.permute.xlu0 %15236  ;;  %15321 = vmatprep.mubr.f32.mxu0 %v23682_v7 }
 0x3c8   : > { %17408 = vrot.lane.b32.xlu0 %v25977_v63, %s27103_s5  ;;  %v15243_v20 = vsel %vm27105_vm0, %v15235_v18, %v15237_v50  ;;  %v15244_v14 = vsel %vm27105_vm0, %v15237_v50, %v15239_v44  ;;  %v22808_v50 = vld [vmem:[%s26943_s1 + $0x15c] sm:$0xf] }
 0x3c9   : > { %v15233_v48 = vpop.permute.xlu1 %15232  ;;  %22781 = vmatprep.subr.msk.mxu0 %vm214_vm1, %v15243_v20 }
 0x3ca   : > { %v15242_v51 = vsel %vm27106_vm14, %v15233_v48, %v15235_v18  ;;  %vm27109_vm14 = vcmask 547840  }
 0x3cb   : > { %17410 = vrot.lane.b32.xlu1 %v25985_v5, %s27103_s5  ;;  %22782 = vmatpush1.msk.msra.mxu0 %vm214_vm1, %v15242_v51  ;;  %v15241_v19 = vpop.permute.xlu0 %15240  ;;  %vm27111_vm0 = vmmov %vm27109_vm14 }
 0x3cc   : > { %17412 = vrot.lane.b32.xlu0 %v17396_v49, %s27103_s5  ;;  %v15245_v13 = vsel %vm27107_vm15, %v15239_v44, %v15241_v19  ;;  %vm27110_vm15 = vmmov %vm27109_vm14 }
 0x3cd   : > { %v15418_v12 = vpop.permute.xlu1 %15417  ;;  %22784 = vmatprep.subr.msk.mxu1 %vm214_vm1, %v15245_v13 }
 0x3ce   : > { %22785 = vmatpush1.msk.msra.mxu1 %vm214_vm1, %v15244_v14  ;;  %22783 = vmatmul.mubr.msk.f32.vlgmr.msra.gmra.mrb[14].mxu0 %vm210_vm2, %v22780_v43 }
 0x3cf   : > { %17404 = vrot.lane.b32.xlu1 %v25936_v52, %s27103_s5  ;;  %v15416_v54 = vpop.permute.xlu0 %15415  ;;  %22786 = vmatmul.mubr.msk.f32.vlgmr.msra.gmra.mrb[14].mxu1 %vm210_vm2, %v22780_v43  ;;  %s23743_s5 = smov 39  }
 0x3d0   : > { %17587 = vrot.lane.b32.xlu0 %v25945_v21, %s27108_s4  ;;  %v15424_v55 = vsel %vm27109_vm14, %v15416_v54, %v15418_v12  ;;  %15502 = vmatprep.mubr.f32.mxu0 %v23682_v7  ;;  %vm27112_vm14 = vmmov %vm27111_vm0 }
 0x3d1   : > { %v15422_v15 = vpop.permute.xlu1 %15421  ;;  %22788 = vmatprep.subr.msk.mxu0 %vm214_vm1, %v15424_v55  ;;  %15573 = vmatprep.mubr.f32.mxu1 %v23682_v7 }
 0x3d3   : > { %17589 = vrot.lane.b32.xlu1 %v25977_v63, %s27108_s4  ;;  %v15420_v57 = vpop.permute.xlu0 %15419 }
 0x3d4   : > { %17591 = vrot.lane.b32.xlu0 %v25985_v5, %s27108_s4  ;;  %v15425_v60 = vsel %vm27110_vm15, %v15418_v12, %v15420_v57  ;;  %v15426_v30 = vsel %vm27111_vm0, %v15420_v57, %v15422_v15  ;;  %vm27113_vm15 = vcmask 539648   ;;  %v18482_v57 = vld [vmem:[%s23826_s30 + $0x14] sm:$0xf] }
 0x3d5   : > { %v15597_v56 = vpop.permute.xlu1 %15596  ;;  %22791 = vmatprep.subr.msk.mxu1 %vm214_vm1, %v15426_v30  ;;  %vm27114_vm0 = vmmov %vm27113_vm15 }
 0x3d6   : > { %22792 = vmatpush1.msk.msra.mxu1 %vm214_vm1, %v15425_v60 }
 0x3d7   : > { %17593 = vrot.lane.b32.xlu1 %v17577_v53, %s27108_s4  ;;  %v15414_v32 = vpop.permute.xlu0 %15413  ;;  %22793 = vmatmul.mubr.msk.f32.vlgmr.msra.gmra.mrb[14].mxu1 %vm210_vm2, %v22787_v61 }
 0x3d8   : > { %17585 = vrot.lane.b32.xlu0 %v25936_v52, %s27108_s4  ;;  %v15423_v0 = vsel %vm27112_vm14, %v15414_v32, %v15416_v54  ;;  %15754 = vmatprep.mubr.f32.mxu1 %v23682_v7  ;;  %vm27115_vm14 = vmmov %vm27114_vm0  ;;  %s23744_s4 = smov 38   ;;  %v22816_v54 = vld [vmem:[%s26943_s1 + $0x164] sm:$0xf] }
 0x3d9   : > { %v15601_v41 = vpop.permute.xlu1 %15600  ;;  %22789 = vmatpush1.msk.msra.mxu0 %vm214_vm1, %v15423_v0  ;;  %v22815_v0 = vld [vmem:[%s26943_s1 + $0x160] sm:$0xf] }
 0x3da   : > { %22790 = vmatmul.mubr.msk.f32.vlgmr.msra.gmra.mrb[14].mxu0 %vm210_vm2, %v22787_v61 }
 0x3db   : > { %17768 = vrot.lane.b32.xlu1 %v25945_v21, %s23743_s5  ;;  %v15599_v10 = vpop.permute.xlu0 %15598  ;;  %15683 = vmatprep.mubr.f32.mxu0 %v23682_v7 }
 0x3dc   : > { %17770 = vrot.lane.b32.xlu0 %v25977_v63, %s23743_s5  ;;  %v15605_v33 = vsel %vm27113_vm15, %v15597_v56, %v15599_v10  ;;  %vm27116_vm15 = vmmov %vm27114_vm0 }
 0x3dd   : > { %v15595_v22 = vpop.permute.xlu1 %15594  ;;  %22795 = vmatprep.subr.msk.mxu0 %vm214_vm1, %v15605_v33  ;;  %v15606_v24 = vsel %vm27116_vm15, %v15599_v10, %v15601_v41  ;;  %vm27119_vm15 = vcmask 384000  }
 0x3de   : > { %v15604_v11 = vsel %vm27114_vm0, %v15595_v22, %v15597_v56  ;;  %vm15785_vm0 = vcmask 531456  }
 0x3df   : > { %17772 = vrot.lane.b32.xlu1 %v25985_v5, %s23743_s5  ;;  %22796 = vmatpush1.msk.msra.mxu0 %vm214_vm1, %v15604_v11  ;;  %v15603_v16 = vpop.permute.xlu0 %15602 }
 0x3e0   : > { %17774 = vrot.lane.b32.xlu0 %v17758_v9, %s23743_s5  ;;  %v15607_v23 = vsel %vm27115_vm14, %v15601_v41, %v15603_v16  ;;  %vm15967_vm14 = vcmask 523264  }
 0x3e1   : > { %v15780_v38 = vpop.permute.xlu1 %15779  ;;  %22798 = vmatprep.subr.msk.mxu1 %vm214_vm1, %v15607_v23 }
 0x3e2   : > { %22799 = vmatpush1.msk.msra.mxu1 %vm214_vm1, %v15606_v24  ;;  %22797 = vmatmul.mubr.msk.f32.vlgmr.msra.gmra.mrb[14].mxu0 %vm210_vm2, %v22794_v17 }
 0x3e3   : > { %17766 = vrot.lane.b32.xlu1 %v25936_v52, %s23743_s5  ;;  %v15778_v26 = vpop.permute.xlu0 %15777  ;;  %22800 = vmatmul.mubr.msk.f32.vlgmr.msra.gmra.mrb[14].mxu1 %vm210_vm2, %v22794_v17  ;;  %s27117_s5 = smov 21  }
 0x3e4   : > { %17950 = vrot.lane.b32.xlu0 %v25945_v21, %s23744_s4  ;;  %v15787_v8 = vsel %vm15785_vm0, %v15778_v26, %v15780_v38  ;;  %15865 = vmatprep.mubr.f32.mxu0 %v23682_v7 }
 0x3e5   : > { %v15784_v25 = vpop.permute.xlu1 %15783  ;;  %22802 = vmatprep.subr.msk.mxu0 %vm214_vm1, %v15787_v8  ;;  %15936 = vmatprep.mubr.f32.mxu1 %v23682_v7 }
 0x3e7   : > { %17952 = vrot.lane.b32.xlu1 %v25977_v63, %s23744_s4  ;;  %v15782_v36 = vpop.permute.xlu0 %15781 }
 0x3e8   : > { %17954 = vrot.lane.b32.xlu0 %v25985_v5, %s23744_s4  ;;  %v15788_v1 = vsel %vm15785_vm0, %v15780_v38, %v15782_v36  ;;  %v15789_v28 = vsel %vm15785_vm0, %v15782_v36, %v15784_v25  ;;  %v18663_v38 = vld [vmem:[%s23826_s30 + $0x14] sm:$0xf] }
 0x3e9   : > { %v15960_v59 = vpop.permute.xlu1 %15959  ;;  %22805 = vmatprep.subr.msk.mxu1 %vm214_vm1, %v15789_v28  ;;  %v18844_v36 = vld [vmem:[%s23826_s30 + $0x14] sm:$0xf] }
 0x3ea   : > { %22806 = vmatpush1.msk.msra.mxu1 %vm214_vm1, %v15788_v1 }
 0x3eb   : > { %17956 = vrot.lane.b32.xlu1 %v17940_v27, %s23744_s4  ;;  %v15776_v34 = vpop.permute.xlu0 %15775  ;;  %22807 = vmatmul.mubr.msk.f32.vlgmr.msra.gmra.mrb[14].mxu1 %vm210_vm2, %v22801_v31 }
 0x3ec   : > { %17948 = vrot.lane.b32.xlu0 %v25936_v52, %s23744_s4  ;;  %v15786_v58 = vsel %vm15785_vm0, %v15776_v34, %v15778_v26  ;;  %16118 = vmatprep.mubr.f32.mxu1 %v23682_v7  ;;  %s27118_s4 = smov 22   ;;  %vm27120_vm0 = vmmov %vm27119_vm15  ;;  %v22829_v26 = vld [vmem:[%s26943_s1 + $0x168] sm:$0xf] }
 0x3ed   : > { %v15964_v46 = vpop.permute.xlu1 %15963  ;;  %v12067_v35 = vpop.f32.mrb[10].mxu0  ;;  %22803 = vmatpush1.msk.msra.mxu0 %vm214_vm1, %v15786_v58  ;;  %v22836_v58 = vld [vmem:[%s26943_s1 + $0x16c] sm:$0xf] }
 0x3ee   : > { %v12069_v39 = vpop.f32.mrb[11].mxu0  ;;  %v12138_v2 = vpop.f32.mrb[10].mxu1  ;;  %22804 = vmatmul.mubr.msk.f32.vlgmr.msra.gmra.mrb[14].mxu0 %vm210_vm2, %v22801_v31 }
 0x3ef   : > { %18148 = vrot.lane.b32.xlu1 %v25945_v21, %s27117_s5  ;;  %v12153_v18 = vcombine.low %v12067_v35, %v12069_v39  ;;  %v15962_v62 = vpop.permute.xlu0 %15961  ;;  %v12140_v42 = vpop.f32.mrb[11].mxu1  ;;  %16047 = vmatprep.mubr.f32.mxu0 %v23682_v7 }
 0x3f0   : > { %18150 = vrot.lane.b32.xlu0 %v25977_v63, %s27117_s5  ;;  %v12154_v4 = vcombine.low %v12138_v2, %v12140_v42  ;;  %v15969_v44 = vsel %vm15967_vm14, %v15960_v59, %v15962_v62  ;;  %v15970_v20 = vsel %vm15967_vm14, %v15962_v62, %v15964_v46 }
 0x3f1   : > { %v15958_v37 = vpop.permute.xlu1 %15957  ;;  %v26169_v45 = vadd.f32 %v12153_v18, %v25896_v6  ;;  %22809 = vmatprep.subr.msk.mxu0 %vm214_vm1, %v15969_v44  ;;  %v19025_v18 = vld [vmem:[%s23826_s30 + $0x14] sm:$0xf] }
 0x3f2   : > { %v15968_v47 = vsel %vm15967_vm14, %v15958_v37, %v15960_v59  ;;  %v26174_v48 = vadd.f32 %v12154_v4, %v25885_v40 }
 0x3f3   : > { %18152 = vrot.lane.b32.xlu1 %v25985_v5, %s27117_s5  ;;  %22810 = vmatpush1.msk.msra.mxu0 %vm214_vm1, %v15968_v47  ;;  %v15966_v49 = vpop.permute.xlu0 %15965 }
 0x3f4   : > { %18154 = vrot.lane.b32.xlu0 %v18136_v29, %s27117_s5  ;;  %v15971_v6 = vsel %vm15967_vm14, %v15964_v46, %v15966_v49  ;;  %vm27121_vm14 = vmmov %vm27120_vm0 }
 0x3f5   : > { %v16160_v3 = vpop.permute.xlu1 %16159  ;;  %22812 = vmatprep.subr.msk.mxu1 %vm214_vm1, %v15971_v6 }
 0x3f6   : > { %22811 = vmatmul.mubr.msk.f32.vlgmr.msra.gmra.mrb[14].mxu0 %vm210_vm2, %v22808_v50  ;;  %22813 = vmatpush1.msk.msra.mxu1 %vm214_vm1, %v15970_v20  ;;  %v19206_v20 = vld [vmem:[%s23826_s30 + $0x14] sm:$0xf] }
 0x3f7   : > { %18146 = vrot.lane.b32.xlu1 %v25936_v52, %s27117_s5  ;;  %v16158_v51 = vpop.permute.xlu0 %16157  ;;  %22814 = vmatmul.mubr.msk.f32.vlgmr.msra.gmra.mrb[14].mxu1 %vm210_vm2, %v22808_v50  ;;  %s27122_s5 = smov 20  }
 0x3f8   : > { %18315 = vrot.lane.b32.xlu0 %v25945_v21, %s27118_s4  ;;  %v16166_v12 = vsel %vm27119_vm15, %v16158_v51, %v16160_v3  ;;  %16244 = vmatprep.mubr.f32.mxu0 %v23682_v7  ;;  %vm27123_vm15 = vmmov %vm27120_vm0 }
 0x3f9   : > { %v16164_v40 = vpop.permute.xlu1 %16163  ;;  %22817 = vmatprep.subr.msk.mxu0 %vm214_vm1, %v16166_v12  ;;  %16315 = vmatprep.mubr.f32.mxu1 %v23682_v7 }
 0x3fb   : > { %18317 = vrot.lane.b32.xlu1 %v25977_v63, %s27118_s4  ;;  %v16162_v43 = vpop.permute.xlu0 %16161 }
 0x3fc   : > { %18319 = vrot.lane.b32.xlu0 %v25985_v5, %s27118_s4  ;;  %v16167_v13 = vsel %vm27120_vm0, %v16160_v3, %v16162_v43  ;;  %v16168_v14 = vsel %vm27121_vm14, %v16162_v43, %v16164_v40  ;;  %vm27124_vm0 = vcmask 392192   ;;  %v22843_v3 = vld [vmem:[%s26943_s1 + $0x170] sm:$0xf] }
 0x3fd   : > { %v16325_v19 = vpop.permute.xlu1 %16324  ;;  %22820 = vmatprep.subr.msk.mxu1 %vm214_vm1, %v16168_v14  ;;  %vm27125_vm14 = vmmov %vm27124_vm0 }
 0x3fe   : > { %22821 = vmatpush1.msk.msra.mxu1 %vm214_vm1, %v16167_v13  ;;  %v22850_v13 = vld [vmem:[%s26943_s1 + $0x174] sm:$0xf] }
 0x3ff   : > { %18321 = vrot.lane.b32.xlu1 %v18136_v29, %s27118_s4  ;;  %v16156_v55 = vpop.permute.xlu0 %16155  ;;  %22822 = vmatmul.mubr.msk.f32.vlgmr.msra.gmra.mrb[16].mxu1 %vm210_vm2, %v22816_v54 }
 0x400   : > { %18313 = vrot.lane.b32.xlu0 %v25936_v52, %s27118_s4  ;;  %v16165_v53 = vsel %vm27123_vm15, %v16156_v55, %v16158_v51  ;;  %16482 = vmatprep.mubr.f32.mxu1 %v23682_v7  ;;  %vm27126_vm15 = vmmov %vm27124_vm0  ;;  %s27127_s4 = smov 19  }
 0x401   : > { %v16329_v15 = vpop.permute.xlu1 %16328  ;;  %22818 = vmatpush1.msk.msra.mxu0 %vm214_vm1, %v16165_v53 }
 0x402   : > { %22819 = vmatmul.mubr.msk.f32.vlgmr.msra.gmra.mrb[16].mxu0 %vm210_vm2, %v22816_v54 }
 0x403   : > { %18492 = vrot.lane.b32.xlu1 %v25945_v21, %s27122_s5  ;;  %v16327_v60 = vpop.permute.xlu0 %16326  ;;  %16411 = vmatprep.mubr.f32.mxu0 %v23682_v7 }
 0x404   : > { %18494 = vrot.lane.b32.xlu0 %v25977_v63, %s27122_s5  ;;  %v16333_v30 = vsel %vm27124_vm0, %v16325_v19, %v16327_v60  ;;  %v16334_v9 = vsel %vm27124_vm0, %v16327_v60, %v16329_v15 }
 0x405   : > { %v16323_v56 = vpop.permute.xlu1 %16322  ;;  %22823 = vmatprep.subr.msk.mxu0 %vm214_vm1, %v16333_v30 }
 0x406   : > { %v16332_v61 = vsel %vm27125_vm14, %v16323_v56, %v16325_v19  ;;  %vm27128_vm14 = vcmask 375808   ;;  %v19387_v56 = vld [vmem:[%s23826_s30 + $0x14] sm:$0xf] }
 0x407   : > { %18496 = vrot.lane.b32.xlu1 %v25985_v5, %s27122_s5  ;;  %22824 = vmatpush1.msk.msra.mxu0 %vm214_vm1, %v16332_v61  ;;  %v16331_v32 = vpop.permute.xlu0 %16330  ;;  %vm27130_vm0 = vmmov %vm27128_vm14 }
 0x408   : > { %18498 = vrot.lane.b32.xlu0 %v18482_v57, %s27122_s5  ;;  %v16335_v22 = vsel %vm27126_vm15, %v16329_v15, %v16331_v32  ;;  %vm27129_vm15 = vmmov %vm27128_vm14 }
 0x409   : > { %v16504_v41 = vpop.permute.xlu1 %16503  ;;  %22826 = vmatprep.subr.msk.mxu1 %vm214_vm1, %v16335_v22 }
 0x40a   : > { %22827 = vmatpush1.msk.msra.mxu1 %vm214_vm1, %v16334_v9  ;;  %22825 = vmatmul.mubr.msk.f32.vlgmr.msra.gmra.mrb[16].mxu0 %vm210_vm2, %v22815_v0 }
 0x40b   : > { %18490 = vrot.lane.b32.xlu1 %v25936_v52, %s27122_s5  ;;  %v16502_v33 = vpop.permute.xlu0 %16501  ;;  %22828 = vmatmul.mubr.msk.f32.vlgmr.msra.gmra.mrb[16].mxu1 %vm210_vm2, %v22815_v0  ;;  %s27131_s5 = smov 18  }
 0x40c   : > { %18673 = vrot.lane.b32.xlu0 %v25945_v21, %s27127_s4  ;;  %v16510_v11 = vsel %vm27128_vm14, %v16502_v33, %v16504_v41  ;;  %16588 = vmatprep.mubr.f32.mxu0 %v23682_v7  ;;  %vm27132_vm14 = vmmov %vm27130_vm0 }
 0x40d   : > { %v16508_v10 = vpop.permute.xlu1 %16507  ;;  %22830 = vmatprep.subr.msk.mxu0 %vm214_vm1, %v16510_v11  ;;  %16659 = vmatprep.mubr.f32.mxu1 %v23682_v7 }
 0x40f   : > { %18675 = vrot.lane.b32.xlu1 %v25977_v63, %s27127_s4  ;;  %v16506_v17 = vpop.permute.xlu0 %16505 }
 0x410   : > { %18677 = vrot.lane.b32.xlu0 %v25985_v5, %s27127_s4  ;;  %v16511_v23 = vsel %vm27129_vm15, %v16504_v41, %v16506_v17  ;;  %v16512_v24 = vsel %vm27130_vm0, %v16506_v17, %v16508_v10  ;;  %vm27133_vm15 = vcmask 367616   ;;  %v22857_v41 = vld [vmem:[%s26943_s1 + $0x178] sm:$0xf]  ;;  %v19568_v10 = vld [vmem:[%s23826_s30 + $0x14] sm:$0xf] }
 0x411   : > { %v16683_v16 = vpop.permute.xlu1 %16682  ;;  %22833 = vmatprep.subr.msk.mxu1 %vm214_vm1, %v16512_v24  ;;  %vm27134_vm0 = vmmov %vm27133_vm15  ;;  %v22864_v24 = vld [vmem:[%s26943_s1 + $0x17c] sm:$0xf] }
 0x412   : > { %22834 = vmatpush1.msk.msra.mxu1 %vm214_vm1, %v16511_v23 }
 0x413   : > { %18679 = vrot.lane.b32.xlu1 %v18663_v38, %s27127_s4  ;;  %v16500_v8 = vpop.permute.xlu0 %16499  ;;  %22835 = vmatmul.mubr.msk.f32.vlgmr.msra.gmra.mrb[16].mxu1 %vm210_vm2, %v22829_v26 }
 0x414   : > { %18671 = vrot.lane.b32.xlu0 %v25936_v52, %s27127_s4  ;;  %v16509_v27 = vsel %vm27132_vm14, %v16500_v8, %v16502_v33  ;;  %16840 = vmatprep.mubr.f32.mxu1 %v23682_v7  ;;  %vm27135_vm14 = vmmov %vm27134_vm0  ;;  %s27136_s4 = smov 17  }
 0x415   : > { %v16687_v25 = vpop.permute.xlu1 %16686  ;;  %22831 = vmatpush1.msk.msra.mxu0 %vm214_vm1, %v16509_v27 }
 0x416   : > { %22832 = vmatmul.mubr.msk.f32.vlgmr.msra.gmra.mrb[16].mxu0 %vm210_vm2, %v22829_v26 }
 0x417   : > { %18854 = vrot.lane.b32.xlu1 %v25945_v21, %s27131_s5  ;;  %v16685_v1 = vpop.permute.xlu0 %16684  ;;  %16769 = vmatprep.mubr.f32.mxu0 %v23682_v7 }
 0x418   : > { %18856 = vrot.lane.b32.xlu0 %v25977_v63, %s27131_s5  ;;  %v16691_v28 = vsel %vm27133_vm15, %v16683_v16, %v16685_v1  ;;  %vm27137_vm15 = vmmov %vm27134_vm0 }
 0x419   : > { %v16681_v59 = vpop.permute.xlu1 %16680  ;;  %22837 = vmatprep.subr.msk.mxu0 %vm214_vm1, %v16691_v28  ;;  %v16692_v37 = vsel %vm27137_vm15, %v16685_v1, %v16687_v25 }
 0x41a   : > { %v16690_v31 = vsel %vm27134_vm0, %v16681_v59, %v16683_v16  ;;  %vm27138_vm0 = vcmask 359424   ;;  %v19749_v59 = vld [vmem:[%s23826_s30 + $0x14] sm:$0xf] }
 0x41b   : > { %18858 = vrot.lane.b32.xlu1 %v25985_v5, %s27131_s5  ;;  %22838 = vmatpush1.msk.msra.mxu0 %vm214_vm1, %v16690_v31  ;;  %v16689_v34 = vpop.permute.xlu0 %16688  ;;  %vm27140_vm15 = vmmov %vm27138_vm0 }
 0x41c   : > { %18860 = vrot.lane.b32.xlu0 %v18844_v36, %s27131_s5  ;;  %v16693_v35 = vsel %vm27135_vm14, %v16687_v25, %v16689_v34  ;;  %vm27139_vm14 = vmmov %vm27138_vm0 }
 0x41d   : > { %v16866_v46 = vpop.permute.xlu1 %16865  ;;  %22840 = vmatprep.subr.msk.mxu1 %vm214_vm1, %v16693_v35 }
 0x41e   : > { %22841 = vmatpush1.msk.msra.mxu1 %vm214_vm1, %v16692_v37  ;;  %22839 = vmatmul.mubr.msk.f32.vlgmr.msra.gmra.mrb[16].mxu0 %vm210_vm2, %v22836_v58 }
 0x41f   : > { %18852 = vrot.lane.b32.xlu1 %v25936_v52, %s27131_s5  ;;  %v16864_v39 = vpop.permute.xlu0 %16863  ;;  %22842 = vmatmul.mubr.msk.f32.vlgmr.msra.gmra.mrb[16].mxu1 %vm210_vm2, %v22836_v58  ;;  %s27141_s5 = smov 16  }
 0x420   : > { %19035 = vrot.lane.b32.xlu0 %v25945_v21, %s27136_s4  ;;  %v16872_v2 = vsel %vm27138_vm0, %v16864_v39, %v16866_v46  ;;  %16950 = vmatprep.mubr.f32.mxu0 %v23682_v7 }
 0x421   : > { %v16870_v29 = vpop.permute.xlu1 %16869  ;;  %22844 = vmatprep.subr.msk.mxu0 %vm214_vm1, %v16872_v2  ;;  %17021 = vmatprep.mubr.f32.mxu1 %v23682_v7 }
 0x423   : > { %19037 = vrot.lane.b32.xlu1 %v25977_v63, %s27136_s4  ;;  %v16868_v42 = vpop.permute.xlu0 %16867 }
 0x424   : > { %19039 = vrot.lane.b32.xlu0 %v25985_v5, %s27136_s4  ;;  %v16873_v4 = vsel %vm27139_vm14, %v16866_v46, %v16868_v42  ;;  %v16874_v44 = vsel %vm27140_vm15, %v16868_v42, %v16870_v29  ;;  %vm27142_vm14 = vcmask 351232   ;;  %v22871_v46 = vld [vmem:[%s26943_s1 + $0x180] sm:$0xf]  ;;  %v19931_v29 = vld [vmem:[%s23826_s30 + $0x14] sm:$0xf] }
 0x425   : > { %v17045_v62 = vpop.permute.xlu1 %17044  ;;  %22847 = vmatprep.subr.msk.mxu1 %vm214_vm1, %v16874_v44  ;;  %vm27143_vm15 = vmmov %vm27142_vm14  ;;  %v22878_v44 = vld [vmem:[%s26943_s1 + $0x184] sm:$0xf] }
 0x426   : > { %22848 = vmatpush1.msk.msra.mxu1 %vm214_vm1, %v16873_v4 }
 0x427   : > { %19041 = vrot.lane.b32.xlu1 %v19025_v18, %s27136_s4  ;;  %v16862_v49 = vpop.permute.xlu0 %16861  ;;  %22849 = vmatmul.mubr.msk.f32.vlgmr.msra.gmra.mrb[16].mxu1 %vm210_vm2, %v22843_v3 }
 0x428   : > { %19033 = vrot.lane.b32.xlu0 %v25936_v52, %s27136_s4  ;;  %v16871_v50 = vsel %vm27138_vm0, %v16862_v49, %v16864_v39  ;;  %17202 = vmatprep.mubr.f32.mxu1 %v23682_v7  ;;  %vm27144_vm0 = vmmov %vm27142_vm14  ;;  %v26411_v39 = vld [vmem:[%s23826_s30 + $0x8] sm:$0xff] }
 0x429   : > { %v17049_v47 = vpop.permute.xlu1 %17048  ;;  %22845 = vmatpush1.msk.msra.mxu0 %vm214_vm1, %v16871_v50 }
 0x42a   : > { %22846 = vmatmul.mubr.msk.f32.vlgmr.msra.gmra.mrb[16].mxu0 %vm210_vm2, %v22843_v3 }
 0x42b   : > { %19216 = vrot.lane.b32.xlu1 %v25945_v21, %s27141_s5  ;;  %v17047_v40 = vpop.permute.xlu0 %17046  ;;  %17131 = vmatprep.mubr.f32.mxu0 %v23682_v7 }
 0x42c   : > { %19218 = vrot.lane.b32.xlu0 %v25977_v63, %s27141_s5  ;;  %v17053_v51 = vsel %vm27142_vm14, %v17045_v62, %v17047_v40  ;;  %vm27145_vm14 = vmmov %vm27144_vm0 }
 0x42d   : > { %v17043_v6 = vpop.permute.xlu1 %17042  ;;  %22851 = vmatprep.subr.msk.mxu0 %vm214_vm1, %v17053_v51  ;;  %v17054_v15 = vsel %vm27145_vm14, %v17047_v40, %v17049_v47  ;;  %v20127_v51 = vld [vmem:[%s23826_s30 + $0x18] sm:$0xf] }
 0x42e   : > { %v17052_v12 = vsel %vm27143_vm15, %v17043_v6, %v17045_v62  ;;  %vm27146_vm15 = vcmask 343040  }
 0x42f   : > { %19220 = vrot.lane.b32.xlu1 %v25985_v5, %s27141_s5  ;;  %22852 = vmatpush1.msk.msra.mxu0 %vm214_vm1, %v17052_v12  ;;  %v17051_v43 = vpop.permute.xlu0 %17050 }
 0x430   : > { %19222 = vrot.lane.b32.xlu0 %v19206_v20, %s27141_s5  ;;  %v17055_v14 = vsel %vm27144_vm0, %v17049_v47, %v17051_v43  ;;  %vm27147_vm0 = vmmov %vm27146_vm15 }
 0x431   : > { %v17228_v19 = vpop.permute.xlu1 %17227  ;;  %22854 = vmatprep.subr.msk.mxu1 %vm214_vm1, %v17055_v14  ;;  %vm27148_vm14 = vmmov %vm27147_vm0 }
 0x432   : > { %22855 = vmatpush1.msk.msra.mxu1 %vm214_vm1, %v17054_v15  ;;  %22853 = vmatmul.mubr.msk.f32.vlgmr.msra.gmra.mrb[16].mxu0 %vm210_vm2, %v22850_v13 }
 0x433   : > { %19214 = vrot.lane.b32.xlu1 %v25936_v52, %s27141_s5  ;;  %v17226_v55 = vpop.permute.xlu0 %17225  ;;  %22856 = vmatmul.mubr.msk.f32.vlgmr.msra.gmra.mrb[16].mxu1 %vm210_vm2, %v22850_v13  ;;  %s23745_s5 = smov 13  }
 0x434   : > { %19397 = vrot.lane.b32.xlu0 %v25945_v21, %s23734_s24  ;;  %v17234_v53 = vsel %vm27146_vm15, %v17226_v55, %v17228_v19  ;;  %17312 = vmatprep.mubr.f32.mxu0 %v23682_v7  ;;  %vm27149_vm15 = vmmov %vm27147_vm0 }
 0x435   : > { %v17232_v54 = vpop.permute.xlu1 %17231  ;;  %22858 = vmatprep.subr.msk.mxu0 %vm214_vm1, %v17234_v53  ;;  %17383 = vmatprep.mubr.f32.mxu1 %v23682_v7  ;;  %v22885_v53 = vld [vmem:[%s26943_s1 + $0x188] sm:$0xf] }
 0x437   : > { %19399 = vrot.lane.b32.xlu1 %v25977_v63, %s23734_s24  ;;  %v17230_v60 = vpop.permute.xlu0 %17229 }
 0x438   : > { %19401 = vrot.lane.b32.xlu0 %v25985_v5, %s23734_s24  ;;  %v17235_v30 = vsel %vm27147_vm0, %v17228_v19, %v17230_v60  ;;  %v17236_v61 = vsel %vm27148_vm14, %v17230_v60, %v17232_v54  ;;  %vm27150_vm0 = vcmask 334848  }
 0x439   : > { %v17407_v57 = vpop.permute.xlu1 %17406  ;;  %22861 = vmatprep.subr.msk.mxu1 %vm214_vm1, %v17236_v61  ;;  %vm27151_vm14 = vmmov %vm27150_vm0 }
 0x43a   : > { %22862 = vmatpush1.msk.msra.mxu1 %vm214_vm1, %v17235_v30 }
 0x43b   : > { %19403 = vrot.lane.b32.xlu1 %v19387_v56, %s23734_s24  ;;  %v17224_v0 = vpop.permute.xlu0 %17223  ;;  %22863 = vmatmul.mubr.msk.f32.vlgmr.msra.gmra.mrb[16].mxu1 %vm210_vm2, %v22857_v41 }
 0x43c   : > { %19395 = vrot.lane.b32.xlu0 %v25936_v52, %s23734_s24  ;;  %v17233_v22 = vsel %vm27149_vm15, %v17224_v0, %v17226_v55  ;;  %17564 = vmatprep.mubr.f32.mxu1 %v23682_v7  ;;  %vm27152_vm15 = vmmov %vm27150_vm0 }
 0x43d   : > { %v17411_v32 = vpop.permute.xlu1 %17410  ;;  %22859 = vmatpush1.msk.msra.mxu0 %vm214_vm1, %v17233_v22 }
 0x43e   : > { %22860 = vmatmul.mubr.msk.f32.vlgmr.msra.gmra.mrb[16].mxu0 %vm210_vm2, %v22857_v41  ;;  %v22893_v41 = vld [vmem:[%s26943_s1 + $0x190] sm:$0xf] }
 0x43f   : > { %19578 = vrot.lane.b32.xlu1 %v25945_v21, %s23735_s26  ;;  %v17409_v33 = vpop.permute.xlu0 %17408  ;;  %17493 = vmatprep.mubr.f32.mxu0 %v23682_v7 }
 0x440   : > { %19580 = vrot.lane.b32.xlu0 %v25977_v63, %s23735_s26  ;;  %v17415_v11 = vsel %vm27150_vm0, %v17407_v57, %v17409_v33  ;;  %v17416_v25 = vsel %vm27150_vm0, %v17409_v33, %v17411_v32 }
 0x441   : > { %v17405_v9 = vpop.permute.xlu1 %17404  ;;  %22865 = vmatprep.subr.msk.mxu0 %vm214_vm1, %v17415_v11 }
 0x442   : > { %v17414_v38 = vsel %vm27151_vm14, %v17405_v9, %v17407_v57  ;;  %vm27153_vm14 = vcmask 326656  }
 0x443   : > { %19582 = vrot.lane.b32.xlu1 %v25985_v5, %s23735_s26  ;;  %22866 = vmatpush1.msk.msra.mxu0 %vm214_vm1, %v17414_v38  ;;  %v17413_v17 = vpop.permute.xlu0 %17412  ;;  %vm27155_vm0 = vmmov %vm27153_vm14 }
 0x444   : > { %19584 = vrot.lane.b32.xlu0 %v19568_v10, %s23735_s26  ;;  %v17417_v23 = vsel %vm27152_vm15, %v17411_v32, %v17413_v17  ;;  %vm27154_vm15 = vmmov %vm27153_vm14 }
 0x445   : > { %v17590_v16 = vpop.permute.xlu1 %17589  ;;  %22868 = vmatprep.subr.msk.mxu1 %vm214_vm1, %v17417_v23 }
 0x446   : > { %22869 = vmatpush1.msk.msra.mxu1 %vm214_vm1, %v17416_v25  ;;  %22867 = vmatmul.mubr.msk.f32.vlgmr.msra.gmra.mrb[16].mxu0 %vm210_vm2, %v22864_v24 }
 0x447   : > { %19576 = vrot.lane.b32.xlu1 %v25936_v52, %s23735_s26  ;;  %v17588_v8 = vpop.permute.xlu0 %17587  ;;  %22870 = vmatmul.mubr.msk.f32.vlgmr.msra.gmra.mrb[16].mxu1 %vm210_vm2, %v22864_v24 }
 0x448   : > { %19759 = vrot.lane.b32.xlu0 %v25945_v21, %s23745_s5  ;;  %v17596_v27 = vsel %vm27153_vm14, %v17588_v8, %v17590_v16  ;;  %17745 = vmatprep.mubr.f32.mxu1 %v23682_v7  ;;  %vm27156_vm14 = vmmov %vm27155_vm0 }
 0x449   : > { %v17594_v26 = vpop.permute.xlu1 %17593  ;;  %22872 = vmatprep.subr.msk.mxu0 %vm214_vm1, %v17596_v27  ;;  %17674 = vmatprep.mubr.f32.mxu0 %v23682_v7 }
 0x44b   : > { %19761 = vrot.lane.b32.xlu1 %v25977_v63, %s23745_s5  ;;  %v17592_v1 = vpop.permute.xlu0 %17591 }
 0x44c   : > { %19763 = vrot.lane.b32.xlu0 %v25985_v5, %s23745_s5  ;;  %v17597_v28 = vsel %vm27154_vm15, %v17590_v16, %v17592_v1  ;;  %v17598_v31 = vsel %vm27155_vm0, %v17592_v1, %v17594_v26  ;;  %vm17776_vm15 = vcmask 318464   ;;  %vm17958_vm0 = vcmask 310272   ;;  %v20473_v16 = vld [vmem:[%s23826_s30 + $0x18] sm:$0xf] }
 0x44d   : > { %v17769_v36 = vpop.permute.xlu1 %17768  ;;  %22875 = vmatprep.subr.msk.mxu1 %vm214_vm1, %v17598_v31  ;;  %v20654_v1 = vld [vmem:[%s23826_s30 + $0x18] sm:$0xf] }
 0x44e   : > { %22876 = vmatpush1.msk.msra.mxu1 %vm214_vm1, %v17597_v28 }
 0x44f   : > { %19765 = vrot.lane.b32.xlu1 %v19749_v59, %s23745_s5  ;;  %v17586_v58 = vpop.permute.xlu0 %17585  ;;  %22877 = vmatmul.mubr.msk.f32.vlgmr.msra.gmra.mrb[16].mxu1 %vm210_vm2, %v22871_v46 }
 0x450   : > { %19757 = vrot.lane.b32.xlu0 %v25936_v52, %s23745_s5  ;;  %v17595_v35 = vsel %vm27156_vm14, %v17586_v58, %v17588_v8  ;;  %17927 = vmatprep.mubr.f32.mxu1 %v23682_v7  ;;  %vm27157_vm14 = vcmask 171008   ;;  %v22892_v8 = vld [vmem:[%s26943_s1 + $0x18c] sm:$0xf] }
 0x451   : > { %v17773_v34 = vpop.permute.xlu1 %17772  ;;  %22873 = vmatpush1.msk.msra.mxu0 %vm214_vm1, %v17595_v35  ;;  %v22906_v35 = vld [vmem:[%s26943_s1 + $0x194] sm:$0xf] }
 0x452   : > { %22874 = vmatmul.mubr.msk.f32.vlgmr.msra.gmra.mrb[16].mxu0 %vm210_vm2, %v22871_v46 }
 0x453   : > { %19941 = vrot.lane.b32.xlu1 %v25945_v21, %s23746_s28  ;;  %v17771_v2 = vpop.permute.xlu0 %17770  ;;  %17856 = vmatprep.mubr.f32.mxu0 %v23682_v7 }
 0x454   : > { %19943 = vrot.lane.b32.xlu0 %v25977_v63, %s23746_s28  ;;  %v17778_v21 = vsel %vm17776_vm15, %v17769_v36, %v17771_v2  ;;  %v26419_v63 = vcombine.high %v26411_v39, %v26411_v39  ;;  %v17779_v3 = vsel %vm17776_vm15, %v17771_v2, %v17773_v34 }
 0x455   : > { %v17767_v37 = vpop.permute.xlu1 %17766  ;;  %22879 = vmatprep.subr.msk.mxu0 %vm214_vm1, %v17778_v21 }
 0x456   : > { %v17777_v18 = vsel %vm17776_vm15, %v17767_v37, %v17769_v36 }
 0x457   : > { %19945 = vrot.lane.b32.xlu1 %v25985_v5, %s23746_s28  ;;  %22880 = vmatpush1.msk.msra.mxu0 %vm214_vm1, %v17777_v18  ;;  %v17775_v42 = vpop.permute.xlu0 %17774  ;;  %v26426_v5 = vld [vmem:[%s23826_s30 + $0x10] sm:$0xff] }
 0x458   : > { %19947 = vrot.lane.b32.xlu0 %v19931_v29, %s23746_s28  ;;  %v17780_v4 = vsel %vm17776_vm15, %v17773_v34, %v17775_v42  ;;  %v26434_v47 = vcombine.high %v26426_v5, %v26426_v5  ;;  %vm27158_vm15 = vmmov %vm27157_vm14 }
 0x459   : > { %v17953_v62 = vpop.permute.xlu1 %17952  ;;  %22882 = vmatprep.subr.msk.mxu1 %vm214_vm1, %v17780_v4 }
 0x45a   : > { %v14129_v49 = vpop.f32.mrb[12].mxu1  ;;  %22883 = vmatpush1.msk.msra.mxu1 %vm214_vm1, %v17779_v3  ;;  %22881 = vmatmul.mubr.msk.f32.vlgmr.msra.gmra.mrb[16].mxu0 %vm210_vm2, %v22878_v44 }
 0x45b   : > { %19939 = vrot.lane.b32.xlu1 %v25936_v52, %s23746_s28  ;;  %v17951_v50 = vpop.permute.xlu0 %17950  ;;  %v14131_v6 = vpop.f32.mrb[13].mxu1  ;;  %22884 = vmatmul.mubr.msk.f32.vlgmr.msra.gmra.mrb[16].mxu1 %vm210_vm2, %v22878_v44 }
 0x45c   : > { %20139 = vrot.lane.b32.xlu0 %v26419_v63, %s23686_s8  ;;  %v14145_v20 = vcombine.low %v14129_v49, %v14131_v6  ;;  %v17960_v40 = vsel %vm17958_vm0, %v17951_v50, %v17953_v62  ;;  %18109 = vmatprep.mubr.f32.mxu1 %v23682_v7  ;;  %v22913_v49 = vld [vmem:[%s26943_s1 + $0x198] sm:$0xf] }
 0x45d   : > { %v17957_v52 = vpop.permute.xlu1 %17956  ;;  %v14058_v12 = vpop.f32.mrb[12].mxu0  ;;  %22886 = vmatprep.subr.msk.mxu0 %vm214_vm1, %v17960_v40  ;;  %18038 = vmatprep.mubr.f32.mxu0 %v23682_v7  ;;  %v21016_v40 = vld [vmem:[%s23826_s30 + $0x18] sm:$0xf] }
 0x45e   : > { %v26453_v43 = vadd.f32 %v14145_v20, %v26174_v48  ;;  %v14060_v13 = vpop.f32.mrb[13].mxu0 }
 0x45f   : > { %20141 = vrot.lane.b32.xlu1 %v26426_v5, %s23686_s8  ;;  %v14144_v14 = vcombine.low %v14058_v12, %v14060_v13  ;;  %v17955_v15 = vpop.permute.xlu0 %17954 }
 0x460   : > { %20143 = vrot.lane.b32.xlu0 %v26434_v47, %s23686_s8  ;;  %v17961_v54 = vsel %vm17958_vm0, %v17953_v62, %v17955_v15  ;;  %v17962_v55 = vsel %vm17958_vm0, %v17955_v15, %v17957_v52  ;;  %v20835_v62 = vld [vmem:[%s23826_s30 + $0x18] sm:$0xf]  ;;  %v22920_v15 = vld [vmem:[%s26943_s1 + $0x19c] sm:$0xf] }
 0x461   : > { %v18149_v19 = vpop.permute.xlu1 %18148  ;;  %v26464_v56 = vadd.f32 %v14144_v14, %v26169_v45  ;;  %22889 = vmatprep.subr.msk.mxu1 %vm214_vm1, %v17962_v55 }
 0x462   : > { %22890 = vmatpush1.msk.msra.mxu1 %vm214_vm1, %v17961_v54 }
 0x463   : > { %20145 = vrot.lane.b32.xlu1 %v20127_v51, %s23686_s8  ;;  %v17949_v57 = vpop.permute.xlu0 %17948  ;;  %22891 = vmatmul.mubr.msk.f32.vlgmr.msra.gmra.mrb[16].mxu1 %vm210_vm2, %v22885_v53 }
 0x464   : > { %20137 = vrot.lane.b32.xlu0 %v26411_v39, %s23686_s8  ;;  %v17959_v60 = vsel %vm17958_vm0, %v17949_v57, %v17951_v50  ;;  %18306 = vmatprep.mubr.f32.mxu1 %v23682_v7  ;;  %vm27159_vm0 = vmmov %vm27157_vm14  ;;  %s23747_s8 = smov 115  }
 0x465   : > { %v18153_v48 = vpop.permute.xlu1 %18152  ;;  %22887 = vmatpush1.msk.msra.mxu0 %vm214_vm1, %v17959_v60  ;;  %v21197_v60 = vld [vmem:[%s23826_s30 + $0x18] sm:$0xf] }
 0x466   : > { %22888 = vmatmul.mubr.msk.f32.vlgmr.msra.gmra.mrb[16].mxu0 %vm210_vm2, %v22885_v53 }
 0x467   : > { %20306 = vrot.lane.b32.xlu1 %v26419_v63, %s23685_s7  ;;  %v18151_v30 = vpop.permute.xlu0 %18150  ;;  %18235 = vmatprep.mubr.f32.mxu0 %v23682_v7 }
 0x468   : > { %20308 = vrot.lane.b32.xlu0 %v26426_v5, %s23685_s7  ;;  %v18157_v61 = vsel %vm27157_vm14, %v18149_v19, %v18151_v30  ;;  %vm27160_vm14 = vmmov %vm27159_vm0 }
 0x469   : > { %v18147_v45 = vpop.permute.xlu1 %18146  ;;  %22894 = vmatprep.subr.msk.mxu0 %vm214_vm1, %v18157_v61  ;;  %v18158_v10 = vsel %vm27160_vm14, %v18151_v30, %v18153_v48 }
 0x46a   : > { %v18156_v32 = vsel %vm27158_vm15, %v18147_v45, %v18149_v19  ;;  %vm27161_vm15 = vcmask 179200  }
 0x46b   : > { %20310 = vrot.lane.b32.xlu1 %v26434_v47, %s23685_s7  ;;  %22895 = vmatpush1.msk.msra.mxu0 %vm214_vm1, %v18156_v32  ;;  %v18155_v22 = vpop.permute.xlu0 %18154 }
 0x46c   : > { %20312 = vrot.lane.b32.xlu0 %v20127_v51, %s23685_s7  ;;  %22896 = vmatmul.mubr.msk.f32.vlgmr.msra.gmra.mrb[18].mxu0 %vm210_vm2, %v22893_v41  ;;  %v18159_v9 = vsel %vm27159_vm0, %v18153_v48, %v18155_v22  ;;  %vm27162_vm0 = vmmov %vm27161_vm15 }
 0x46d   : > { %v18318_v0 = vpop.permute.xlu1 %18317  ;;  %18402 = vmatprep.mubr.f32.mxu0 %v23682_v7  ;;  %22897 = vmatprep.subr.msk.mxu1 %vm214_vm1, %v18159_v9  ;;  %vm27163_vm14 = vmmov %vm27162_vm0 }
 0x46e   : > { %22898 = vmatpush1.msk.msra.mxu1 %vm214_vm1, %v18158_v10 }
 0x46f   : > { %20304 = vrot.lane.b32.xlu1 %v26411_v39, %s23685_s7  ;;  %v18316_v11 = vpop.permute.xlu0 %18315  ;;  %22899 = vmatmul.mubr.msk.f32.vlgmr.msra.gmra.mrb[18].mxu1 %vm210_vm2, %v22893_v41  ;;  %s23748_s7 = smov 114  }
 0x470   : > { %20483 = vrot.lane.b32.xlu0 %v26419_v63, %s23687_s9  ;;  %v18324_v38 = vsel %vm27161_vm15, %v18316_v11, %v18318_v0  ;;  %18473 = vmatprep.mubr.f32.mxu1 %v23682_v7  ;;  %vm27164_vm15 = vmmov %vm27162_vm0 }
 0x471   : > { %v18322_v33 = vpop.permute.xlu1 %18321  ;;  %22900 = vmatprep.subr.msk.mxu0 %vm214_vm1, %v18324_v38 }
 0x473   : > { %20485 = vrot.lane.b32.xlu1 %v26426_v5, %s23687_s9  ;;  %v18320_v23 = vpop.permute.xlu0 %18319 }
 0x474   : > { %20487 = vrot.lane.b32.xlu0 %v26434_v47, %s23687_s9  ;;  %v18325_v24 = vsel %vm27162_vm0, %v18318_v0, %v18320_v23  ;;  %v18326_v25 = vsel %vm27163_vm14, %v18320_v23, %v18322_v33  ;;  %vm27165_vm0 = vcmask 162816   ;;  %v22927_v0 = vld [vmem:[%s26943_s1 + $0x1a0] sm:$0xf]  ;;  %v21378_v33 = vld [vmem:[%s23826_s30 + $0x18] sm:$0xf] }
 0x475   : > { %v18493_v17 = vpop.permute.xlu1 %18492  ;;  %22903 = vmatprep.subr.msk.mxu1 %vm214_vm1, %v18326_v25  ;;  %vm27166_vm14 = vmmov %vm27165_vm0 }
 0x476   : > { %22904 = vmatpush1.msk.msra.mxu1 %vm214_vm1, %v18325_v24  ;;  %v22934_v24 = vld [vmem:[%s26943_s1 + $0x1a4] sm:$0xf] }
 0x477   : > { %20489 = vrot.lane.b32.xlu1 %v20473_v16, %s23687_s9  ;;  %v18314_v27 = vpop.permute.xlu0 %18313  ;;  %22905 = vmatmul.mubr.msk.f32.vlgmr.msra.gmra.mrb[18].mxu1 %vm210_vm2, %v22892_v8 }
 0x478   : > { %20481 = vrot.lane.b32.xlu0 %v26411_v39, %s23687_s9  ;;  %v18323_v59 = vsel %vm27164_vm15, %v18314_v27, %v18316_v11  ;;  %18650 = vmatprep.mubr.f32.mxu1 %v23682_v7  ;;  %vm27167_vm15 = vmmov %vm27165_vm0 }
 0x479   : > { %v18497_v26 = vpop.permute.xlu1 %18496  ;;  %22901 = vmatpush1.msk.msra.mxu0 %vm214_vm1, %v18323_v59 }
 0x47a   : > { %22902 = vmatmul.mubr.msk.f32.vlgmr.msra.gmra.mrb[18].mxu0 %vm210_vm2, %v22892_v8 }
 0x47b   : > { %20664 = vrot.lane.b32.xlu1 %v26419_v63, %s23688_s10  ;;  %v18495_v28 = vpop.permute.xlu0 %18494  ;;  %18579 = vmatprep.mubr.f32.mxu0 %v23682_v7 }
 0x47c   : > { %20666 = vrot.lane.b32.xlu0 %v26426_v5, %s23688_s10  ;;  %v18501_v31 = vsel %vm27165_vm0, %v18493_v17, %v18495_v28  ;;  %v18502_v29 = vsel %vm27165_vm0, %v18495_v28, %v18497_v26 }
 0x47d   : > { %v18491_v36 = vpop.permute.xlu1 %18490  ;;  %22907 = vmatprep.subr.msk.mxu0 %vm214_vm1, %v18501_v31 }
 0x47e   : > { %v18500_v46 = vsel %vm27166_vm14, %v18491_v36, %v18493_v17  ;;  %vm27168_vm14 = vcmask 154624   ;;  %v21559_v36 = vld [vmem:[%s23826_s30 + $0x18] sm:$0xf] }
 0x47f   : > { %20668 = vrot.lane.b32.xlu1 %v26434_v47, %s23688_s10  ;;  %22908 = vmatpush1.msk.msra.mxu0 %vm214_vm1, %v18500_v46  ;;  %v18499_v58 = vpop.permute.xlu0 %18498  ;;  %vm27170_vm0 = vmmov %vm27168_vm14 }
 0x480   : > { %20670 = vrot.lane.b32.xlu0 %v20654_v1, %s23688_s10  ;;  %v18503_v37 = vsel %vm27167_vm15, %v18497_v26, %v18499_v58  ;;  %vm27169_vm15 = vmmov %vm27168_vm14 }
 0x481   : > { %v18676_v34 = vpop.permute.xlu1 %18675  ;;  %22910 = vmatprep.subr.msk.mxu1 %vm214_vm1, %v18503_v37 }
 0x482   : > { %22911 = vmatpush1.msk.msra.mxu1 %vm214_vm1, %v18502_v29  ;;  %22909 = vmatmul.mubr.msk.f32.vlgmr.msra.gmra.mrb[18].mxu0 %vm210_vm2, %v22906_v35 }
 0x483   : > { %20662 = vrot.lane.b32.xlu1 %v26411_v39, %s23688_s10  ;;  %v18674_v21 = vpop.permute.xlu0 %18673  ;;  %22912 = vmatmul.mubr.msk.f32.vlgmr.msra.gmra.mrb[18].mxu1 %vm210_vm2, %v22906_v35 }
 0x484   : > { %20845 = vrot.lane.b32.xlu0 %v26419_v63, %s23689_s11  ;;  %v18682_v18 = vsel %vm27168_vm14, %v18674_v21, %v18676_v34  ;;  %18760 = vmatprep.mubr.f32.mxu0 %v23682_v7  ;;  %vm27171_vm14 = vmmov %vm27170_vm0 }
 0x485   : > { %v18680_v2 = vpop.permute.xlu1 %18679  ;;  %22914 = vmatprep.subr.msk.mxu0 %vm214_vm1, %v18682_v18  ;;  %18831 = vmatprep.mubr.f32.mxu1 %v23682_v7 }
 0x487   : > { %20847 = vrot.lane.b32.xlu1 %v26426_v5, %s23689_s11  ;;  %v18678_v4 = vpop.permute.xlu0 %18677 }
 0x488   : > { %20849 = vrot.lane.b32.xlu0 %v26434_v47, %s23689_s11  ;;  %v18683_v44 = vsel %vm27169_vm15, %v18676_v34, %v18678_v4  ;;  %v18684_v3 = vsel %vm27170_vm0, %v18678_v4, %v18680_v2  ;;  %vm27172_vm15 = vcmask 146432   ;;  %v22941_v34 = vld [vmem:[%s26943_s1 + $0x1a8] sm:$0xf]  ;;  %v21740_v2 = vld [vmem:[%s23826_s30 + $0x18] sm:$0xf] }
 0x489   : > { %v18855_v42 = vpop.permute.xlu1 %18854  ;;  %22917 = vmatprep.subr.msk.mxu1 %vm214_vm1, %v18684_v3  ;;  %vm27173_vm0 = vmmov %vm27172_vm15 }
 0x48a   : > { %22918 = vmatpush1.msk.msra.mxu1 %vm214_vm1, %v18683_v44  ;;  %v22948_v44 = vld [vmem:[%s26943_s1 + $0x1ac] sm:$0xf] }
 0x48b   : > { %20851 = vrot.lane.b32.xlu1 %v20835_v62, %s23689_s11  ;;  %v18672_v50 = vpop.permute.xlu0 %18671  ;;  %22919 = vmatmul.mubr.msk.f32.vlgmr.msra.gmra.mrb[18].mxu1 %vm210_vm2, %v22913_v49 }
 0x48c   : > { %20843 = vrot.lane.b32.xlu0 %v26411_v39, %s23689_s11  ;;  %v18681_v6 = vsel %vm27171_vm14, %v18672_v50, %v18674_v21  ;;  %19012 = vmatprep.mubr.f32.mxu1 %v23682_v7  ;;  %vm27174_vm14 = vmmov %vm27173_vm0 }
 0x48d   : > { %v18859_v52 = vpop.permute.xlu1 %18858  ;;  %22915 = vmatpush1.msk.msra.mxu0 %vm214_vm1, %v18681_v6 }
 0x48e   : > { %22916 = vmatmul.mubr.msk.f32.vlgmr.msra.gmra.mrb[18].mxu0 %vm210_vm2, %v22913_v49 }
 0x48f   : > { %21026 = vrot.lane.b32.xlu1 %v26419_v63, %s23690_s17  ;;  %v18857_v51 = vpop.permute.xlu0 %18856  ;;  %18941 = vmatprep.mubr.f32.mxu0 %v23682_v7 }
 0x490   : > { %21028 = vrot.lane.b32.xlu0 %v26426_v5, %s23690_s17  ;;  %v18863_v12 = vsel %vm27172_vm15, %v18855_v42, %v18857_v51  ;;  %vm27175_vm15 = vmmov %vm27173_vm0 }
 0x491   : > { %v18853_v20 = vpop.permute.xlu1 %18852  ;;  %22921 = vmatprep.subr.msk.mxu0 %vm214_vm1, %v18863_v12  ;;  %v18864_v55 = vsel %vm27175_vm15, %v18857_v51, %v18859_v52 }
 0x492   : > { %v18862_v19 = vsel %vm27173_vm0, %v18853_v20, %v18855_v42  ;;  %vm27176_vm0 = vcmask 138240  }
 0x493   : > { %21030 = vrot.lane.b32.xlu1 %v26434_v47, %s23690_s17  ;;  %22922 = vmatpush1.msk.msra.mxu0 %vm214_vm1, %v18862_v19  ;;  %v18861_v14 = vpop.permute.xlu0 %18860  ;;  %vm27178_vm15 = vmmov %vm27176_vm0 }
 0x494   : > { %21032 = vrot.lane.b32.xlu0 %v21016_v40, %s23690_s17  ;;  %v18865_v54 = vsel %vm27174_vm14, %v18859_v52, %v18861_v14  ;;  %vm27177_vm14 = vmmov %vm27176_vm0 }
 0x495   : > { %v19038_v13 = vpop.permute.xlu1 %19037  ;;  %22924 = vmatprep.subr.msk.mxu1 %vm214_vm1, %v18865_v54 }
 0x496   : > { %22925 = vmatpush1.msk.msra.mxu1 %vm214_vm1, %v18864_v55  ;;  %22923 = vmatmul.mubr.msk.f32.vlgmr.msra.gmra.mrb[18].mxu0 %vm210_vm2, %v22920_v15 }
 0x497   : > { %21024 = vrot.lane.b32.xlu1 %v26411_v39, %s23690_s17  ;;  %v19036_v48 = vpop.permute.xlu0 %19035  ;;  %22926 = vmatmul.mubr.msk.f32.vlgmr.msra.gmra.mrb[18].mxu1 %vm210_vm2, %v22920_v15  ;;  %s161_s17 = sand.u32 1, %s23670_s13  }
 0x498   : > { %21207 = vrot.lane.b32.xlu0 %v26419_v63, %s23691_s19  ;;  %v19044_v57 = vsel %vm27176_vm0, %v19036_v48, %v19038_v13  ;;  %19122 = vmatprep.mubr.f32.mxu0 %v23682_v7  ;;  %s22198_s27 = sshll.u32 %s161_s17, 4  ;;  %s22121_s5 = scalar_lea.sflag [#allocation4], %s161_s17 }
 0x499   : > { %v19042_v53 = vpop.permute.xlu1 %19041  ;;  %22928 = vmatprep.subr.msk.mxu0 %vm214_vm1, %v19044_v57  ;;  %19193 = vmatprep.mubr.f32.mxu1 %v23682_v7  ;;  %s163_s24 = scalar_lea.vmem [#allocation3], %s22198_s27 }
 0x49b   : > { %21209 = vrot.lane.b32.xlu1 %v26426_v5, %s23691_s19  ;;  %v19040_v30 = vpop.permute.xlu0 %19039 }
 0x49c   : > { %21211 = vrot.lane.b32.xlu0 %v26434_v47, %s23691_s19  ;;  %v19045_v61 = vsel %vm27177_vm14, %v19038_v13, %v19040_v30  ;;  %v19046_v41 = vsel %vm27178_vm15, %v19040_v30, %v19042_v53  ;;  %vm27179_vm14 = vcmask 130048  }
 0x49d   : > { %v19217_v45 = vpop.permute.xlu1 %19216  ;;  %22931 = vmatprep.subr.msk.mxu1 %vm214_vm1, %v19046_v41  ;;  %vm27180_vm15 = vmmov %vm27179_vm14 }
 0x49e   : > { %22932 = vmatpush1.msk.msra.mxu1 %vm214_vm1, %v19045_v61 }
 0x49f   : > { %21213 = vrot.lane.b32.xlu1 %v21197_v60, %s23691_s19  ;;  %v19034_v22 = vpop.permute.xlu0 %19033  ;;  %22933 = vmatmul.mubr.msk.f32.vlgmr.msra.gmra.mrb[18].mxu1 %vm210_vm2, %v22927_v0 }
 0x4a0   : > { %21205 = vrot.lane.b32.xlu0 %v26411_v39, %s23691_s19  ;;  %v19043_v9 = vsel %vm27176_vm0, %v19034_v22, %v19036_v48  ;;  %19374 = vmatprep.mubr.f32.mxu1 %v23682_v7  ;;  %vm27181_vm0 = vmmov %vm27179_vm14  ;;  %s23051_s19 = sshll.u32 %s23791_s16, 8  ;;  %s23749_s16 = smov [#allocation3]  }
 0x4a1   : > { %v19221_v32 = vpop.permute.xlu1 %19220  ;;  %22929 = vmatpush1.msk.msra.mxu0 %vm214_vm1, %v19043_v9  ;;  %s23620_s26 = sshll.u32 %s23749_s16, 4  ;;  %s23621_s26 = int_to_ptr.vmem [resolvable:$false] %s23620_s26 }
 0x4a2   : > { %22930 = vmatmul.mubr.msk.f32.vlgmr.msra.gmra.mrb[18].mxu0 %vm210_vm2, %v22927_v0  ;;  %v22962_v0 = vld [vmem:[%s26943_s1 + $0x1b4] sm:$0xf]  ;;  %s23622_s9 = scalar_lea.vmem %s23621_s26, 512 }
 0x4a3   : > { %21388 = vrot.lane.b32.xlu1 %v26419_v63, %s23737_s6  ;;  %v19219_v11 = vpop.permute.xlu0 %19218  ;;  %19303 = vmatprep.mubr.f32.mxu0 %v23682_v7 }
 0x4a4   : > { %21390 = vrot.lane.b32.xlu0 %v26426_v5, %s23737_s6  ;;  %v19225_v38 = vsel %vm27179_vm14, %v19217_v45, %v19219_v11  ;;  %vm27182_vm14 = vmmov %vm27181_vm0 }
 0x4a5   : > { %v19215_v10 = vpop.permute.xlu1 %19214  ;;  %22935 = vmatprep.subr.msk.mxu0 %vm214_vm1, %v19225_v38  ;;  %v19226_v26 = vsel %vm27182_vm14, %v19219_v11, %v19221_v32 }
 0x4a6   : > { %v19224_v16 = vsel %vm27180_vm15, %v19215_v10, %v19217_v45 }
 0x4a7   : > { %21392 = vrot.lane.b32.xlu1 %v26434_v47, %s23737_s6  ;;  %22936 = vmatpush1.msk.msra.mxu0 %vm214_vm1, %v19224_v16  ;;  %v19223_v23 = vpop.permute.xlu0 %19222 }
 0x4a8   : > { %21394 = vrot.lane.b32.xlu0 %v21378_v33, %s23737_s6  ;;  %v19227_v25 = vsel %vm27181_vm0, %v19221_v32, %v19223_v23  ;;  %v22970_v23 = vld [vmem:[%s26943_s1 + $0x1bc] sm:$0xf] }
 0x4a9   : > { %v19400_v17 = vpop.permute.xlu1 %19399  ;;  %22938 = vmatprep.subr.msk.mxu1 %vm214_vm1, %v19227_v25 }
 0x4aa   : > { %22939 = vmatpush1.msk.msra.mxu1 %vm214_vm1, %v19226_v26  ;;  %22937 = vmatmul.mubr.msk.f32.vlgmr.msra.gmra.mrb[18].mxu0 %vm210_vm2, %v22934_v24 }
 0x4ab   : > { %21386 = vrot.lane.b32.xlu1 %v26411_v39, %s23737_s6  ;;  %v19398_v27 = vpop.permute.xlu0 %19397  ;;  %22940 = vmatmul.mubr.msk.f32.vlgmr.msra.gmra.mrb[18].mxu1 %vm210_vm2, %v22934_v24  ;;  %s22135_s6 = sshll.u32 %s163_s24, 4  ;;  %s26902_s6 = int_to_ptr.vmem [resolvable:$true] %s22135_s6 }
 0x4ac   : > { %21569 = vrot.lane.b32.xlu0 %v26419_v63, %s23738_s29  ;;  %v19406_v59 = vsel %vm9812_vm13, %v19398_v27, %v19400_v17  ;;  %19484 = vmatprep.mubr.f32.mxu0 %v23682_v7  ;;  %p23623_p0 = scmp.lt.s32.totalorder %s26902_s6, %s23621_s26 }
 0x4ad   : > { %v19404_v8 = vpop.permute.xlu1 %19403  ;;  %22942 = vmatprep.subr.msk.mxu0 %vm214_vm1, %v19406_v59  ;;  %19555 = vmatprep.mubr.f32.mxu1 %v23682_v7 }
 0x4af   : > { %21571 = vrot.lane.b32.xlu1 %v26426_v5, %s23738_s29  ;;  %v19402_v28 = vpop.permute.xlu0 %19401 }
 0x4b0   : > { %21573 = vrot.lane.b32.xlu0 %v26434_v47, %s23738_s29  ;;  %v19407_v31 = vsel %vm9812_vm13, %v19400_v17, %v19402_v28  ;;  %v19408_v46 = vsel %vm9812_vm13, %v19402_v28, %v19404_v8  ;;  %v22969_v28 = vld [vmem:[%s26943_s1 + $0x1b8] sm:$0xf] }
 0x4b1   : > { %v19579_v1 = vpop.permute.xlu1 %19578  ;;  %22945 = vmatprep.subr.msk.mxu1 %vm214_vm1, %v19408_v46 }
 0x4b2   : > { %22946 = vmatpush1.msk.msra.mxu1 %vm214_vm1, %v19407_v31 }
 0x4b3   : > { %21575 = vrot.lane.b32.xlu1 %v21559_v36, %s23738_s29  ;;  %v19396_v35 = vpop.permute.xlu0 %19395  ;;  %22947 = vmatmul.mubr.msk.f32.vlgmr.msra.gmra.mrb[18].mxu1 %vm210_vm2, %v22941_v34 }
 0x4b4   : > { %21567 = vrot.lane.b32.xlu0 %v26411_v39, %s23738_s29  ;;  %v19405_v37 = vsel %vm9812_vm13, %v19396_v35, %v19398_v27  ;;  %19736 = vmatprep.mubr.f32.mxu1 %v23682_v7  ;;  %vm19767_vm13 = vcmask 105472   ;;  %s26900_s29 = scalar_lea.hbm %s26945_s3, %s23051_s19 }
 0x4b5   : > { %v19583_v58 = vpop.permute.xlu1 %19582  ;;  %22943 = vmatpush1.msk.msra.mxu0 %vm214_vm1, %v19405_v37 }
 0x4b6   : > { %22944 = vmatmul.mubr.msk.f32.vlgmr.msra.gmra.mrb[18].mxu0 %vm210_vm2, %v22941_v34 }
 0x4b7   : > { %21750 = vrot.lane.b32.xlu1 %v26419_v63, %s23747_s8  ;;  %v19581_v21 = vpop.permute.xlu0 %19580  ;;  %19665 = vmatprep.mubr.f32.mxu0 %v23682_v7 }
 0x4b8   : > { %21752 = vrot.lane.b32.xlu0 %v26426_v5, %s23747_s8  ;;  %v19587_v18 = vsel %vm9994_vm12, %v19579_v1, %v19581_v21  ;;  %v19588_v52 = vsel %vm9994_vm12, %v19581_v21, %v19583_v58 }
 0x4b9   : > { %v19577_v29 = vpop.permute.xlu1 %19576  ;;  %22949 = vmatprep.subr.msk.mxu0 %vm214_vm1, %v19587_v18 }
 0x4ba   : > { %v19586_v62 = vsel %vm9994_vm12, %v19577_v29, %v19579_v1 }
 0x4bb   : > { %21754 = vrot.lane.b32.xlu1 %v26434_v47, %s23747_s8  ;;  %22950 = vmatpush1.msk.msra.mxu0 %vm214_vm1, %v19586_v62  ;;  %v19585_v4 = vpop.permute.xlu0 %19584  ;;  %v22983_v62 = vld [vmem:[%s26943_s1 + $0x1c0] sm:$0xf] }
 0x4bc   : > { %21756 = vrot.lane.b32.xlu0 %v21740_v2, %s23747_s8  ;;  %v19589_v3 = vsel %vm9994_vm12, %v19583_v58, %v19585_v4  ;;  %vm19949_vm12 = vcmask 97280  }
 0x4bd   : > { %v19762_v42 = vpop.permute.xlu1 %19761  ;;  %22952 = vmatprep.subr.msk.mxu1 %vm214_vm1, %v19589_v3 }
 0x4be   : > { %22953 = vmatpush1.msk.msra.mxu1 %vm214_vm1, %v19588_v52  ;;  %22951 = vmatmul.mubr.msk.f32.vlgmr.msra.gmra.mrb[18].mxu0 %vm210_vm2, %v22948_v44 }
 0x4bf   : > { %21748 = vrot.lane.b32.xlu1 %v26411_v39, %s23747_s8  ;;  %v19760_v50 = vpop.permute.xlu0 %19759  ;;  %22954 = vmatmul.mubr.msk.f32.vlgmr.msra.gmra.mrb[18].mxu1 %vm210_vm2, %v22948_v44 }
 0x4c0   : > { %21932 = vrot.lane.b32.xlu0 %v26419_v63, %s23748_s7  ;;  %v19769_v6 = vsel %vm19767_vm13, %v19760_v50, %v19762_v42  ;;  %v21922_v63 = vld [vmem:[%s23826_s30 + $0x18] sm:$0xf]  ;;  %19847 = vmatprep.mubr.f32.mxu0 %v23682_v7 }
 0x4c1   : > { %v19766_v49 = vpop.permute.xlu1 %19765  ;;  %22956 = vmatprep.subr.msk.mxu0 %vm214_vm1, %v19769_v6  ;;  %19918 = vmatprep.mubr.f32.mxu1 %v23682_v7 }
 0x4c3   : > { %21934 = vrot.lane.b32.xlu1 %v26426_v5, %s23748_s7  ;;  %v19764_v40 = vpop.permute.xlu0 %19763  ;;  %v22955_v5 = vld [vmem:[%s26943_s1 + $0x1b0] sm:$0xf] }
 0x4c4   : > { %21936 = vrot.lane.b32.xlu0 %v26434_v47, %s23748_s7  ;;  %v19770_v51 = vsel %vm19767_vm13, %v19762_v42, %v19764_v40  ;;  %v19771_v12 = vsel %vm19767_vm13, %v19764_v40, %v19766_v49 }
 0x4c5   : > { %v19942_v20 = vpop.permute.xlu1 %19941  ;;  %22959 = vmatprep.subr.msk.mxu1 %vm214_vm1, %v19771_v12 }
 0x4c6   : > { %22960 = vmatpush1.msk.msra.mxu1 %vm214_vm1, %v19770_v51 }
 0x4c7   : > { %21938 = vrot.lane.b32.xlu1 %v21922_v63, %s23748_s7  ;;  %v19758_v19 = vpop.permute.xlu0 %19757  ;;  %22961 = vmatmul.mubr.msk.f32.vlgmr.msra.gmra.mrb[18].mxu1 %vm210_vm2, %v22955_v5  ;;  %v22990_v63 = vld [vmem:[%s26943_s1 + $0x1c4] sm:$0xf] }
 0x4c8   : > { %21930 = vrot.lane.b32.xlu0 %v26411_v39, %s23748_s7  ;;  %v19768_v13 = vsel %vm19767_vm13, %v19758_v19, %v19760_v50  ;;  %20100 = vmatprep.mubr.f32.mxu1 %v23682_v7  ;;  %s23616_s7 = scalar_lea.vmem %s26902_s6, 256 }
 0x4c9   : > { %v19946_v47 = vpop.permute.xlu1 %19945  ;;  %v16049_v14 = vpop.f32.mrb[14].mxu0  ;;  %22957 = vmatpush1.msk.msra.mxu0 %vm214_vm1, %v19768_v13  ;;  %p23617_p11 = scmp.ne.s32.totalorder %s26902_s6, %s23616_s7  ;;  %p23624_p1 = scmp.lt.s32.totalorder %s23622_s9, %s23616_s7 }
 0x4ca   : > { %v16051_v54 = vpop.f32.mrb[15].mxu0  ;;  %v16120_v55 = vpop.f32.mrb[14].mxu1  ;;  %22958 = vmatmul.mubr.msk.f32.vlgmr.msra.gmra.mrb[18].mxu0 %vm210_vm2, %v22955_v5 }
 0x4cb   : > { %v16135_v39 = vcombine.low %v16049_v14, %v16051_v54  ;;  %v19944_v53 = vpop.permute.xlu0 %19943  ;;  %v16122_v48 = vpop.f32.mrb[15].mxu1  ;;  %20029 = vmatprep.mubr.f32.mxu0 %v23682_v7  ;;  %v22997_v54 = vld [vmem:[%s26943_s1 + $0x1c8] sm:$0xf]  ;;  %p23618_p12 = pnand %p23617_p11, %p23808_p5  ;;  %p23625_p2 = por %p23624_p1, %p23623_p0 }
 0x4cc   : > { %v19951_v57 = vsel %vm19949_vm12, %v19942_v20, %v19944_v53  ;;  %v16136_v60 = vcombine.low %v16120_v55, %v16122_v48 }
 0x4cd   : > { %v19940_v15 = vpop.permute.xlu1 %19939  ;;  %v26715_v45 = vadd.f32 %v16135_v39, %v26464_v56  ;;  %22963 = vmatprep.subr.msk.mxu0 %vm214_vm1, %v19951_v57  ;;  %v19952_v56 = vsel %vm19949_vm12, %v19944_v53, %v19946_v47  ;;  %p23619_p13 = pneg %p23618_p12 }
 0x4ce   : > { %v19950_v30 = vsel %vm19949_vm12, %v19940_v15, %v19942_v20  ;;  %v26720_v41 = vadd.f32 %v16136_v60, %v26453_v43 }
 0x4cf   : > { %22964 = vmatpush1.msk.msra.mxu0 %vm214_vm1, %v19950_v30  ;;  %v19948_v32 = vpop.permute.xlu0 %19947  ;;  %p23626_p3 = pnand %p23625_p2, %p23619_p13 }
 0x4d0   : > { %v19953_v22 = vsel %vm19949_vm12, %v19946_v47, %v19948_v32  ;;  %v23004_v32 = vld [vmem:[%s26943_s1 + $0x1cc] sm:$0xf] }
 0x4d1   : > { %v20142_v61 = vpop.permute.xlu1 %20141  ;;  %22966 = vmatprep.subr.msk.mxu1 %vm214_vm1, %v19953_v22 }
 0x4d2   : > { %22965 = vmatmul.mubr.msk.f32.vlgmr.msra.gmra.mrb[18].mxu0 %vm210_vm2, %v22962_v0  ;;  %22967 = vmatpush1.msk.msra.mxu1 %vm214_vm1, %v19952_v56 }
 0x4d3   : > { %v20140_v43 = vpop.permute.xlu0 %20139  ;;  %22968 = vmatmul.mubr.msk.f32.vlgmr.msra.gmra.mrb[18].mxu1 %vm210_vm2, %v22962_v0  ;;  %20226 = vmatprep.mubr.f32.mxu0 %v23682_v7 }
 0x4d4   : > { %v20148_v10 = vsel %vm1084_vm6, %v20140_v43, %v20142_v61  ;;  %20297 = vmatprep.mubr.f32.mxu1 %v23682_v7 }
 0x4d5   : > { %v20146_v9 = vpop.permute.xlu1 %20145  ;;  %22971 = vmatprep.subr.msk.mxu0 %vm214_vm1, %v20148_v10 }
 0x4d7   : > { %v20144_v11 = vpop.permute.xlu0 %20143 }
 0x4d8   : > { %v20149_v38 = vsel %vm1084_vm6, %v20142_v61, %v20144_v11  ;;  %v20150_v16 = vsel %vm1084_vm6, %v20144_v11, %v20146_v9 }
 0x4d9   : > { %v20307_v33 = vpop.permute.xlu1 %20306  ;;  %22974 = vmatprep.subr.msk.mxu1 %vm214_vm1, %v20150_v16  ;;  %v23011_v16 = vld [vmem:[%s26943_s1 + $0x1d0] sm:$0xf] }
 0x4da   : > { %22975 = vmatpush1.msk.msra.mxu1 %vm214_vm1, %v20149_v38 }
 0x4db   : > { %v20138_v24 = vpop.permute.xlu0 %20137  ;;  %22976 = vmatmul.mubr.msk.f32.vlgmr.msra.gmra.mrb[20].mxu1 %vm210_vm2, %v22970_v23 }
 0x4dc   : > { %v20147_v25 = vsel %vm1084_vm6, %v20138_v24, %v20140_v43  ;;  %20464 = vmatprep.mubr.f32.mxu1 %v23682_v7  ;;  %vm21940_vm6 = vcmask 932864  }
 0x4dd   : > { %v20311_v17 = vpop.permute.xlu1 %20310  ;;  %22972 = vmatpush1.msk.msra.mxu0 %vm214_vm1, %v20147_v25 }
 0x4de   : > { %22973 = vmatmul.mubr.msk.f32.vlgmr.msra.gmra.mrb[20].mxu0 %vm210_vm2, %v22970_v23 }
 0x4df   : > { %v20309_v8 = vpop.permute.xlu0 %20308  ;;  %20393 = vmatprep.mubr.f32.mxu0 %v23682_v7 }
 0x4e0   : > { %v20315_v27 = vsel %vm902_vm5, %v20307_v33, %v20309_v8  ;;  %v20316_v46 = vsel %vm902_vm5, %v20309_v8, %v20311_v17 }
 0x4e1   : > { %v20305_v26 = vpop.permute.xlu1 %20304  ;;  %22977 = vmatprep.subr.msk.mxu0 %vm214_vm1, %v20315_v27 }
 0x4e2   : > { %v20314_v59 = vsel %vm902_vm5, %v20305_v26, %v20307_v33 }
 0x4e3   : > { %22978 = vmatpush1.msk.msra.mxu0 %vm214_vm1, %v20314_v59  ;;  %v20313_v1 = vpop.permute.xlu0 %20312 }
 0x4e4   : > { %v20317_v31 = vsel %vm902_vm5, %v20311_v17, %v20313_v1  ;;  %vm21758_vm5 = vcmask 941056  }
 0x4e5   : > { %v20486_v36 = vpop.permute.xlu1 %20485  ;;  %22980 = vmatprep.subr.msk.mxu1 %vm214_vm1, %v20317_v31 }
 0x4e6   : > { %22981 = vmatpush1.msk.msra.mxu1 %vm214_vm1, %v20316_v46  ;;  %22979 = vmatmul.mubr.msk.f32.vlgmr.msra.gmra.mrb[20].mxu0 %vm210_vm2, %v22969_v28 }
 0x4e7   : > { %v20484_v58 = vpop.permute.xlu0 %20483  ;;  %22982 = vmatmul.mubr.msk.f32.vlgmr.msra.gmra.mrb[20].mxu1 %vm210_vm2, %v22969_v28  ;;  %20570 = vmatprep.mubr.f32.mxu0 %v23682_v7  ;;  %v23018_v28 = vld [vmem:[%s26943_s1 + $0x1d4] sm:$0xf] }
 0x4e8   : > { %v20492_v35 = vsel %vm1266_vm7, %v20484_v58, %v20486_v36  ;;  %20641 = vmatprep.mubr.f32.mxu1 %v23682_v7 }
 0x4e9   : > { %v20490_v34 = vpop.permute.xlu1 %20489  ;;  %22984 = vmatprep.subr.msk.mxu0 %vm214_vm1, %v20492_v35 }
 0x4eb   : > { %v20488_v29 = vpop.permute.xlu0 %20487 }
 0x4ec   : > { %v20493_v2 = vsel %vm1266_vm7, %v20486_v36, %v20488_v29  ;;  %v20494_v21 = vsel %vm1266_vm7, %v20488_v29, %v20490_v34 }
 0x4ed   : > { %v20665_v37 = vpop.permute.xlu1 %20664  ;;  %22987 = vmatprep.subr.msk.mxu1 %vm214_vm1, %v20494_v21  ;;  %v23025_v21 = vld [vmem:[%s26943_s1 + $0x1d8] sm:$0xf] }
 0x4ee   : > { %22988 = vmatpush1.msk.msra.mxu1 %vm214_vm1, %v20493_v2 }
 0x4ef   : > { %v20482_v42 = vpop.permute.xlu0 %20481  ;;  %22989 = vmatmul.mubr.msk.f32.vlgmr.msra.gmra.mrb[20].mxu1 %vm210_vm2, %v22983_v62 }
 0x4f0   : > { %v20491_v4 = vsel %vm1266_vm7, %v20482_v42, %v20484_v58  ;;  %20822 = vmatprep.mubr.f32.mxu1 %v23682_v7 }
 0x4f1   : > { %v20669_v18 = vpop.permute.xlu1 %20668  ;;  %22985 = vmatpush1.msk.msra.mxu0 %vm214_vm1, %v20491_v4 }
 0x4f2   : > { %22986 = vmatmul.mubr.msk.f32.vlgmr.msra.gmra.mrb[20].mxu0 %vm210_vm2, %v22983_v62 }
 0x4f3   : > { %v20667_v3 = vpop.permute.xlu0 %20666  ;;  %20751 = vmatprep.mubr.f32.mxu0 %v23682_v7 }
 0x4f4   : > { %v20673_v52 = vsel %vm1448_vm8, %v20665_v37, %v20667_v3  ;;  %v20674_v40 = vsel %vm1448_vm8, %v20667_v3, %v20669_v18 }
 0x4f5   : > { %v20663_v44 = vpop.permute.xlu1 %20662  ;;  %22991 = vmatprep.subr.msk.mxu0 %vm214_vm1, %v20673_v52 }
 0x4f6   : > { %v20672_v49 = vsel %vm1448_vm8, %v20663_v44, %v20665_v37 }
 0x4f7   : > { %22992 = vmatpush1.msk.msra.mxu0 %vm214_vm1, %v20672_v49  ;;  %v20671_v6 = vpop.permute.xlu0 %20670 }
 0x4f8   : > { %v20675_v20 = vsel %vm1448_vm8, %v20669_v18, %v20671_v6 }
 0x4f9   : > { %v20848_v50 = vpop.permute.xlu1 %20847  ;;  %22994 = vmatprep.subr.msk.mxu1 %vm214_vm1, %v20675_v20 }
 0x4fa   : > { %22995 = vmatpush1.msk.msra.mxu1 %vm214_vm1, %v20674_v40  ;;  %22993 = vmatmul.mubr.msk.f32.vlgmr.msra.gmra.mrb[20].mxu0 %vm210_vm2, %v22990_v63 }
 0x4fb   : > { %v20846_v12 = vpop.permute.xlu0 %20845  ;;  %22996 = vmatmul.mubr.msk.f32.vlgmr.msra.gmra.mrb[20].mxu1 %vm210_vm2, %v22990_v63  ;;  %20932 = vmatprep.mubr.f32.mxu0 %v23682_v7  ;;  %v23032_v63 = vld [vmem:[%s26943_s1 + $0x1dc] sm:$0xf] }
 0x4fc   : > { %v20854_v5 = vsel %vm1630_vm9, %v20846_v12, %v20848_v50  ;;  %21003 = vmatprep.mubr.f32.mxu1 %v23682_v7 }
 0x4fd   : > { %v20852_v51 = vpop.permute.xlu1 %20851  ;;  %22998 = vmatprep.subr.msk.mxu0 %vm214_vm1, %v20854_v5 }
 0x4ff   : > { %v20850_v19 = vpop.permute.xlu0 %20849 }
 0x500   : > { %v20855_v13 = vsel %vm1630_vm9, %v20848_v50, %v20850_v19  ;;  %v20856_v14 = vsel %vm1630_vm9, %v20850_v19, %v20852_v51 }
 0x501   : > { %v21027_v47 = vpop.permute.xlu1 %21026  ;;  %23001 = vmatprep.subr.msk.mxu1 %vm214_vm1, %v20856_v14 }
 0x502   : > { %23002 = vmatpush1.msk.msra.mxu1 %vm214_vm1, %v20855_v13 }
 0x503   : > { %v20844_v55 = vpop.permute.xlu0 %20843  ;;  %23003 = vmatmul.mubr.msk.f32.vlgmr.msra.gmra.mrb[20].mxu1 %vm210_vm2, %v22997_v54 }
 0x504   : > { %v20853_v39 = vsel %vm1630_vm9, %v20844_v55, %v20846_v12  ;;  %21184 = vmatprep.mubr.f32.mxu1 %v23682_v7 }
 0x505   : > { %v21031_v15 = vpop.permute.xlu1 %21030  ;;  %22999 = vmatpush1.msk.msra.mxu0 %vm214_vm1, %v20853_v39 }
 0x506   : > { %23000 = vmatmul.mubr.msk.f32.vlgmr.msra.gmra.mrb[20].mxu0 %vm210_vm2, %v22997_v54 }
 0x507   : > { %v21029_v48 = vpop.permute.xlu0 %21028  ;;  %21113 = vmatprep.mubr.f32.mxu0 %v23682_v7 }
 0x508   : > { %v21035_v57 = vsel %vm1812_vm10, %v21027_v47, %v21029_v48  ;;  %v21036_v22 = vsel %vm1812_vm10, %v21029_v48, %v21031_v15  ;;  %v23039_v48 = vld [vmem:[%s26943_s1 + $0x1e0] sm:$0xf] }
 0x509   : > { %v21025_v53 = vpop.permute.xlu1 %21024  ;;  %23005 = vmatprep.subr.msk.mxu0 %vm214_vm1, %v21035_v57 }
 0x50a   : > { %v21034_v60 = vsel %vm1812_vm10, %v21025_v53, %v21027_v47 }
 0x50b   : > { %23006 = vmatpush1.msk.msra.mxu0 %vm214_vm1, %v21034_v60  ;;  %v21033_v61 = vpop.permute.xlu0 %21032 }
 0x50c   : > { %v21037_v0 = vsel %vm1812_vm10, %v21031_v15, %v21033_v61 }
 0x50d   : > { %v21210_v30 = vpop.permute.xlu1 %21209  ;;  %23008 = vmatprep.subr.msk.mxu1 %vm214_vm1, %v21037_v0 }
 0x50e   : > { %23009 = vmatpush1.msk.msra.mxu1 %vm214_vm1, %v21036_v22  ;;  %23007 = vmatmul.mubr.msk.f32.vlgmr.msra.gmra.mrb[20].mxu0 %vm210_vm2, %v23004_v32 }
 0x50f   : > { %v21208_v9 = vpop.permute.xlu0 %21207  ;;  %23010 = vmatmul.mubr.msk.f32.vlgmr.msra.gmra.mrb[20].mxu1 %vm210_vm2, %v23004_v32  ;;  %21294 = vmatprep.mubr.f32.mxu0 %v23682_v7 }
 0x510   : > { %v21216_v43 = vsel %vm1994_vm11, %v21208_v9, %v21210_v30  ;;  %21365 = vmatprep.mubr.f32.mxu1 %v23682_v7 }
 0x511   : > { %v21214_v56 = vpop.permute.xlu1 %21213  ;;  %23012 = vmatprep.subr.msk.mxu0 %vm214_vm1, %v21216_v43 }
 0x513   : > { %v21212_v33 = vpop.permute.xlu0 %21211 }
 0x514   : > { %v21217_v11 = vsel %vm1994_vm11, %v21210_v30, %v21212_v33  ;;  %v21218_v38 = vsel %vm1994_vm11, %v21212_v33, %v21214_v56 }
 0x515   : > { %v21389_v10 = vpop.permute.xlu1 %21388  ;;  %23015 = vmatprep.subr.msk.mxu1 %vm214_vm1, %v21218_v38 }
 0x516   : > { %23016 = vmatpush1.msk.msra.mxu1 %vm214_vm1, %v21217_v11 }
 0x517   : > { %v21206_v23 = vpop.permute.xlu0 %21205  ;;  %23017 = vmatmul.mubr.msk.f32.vlgmr.msra.gmra.mrb[20].mxu1 %vm210_vm2, %v23011_v16 }
 0x518   : > { %v21215_v24 = vsel %vm1994_vm11, %v21206_v23, %v21208_v9  ;;  %21546 = vmatprep.mubr.f32.mxu1 %v23682_v7 }
 0x519   : > { %v21393_v17 = vpop.permute.xlu1 %21392  ;;  %23013 = vmatpush1.msk.msra.mxu0 %vm214_vm1, %v21215_v24 }
 0x51a   : > { %23014 = vmatmul.mubr.msk.f32.vlgmr.msra.gmra.mrb[20].mxu0 %vm210_vm2, %v23011_v16 }
 0x51b   : > { %v21391_v26 = vpop.permute.xlu0 %21390  ;;  %21475 = vmatprep.mubr.f32.mxu0 %v23682_v7 }
 0x51c   : > { %v21397_v8 = vsel %vm11803_vm3, %v21389_v10, %v21391_v26  ;;  %v21398_v31 = vsel %vm11803_vm3, %v21391_v26, %v21393_v17 }
 0x51d   : > { %v21387_v25 = vpop.permute.xlu1 %21386  ;;  %23019 = vmatprep.subr.msk.mxu0 %vm214_vm1, %v21397_v8 }
 0x51e   : > { %v21396_v27 = vsel %vm11803_vm3, %v21387_v25, %v21389_v10 }
 0x51f   : > { %23020 = vmatpush1.msk.msra.mxu0 %vm214_vm1, %v21396_v27  ;;  %v21395_v36 = vpop.permute.xlu0 %21394 }
 0x520   : > { %v21399_v1 = vsel %vm11803_vm3, %v21393_v17, %v21395_v36 }
 0x521   : > { %v21572_v59 = vpop.permute.xlu1 %21571  ;;  %23022 = vmatprep.subr.msk.mxu1 %vm214_vm1, %v21399_v1 }
 0x522   : > { %23023 = vmatpush1.msk.msra.mxu1 %vm214_vm1, %v21398_v31  ;;  %23021 = vmatmul.mubr.msk.f32.vlgmr.msra.gmra.mrb[20].mxu0 %vm210_vm2, %v23018_v28 }
 0x523   : > { %v21570_v34 = vpop.permute.xlu0 %21569  ;;  %23024 = vmatmul.mubr.msk.f32.vlgmr.msra.gmra.mrb[20].mxu1 %vm210_vm2, %v23018_v28  ;;  %21656 = vmatprep.mubr.f32.mxu0 %v23682_v7 }
 0x524   : > { %v21578_v58 = vsel %vm11985_vm4, %v21570_v34, %v21572_v59  ;;  %21727 = vmatprep.mubr.f32.mxu1 %v23682_v7 }
 0x525   : > { %v21576_v46 = vpop.permute.xlu1 %21575  ;;  %23026 = vmatprep.subr.msk.mxu0 %vm214_vm1, %v21578_v58 }
 0x527   : > { %v21574_v37 = vpop.permute.xlu0 %21573 }
 0x528   : > { %v21579_v29 = vsel %vm11985_vm4, %v21572_v59, %v21574_v37  ;;  %v21580_v2 = vsel %vm11985_vm4, %v21574_v37, %v21576_v46 }
 0x529   : > { %v21751_v35 = vpop.permute.xlu1 %21750  ;;  %23029 = vmatprep.subr.msk.mxu1 %vm214_vm1, %v21580_v2 }
 0x52a   : > { %23030 = vmatpush1.msk.msra.mxu1 %vm214_vm1, %v21579_v29 }
 0x52b   : > { %v21568_v62 = vpop.permute.xlu0 %21567  ;;  %23031 = vmatmul.mubr.msk.f32.vlgmr.msra.gmra.mrb[20].mxu1 %vm210_vm2, %v23025_v21 }
 0x52c   : > { %v21577_v42 = vsel %vm11985_vm4, %v21568_v62, %v21570_v34  ;;  %21909 = vmatprep.mubr.f32.mxu1 %v23682_v7 }
 0x52d   : > { %v21755_v18 = vpop.permute.xlu1 %21754  ;;  %23027 = vmatpush1.msk.msra.mxu0 %vm214_vm1, %v21577_v42 }
 0x52e   : > { %23028 = vmatmul.mubr.msk.f32.vlgmr.msra.gmra.mrb[20].mxu0 %vm210_vm2, %v23025_v21 }
 0x52f   : > { %v21753_v44 = vpop.permute.xlu0 %21752  ;;  %21838 = vmatprep.mubr.f32.mxu0 %v23682_v7 }
 0x530   : > { %v21760_v3 = vsel %vm21758_vm5, %v21751_v35, %v21753_v44  ;;  %v21761_v20 = vsel %vm21758_vm5, %v21753_v44, %v21755_v18 }
 0x531   : > { %v21749_v4 = vpop.permute.xlu1 %21748  ;;  %23033 = vmatprep.subr.msk.mxu0 %vm214_vm1, %v21760_v3 }
 0x532   : > { %v21759_v52 = vsel %vm21758_vm5, %v21749_v4, %v21751_v35 }
 0x533   : > { %23034 = vmatpush1.msk.msra.mxu0 %vm214_vm1, %v21759_v52  ;;  %v21757_v49 = vpop.permute.xlu0 %21756 }
 0x534   : > { %v21762_v6 = vsel %vm21758_vm5, %v21755_v18, %v21757_v49 }
 0x535   : > { %v21935_v50 = vpop.permute.xlu1 %21934  ;;  %23036 = vmatprep.subr.msk.mxu1 %vm214_vm1, %v21762_v6 }
 0x536   : > { %v18111_v40 = vpop.f32.mrb[16].mxu1  ;;  %23037 = vmatpush1.msk.msra.mxu1 %vm214_vm1, %v21761_v20  ;;  %23035 = vmatmul.mubr.msk.f32.vlgmr.msra.gmra.mrb[20].mxu0 %vm210_vm2, %v23032_v63 }
 0x537   : > { %v21933_v51 = vpop.permute.xlu0 %21932  ;;  %v18113_v12 = vpop.f32.mrb[17].mxu1  ;;  %23038 = vmatmul.mubr.msk.f32.vlgmr.msra.gmra.mrb[20].mxu1 %vm210_vm2, %v23032_v63  ;;  %22020 = vmatprep.mubr.f32.mxu0 %v23682_v7 }
 0x538   : > { %v18127_v5 = vcombine.low %v18111_v40, %v18113_v12  ;;  %v21942_v47 = vsel %vm21940_vm6, %v21933_v51, %v21935_v50  ;;  %22091 = vmatprep.mubr.f32.mxu1 %v23682_v7 }
 0x539   : > { %v18040_v19 = vpop.f32.mrb[16].mxu0  ;;  %23040 = vmatprep.subr.msk.mxu0 %vm214_vm1, %v21942_v47  ;;  %v21939_v13 = vpop.permute.xlu1 %21938 }
 0x53a   : > { %v18131_v14 = vadd.f32 %v18127_v5, %v26720_v41  ;;  %v18042_v15 = vpop.f32.mrb[17].mxu0 }
 0x53b   : > { %v18126_v54 = vcombine.low %v18040_v19, %v18042_v15  ;;  %v21937_v55 = vpop.permute.xlu0 %21936 }
 0x53c   : > { %v21943_v39 = vsel %vm21940_vm6, %v21935_v50, %v21937_v55  ;;  %v21944_v53 = vsel %vm21940_vm6, %v21937_v55, %v21939_v13 }
 0x53d   : > { %v18130_v57 = vadd.f32 %v18126_v54, %v26715_v45  ;;  %23043 = vmatprep.subr.msk.mxu1 %vm214_vm1, %v21944_v53 }
 0x53e   : > { %23044 = vmatpush1.msk.msra.mxu1 %vm214_vm1, %v21943_v39 }
 0x53f   : > { %v21931_v7 = vpop.permute.xlu0 %21930  ;;  %23045 = vmatmul.mubr.msk.f32.vlgmr.msra.gmra.mrb[20].mxu1 %vm210_vm2, %v23039_v48 }
 0x540   : > { %v21941_v41 = vsel %vm21940_vm6, %v21931_v7, %v21933_v51 }
 0x541   : > { %23041 = vmatpush1.msk.msra.mxu0 %vm214_vm1, %v21941_v41 }
 0x542   : > { %23042 = vmatmul.mubr.msk.f32.vlgmr.msra.gmra.mrb[20].mxu0 %vm210_vm2, %v23039_v48 }
 0x5a5   : > { %v20031_v60 = vpop.f32.mrb[18].mxu0 }
 0x5a6   : > { %v20033_v30 = vpop.f32.mrb[19].mxu0  ;;  %v20102_v61 = vpop.f32.mrb[18].mxu1 }
 0x5a7   : > { %v20117_v32 = vcombine.low %v20031_v60, %v20033_v30  ;;  %v20104_v45 = vpop.f32.mrb[19].mxu1 }
 0x5a8   : > { %v20118_v0 = vcombine.low %v20102_v61, %v20104_v45 }
 0x5a9   : > { %v20121_v22 = vadd.f32 %v20117_v32, %v18130_v57 }
 0x5aa   : > { %v20122_v56 = vadd.f32 %v20118_v0, %v18131_v14 }
 0x612   : > { %v22093_v9 = vpop.f32.mrb[20].mxu1 }
 0x613   : > { %v22095_v43 = vpop.f32.mrb[21].mxu1 }
 0x614   : > { %v22109_v10 = vcombine.low %v22093_v9, %v22095_v43 }
 0x615   : > { %v22022_v33 = vpop.f32.mrb[20].mxu0 }
 0x616   : > { %v22113_v11 = vadd.f32 %v22109_v10, %v20122_v56  ;;  %v22024_v38 = vpop.f32.mrb[21].mxu0 }
 0x617   : > { %v22108_v16 = vcombine.low %v22022_v33, %v22024_v38 }
 0x618   : > { %22119 = vst [vmem:[%s163_s24 + $0x8] sm:$0xff] %v22113_v11 }
 0x619   : > { %v22112_v17 = vadd.f32 %v22108_v16, %v20121_v22 }
 0x61b   : > { %22118 = vst [vmem:[%s163_s24] sm:$0xff] %v22112_v17 }
 0x61c   : > { %23629 = shalt.err (!%p23626_p3)
}
 0x61d   : > { %s23630_s30 = scalar_lea.hbm %s26900_s29, 256  ;;  %s23634_s28 = scalar_lea.hbm %s26945_s3, 512 }
 0x61e   : > { %p23631_p4 = scmp.ne.s32.totalorder %s26900_s29, %s23630_s30  ;;  %p23635_p9 = scmp.lt.u32.totalorder %s26900_s29, %s26945_s3 }
 0x61f   : > { %p23636_p10 = scmp.lt.u32.totalorder %s23634_s28, %s23630_s30  ;;  %p23638_p12 = scmp.lt.u32.totalorder %s23630_s30, %s26900_s29 }
 0x620   : > { %p23632_p7 = pnand %p23631_p4, %p23808_p5 }
 0x621   : > { %p23637_p11 = por %p23636_p10, %p23635_p9 }
 0x622   : > { %p23633_p8 = pneg %p23632_p7 }
 0x623   : > { %p23639_p13 = por %p23638_p12, %p23637_p11 }
 0x625   : > { %p23640_p0 = pnand %p23639_p13, %p23633_p8 }
 0x627   : > { %23643 = shalt.err (!%p23640_p0)
}
 0x628   : > { %23493 = dma.vmem_to_hbm [thread:$0]  (%p23808_p5), %s26902_s6, 256, %s26900_s29, %s22121_s5  }
 0x629 PF: > { %p23499_p1 = scmp.ge.s32.totalorder %s23678_s15, 2  ;;  %s22147_s17 = sand.u32 1, %s23666_s12  }
 0x62a   : > { %s22148_s27 = scalar_lea.sflag [#allocation4], %s22147_s17 }
 0x62b   : > { %p23496_p2 = pnand %p23499_p1, %p23812_p6 }
 0x62d   : > { %23661 = dma.done.wait (!%p23496_p2), %s22148_s27, 256  }
 0x62e   : > { %23663 = vsyncadd (!%p23496_p2), %s22148_s27, 4294967040  ;;  %p13_p3 = scmp.ge.s32.totalorder %s23795_s18, 4   ;;  %s27183_s12 = smov %s23670_s13 }
 0x62f   : > { %s27184_s13 = smov %s23674_s14  ;;  %s27185_s14 = smov %s23806_s21 }
 0x630   : > { %s27186_s15 = smov %s23795_s18  ;;  %15 = sbr.rel (!%p13_p3) target bundleno = 3 (0x3), region = 187 }
 0x637   :  { %22153 = vsyncpa [#allocation4], 1 }
 0x638   :  { %22155 = vsyncpa [#allocation4 + $0x1], 1 }

</bundles_post_ra>
